<compile_context>
chip_gen: v7x
topology: tpu7x:2x2x1
jax: 0.10.0
libtpu: 0.0.40
codegen_flags: <defaults>
</compile_context>

<pallas_src>
import math

import numpy as np
import jax
import jax.numpy as jnp
from jax import lax
from jax.experimental import pallas as pl
from jax.experimental.pallas import tpu as pltpu


# ----------------------------- static dimensions ---------------------------
C_IN, C1, C2 = 3, 16, 32
H = W = 28                        # input spatial -> 14 -> 7 after two pools
HP1, WP1 = H + 2, W + 2           # conv1 zero-padded image (30, 30)
L1 = HP1 * WP1 + 2                # guarded, row-flattened padded input (902)
N1 = H * WP1                      # conv1 flat output grid per image (840)
H2 = W2 = H // 2                  # 14
HP2, WP2 = H2 + 2, W2 + 2         # conv2 zero-padded image (16, 16)
L2 = HP2 * WP2 + 2                # guarded flat conv2 input (258)
N2 = H2 * WP2                     # conv2 flat output grid per image (224)
HO = WO = H2 // 2                 # 7
FEAT = C2 * HO * WO               # 1568 (== torch flatten of (C2,7,7))
HIDDEN = 512                      # classifier hidden (4096 scaled down)
NUM_CLASSES = 1470
TN = 256                          # fc2 weight streaming tile (multiple of 128)
N_PAD = 1536                      # NUM_CLASSES padded to 6 * TN

SEL1_K = N1 - WP1 - 1             # 809: pool1 selector contraction extent
SEL2_K = N2 - WP2 - 1             # 207: pool2 selector contraction extent


def _pick_img_tile(batch):
    for t in (8, 4, 2, 1):
        if batch % t == 0:
            return t
    return 1


# ---------------------------------------------------------------------------
# Fused features kernel: conv1+ReLU -> pool1 -> conv2+ReLU -> pool2 for
# IMG_TILE images per grid step.  Layout: channels on sublanes, flattened
# padded spatial on lanes.  Each conv is one bf16 im2col matmul; each pool is
# two wide shifted maxima + one one-hot selection matmul per image whose
# output already carries the next stage's zero padding / feature layout.
# ---------------------------------------------------------------------------
def _make_features_kernel(img_tile):
    def kernel(x_ref, c1w_ref, c1b_ref, c2w_ref, c2b_ref, sel1_ref, sel2_ref,
               o_ref, im1_ref, im2_ref):
        bf16 = jnp.bfloat16
        f32 = jnp.float32

        # ---- conv1 im2col: 9 shifted slices per image into VMEM scratch ----
        for t in range(9):
            dy, dx = divmod(t, 3)
            s = dy * WP1 + dx
            for img in range(img_tile):
                im1_ref[t * C_IN:(t + 1) * C_IN, img * N1:(img + 1) * N1] = \
                    x_ref[img, :, s:s + N1]

        # ---- conv1: one bf16 matmul (C1, 27) x (27, IMG*840) + bias + ReLU --
        y1 = jnp.dot(c1w_ref[...], im1_ref[...].astype(bf16),
                     preferred_element_type=f32)
        y1 = jnp.maximum(y1 + c1b_ref[...], 0.0).astype(bf16)

        # ---- maxpool1 (2x2/2): w[:, i] = max of the 2x2 window anchored at i,
        #      then a one-hot matmul that picks the valid anchors AND lays the
        #      result out as conv2's zero-padded flat input (one store/image).
        m = jnp.maximum(y1[:, :-WP1], y1[:, WP1:])
        w = jnp.maximum(m[:, :-1], m[:, 1:])
        p1 = []
        for img in range(img_tile):
            win = w[:, img * N1:img * N1 + SEL1_K]           # (C1, 809)
            p1.append(jnp.dot(win, sel1_ref[...],
                              preferred_element_type=f32).astype(bf16))  # (C1, 258)

        # ---- conv2 im2col -------------------------------------------------
        for t in range(9):
            dy, dx = divmod(t, 3)
            s = dy * WP2 + dx
            for img in range(img_tile):
                im2_ref[t * C1:(t + 1) * C1, img * N2:(img + 1) * N2] = \
                    p1[img][:, s:s + N2]

        # ---- conv2: one bf16 matmul (C2, 144) x (144, IMG*224) + bias + ReLU
        y2 = jnp.dot(c2w_ref[...], im2_ref[...], preferred_element_type=f32)
        y2 = jnp.maximum(y2 + c2b_ref[...], 0.0).astype(bf16)

        # ---- maxpool2 -> (C2, 49) feature map per image, one store/image ---
        m2 = jnp.maximum(y2[:, :-WP2], y2[:, WP2:])
        w2 = jnp.maximum(m2[:, :-1], m2[:, 1:])
        for img in range(img_tile):
            win = w2[:, img * N2:img * N2 + SEL2_K]          # (C2, 207)
            o_ref[img, :, :] = jnp.dot(win, sel2_ref[...],
                                       preferred_element_type=f32).astype(bf16)
    return kernel


def _features_call(xg, kp, img_tile):
    B = xg.shape[0]
    flops = B * (2 * C1 * 9 * C_IN * N1 + 2 * C2 * 9 * C1 * N2
                 + 2 * C1 * SEL1_K * L2 + 2 * C2 * SEL2_K * (HO * WO))
    bytes_acc = (B * C_IN * L1 * 4 + C1 * 9 * C_IN * 2 + C1 * 4
                 + C2 * 9 * C1 * 2 + C2 * 4 + SEL1_K * L2 * 2
                 + SEL2_K * HO * WO * 2 + B * C2 * HO * WO * 2)
    return pl.pallas_call(
        _make_features_kernel(img_tile),
        out_shape=jax.ShapeDtypeStruct((B, C2, HO * WO), jnp.bfloat16),
        grid=(B // img_tile,),
        in_specs=[
            pl.BlockSpec((img_tile, C_IN, L1), lambda b: (b, 0, 0)),
            pl.BlockSpec((C1, 9 * C_IN), lambda b: (0, 0)),
            pl.BlockSpec((C1, 1), lambda b: (0, 0)),
            pl.BlockSpec((C2, 9 * C1), lambda b: (0, 0)),
            pl.BlockSpec((C2, 1), lambda b: (0, 0)),
            pl.BlockSpec((SEL1_K, L2), lambda b: (0, 0)),
            pl.BlockSpec((SEL2_K, HO * WO), lambda b: (0, 0)),
        ],
        out_specs=pl.BlockSpec((img_tile, C2, HO * WO), lambda b: (b, 0, 0)),
        scratch_shapes=[
            pltpu.VMEM((9 * C_IN, img_tile * N1), jnp.float32),
            pltpu.VMEM((9 * C1, img_tile * N2), jnp.bfloat16),
        ],
        compiler_params=pltpu.CompilerParams(
            dimension_semantics=("parallel",)),
        cost_estimate=pl.CostEstimate(flops=int(flops), transcendentals=0,
                                      bytes_accessed=int(bytes_acc)),
    )(xg, kp["c1_wt"], kp["c1_b"], kp["c2_wt"], kp["c2_b"],
      kp["sel1"], kp["sel2"])


# ---------------------------------------------------------------------------
# Classifier: Linear -> ReLU -> Dropout(eval: identity) -> Linear -> sigmoid.
# fc1 is computed once (step 0) into a persistent VMEM scratch; fc2's bf16
# weights stream through VMEM in TN-wide tiles (double buffered by Pallas).
# ---------------------------------------------------------------------------
def _classifier_kernel(x_ref, w1_ref, b1_ref, w2_ref, b2_ref, o_ref, h_ref):
    @pl.when(pl.program_id(0) == 0)
    def _():
        h = jnp.dot(x_ref[...], w1_ref[...], preferred_element_type=jnp.float32)
        h_ref[...] = jnp.maximum(h + b1_ref[...], 0.0).astype(jnp.bfloat16)

    # TODO(synk): nn.Dropout() is identity at inference; train-mode dropout not implemented.
    logits = jnp.dot(h_ref[...], w2_ref[...],
                     preferred_element_type=jnp.float32) + b2_ref[...]
    o_ref[...] = jax.nn.sigmoid(logits)


def _classifier_call(feat, kp):
    B = feat.shape[0]
    flops = 2 * B * FEAT * HIDDEN + 2 * B * HIDDEN * N_PAD
    bytes_acc = (B * FEAT * 2 + FEAT * HIDDEN * 2 + HIDDEN * 4
                 + HIDDEN * N_PAD * 2 + N_PAD * 4 + B * N_PAD * 4)
    return pl.pallas_call(
        _classifier_kernel,
        out_shape=jax.ShapeDtypeStruct((B, N_PAD), jnp.float32),
        grid=(N_PAD // TN,),
        in_specs=[
            pl.BlockSpec((B, FEAT), lambda j: (0, 0)),
            pl.BlockSpec((FEAT, HIDDEN), lambda j: (0, 0)),
            pl.BlockSpec((1, HIDDEN), lambda j: (0, 0)),
            pl.BlockSpec((HIDDEN, TN), lambda j: (0, j)),
            pl.BlockSpec((1, TN), lambda j: (0, j)),
        ],
        out_specs=pl.BlockSpec((B, TN), lambda j: (0, j)),
        scratch_shapes=[pltpu.VMEM((B, HIDDEN), jnp.bfloat16)],
        compiler_params=pltpu.CompilerParams(
            dimension_semantics=("arbitrary",)),
        cost_estimate=pl.CostEstimate(flops=int(flops),
                                      transcendentals=int(B * N_PAD),
                                      bytes_accessed=int(bytes_acc)),
    )(feat, kp["fc1_wt"], kp["fc1_b"], kp["fc2_wt"], kp["fc2_b"])


# ---------------------------------------------------------------------------
# Full VGG forward (NCHW input, like the PyTorch module).
# ---------------------------------------------------------------------------
def vgg_forward(x_nchw, kp):
    B = x_nchw.shape[0]
    img_tile = _pick_img_tile(B)
    x = x_nchw.astype(jnp.float32)
    # NCHW is already the kernel layout: pad spatially, flatten the padded
    # rows, add one zero guard at each end (tiny input-only glue).
    xp = jnp.pad(x, ((0, 0), (0, 0), (1, 1), (1, 1))).reshape(B, C_IN, HP1 * WP1)
    xg = jnp.pad(xp, ((0, 0), (0, 0), (1, 1)))               # (B, C_IN, L1)
    feat = _features_call(xg, kp, img_tile)                   # (B, C2, 49) bf16
    feat = feat.reshape(B, FEAT)                              # == torch x.view(B,-1)
    out = _classifier_call(feat, kp)                          # (B, N_PAD) f32
    return out[:, :NUM_CLASSES].reshape(-1, 7, 7, 30)


# ---------------------------------------------------------------------------
# Parameters: torch layouts + deterministic init mirroring _initialize_weights,
# plus a one-time repack into kernel layouts (zero per-forward cost).
# ---------------------------------------------------------------------------
def init_params(key):
    k1, k2, k3, k4 = jax.random.split(key, 4)
    return {
        "conv1_w": jax.random.normal(k1, (C1, C_IN, 3, 3), jnp.float32)
        * math.sqrt(2.0 / (3 * 3 * C1)),
        "conv1_b": jnp.zeros((C1,), jnp.float32),
        "conv2_w": jax.random.normal(k2, (C2, C1, 3, 3), jnp.float32)
        * math.sqrt(2.0 / (3 * 3 * C2)),
        "conv2_b": jnp.zeros((C2,), jnp.float32),
        "fc1_w": jax.random.normal(k3, (HIDDEN, FEAT), jnp.float32) * 0.01,
        "fc1_b": jnp.zeros((HIDDEN,), jnp.float32),
        "fc2_w": jax.random.normal(k4, (NUM_CLASSES, HIDDEN), jnp.float32) * 0.01,
        "fc2_b": jnp.zeros((NUM_CLASSES,), jnp.float32),
    }


def _build_selectors():
    # pool1: w1[:, i] = max of the 2x2 window anchored at flat index i of the
    # conv1 output grid (i = 2r*WP1 + 1 + 2j); map it straight into conv2's
    # guarded, zero-padded flat layout at column (r+1)*WP2 + 2 + j.
    sel1 = np.zeros((SEL1_K, L2), np.float32)
    for r in range(H2):
        for j in range(W2):
            sel1[2 * r * WP1 + 1 + 2 * j, (r + 1) * WP2 + 2 + j] = 1.0
    # pool2: anchors i = 2r*WP2 + 1 + 2j -> feature column r*WO + j, so the
    # (C2, 49) output flattens to exactly torch's x.view(B, -1) order.
    sel2 = np.zeros((SEL2_K, HO * WO), np.float32)
    for r in range(HO):
        for j in range(WO):
            sel2[2 * r * WP2 + 1 + 2 * j, r * WO + j] = 1.0
    return jnp.asarray(sel1, jnp.bfloat16), jnp.asarray(sel2, jnp.bfloat16)


def prepare_params(p):
    sel1, sel2 = _build_selectors()
    return {
        # conv weights -> (Cout, 9*Cin), column = (3*dy+dx)*Cin + cin, bf16.
        "c1_wt": jnp.transpose(p["conv1_w"], (0, 2, 3, 1))
        .reshape(C1, 9 * C_IN).astype(jnp.bfloat16),
        "c1_b": p["conv1_b"].reshape(C1, 1).astype(jnp.float32),
        "c2_wt": jnp.transpose(p["conv2_w"], (0, 2, 3, 1))
        .reshape(C2, 9 * C1).astype(jnp.bfloat16),
        "c2_b": p["conv2_b"].reshape(C2, 1).astype(jnp.float32),
        # one-hot pooling / layout selectors (exact in bf16), resident in VMEM.
        "sel1": sel1,
        "sel2": sel2,
        # FC weights: (in, out), bf16 (halves the dominant HBM transfer),
        # fc2 padded to a multiple of the streaming tile; biases stay f32.
        "fc1_wt": p["fc1_w"].T.astype(jnp.bfloat16),
        "fc1_b": p["fc1_b"].reshape(1, HIDDEN).astype(jnp.float32),
        "fc2_wt": jnp.pad(p["fc2_w"].T,
                          ((0, 0), (0, N_PAD - NUM_CLASSES))).astype(jnp.bfloat16),
        "fc2_b": jnp.pad(p["fc2_b"],
                         (0, N_PAD - NUM_CLASSES)).reshape(1, N_PAD)
        .astype(jnp.float32),
    }


# ---------------------------------------------------------------------------
# Pure-JAX f32 reference (true module semantics) for the correctness check.
# ---------------------------------------------------------------------------
def vgg_reference(x_nchw, p):
    x = x_nchw.astype(jnp.float32)
    dn = lax.conv_dimension_numbers(x.shape, p["conv1_w"].shape,
                                    ("NCHW", "OIHW", "NCHW"))

    def conv(x, w, b):
        y = lax.conv_general_dilated(x, w, (1, 1), "SAME", dimension_numbers=dn,
                                     precision=lax.Precision.HIGHEST)
        return jnp.maximum(y + b.reshape(1, -1, 1, 1), 0.0)

    def pool(x):
        return lax.reduce_window(x, -jnp.inf, lax.max,
                                 (1, 1, 2, 2), (1, 1, 2, 2), "VALID")

    x = pool(conv(x, p["conv1_w"], p["conv1_b"]))
    x = pool(conv(x, p["conv2_w"], p["conv2_b"]))
    B = x.shape[0]
    x = x.reshape(B, -1)
    h = jnp.maximum(x @ p["fc1_w"].T + p["fc1_b"], 0.0)
    y = jax.nn.sigmoid(h @ p["fc2_w"].T + p["fc2_b"])
    return y.reshape(-1, 7, 7, 30)


if __name__ == "__main__":
    key = jax.random.PRNGKey(0)
    pkey, xkey = jax.random.split(key)
    params = init_params(pkey)
    kparams = prepare_params(params)

    # NCHW input; two 2x2 pools take 28x28 -> 7x7 as the classifier expects.
    x = jax.random.normal(xkey, (2, C_IN, H, W), jnp.float32)

    fwd = jax.jit(vgg_forward)
    out = jax.block_until_ready(fwd(x, kparams))
    ref = jax.block_until_ready(vgg_reference(x, params))

    assert out.shape == (2, 7, 7, 30), out.shape
    err = float(jnp.max(jnp.abs(out - ref)))
    # bf16 conv/FC operands vs the f32 reference; sigmoid output so absolute
    # error stays well below this bound (typically a few 1e-4).
    assert err < 5e-3, f"max abs diff {err}"
    print("KERNEL_OK")
</pallas_src>

<mosaic_0001>
module attributes {stable_mosaic.version = 11 : i64} {
  func.func @kernel(%arg0: i32, %arg1: memref<2x3x902xf32, #tpu.memory_space<vmem>>, %arg2: memref<16x27xbf16, #tpu.memory_space<vmem>>, %arg3: memref<16x1xf32, #tpu.memory_space<vmem>>, %arg4: memref<32x144xbf16, #tpu.memory_space<vmem>>, %arg5: memref<32x1xf32, #tpu.memory_space<vmem>>, %arg6: memref<809x258xbf16, #tpu.memory_space<vmem>>, %arg7: memref<207x49xbf16, #tpu.memory_space<vmem>>, %arg8: memref<2x32x49xbf16, #tpu.memory_space<vmem>>, %arg9: memref<27x1680xf32, #tpu.memory_space<vmem>>, %arg10: memref<144x448xbf16, #tpu.memory_space<vmem>>) attributes {dimension_semantics = [#tpu.dimension_semantics<parallel>], iteration_bounds = array<i64: 1>, scalar_prefetch = 0 : i64, scratch_operands = 2 : i64, tpu.core_type = #tpu.core_type<tc>, window_params = [{transform_indices = @transform_0, window_bounds = array<i64: 2, 3, 902>}, {pipeline_mode = #tpu.pipeline_mode<synchronous>, transform_indices = @transform_1, window_bounds = array<i64: 16, 27>}, {pipeline_mode = #tpu.pipeline_mode<synchronous>, transform_indices = @transform_2, window_bounds = array<i64: 16, 1>}, {pipeline_mode = #tpu.pipeline_mode<synchronous>, transform_indices = @transform_3, window_bounds = array<i64: 32, 144>}, {pipeline_mode = #tpu.pipeline_mode<synchronous>, transform_indices = @transform_4, window_bounds = array<i64: 32, 1>}, {pipeline_mode = #tpu.pipeline_mode<synchronous>, transform_indices = @transform_5, window_bounds = array<i64: 809, 258>}, {pipeline_mode = #tpu.pipeline_mode<synchronous>, transform_indices = @transform_6, window_bounds = array<i64: 207, 49>}, {transform_indices = @transform_7, window_bounds = array<i64: 2, 32, 49>}]} {
    %c0 = arith.constant 0 : index
    %c0_0 = arith.constant 0 : index
    %c0_1 = arith.constant 0 : index
    %0 = vector.load %arg1[%c0, %c0_0, %c0_1] : memref<2x3x902xf32, #tpu.memory_space<vmem>>, vector<1x3x840xf32>
    %1 = vector.shape_cast %0 : vector<1x3x840xf32> to vector<3x840xf32>
    %c0_2 = arith.constant 0 : index
    %c0_3 = arith.constant 0 : index
    %2 = vector.load %arg9[%c0_2, %c0_3] : memref<27x1680xf32, #tpu.memory_space<vmem>>, vector<3x840xf32>
    tpu.vector_store %arg9[%c0_2, %c0_3], %1 {strides = array<i32>} : memref<27x1680xf32, #tpu.memory_space<vmem>>, vector<3x840xf32>,
    %c1 = arith.constant 1 : index
    %c0_4 = arith.constant 0 : index
    %c0_5 = arith.constant 0 : index
    %3 = vector.load %arg1[%c1, %c0_4, %c0_5] : memref<2x3x902xf32, #tpu.memory_space<vmem>>, vector<1x3x840xf32>
    %4 = vector.shape_cast %3 : vector<1x3x840xf32> to vector<3x840xf32>
    %c0_6 = arith.constant 0 : index
    %c840 = arith.constant 840 : index
    %5 = vector.load %arg9[%c0_6, %c840] : memref<27x1680xf32, #tpu.memory_space<vmem>>, vector<3x840xf32>
    tpu.vector_store %arg9[%c0_6, %c840], %4 {strides = array<i32>} : memref<27x1680xf32, #tpu.memory_space<vmem>>, vector<3x840xf32>,
    %c0_7 = arith.constant 0 : index
    %c0_8 = arith.constant 0 : index
    %c1_9 = arith.constant 1 : index
    %6 = vector.load %arg1[%c0_7, %c0_8, %c1_9] : memref<2x3x902xf32, #tpu.memory_space<vmem>>, vector<1x3x840xf32>
    %7 = vector.shape_cast %6 : vector<1x3x840xf32> to vector<3x840xf32>
    %c3 = arith.constant 3 : index
    %c0_10 = arith.constant 0 : index
    %8 = vector.load %arg9[%c3, %c0_10] : memref<27x1680xf32, #tpu.memory_space<vmem>>, vector<3x840xf32>
    tpu.vector_store %arg9[%c3, %c0_10], %7 {strides = array<i32>} : memref<27x1680xf32, #tpu.memory_space<vmem>>, vector<3x840xf32>,
    %c1_11 = arith.constant 1 : index
    %c0_12 = arith.constant 0 : index
    %c1_13 = arith.constant 1 : index
    %9 = vector.load %arg1[%c1_11, %c0_12, %c1_13] : memref<2x3x902xf32, #tpu.memory_space<vmem>>, vector<1x3x840xf32>
    %10 = vector.shape_cast %9 : vector<1x3x840xf32> to vector<3x840xf32>
    %c3_14 = arith.constant 3 : index
    %c840_15 = arith.constant 840 : index
    %11 = vector.load %arg9[%c3_14, %c840_15] : memref<27x1680xf32, #tpu.memory_space<vmem>>, vector<3x840xf32>
    tpu.vector_store %arg9[%c3_14, %c840_15], %10 {strides = array<i32>} : memref<27x1680xf32, #tpu.memory_space<vmem>>, vector<3x840xf32>,
    %c0_16 = arith.constant 0 : index
    %c0_17 = arith.constant 0 : index
    %c2 = arith.constant 2 : index
    %12 = vector.load %arg1[%c0_16, %c0_17, %c2] : memref<2x3x902xf32, #tpu.memory_space<vmem>>, vector<1x3x840xf32>
    %13 = vector.shape_cast %12 : vector<1x3x840xf32> to vector<3x840xf32>
    %c6 = arith.constant 6 : index
    %c0_18 = arith.constant 0 : index
    %14 = vector.load %arg9[%c6, %c0_18] : memref<27x1680xf32, #tpu.memory_space<vmem>>, vector<3x840xf32>
    tpu.vector_store %arg9[%c6, %c0_18], %13 {strides = array<i32>} : memref<27x1680xf32, #tpu.memory_space<vmem>>, vector<3x840xf32>,
    %c1_19 = arith.constant 1 : index
    %c0_20 = arith.constant 0 : index
    %c2_21 = arith.constant 2 : index
    %15 = vector.load %arg1[%c1_19, %c0_20, %c2_21] : memref<2x3x902xf32, #tpu.memory_space<vmem>>, vector<1x3x840xf32>
    %16 = vector.shape_cast %15 : vector<1x3x840xf32> to vector<3x840xf32>
    %c6_22 = arith.constant 6 : index
    %c840_23 = arith.constant 840 : index
    %17 = vector.load %arg9[%c6_22, %c840_23] : memref<27x1680xf32, #tpu.memory_space<vmem>>, vector<3x840xf32>
    tpu.vector_store %arg9[%c6_22, %c840_23], %16 {strides = array<i32>} : memref<27x1680xf32, #tpu.memory_space<vmem>>, vector<3x840xf32>,
    %c0_24 = arith.constant 0 : index
    %c0_25 = arith.constant 0 : index
    %c30 = arith.constant 30 : index
    %18 = vector.load %arg1[%c0_24, %c0_25, %c30] : memref<2x3x902xf32, #tpu.memory_space<vmem>>, vector<1x3x840xf32>
    %19 = vector.shape_cast %18 : vector<1x3x840xf32> to vector<3x840xf32>
    %c9 = arith.constant 9 : index
    %c0_26 = arith.constant 0 : index
    %20 = vector.load %arg9[%c9, %c0_26] : memref<27x1680xf32, #tpu.memory_space<vmem>>, vector<3x840xf32>
    tpu.vector_store %arg9[%c9, %c0_26], %19 {strides = array<i32>} : memref<27x1680xf32, #tpu.memory_space<vmem>>, vector<3x840xf32>,
    %c1_27 = arith.constant 1 : index
    %c0_28 = arith.constant 0 : index
    %c30_29 = arith.constant 30 : index
    %21 = vector.load %arg1[%c1_27, %c0_28, %c30_29] : memref<2x3x902xf32, #tpu.memory_space<vmem>>, vector<1x3x840xf32>
    %22 = vector.shape_cast %21 : vector<1x3x840xf32> to vector<3x840xf32>
    %c9_30 = arith.constant 9 : index
    %c840_31 = arith.constant 840 : index
    %23 = vector.load %arg9[%c9_30, %c840_31] : memref<27x1680xf32, #tpu.memory_space<vmem>>, vector<3x840xf32>
    tpu.vector_store %arg9[%c9_30, %c840_31], %22 {strides = array<i32>} : memref<27x1680xf32, #tpu.memory_space<vmem>>, vector<3x840xf32>,
    %c0_32 = arith.constant 0 : index
    %c0_33 = arith.constant 0 : index
    %c31 = arith.constant 31 : index
    %24 = vector.load %arg1[%c0_32, %c0_33, %c31] : memref<2x3x902xf32, #tpu.memory_space<vmem>>, vector<1x3x840xf32>
    %25 = vector.shape_cast %24 : vector<1x3x840xf32> to vector<3x840xf32>
    %c12 = arith.constant 12 : index
    %c0_34 = arith.constant 0 : index
    %26 = vector.load %arg9[%c12, %c0_34] : memref<27x1680xf32, #tpu.memory_space<vmem>>, vector<3x840xf32>
    tpu.vector_store %arg9[%c12, %c0_34], %25 {strides = array<i32>} : memref<27x1680xf32, #tpu.memory_space<vmem>>, vector<3x840xf32>,
    %c1_35 = arith.constant 1 : index
    %c0_36 = arith.constant 0 : index
    %c31_37 = arith.constant 31 : index
    %27 = vector.load %arg1[%c1_35, %c0_36, %c31_37] : memref<2x3x902xf32, #tpu.memory_space<vmem>>, vector<1x3x840xf32>
    %28 = vector.shape_cast %27 : vector<1x3x840xf32> to vector<3x840xf32>
    %c12_38 = arith.constant 12 : index
    %c840_39 = arith.constant 840 : index
    %29 = vector.load %arg9[%c12_38, %c840_39] : memref<27x1680xf32, #tpu.memory_space<vmem>>, vector<3x840xf32>
    tpu.vector_store %arg9[%c12_38, %c840_39], %28 {strides = array<i32>} : memref<27x1680xf32, #tpu.memory_space<vmem>>, vector<3x840xf32>,
    %c0_40 = arith.constant 0 : index
    %c0_41 = arith.constant 0 : index
    %c32 = arith.constant 32 : index
    %30 = vector.load %arg1[%c0_40, %c0_41, %c32] : memref<2x3x902xf32, #tpu.memory_space<vmem>>, vector<1x3x840xf32>
    %31 = vector.shape_cast %30 : vector<1x3x840xf32> to vector<3x840xf32>
    %c15 = arith.constant 15 : index
    %c0_42 = arith.constant 0 : index
    %32 = vector.load %arg9[%c15, %c0_42] : memref<27x1680xf32, #tpu.memory_space<vmem>>, vector<3x840xf32>
    tpu.vector_store %arg9[%c15, %c0_42], %31 {strides = array<i32>} : memref<27x1680xf32, #tpu.memory_space<vmem>>, vector<3x840xf32>,
    %c1_43 = arith.constant 1 : index
    %c0_44 = arith.constant 0 : index
    %c32_45 = arith.constant 32 : index
    %33 = vector.load %arg1[%c1_43, %c0_44, %c32_45] : memref<2x3x902xf32, #tpu.memory_space<vmem>>, vector<1x3x840xf32>
    %34 = vector.shape_cast %33 : vector<1x3x840xf32> to vector<3x840xf32>
    %c15_46 = arith.constant 15 : index
    %c840_47 = arith.constant 840 : index
    %35 = vector.load %arg9[%c15_46, %c840_47] : memref<27x1680xf32, #tpu.memory_space<vmem>>, vector<3x840xf32>
    tpu.vector_store %arg9[%c15_46, %c840_47], %34 {strides = array<i32>} : memref<27x1680xf32, #tpu.memory_space<vmem>>, vector<3x840xf32>,
    %c0_48 = arith.constant 0 : index
    %c0_49 = arith.constant 0 : index
    %c60 = arith.constant 60 : index
    %36 = vector.load %arg1[%c0_48, %c0_49, %c60] : memref<2x3x902xf32, #tpu.memory_space<vmem>>, vector<1x3x840xf32>
    %37 = vector.shape_cast %36 : vector<1x3x840xf32> to vector<3x840xf32>
    %c18 = arith.constant 18 : index
    %c0_50 = arith.constant 0 : index
    %38 = vector.load %arg9[%c18, %c0_50] : memref<27x1680xf32, #tpu.memory_space<vmem>>, vector<3x840xf32>
    tpu.vector_store %arg9[%c18, %c0_50], %37 {strides = array<i32>} : memref<27x1680xf32, #tpu.memory_space<vmem>>, vector<3x840xf32>,
    %c1_51 = arith.constant 1 : index
    %c0_52 = arith.constant 0 : index
    %c60_53 = arith.constant 60 : index
    %39 = vector.load %arg1[%c1_51, %c0_52, %c60_53] : memref<2x3x902xf32, #tpu.memory_space<vmem>>, vector<1x3x840xf32>
    %40 = vector.shape_cast %39 : vector<1x3x840xf32> to vector<3x840xf32>
    %c18_54 = arith.constant 18 : index
    %c840_55 = arith.constant 840 : index
    %41 = vector.load %arg9[%c18_54, %c840_55] : memref<27x1680xf32, #tpu.memory_space<vmem>>, vector<3x840xf32>
    tpu.vector_store %arg9[%c18_54, %c840_55], %40 {strides = array<i32>} : memref<27x1680xf32, #tpu.memory_space<vmem>>, vector<3x840xf32>,
    %c0_56 = arith.constant 0 : index
    %c0_57 = arith.constant 0 : index
    %c61 = arith.constant 61 : index
    %42 = vector.load %arg1[%c0_56, %c0_57, %c61] : memref<2x3x902xf32, #tpu.memory_space<vmem>>, vector<1x3x840xf32>
    %43 = vector.shape_cast %42 : vector<1x3x840xf32> to vector<3x840xf32>
    %c21 = arith.constant 21 : index
    %c0_58 = arith.constant 0 : index
    %44 = vector.load %arg9[%c21, %c0_58] : memref<27x1680xf32, #tpu.memory_space<vmem>>, vector<3x840xf32>
    tpu.vector_store %arg9[%c21, %c0_58], %43 {strides = array<i32>} : memref<27x1680xf32, #tpu.memory_space<vmem>>, vector<3x840xf32>,
    %c1_59 = arith.constant 1 : index
    %c0_60 = arith.constant 0 : index
    %c61_61 = arith.constant 61 : index
    %45 = vector.load %arg1[%c1_59, %c0_60, %c61_61] : memref<2x3x902xf32, #tpu.memory_space<vmem>>, vector<1x3x840xf32>
    %46 = vector.shape_cast %45 : vector<1x3x840xf32> to vector<3x840xf32>
    %c21_62 = arith.constant 21 : index
    %c840_63 = arith.constant 840 : index
    %47 = vector.load %arg9[%c21_62, %c840_63] : memref<27x1680xf32, #tpu.memory_space<vmem>>, vector<3x840xf32>
    tpu.vector_store %arg9[%c21_62, %c840_63], %46 {strides = array<i32>} : memref<27x1680xf32, #tpu.memory_space<vmem>>, vector<3x840xf32>,
    %c0_64 = arith.constant 0 : index
    %c0_65 = arith.constant 0 : index
    %c62 = arith.constant 62 : index
    %48 = vector.load %arg1[%c0_64, %c0_65, %c62] : memref<2x3x902xf32, #tpu.memory_space<vmem>>, vector<1x3x840xf32>
    %49 = vector.shape_cast %48 : vector<1x3x840xf32> to vector<3x840xf32>
    %c24 = arith.constant 24 : index
    %c0_66 = arith.constant 0 : index
    %50 = vector.load %arg9[%c24, %c0_66] : memref<27x1680xf32, #tpu.memory_space<vmem>>, vector<3x840xf32>
    tpu.vector_store %arg9[%c24, %c0_66], %49 {strides = array<i32>} : memref<27x1680xf32, #tpu.memory_space<vmem>>, vector<3x840xf32>,
    %c1_67 = arith.constant 1 : index
    %c0_68 = arith.constant 0 : index
    %c62_69 = arith.constant 62 : index
    %51 = vector.load %arg1[%c1_67, %c0_68, %c62_69] : memref<2x3x902xf32, #tpu.memory_space<vmem>>, vector<1x3x840xf32>
    %52 = vector.shape_cast %51 : vector<1x3x840xf32> to vector<3x840xf32>
    %c24_70 = arith.constant 24 : index
    %c840_71 = arith.constant 840 : index
    %53 = vector.load %arg9[%c24_70, %c840_71] : memref<27x1680xf32, #tpu.memory_space<vmem>>, vector<3x840xf32>
    tpu.vector_store %arg9[%c24_70, %c840_71], %52 {strides = array<i32>} : memref<27x1680xf32, #tpu.memory_space<vmem>>, vector<3x840xf32>,
    %c0_72 = arith.constant 0 : index
    %c0_73 = arith.constant 0 : index
    %54 = vector.load %arg2[%c0_72, %c0_73] : memref<16x27xbf16, #tpu.memory_space<vmem>>, vector<16x27xbf16>
    %c0_74 = arith.constant 0 : index
    %c0_75 = arith.constant 0 : index
    %55 = vector.load %arg9[%c0_74, %c0_75] : memref<27x1680xf32, #tpu.memory_space<vmem>>, vector<27x1680xf32>
    %56 = arith.truncf %55 : vector<27x1680xf32> to vector<27x1680xbf16>
    %cst = arith.constant dense<0.000000e+00> : vector<16x1680xf32>
    %57 = tpu.matmul %54, %56, %cst {dimension_numbers = #tpu.dot_dimension_numbers<[1], [0], [0], [1], [0, 0, 1, 1], [], []>} : vector<16x27xbf16>, vector<27x1680xbf16>, vector<16x1680xf32> -> vector<16x1680xf32>
    %c0_76 = arith.constant 0 : index
    %c0_77 = arith.constant 0 : index
    %58 = vector.load %arg3[%c0_76, %c0_77] : memref<16x1xf32, #tpu.memory_space<vmem>>, vector<16x1xf32>
    %59 = vector.broadcast %58 : vector<16x1xf32> to vector<16x1680xf32>
    %60 = arith.addf %57, %59 : vector<16x1680xf32>
    %cst_78 = arith.constant 0.000000e+00 : f32
    %61 = vector.broadcast %cst_78 : f32 to vector<16x1680xf32>
    %62 = arith.maximumf %60, %61 : vector<16x1680xf32>
    %63 = arith.truncf %62 : vector<16x1680xf32> to vector<16x1680xbf16>
    %64 = vector.extract_strided_slice %63 {offsets = [0, 0], sizes = [16, 1650], strides = [1, 1]} : vector<16x1680xbf16> to vector<16x1650xbf16>
    %65 = vector.extract_strided_slice %63 {offsets = [0, 30], sizes = [16, 1650], strides = [1, 1]} : vector<16x1680xbf16> to vector<16x1650xbf16>
    %66 = arith.maximumf %64, %65 : vector<16x1650xbf16>
    %67 = vector.extract_strided_slice %66 {offsets = [0, 0], sizes = [16, 1649], strides = [1, 1]} : vector<16x1650xbf16> to vector<16x1649xbf16>
    %68 = vector.extract_strided_slice %66 {offsets = [0, 1], sizes = [16, 1649], strides = [1, 1]} : vector<16x1650xbf16> to vector<16x1649xbf16>
    %69 = arith.maximumf %67, %68 : vector<16x1649xbf16>
    %70 = vector.extract_strided_slice %69 {offsets = [0, 0], sizes = [16, 809], strides = [1, 1]} : vector<16x1649xbf16> to vector<16x809xbf16>
    %c0_79 = arith.constant 0 : index
    %c0_80 = arith.constant 0 : index
    %71 = vector.load %arg6[%c0_79, %c0_80] : memref<809x258xbf16, #tpu.memory_space<vmem>>, vector<809x258xbf16>
    %cst_81 = arith.constant dense<0.000000e+00> : vector<16x258xf32>
    %72 = tpu.matmul %70, %71, %cst_81 {dimension_numbers = #tpu.dot_dimension_numbers<[1], [0], [0], [1], [0, 0, 1, 1], [], []>} : vector<16x809xbf16>, vector<809x258xbf16>, vector<16x258xf32> -> vector<16x258xf32>
    %73 = arith.truncf %72 : vector<16x258xf32> to vector<16x258xbf16>
    %74 = vector.extract_strided_slice %69 {offsets = [0, 840], sizes = [16, 809], strides = [1, 1]} : vector<16x1649xbf16> to vector<16x809xbf16>
    %c0_82 = arith.constant 0 : index
    %c0_83 = arith.constant 0 : index
    %75 = vector.load %arg6[%c0_82, %c0_83] : memref<809x258xbf16, #tpu.memory_space<vmem>>, vector<809x258xbf16>
    %cst_84 = arith.constant dense<0.000000e+00> : vector<16x258xf32>
    %76 = tpu.matmul %74, %75, %cst_84 {dimension_numbers = #tpu.dot_dimension_numbers<[1], [0], [0], [1], [0, 0, 1, 1], [], []>} : vector<16x809xbf16>, vector<809x258xbf16>, vector<16x258xf32> -> vector<16x258xf32>
    %77 = arith.truncf %76 : vector<16x258xf32> to vector<16x258xbf16>
    %78 = vector.extract_strided_slice %73 {offsets = [0, 0], sizes = [16, 224], strides = [1, 1]} : vector<16x258xbf16> to vector<16x224xbf16>
    %c0_85 = arith.constant 0 : index
    %c0_86 = arith.constant 0 : index
    %79 = vector.load %arg10[%c0_85, %c0_86] : memref<144x448xbf16, #tpu.memory_space<vmem>>, vector<16x224xbf16>
    tpu.vector_store %arg10[%c0_85, %c0_86], %78 {strides = array<i32>} : memref<144x448xbf16, #tpu.memory_space<vmem>>, vector<16x224xbf16>,
    %80 = vector.extract_strided_slice %77 {offsets = [0, 0], sizes = [16, 224], strides = [1, 1]} : vector<16x258xbf16> to vector<16x224xbf16>
    %c0_87 = arith.constant 0 : index
    %c224 = arith.constant 224 : index
    %81 = vector.load %arg10[%c0_87, %c224] : memref<144x448xbf16, #tpu.memory_space<vmem>>, vector<16x224xbf16>
    tpu.vector_store %arg10[%c0_87, %c224], %80 {strides = array<i32>} : memref<144x448xbf16, #tpu.memory_space<vmem>>, vector<16x224xbf16>,
    %82 = vector.extract_strided_slice %73 {offsets = [0, 1], sizes = [16, 224], strides = [1, 1]} : vector<16x258xbf16> to vector<16x224xbf16>
    %c16 = arith.constant 16 : index
    %c0_88 = arith.constant 0 : index
    %83 = vector.load %arg10[%c16, %c0_88] : memref<144x448xbf16, #tpu.memory_space<vmem>>, vector<16x224xbf16>
    tpu.vector_store %arg10[%c16, %c0_88], %82 {strides = array<i32>} : memref<144x448xbf16, #tpu.memory_space<vmem>>, vector<16x224xbf16>,
    %84 = vector.extract_strided_slice %77 {offsets = [0, 1], sizes = [16, 224], strides = [1, 1]} : vector<16x258xbf16> to vector<16x224xbf16>
    %c16_89 = arith.constant 16 : index
    %c224_90 = arith.constant 224 : index
    %85 = vector.load %arg10[%c16_89, %c224_90] : memref<144x448xbf16, #tpu.memory_space<vmem>>, vector<16x224xbf16>
    tpu.vector_store %arg10[%c16_89, %c224_90], %84 {strides = array<i32>} : memref<144x448xbf16, #tpu.memory_space<vmem>>, vector<16x224xbf16>,
    %86 = vector.extract_strided_slice %73 {offsets = [0, 2], sizes = [16, 224], strides = [1, 1]} : vector<16x258xbf16> to vector<16x224xbf16>
    %c32_91 = arith.constant 32 : index
    %c0_92 = arith.constant 0 : index
    %87 = vector.load %arg10[%c32_91, %c0_92] : memref<144x448xbf16, #tpu.memory_space<vmem>>, vector<16x224xbf16>
    tpu.vector_store %arg10[%c32_91, %c0_92], %86 {strides = array<i32>} : memref<144x448xbf16, #tpu.memory_space<vmem>>, vector<16x224xbf16>,
    %88 = vector.extract_strided_slice %77 {offsets = [0, 2], sizes = [16, 224], strides = [1, 1]} : vector<16x258xbf16> to vector<16x224xbf16>
    %c32_93 = arith.constant 32 : index
    %c224_94 = arith.constant 224 : index
    %89 = vector.load %arg10[%c32_93, %c224_94] : memref<144x448xbf16, #tpu.memory_space<vmem>>, vector<16x224xbf16>
    tpu.vector_store %arg10[%c32_93, %c224_94], %88 {strides = array<i32>} : memref<144x448xbf16, #tpu.memory_space<vmem>>, vector<16x224xbf16>,
    %90 = vector.extract_strided_slice %73 {offsets = [0, 16], sizes = [16, 224], strides = [1, 1]} : vector<16x258xbf16> to vector<16x224xbf16>
    %c48 = arith.constant 48 : index
    %c0_95 = arith.constant 0 : index
    %91 = vector.load %arg10[%c48, %c0_95] : memref<144x448xbf16, #tpu.memory_space<vmem>>, vector<16x224xbf16>
    tpu.vector_store %arg10[%c48, %c0_95], %90 {strides = array<i32>} : memref<144x448xbf16, #tpu.memory_space<vmem>>, vector<16x224xbf16>,
    %92 = vector.extract_strided_slice %77 {offsets = [0, 16], sizes = [16, 224], strides = [1, 1]} : vector<16x258xbf16> to vector<16x224xbf16>
    %c48_96 = arith.constant 48 : index
    %c224_97 = arith.constant 224 : index
    %93 = vector.load %arg10[%c48_96, %c224_97] : memref<144x448xbf16, #tpu.memory_space<vmem>>, vector<16x224xbf16>
    tpu.vector_store %arg10[%c48_96, %c224_97], %92 {strides = array<i32>} : memref<144x448xbf16, #tpu.memory_space<vmem>>, vector<16x224xbf16>,
    %94 = vector.extract_strided_slice %73 {offsets = [0, 17], sizes = [16, 224], strides = [1, 1]} : vector<16x258xbf16> to vector<16x224xbf16>
    %c64 = arith.constant 64 : index
    %c0_98 = arith.constant 0 : index
    %95 = vector.load %arg10[%c64, %c0_98] : memref<144x448xbf16, #tpu.memory_space<vmem>>, vector<16x224xbf16>
    tpu.vector_store %arg10[%c64, %c0_98], %94 {strides = array<i32>} : memref<144x448xbf16, #tpu.memory_space<vmem>>, vector<16x224xbf16>,
    %96 = vector.extract_strided_slice %77 {offsets = [0, 17], sizes = [16, 224], strides = [1, 1]} : vector<16x258xbf16> to vector<16x224xbf16>
    %c64_99 = arith.constant 64 : index
    %c224_100 = arith.constant 224 : index
    %97 = vector.load %arg10[%c64_99, %c224_100] : memref<144x448xbf16, #tpu.memory_space<vmem>>, vector<16x224xbf16>
    tpu.vector_store %arg10[%c64_99, %c224_100], %96 {strides = array<i32>} : memref<144x448xbf16, #tpu.memory_space<vmem>>, vector<16x224xbf16>,
    %98 = vector.extract_strided_slice %73 {offsets = [0, 18], sizes = [16, 224], strides = [1, 1]} : vector<16x258xbf16> to vector<16x224xbf16>
    %c80 = arith.constant 80 : index
    %c0_101 = arith.constant 0 : index
    %99 = vector.load %arg10[%c80, %c0_101] : memref<144x448xbf16, #tpu.memory_space<vmem>>, vector<16x224xbf16>
    tpu.vector_store %arg10[%c80, %c0_101], %98 {strides = array<i32>} : memref<144x448xbf16, #tpu.memory_space<vmem>>, vector<16x224xbf16>,
    %100 = vector.extract_strided_slice %77 {offsets = [0, 18], sizes = [16, 224], strides = [1, 1]} : vector<16x258xbf16> to vector<16x224xbf16>
    %c80_102 = arith.constant 80 : index
    %c224_103 = arith.constant 224 : index
    %101 = vector.load %arg10[%c80_102, %c224_103] : memref<144x448xbf16, #tpu.memory_space<vmem>>, vector<16x224xbf16>
    tpu.vector_store %arg10[%c80_102, %c224_103], %100 {strides = array<i32>} : memref<144x448xbf16, #tpu.memory_space<vmem>>, vector<16x224xbf16>,
    %102 = vector.extract_strided_slice %73 {offsets = [0, 32], sizes = [16, 224], strides = [1, 1]} : vector<16x258xbf16> to vector<16x224xbf16>
    %c96 = arith.constant 96 : index
    %c0_104 = arith.constant 0 : index
    %103 = vector.load %arg10[%c96, %c0_104] : memref<144x448xbf16, #tpu.memory_space<vmem>>, vector<16x224xbf16>
    tpu.vector_store %arg10[%c96, %c0_104], %102 {strides = array<i32>} : memref<144x448xbf16, #tpu.memory_space<vmem>>, vector<16x224xbf16>,
    %104 = vector.extract_strided_slice %77 {offsets = [0, 32], sizes = [16, 224], strides = [1, 1]} : vector<16x258xbf16> to vector<16x224xbf16>
    %c96_105 = arith.constant 96 : index
    %c224_106 = arith.constant 224 : index
    %105 = vector.load %arg10[%c96_105, %c224_106] : memref<144x448xbf16, #tpu.memory_space<vmem>>, vector<16x224xbf16>
    tpu.vector_store %arg10[%c96_105, %c224_106], %104 {strides = array<i32>} : memref<144x448xbf16, #tpu.memory_space<vmem>>, vector<16x224xbf16>,
    %106 = vector.extract_strided_slice %73 {offsets = [0, 33], sizes = [16, 224], strides = [1, 1]} : vector<16x258xbf16> to vector<16x224xbf16>
    %c112 = arith.constant 112 : index
    %c0_107 = arith.constant 0 : index
    %107 = vector.load %arg10[%c112, %c0_107] : memref<144x448xbf16, #tpu.memory_space<vmem>>, vector<16x224xbf16>
    tpu.vector_store %arg10[%c112, %c0_107], %106 {strides = array<i32>} : memref<144x448xbf16, #tpu.memory_space<vmem>>, vector<16x224xbf16>,
    %108 = vector.extract_strided_slice %77 {offsets = [0, 33], sizes = [16, 224], strides = [1, 1]} : vector<16x258xbf16> to vector<16x224xbf16>
    %c112_108 = arith.constant 112 : index
    %c224_109 = arith.constant 224 : index
    %109 = vector.load %arg10[%c112_108, %c224_109] : memref<144x448xbf16, #tpu.memory_space<vmem>>, vector<16x224xbf16>
    tpu.vector_store %arg10[%c112_108, %c224_109], %108 {strides = array<i32>} : memref<144x448xbf16, #tpu.memory_space<vmem>>, vector<16x224xbf16>,
    %110 = vector.extract_strided_slice %73 {offsets = [0, 34], sizes = [16, 224], strides = [1, 1]} : vector<16x258xbf16> to vector<16x224xbf16>
    %c128 = arith.constant 128 : index
    %c0_110 = arith.constant 0 : index
    %111 = vector.load %arg10[%c128, %c0_110] : memref<144x448xbf16, #tpu.memory_space<vmem>>, vector<16x224xbf16>
    tpu.vector_store %arg10[%c128, %c0_110], %110 {strides = array<i32>} : memref<144x448xbf16, #tpu.memory_space<vmem>>, vector<16x224xbf16>,
    %112 = vector.extract_strided_slice %77 {offsets = [0, 34], sizes = [16, 224], strides = [1, 1]} : vector<16x258xbf16> to vector<16x224xbf16>
    %c128_111 = arith.constant 128 : index
    %c224_112 = arith.constant 224 : index
    %113 = vector.load %arg10[%c128_111, %c224_112] : memref<144x448xbf16, #tpu.memory_space<vmem>>, vector<16x224xbf16>
    tpu.vector_store %arg10[%c128_111, %c224_112], %112 {strides = array<i32>} : memref<144x448xbf16, #tpu.memory_space<vmem>>, vector<16x224xbf16>,
    %c0_113 = arith.constant 0 : index
    %c0_114 = arith.constant 0 : index
    %114 = vector.load %arg4[%c0_113, %c0_114] : memref<32x144xbf16, #tpu.memory_space<vmem>>, vector<32x144xbf16>
    %c0_115 = arith.constant 0 : index
    %c0_116 = arith.constant 0 : index
    %115 = vector.load %arg10[%c0_115, %c0_116] : memref<144x448xbf16, #tpu.memory_space<vmem>>, vector<144x448xbf16>
    %cst_117 = arith.constant dense<0.000000e+00> : vector<32x448xf32>
    %116 = tpu.matmul %114, %115, %cst_117 {dimension_numbers = #tpu.dot_dimension_numbers<[1], [0], [0], [1], [0, 0, 1, 1], [], []>} : vector<32x144xbf16>, vector<144x448xbf16>, vector<32x448xf32> -> vector<32x448xf32>
    %c0_118 = arith.constant 0 : index
    %c0_119 = arith.constant 0 : index
    %117 = vector.load %arg5[%c0_118, %c0_119] : memref<32x1xf32, #tpu.memory_space<vmem>>, vector<32x1xf32>
    %118 = vector.broadcast %117 : vector<32x1xf32> to vector<32x448xf32>
    %119 = arith.addf %116, %118 : vector<32x448xf32>
    %cst_120 = arith.constant 0.000000e+00 : f32
    %120 = vector.broadcast %cst_120 : f32 to vector<32x448xf32>
    %121 = arith.maximumf %119, %120 : vector<32x448xf32>
    %122 = arith.truncf %121 : vector<32x448xf32> to vector<32x448xbf16>
    %123 = vector.extract_strided_slice %122 {offsets = [0, 0], sizes = [32, 432], strides = [1, 1]} : vector<32x448xbf16> to vector<32x432xbf16>
    %124 = vector.extract_strided_slice %122 {offsets = [0, 16], sizes = [32, 432], strides = [1, 1]} : vector<32x448xbf16> to vector<32x432xbf16>
    %125 = arith.maximumf %123, %124 : vector<32x432xbf16>
    %126 = vector.extract_strided_slice %125 {offsets = [0, 0], sizes = [32, 431], strides = [1, 1]} : vector<32x432xbf16> to vector<32x431xbf16>
    %127 = vector.extract_strided_slice %125 {offsets = [0, 1], sizes = [32, 431], strides = [1, 1]} : vector<32x432xbf16> to vector<32x431xbf16>
    %128 = arith.maximumf %126, %127 : vector<32x431xbf16>
    %129 = vector.extract_strided_slice %128 {offsets = [0, 0], sizes = [32, 207], strides = [1, 1]} : vector<32x431xbf16> to vector<32x207xbf16>
    %c0_121 = arith.constant 0 : index
    %c0_122 = arith.constant 0 : index
    %130 = vector.load %arg7[%c0_121, %c0_122] : memref<207x49xbf16, #tpu.memory_space<vmem>>, vector<207x49xbf16>
    %cst_123 = arith.constant dense<0.000000e+00> : vector<32x49xf32>
    %131 = tpu.matmul %129, %130, %cst_123 {dimension_numbers = #tpu.dot_dimension_numbers<[1], [0], [0], [1], [0, 0, 1, 1], [], []>} : vector<32x207xbf16>, vector<207x49xbf16>, vector<32x49xf32> -> vector<32x49xf32>
    %132 = arith.truncf %131 : vector<32x49xf32> to vector<32x49xbf16>
    %c0_124 = arith.constant 0 : index
    %c0_125 = arith.constant 0 : index
    %c0_126 = arith.constant 0 : index
    %133 = vector.load %arg8[%c0_124, %c0_125, %c0_126] : memref<2x32x49xbf16, #tpu.memory_space<vmem>>, vector<1x32x49xbf16>
    %134 = vector.shape_cast %133 : vector<1x32x49xbf16> to vector<32x49xbf16>
    %135 = vector.shape_cast %132 : vector<32x49xbf16> to vector<1x32x49xbf16>
    tpu.vector_store %arg8[%c0_124, %c0_125, %c0_126], %135 {strides = array<i32>} : memref<2x32x49xbf16, #tpu.memory_space<vmem>>, vector<1x32x49xbf16>,
    %136 = vector.extract_strided_slice %128 {offsets = [0, 224], sizes = [32, 207], strides = [1, 1]} : vector<32x431xbf16> to vector<32x207xbf16>
    %c0_127 = arith.constant 0 : index
    %c0_128 = arith.constant 0 : index
    %137 = vector.load %arg7[%c0_127, %c0_128] : memref<207x49xbf16, #tpu.memory_space<vmem>>, vector<207x49xbf16>
    %cst_129 = arith.constant dense<0.000000e+00> : vector<32x49xf32>
    %138 = tpu.matmul %136, %137, %cst_129 {dimension_numbers = #tpu.dot_dimension_numbers<[1], [0], [0], [1], [0, 0, 1, 1], [], []>} : vector<32x207xbf16>, vector<207x49xbf16>, vector<32x49xf32> -> vector<32x49xf32>
    %139 = arith.truncf %138 : vector<32x49xf32> to vector<32x49xbf16>
    %c1_130 = arith.constant 1 : index
    %c0_131 = arith.constant 0 : index
    %c0_132 = arith.constant 0 : index
    %140 = vector.load %arg8[%c1_130, %c0_131, %c0_132] : memref<2x32x49xbf16, #tpu.memory_space<vmem>>, vector<1x32x49xbf16>
    %141 = vector.shape_cast %140 : vector<1x32x49xbf16> to vector<32x49xbf16>
    %142 = vector.shape_cast %139 : vector<32x49xbf16> to vector<1x32x49xbf16>
    tpu.vector_store %arg8[%c1_130, %c0_131, %c0_132], %142 {strides = array<i32>} : memref<2x32x49xbf16, #tpu.memory_space<vmem>>, vector<1x32x49xbf16>,
    return
  }
  func.func @transform_0(%arg0: i32) -> (i32, i32, i32) {
    %c0_i32 = arith.constant 0 : i32
    %c0_i32_0 = arith.constant 0 : i32
    %c0_i32_1 = arith.constant 0 : i32
    return %arg0, %c0_i32, %c0_i32_0 : i32, i32, i32
  }
  func.func @transform_1(%arg0: i32) -> (i32, i32) {
    %c0_i32 = arith.constant 0 : i32
    %c0_i32_0 = arith.constant 0 : i32
    %c0_i32_1 = arith.constant 0 : i32
    return %c0_i32, %c0_i32_0 : i32, i32
  }
  func.func @transform_2(%arg0: i32) -> (i32, i32) {
    %c0_i32 = arith.constant 0 : i32
    %c0_i32_0 = arith.constant 0 : i32
    %c0_i32_1 = arith.constant 0 : i32
    return %c0_i32, %c0_i32_0 : i32, i32
  }
  func.func @transform_3(%arg0: i32) -> (i32, i32) {
    %c0_i32 = arith.constant 0 : i32
    %c0_i32_0 = arith.constant 0 : i32
    %c0_i32_1 = arith.constant 0 : i32
    return %c0_i32, %c0_i32_0 : i32, i32
  }
  func.func @transform_4(%arg0: i32) -> (i32, i32) {
    %c0_i32 = arith.constant 0 : i32
    %c0_i32_0 = arith.constant 0 : i32
    %c0_i32_1 = arith.constant 0 : i32
    return %c0_i32, %c0_i32_0 : i32, i32
  }
  func.func @transform_5(%arg0: i32) -> (i32, i32) {
    %c0_i32 = arith.constant 0 : i32
    %c0_i32_0 = arith.constant 0 : i32
    %c0_i32_1 = arith.constant 0 : i32
    return %c0_i32, %c0_i32_0 : i32, i32
  }
  func.func @transform_6(%arg0: i32) -> (i32, i32) {
    %c0_i32 = arith.constant 0 : i32
    %c0_i32_0 = arith.constant 0 : i32
    %c0_i32_1 = arith.constant 0 : i32
    return %c0_i32, %c0_i32_0 : i32, i32
  }
  func.func @transform_7(%arg0: i32) -> (i32, i32, i32) {
    %c0_i32 = arith.constant 0 : i32
    %c0_i32_0 = arith.constant 0 : i32
    %c0_i32_1 = arith.constant 0 : i32
    return %arg0, %c0_i32, %c0_i32_0 : i32, i32, i32
  }
}

module attributes {stable_mosaic.version = 11 : i64} {
  func.func @_classifier_kernel(%arg0: i32, %arg1: memref<2x1568xbf16, #tpu.memory_space<vmem>>, %arg2: memref<1568x512xbf16, #tpu.memory_space<vmem>>, %arg3: memref<1x512xf32, #tpu.memory_space<vmem>>, %arg4: memref<512x256xbf16, #tpu.memory_space<vmem>>, %arg5: memref<1x256xf32, #tpu.memory_space<vmem>>, %arg6: memref<2x256xf32, #tpu.memory_space<vmem>>, %arg7: memref<2x512xbf16, #tpu.memory_space<vmem>>) attributes {dimension_semantics = [#tpu.dimension_semantics<arbitrary>], iteration_bounds = array<i64: 6>, scalar_prefetch = 0 : i64, scratch_operands = 1 : i64, tpu.core_type = #tpu.core_type<tc>, window_params = [{pipeline_mode = #tpu.pipeline_mode<synchronous>, transform_indices = @transform_0, window_bounds = array<i64: 2, 1568>}, {pipeline_mode = #tpu.pipeline_mode<synchronous>, transform_indices = @transform_1, window_bounds = array<i64: 1568, 512>}, {pipeline_mode = #tpu.pipeline_mode<synchronous>, transform_indices = @transform_2, window_bounds = array<i64: 1, 512>}, {transform_indices = @transform_3, window_bounds = array<i64: 512, 256>}, {transform_indices = @transform_4, window_bounds = array<i64: 1, 256>}, {transform_indices = @transform_5, window_bounds = array<i64: 2, 256>}]} {
    %c0_i32 = arith.constant 0 : i32
    %0 = arith.cmpi eq, %arg0, %c0_i32 : i32
    %1 = arith.extui %0 : i1 to i32
    %c0_i32_0 = arith.constant 0 : i32
    %2 = arith.cmpi ne, %1, %c0_i32_0 : i32
    scf.if %2 {
      %c0_9 = arith.constant 0 : index
      %c0_10 = arith.constant 0 : index
      %15 = vector.load %arg1[%c0_9, %c0_10] : memref<2x1568xbf16, #tpu.memory_space<vmem>>, vector<2x1568xbf16>
      %c0_11 = arith.constant 0 : index
      %c0_12 = arith.constant 0 : index
      %16 = vector.load %arg2[%c0_11, %c0_12] : memref<1568x512xbf16, #tpu.memory_space<vmem>>, vector<1568x512xbf16>
      %cst_13 = arith.constant dense<0.000000e+00> : vector<2x512xf32>
      %17 = tpu.matmul %15, %16, %cst_13 {dimension_numbers = #tpu.dot_dimension_numbers<[1], [0], [0], [1], [0, 0, 1, 1], [], []>} : vector<2x1568xbf16>, vector<1568x512xbf16>, vector<2x512xf32> -> vector<2x512xf32>
      %c0_14 = arith.constant 0 : index
      %c0_15 = arith.constant 0 : index
      %18 = vector.load %arg3[%c0_14, %c0_15] : memref<1x512xf32, #tpu.memory_space<vmem>>, vector<1x512xf32>
      %19 = vector.broadcast %18 : vector<1x512xf32> to vector<2x512xf32>
      %20 = arith.addf %17, %19 : vector<2x512xf32>
      %cst_16 = arith.constant 0.000000e+00 : f32
      %21 = vector.broadcast %cst_16 : f32 to vector<2x512xf32>
      %22 = arith.maximumf %20, %21 : vector<2x512xf32>
      %23 = arith.truncf %22 : vector<2x512xf32> to vector<2x512xbf16>
      %c0_17 = arith.constant 0 : index
      %c0_18 = arith.constant 0 : index
      %24 = vector.load %arg7[%c0_17, %c0_18] : memref<2x512xbf16, #tpu.memory_space<vmem>>, vector<2x512xbf16>
      tpu.vector_store %arg7[%c0_17, %c0_18], %23 {strides = array<i32>} : memref<2x512xbf16, #tpu.memory_space<vmem>>, vector<2x512xbf16>,
    } else {
    }
    %c0 = arith.constant 0 : index
    %c0_1 = arith.constant 0 : index
    %3 = vector.load %arg7[%c0, %c0_1] : memref<2x512xbf16, #tpu.memory_space<vmem>>, vector<2x512xbf16>
    %c0_2 = arith.constant 0 : index
    %c0_3 = arith.constant 0 : index
    %4 = vector.load %arg4[%c0_2, %c0_3] : memref<512x256xbf16, #tpu.memory_space<vmem>>, vector<512x256xbf16>
    %cst = arith.constant dense<0.000000e+00> : vector<2x256xf32>
    %5 = tpu.matmul %3, %4, %cst {dimension_numbers = #tpu.dot_dimension_numbers<[1], [0], [0], [1], [0, 0, 1, 1], [], []>} : vector<2x512xbf16>, vector<512x256xbf16>, vector<2x256xf32> -> vector<2x256xf32>
    %c0_4 = arith.constant 0 : index
    %c0_5 = arith.constant 0 : index
    %6 = vector.load %arg5[%c0_4, %c0_5] : memref<1x256xf32, #tpu.memory_space<vmem>>, vector<1x256xf32>
    %7 = vector.broadcast %6 : vector<1x256xf32> to vector<2x256xf32>
    %8 = arith.addf %5, %7 : vector<2x256xf32>
    %9 = arith.negf %8 : vector<2x256xf32>
    %10 = math.exp %9 : vector<2x256xf32>
    %cst_6 = arith.constant 1.000000e+00 : f32
    %11 = vector.broadcast %cst_6 : f32 to vector<2x256xf32>
    %12 = arith.addf %11, %10 : vector<2x256xf32>
    %13 = arith.divf %11, %12 : vector<2x256xf32>
    %c0_7 = arith.constant 0 : index
    %c0_8 = arith.constant 0 : index
    %14 = vector.load %arg6[%c0_7, %c0_8] : memref<2x256xf32, #tpu.memory_space<vmem>>, vector<2x256xf32>
    tpu.vector_store %arg6[%c0_7, %c0_8], %13 {strides = array<i32>} : memref<2x256xf32, #tpu.memory_space<vmem>>, vector<2x256xf32>,
    return
  }
  func.func @transform_0(%arg0: i32) -> (i32, i32) {
    %c0_i32 = arith.constant 0 : i32
    %c0_i32_0 = arith.constant 0 : i32
    %c0_i32_1 = arith.constant 0 : i32
    return %c0_i32, %c0_i32_0 : i32, i32
  }
  func.func @transform_1(%arg0: i32) -> (i32, i32) {
    %c0_i32 = arith.constant 0 : i32
    %c0_i32_0 = arith.constant 0 : i32
    %c0_i32_1 = arith.constant 0 : i32
    return %c0_i32, %c0_i32_0 : i32, i32
  }
  func.func @transform_2(%arg0: i32) -> (i32, i32) {
    %c0_i32 = arith.constant 0 : i32
    %c0_i32_0 = arith.constant 0 : i32
    %c0_i32_1 = arith.constant 0 : i32
    return %c0_i32, %c0_i32_0 : i32, i32
  }
  func.func @transform_3(%arg0: i32) -> (i32, i32) {
    %c0_i32 = arith.constant 0 : i32
    %c0_i32_0 = arith.constant 0 : i32
    return %c0_i32, %arg0 : i32, i32
  }
  func.func @transform_4(%arg0: i32) -> (i32, i32) {
    %c0_i32 = arith.constant 0 : i32
    %c0_i32_0 = arith.constant 0 : i32
    return %c0_i32, %arg0 : i32, i32
  }
  func.func @transform_5(%arg0: i32) -> (i32, i32) {
    %c0_i32 = arith.constant 0 : i32
    %c0_i32_0 = arith.constant 0 : i32
    return %c0_i32, %arg0 : i32, i32
  }
}

</mosaic_0001>

<bundles_post_ra>
// kernel: vgg_forward.3
= control target key start
LH: loop header
LB: loop body
LE: loop exit
PB: predicated region body
PF: predicated region fallthrough
CT: control target
= control target key end

     0   :  { %10 = vsyncpa [#allocation4], 0  ;;  %s6801_s0 = inlined_call_operand.vmem [shape: bf16[2,1568], index: 0, kind: input, shape index: {}]   ;;  %s6802_s1 = inlined_call_operand.vmem [shape: bf16[1568,512], index: 1, kind: input, shape index: {}]   ;;  %s6803_s2 = inlined_call_operand.vmem [shape: f32[1,512], index: 2, kind: input, shape index: {}]   ;;  %s6804_s3 = inlined_call_operand.hbm [shape: bf16[512,1536], index: 3, kind: input, shape index: {}]   ;;  %s6805_s4 = inlined_call_operand.vmem [shape: f32[1,1536], index: 4, kind: input, shape index: {}]   ;;  %s6806_s5 = inlined_call_operand.vmem [shape: f32[2,1536], index: 5, kind: output, shape index: {}]  }
   0x1   :  { %12 = vsyncpa [#allocation4 + $0x1], 0  ;;  %s5352_s18 = smov 0   ;;  %s5354_s19 = smov 0  }
   0x2   :  { %s5356_s20 = smov 0   ;;  %s5358_s21 = smov 0  }
   0x3 LB: > { %s5371_s22 = sadd.s32 4294967295, %s5313_s21   ;;  %s5374_s23 = sadd.s32 1, %s5313_s21   ;;  %s5313_s21 = sphi %s5358_s21, %s6812_s21   ;;  %s5309_s20 = sphi %s5356_s20, %s6811_s20   ;;  %s5305_s19 = sphi %s5354_s19, %s6810_s19   ;;  %s5301_s18 = sphi %s5352_s18, %s6809_s18  }
   0x4   : > { %s85_s24 = ssub.s32 %s5313_s21, %s5374_s23  ;;  %s88_s25 = sadd.s32 1, %s5309_s20 }
   0x5   : > { %p86_p0 = scmp.eq.s32.totalorder %s85_s24, 0  ;;  %p95_p1 = scmp.ne.s32.totalorder %s5309_s20, %s5305_s19 }
   0x6   : > { %p96_p2 = scmp.eq.s32.totalorder %s5313_s21, 0  ;;  %p101_p3 = scmp.ne.s32.totalorder %s5305_s19, %s5301_s18 }
   0x7   : > { %s5384_s26 = scalar_select %p86_p0, %s5309_s20, %s88_s25  }
   0x8   : > { %p97_p4 = por %p96_p2, %p95_p1  ;;  %p102_p5 = scmp.eq.s32.totalorder %s5371_s22, 0 }
   0x9   : > { %p4516_p6 = scmp.lt.s32.totalorder %s5313_s21, 6  ;;  %s186_s28 = sand.u32 1, %s5309_s20  }
   0xa   : > { %p5388_p7 = por %p102_p5, %p101_p3  ;;  %s3977_s29 = sshll.u32 %s186_s28, 9 }
   0xb   : > { %s4453_s30 = sshll.u32 %s5313_s21, 7  ;;  %s190_s9 = scalar_lea.vmem [#allocation3], %s3977_s29 }
   0xc   : > { %s5397_s8 = scalar_lea.hbm %s6804_s3, %s4453_s30  ;;  %s197_s10 = sshll.u32 %s190_s9, 4  ;;  %s5399_s10 = int_to_ptr.vmem [resolvable:$true] %s197_s10 }
   0xd   : > { %p5401_p8 = pnand %p4516_p6, %p97_p4  ;;  %s5405_s12 = scalar_lea.sflag [#allocation4], %s186_s28 }
   0xe   : > { %s5249_s13 = scalar_lea.hbm %s5397_s8, 8192  ;;  %s5254_s16 = scalar_lea.hbm %s6804_s3, 49152 }
   0xf   : > { %p5250_p9 = scmp.ne.s32.totalorder %s5397_s8, %s5249_s13  ;;  %p5251_p10 = pneg %p5401_p8 }
  0x10   : > { %p5255_p13 = scmp.lt.u32.totalorder %s5397_s8, %s6804_s3  ;;  %p5256_p0 = scmp.lt.u32.totalorder %s5254_s16, %s5249_s13 }
  0x11   : > { %p5252_p11 = pnand %p5251_p10, %p5250_p9  ;;  %p5258_p2 = scmp.lt.u32.totalorder %s5249_s13, %s5397_s8 }
  0x12   : > { %p5257_p1 = por %p5256_p0, %p5255_p13 }
  0x13   : > { %p5253_p12 = pneg %p5252_p11 }
  0x14   : > { %p5259_p3 = por %p5258_p2, %p5257_p1 }
  0x16   : > { %p5260_p4 = pnand %p5259_p3, %p5253_p12 }
  0x18   : > { %5263 = shalt.err (!%p5260_p4)
}
  0x19   : > { %s5264_s24 = scalar_lea.vmem %s5399_s10, 8192  ;;  %s5315_s25 = smov [#allocation3]  }
  0x1a   : > { %p5265_p5 = scmp.ne.s32.totalorder %s5399_s10, %s5264_s24  ;;  %s5269_s28 = sshll.u32 %s5315_s25, 4  ;;  %s5270_s28 = int_to_ptr.vmem [resolvable:$false] %s5269_s28 }
  0x1b   : > { %s5271_s29 = scalar_lea.vmem %s5270_s28, 16384  ;;  %p5272_p11 = scmp.lt.s32.totalorder %s5399_s10, %s5270_s28 }
  0x1c   : > { %p5267_p6 = pnand %p5265_p5, %p5251_p10  ;;  %p5273_p13 = scmp.lt.s32.totalorder %s5271_s29, %s5264_s24 }
  0x1e   : > { %p5268_p9 = pneg %p5267_p6  ;;  %p5274_p0 = por %p5273_p13, %p5272_p11 }
  0x20   : > { %p5275_p1 = pnand %p5274_p0, %p5268_p9 }
  0x22   : > { %5278 = shalt.err (!%p5275_p1)
}
  0x23   : > { %s5316_s30 = smov 768   ;;  %s5317_s6 = smov 128  }
  0x24   : > { %s5318_s7 = smov 8   ;;  %p3980_p10 = scmp.ge.s32.totalorder %s5313_s21, 1 }
  0x25   : > { %4515 = dma.hbm_to_vmem [thread:$0]  (!%p5401_p8), %s5397_s8, 8192, %s5399_s10, %s5405_s12, %s5316_s30, %s5317_s6, %s5318_s7  }
  0x26   : > { %p213_p12 = scmp.lt.s32.totalorder %s5313_s21, 7 }
  0x28   : > { %p214_p2 = pnand %p3980_p10, %p213_p12 }
  0x29   : > { %s219_s9 = sand.u32 (!%p214_p2), 1, %s5305_s19  }
  0x2a   : > { %217 = sbr.rel (%p214_p2) target bundleno = 983 (0x3d7), region = 40  ;;  %s3981_s13 = sshll.u32 (!%p214_p2), %s219_s9, 9 }
  0x2b   : > { %s220_s14 = scalar_lea.sflag (!%p214_p2), [#allocation4], %s219_s9  ;;  %s5436_s15 = scalar_lea.vmem (!%p214_p2), [#allocation3], %s3981_s13 }
  0x31   : > { %5296 = dma.done.wait (%p5388_p7), %s220_s14, 8192  }
  0x32   : > { %5298 = vsyncadd (%p5388_p7), %s220_s14, 4294959104  ;;  %s3982_s16 = sshll.u32 %s5371_s22, 1  ;;  %p3985_p8 = scmp.ne.s32.totalorder %s5371_s22, 0 }
  0x33   : > { %p256_p3 = scmp.lt.s32.totalorder %s3982_s16, 11  ;;  %v4555_v0 = vld [vmem:[%s6802_s1 + $0x4] ss:$16 sps:$4 sm:$0xff] (!%p3985_p8)   ;;  %v4557_v1 = vld [vmem:[%s6802_s1 + $0xc] ss:$16 sps:$4 sm:$0xff] (!%p3985_p8)   ;;  %v667_v36 = vlaneseq (!%p3985_p8)  ;;  %vm2749_vm0 = vcmask (!%p3985_p8), 261120  }
  0x34   : > { %270 = sbr.rel (%p3985_p8) target bundleno = 672 (0x2a0), region = 48  ;;  %2753 = vmatprep.subr.bf16.mxu0 (!%p3985_p8), %v4555_v0  ;;  %v4559_v2 = vld [vmem:[%s6802_s1] ss:$16 sps:$4 sm:$0xff] (!%p3985_p8)   ;;  %v4560_v3 = vld [vmem:[%s6802_s1 + $0x8] ss:$16 sps:$4 sm:$0xff] (!%p3985_p8)   ;;  %3040 = vmatprep.subr.bf16.mxu1 (!%p3985_p8), %v4557_v1 }
  0x35   : > { %s6814_s16 = smov (!%p256_p3, %s3982_s16), 11  ;;  %v4561_v4 = vld [vmem:[%s6802_s1 + $0x24] ss:$16 sps:$4 sm:$0xff] (!%p3985_p8)   ;;  %2754 = vmatpush1.bf16.msra.mxu0 (!%p3985_p8), %v4559_v2  ;;  %3041 = vmatpush1.bf16.msra.mxu1 (!%p3985_p8), %v4560_v3  ;;  %v4563_v5 = vld [vmem:[%s6802_s1 + $0x2c] ss:$16 sps:$4 sm:$0xff] (!%p3985_p8)   ;;  %v5573_v42 = vshrl.u32 (!%p3985_p8), %v667_v36, 7 }
  0x36   : > { %s258_s10 = scalar_lea.vmem %s6805_s4, %s6814_s16  ;;  %s3984_s11 = sshll.u32 %s6814_s16, 1  ;;  %v4565_v6 = vld [vmem:[%s6802_s1 + $0x20] ss:$16 sps:$4 sm:$0xff] (!%p3985_p8)   ;;  %2755 = vmatprep.subr.bf16.mxu0 (!%p3985_p8), %v4561_v4  ;;  %v4566_v7 = vld [vmem:[%s6802_s1 + $0x28] ss:$16 sps:$4 sm:$0xff] (!%p3985_p8)   ;;  %3042 = vmatprep.subr.bf16.mxu1 (!%p3985_p8), %v4563_v5 }
  0x37   : > { %s5453_s18 = scalar_lea.vmem %s6806_s5, %s3984_s11  ;;  %v4567_v8 = vld [vmem:[%s6802_s1 + $0x44] ss:$16 sps:$4 sm:$0xff] (!%p3985_p8)   ;;  %v4569_v9 = vld [vmem:[%s6802_s1 + $0x4c] ss:$16 sps:$4 sm:$0xff] (!%p3985_p8)   ;;  %v4571_v10 = vld [vmem:[%s6802_s1 + $0x40] ss:$16 sps:$4 sm:$0xff] (!%p3985_p8)  }
  0x38   : > { %v4572_v11 = vld [vmem:[%s6802_s1 + $0x48] ss:$16 sps:$4 sm:$0xff] (!%p3985_p8)   ;;  %v4573_v12 = vld [vmem:[%s6802_s1 + $0x64] ss:$16 sps:$4 sm:$0xff] (!%p3985_p8)   ;;  %v4575_v13 = vld [vmem:[%s6802_s1 + $0x6c] ss:$16 sps:$4 sm:$0xff] (!%p3985_p8)  }
  0x39   : > { %2756 = vmatpush1.bf16.msra.mxu0 (!%p3985_p8), %v4565_v6  ;;  %3043 = vmatpush1.bf16.msra.mxu1 (!%p3985_p8), %v4566_v7  ;;  %v4577_v14 = vld [vmem:[%s6802_s1 + $0x60] ss:$16 sps:$4 sm:$0xff] (!%p3985_p8)   ;;  %v4578_v15 = vld [vmem:[%s6802_s1 + $0x68] ss:$16 sps:$4 sm:$0xff] (!%p3985_p8)   ;;  %v4579_v16 = vld [vmem:[%s6802_s1 + $0x84] ss:$16 sps:$4 sm:$0xff] (!%p3985_p8)  }
  0x3a   : > { %2757 = vmatprep.subr.bf16.mxu0 (!%p3985_p8), %v4567_v8  ;;  %3044 = vmatprep.subr.bf16.mxu1 (!%p3985_p8), %v4569_v9  ;;  %v4581_v17 = vld [vmem:[%s6802_s1 + $0x8c] ss:$16 sps:$4 sm:$0xff] (!%p3985_p8)   ;;  %v4583_v18 = vld [vmem:[%s6802_s1 + $0x80] ss:$16 sps:$4 sm:$0xff] (!%p3985_p8)   ;;  %v4584_v19 = vld [vmem:[%s6802_s1 + $0x88] ss:$16 sps:$4 sm:$0xff] (!%p3985_p8)  }
  0x3b   : > { %v4585_v20 = vld [vmem:[%s6802_s1 + $0xa4] ss:$16 sps:$4 sm:$0xff]   ;;  %v4587_v21 = vld [vmem:[%s6802_s1 + $0xac] ss:$16 sps:$4 sm:$0xff]   ;;  %v4589_v22 = vld [vmem:[%s6802_s1 + $0xa0] ss:$16 sps:$4 sm:$0xff]  }
  0x3c   : > { %v4590_v23 = vld [vmem:[%s6802_s1 + $0xa8] ss:$16 sps:$4 sm:$0xff]   ;;  %v4591_v24 = vld [vmem:[%s6802_s1 + $0xc4] ss:$16 sps:$4 sm:$0xff]   ;;  %v4593_v25 = vld [vmem:[%s6802_s1 + $0xcc] ss:$16 sps:$4 sm:$0xff]  }
  0x3d   : > { %2758 = vmatpush1.bf16.msra.mxu0 %v4571_v10  ;;  %3045 = vmatpush1.bf16.msra.mxu1 %v4572_v11  ;;  %v4595_v26 = vld [vmem:[%s6802_s1 + $0xc0] ss:$16 sps:$4 sm:$0xff]   ;;  %v4596_v27 = vld [vmem:[%s6802_s1 + $0xc8] ss:$16 sps:$4 sm:$0xff]   ;;  %v4597_v28 = vld [vmem:[%s6802_s1 + $0xe4] ss:$16 sps:$4 sm:$0xff]  }
  0x3e   : > { %2759 = vmatprep.subr.bf16.mxu0 %v4573_v12  ;;  %3046 = vmatprep.subr.bf16.mxu1 %v4575_v13  ;;  %v4599_v29 = vld [vmem:[%s6802_s1 + $0xec] ss:$16 sps:$4 sm:$0xff]   ;;  %v4601_v30 = vld [vmem:[%s6802_s1 + $0xe0] ss:$16 sps:$4 sm:$0xff]   ;;  %v4602_v31 = vld [vmem:[%s6802_s1 + $0xe8] ss:$16 sps:$4 sm:$0xff]  }
  0x3f   : > { %v4603_v32 = vld [vmem:[%s6802_s1 + $0x104] ss:$16 sps:$4 sm:$0xff]   ;;  %v4605_v33 = vld [vmem:[%s6802_s1 + $0x10c] ss:$16 sps:$4 sm:$0xff]   ;;  %v4607_v34 = vld [vmem:[%s6802_s1 + $0x100] ss:$16 sps:$4 sm:$0xff]  }
  0x40   : > { %v4608_v35 = vld [vmem:[%s6802_s1 + $0x108] ss:$16 sps:$4 sm:$0xff]   ;;  %v5319_v37 = vmov 1966171168   ;;  %v4609_v39 = vld [vmem:[%s6802_s1 + $0x124] ss:$16 sps:$4 sm:$0xff]  }
  0x41   : > { %2760 = vmatpush1.bf16.msra.mxu0 %v4577_v14  ;;  %3047 = vmatpush1.bf16.msra.mxu1 %v4578_v15  ;;  %v691_v38 = vunpack.c.l.s4 %v5319_v37  ;;  %v4611_v40 = vld [vmem:[%s6802_s1 + $0x12c] ss:$16 sps:$4 sm:$0xff]   ;;  %v4613_v41 = vld [vmem:[%s6802_s1 + $0x120] ss:$16 sps:$4 sm:$0xff]   ;;  %v4614_v44 = vld [vmem:[%s6802_s1 + $0x128] ss:$16 sps:$4 sm:$0xff]  }
  0x42   : > { %2761 = vmatprep.subr.bf16.mxu0 %v4579_v16  ;;  %3048 = vmatprep.subr.bf16.mxu1 %v4581_v17  ;;  %v4615_v45 = vld [vmem:[%s6802_s1 + $0x144] ss:$16 sps:$4 sm:$0xff]   ;;  %v4617_v46 = vld [vmem:[%s6802_s1 + $0x14c] ss:$16 sps:$4 sm:$0xff]   ;;  %v4619_v47 = vld [vmem:[%s6802_s1 + $0x140] ss:$16 sps:$4 sm:$0xff]  }
  0x43   : > { %v692_v43 = vunpack.c.0.s8 %v691_v38  ;;  %v4620_v48 = vld [vmem:[%s6802_s1 + $0x148] ss:$16 sps:$4 sm:$0xff]   ;;  %v4621_v50 = vld [vmem:[%s6802_s1 + $0x164] ss:$16 sps:$4 sm:$0xff]   ;;  %v4623_v51 = vld [vmem:[%s6802_s1 + $0x16c] ss:$16 sps:$4 sm:$0xff]  }
  0x44   : > { %v5602_v52 = vld [vmem:[%s6801_s0] sm:$0xff]  ;;  %v4626_v55 = vld [vmem:[%s6802_s1 + $0x168] ss:$16 sps:$4 sm:$0xff]   ;;  %v4629_v57 = vld [vmem:[%s6802_s1 + $0x18c] ss:$16 sps:$4 sm:$0xff]  }
  0x45   : > { %2762 = vmatpush1.bf16.msra.mxu0 %v4583_v18  ;;  %3049 = vmatpush1.bf16.msra.mxu1 %v4584_v19  ;;  %v5591_v49 = vsub.s32 %v692_v43, %v5573_v42  ;;  %v4625_v53 = vld [vmem:[%s6802_s1 + $0x160] ss:$16 sps:$4 sm:$0xff]   ;;  %v4627_v56 = vld [vmem:[%s6802_s1 + $0x184] ss:$16 sps:$4 sm:$0xff]   ;;  %v4632_v61 = vld [vmem:[%s6802_s1 + $0x188] ss:$16 sps:$4 sm:$0xff]  }
  0x46   : > { %2763 = vmatprep.subr.bf16.mxu0 %v4585_v20  ;;  %3050 = vmatprep.subr.bf16.mxu1 %v4587_v21  ;;  %v4631_v59 = vld [vmem:[%s6802_s1 + $0x180] ss:$16 sps:$4 sm:$0xff]   ;;  %v4633_v62 = vld [vmem:[%s6802_s1 + $0x1a4] ss:$16 sps:$4 sm:$0xff]   ;;  %v4635_v63 = vld [vmem:[%s6802_s1 + $0x1ac] ss:$16 sps:$4 sm:$0xff]  }
  0x47   : > { %v696_v54 = vrot.slane %v5602_v52, %v5591_v49  ;;  %v4637_v0 = vld [vmem:[%s6802_s1 + $0x1a0] ss:$16 sps:$4 sm:$0xff]   ;;  %v4638_v1 = vld [vmem:[%s6802_s1 + $0x1a8] ss:$16 sps:$4 sm:$0xff]   ;;  %v4639_v2 = vld [vmem:[%s6802_s1 + $0x1c4] ss:$16 sps:$4 sm:$0xff]  }
  0x48   : > { %v4641_v3 = vld [vmem:[%s6802_s1 + $0x1cc] ss:$16 sps:$4 sm:$0xff]   ;;  %v4643_v4 = vld [vmem:[%s6802_s1 + $0x1c0] ss:$16 sps:$4 sm:$0xff]   ;;  %v4644_v5 = vld [vmem:[%s6802_s1 + $0x1c8] ss:$16 sps:$4 sm:$0xff]  }
  0x49   : > { %2764 = vmatpush1.bf16.msra.mxu0 %v4589_v22  ;;  %3051 = vmatpush1.bf16.msra.mxu1 %v4590_v23  ;;  %v704_v58 = vcombine.high %v696_v54, %v696_v54  ;;  %v4645_v6 = vld [vmem:[%s6802_s1 + $0x1e4] ss:$16 sps:$4 sm:$0xff]   ;;  %v4647_v7 = vld [vmem:[%s6802_s1 + $0x1ec] ss:$16 sps:$4 sm:$0xff]   ;;  %v4649_v8 = vld [vmem:[%s6802_s1 + $0x1e0] ss:$16 sps:$4 sm:$0xff]   ;;  %v5671_v13 = vrot.slane %v696_v54, %v5591_v49 }
  0x4a   : > { %2765 = vmatprep.subr.bf16.mxu0 %v4591_v24  ;;  %3052 = vmatprep.subr.bf16.mxu1 %v4593_v25  ;;  %v4650_v9 = vld [vmem:[%s6802_s1 + $0x1e8] ss:$16 sps:$4 sm:$0xff]   ;;  %v4653_v10 = vld [vmem:[%s6802_s1 + $0x204] ss:$16 sps:$4 sm:$0xff]   ;;  %v4656_v11 = vld [vmem:[%s6802_s1 + $0x20c] ss:$16 sps:$4 sm:$0xff]  }
  0x4b   : > { %v726_v60 = vrot.slane %v704_v58, %v5591_v49  ;;  %v4651_v12 = vld [vmem:[%s6802_s1 + $0x200] ss:$16 sps:$4 sm:$0xff]   ;;  %v4654_v14 = vld [vmem:[%s6802_s1 + $0x208] ss:$16 sps:$4 sm:$0xff]   ;;  %v4659_v15 = vld [vmem:[%s6802_s1 + $0x224] ss:$16 sps:$4 sm:$0xff]  }
  0x4c   : > { %v4662_v16 = vld [vmem:[%s6802_s1 + $0x22c] ss:$16 sps:$4 sm:$0xff]   ;;  %v4657_v18 = vld [vmem:[%s6802_s1 + $0x220] ss:$16 sps:$4 sm:$0xff]   ;;  %v4660_v19 = vld [vmem:[%s6802_s1 + $0x228] ss:$16 sps:$4 sm:$0xff]  }
  0x4d   : > { %2766 = vmatpush1.bf16.msra.mxu0 %v4595_v26  ;;  %3053 = vmatpush1.bf16.msra.mxu1 %v4596_v27  ;;  %v736_v17 = vcombine.high %v726_v60, %v726_v60  ;;  %v4665_v20 = vld [vmem:[%s6802_s1 + $0x244] ss:$16 sps:$4 sm:$0xff]   ;;  %v4668_v21 = vld [vmem:[%s6802_s1 + $0x24c] ss:$16 sps:$4 sm:$0xff]   ;;  %v4663_v22 = vld [vmem:[%s6802_s1 + $0x240] ss:$16 sps:$4 sm:$0xff]  }
  0x4e   : > { %2767 = vmatprep.subr.bf16.mxu0 %v4597_v28  ;;  %3054 = vmatprep.subr.bf16.mxu1 %v4599_v29  ;;  %v4666_v23 = vld [vmem:[%s6802_s1 + $0x248] ss:$16 sps:$4 sm:$0xff]   ;;  %v4671_v24 = vld [vmem:[%s6802_s1 + $0x264] ss:$16 sps:$4 sm:$0xff]   ;;  %v4674_v25 = vld [vmem:[%s6802_s1 + $0x26c] ss:$16 sps:$4 sm:$0xff]  }
  0x4f   : > { %2785 = vmatprep.mubr.bf16.mxu0 %v726_v60  ;;  %3072 = vmatprep.mubr.bf16.mxu1 %v726_v60  ;;  %v4669_v26 = vld [vmem:[%s6802_s1 + $0x260] ss:$16 sps:$4 sm:$0xff]   ;;  %v4672_v27 = vld [vmem:[%s6802_s1 + $0x268] ss:$16 sps:$4 sm:$0xff]   ;;  %v4677_v28 = vld [vmem:[%s6802_s1 + $0x284] ss:$16 sps:$4 sm:$0xff]  }
  0x50   : > { %v4680_v29 = vld [vmem:[%s6802_s1 + $0x28c] ss:$16 sps:$4 sm:$0xff]   ;;  %v4689_v36 = vld [vmem:[%s6802_s1 + $0x2c4] ss:$16 sps:$4 sm:$0xff]   ;;  %v4687_v38 = vld [vmem:[%s6802_s1 + $0x2c0] ss:$16 sps:$4 sm:$0xff]  }
  0x51   : > { %2768 = vmatpush1.bf16.msra.mxu0 %v4601_v30  ;;  %3055 = vmatpush1.bf16.msra.mxu1 %v4602_v31  ;;  %v4675_v30 = vld [vmem:[%s6802_s1 + $0x280] ss:$16 sps:$4 sm:$0xff]   ;;  %v4678_v31 = vld [vmem:[%s6802_s1 + $0x288] ss:$16 sps:$4 sm:$0xff]   ;;  %v4692_v37 = vld [vmem:[%s6802_s1 + $0x2cc] ss:$16 sps:$4 sm:$0xff]  }
  0x52   : > { %2769 = vmatprep.subr.bf16.mxu0 %v4603_v32  ;;  %3056 = vmatprep.subr.bf16.mxu1 %v4605_v33  ;;  %v4683_v32 = vld [vmem:[%s6802_s1 + $0x2a4] ss:$16 sps:$4 sm:$0xff]   ;;  %v4686_v33 = vld [vmem:[%s6802_s1 + $0x2ac] ss:$16 sps:$4 sm:$0xff]   ;;  %v4693_v43 = vld [vmem:[%s6802_s1 + $0x2e0] ss:$16 sps:$4 sm:$0xff]  }
  0x53   : > { %v4708_v54 = vld [vmem:[%s6802_s1 + $0x328] ss:$16 sps:$4 sm:$0xff]   ;;  %v4722_v60 = vld [vmem:[%s6802_s1 + $0x36c] ss:$16 sps:$4 sm:$0xff]  }
  0x54   : > { %v4714_v58 = vld [vmem:[%s6802_s1 + $0x348] ss:$16 sps:$4 sm:$0xff]  }
  0x55   : > { %2770 = vmatpush1.bf16.msra.mxu0 %v4607_v34  ;;  %3057 = vmatpush1.bf16.msra.mxu1 %v4608_v35  ;;  %v4681_v34 = vld [vmem:[%s6802_s1 + $0x2a0] ss:$16 sps:$4 sm:$0xff]   ;;  %v4684_v35 = vld [vmem:[%s6802_s1 + $0x2a8] ss:$16 sps:$4 sm:$0xff]  }
  0x56   : > { %2771 = vmatprep.subr.bf16.mxu0 %v4609_v39  ;;  %3058 = vmatprep.subr.bf16.mxu1 %v4611_v40  ;;  %v4690_v39 = vld [vmem:[%s6802_s1 + $0x2c8] ss:$16 sps:$4 sm:$0xff]   ;;  %v4695_v40 = vld [vmem:[%s6802_s1 + $0x2e4] ss:$16 sps:$4 sm:$0xff]  }
  0x59   : > { %2772 = vmatpush1.bf16.msra.mxu0 %v4613_v41  ;;  %3059 = vmatpush1.bf16.msra.mxu1 %v4614_v44  ;;  %v4698_v41 = vld [vmem:[%s6802_s1 + $0x2ec] ss:$16 sps:$4 sm:$0xff]   ;;  %v4696_v44 = vld [vmem:[%s6802_s1 + $0x2e8] ss:$16 sps:$4 sm:$0xff]  }
  0x5a   : > { %2773 = vmatprep.subr.bf16.mxu0 %v4615_v45  ;;  %3060 = vmatprep.subr.bf16.mxu1 %v4617_v46  ;;  %v4701_v45 = vld [vmem:[%s6802_s1 + $0x304] ss:$16 sps:$4 sm:$0xff]   ;;  %v4704_v46 = vld [vmem:[%s6802_s1 + $0x30c] ss:$16 sps:$4 sm:$0xff]  }
  0x5d   : > { %2774 = vmatpush1.bf16.msra.mxu0 %v4619_v47  ;;  %3061 = vmatpush1.bf16.msra.mxu1 %v4620_v48  ;;  %v4699_v47 = vld [vmem:[%s6802_s1 + $0x300] ss:$16 sps:$4 sm:$0xff]   ;;  %v4702_v48 = vld [vmem:[%s6802_s1 + $0x308] ss:$16 sps:$4 sm:$0xff]  }
  0x5e   : > { %2775 = vmatprep.subr.bf16.mxu0 %v4621_v50  ;;  %3062 = vmatprep.subr.bf16.mxu1 %v4623_v51  ;;  %v4707_v50 = vld [vmem:[%s6802_s1 + $0x324] ss:$16 sps:$4 sm:$0xff]   ;;  %v4710_v51 = vld [vmem:[%s6802_s1 + $0x32c] ss:$16 sps:$4 sm:$0xff]  }
  0x61   : > { %2776 = vmatpush1.bf16.msra.mxu0 %v4625_v53  ;;  %3063 = vmatpush1.bf16.msra.mxu1 %v4626_v55  ;;  %v4705_v53 = vld [vmem:[%s6802_s1 + $0x320] ss:$16 sps:$4 sm:$0xff]   ;;  %v4713_v55 = vld [vmem:[%s6802_s1 + $0x344] ss:$16 sps:$4 sm:$0xff]  }
  0x62   : > { %2777 = vmatprep.subr.bf16.mxu0 %v4627_v56  ;;  %3064 = vmatprep.subr.bf16.mxu1 %v4629_v57  ;;  %v4716_v56 = vld [vmem:[%s6802_s1 + $0x34c] ss:$16 sps:$4 sm:$0xff]   ;;  %v4711_v57 = vld [vmem:[%s6802_s1 + $0x340] ss:$16 sps:$4 sm:$0xff]  }
  0x65   : > { %2778 = vmatpush1.bf16.msra.mxu0 %v4631_v59  ;;  %3065 = vmatpush1.bf16.msra.mxu1 %v4632_v61  ;;  %v4719_v59 = vld [vmem:[%s6802_s1 + $0x364] ss:$16 sps:$4 sm:$0xff]   ;;  %v4717_v61 = vld [vmem:[%s6802_s1 + $0x360] ss:$16 sps:$4 sm:$0xff]  }
  0x66   : > { %2779 = vmatprep.subr.bf16.mxu0 %v4633_v62  ;;  %3066 = vmatprep.subr.bf16.mxu1 %v4635_v63  ;;  %v4720_v62 = vld [vmem:[%s6802_s1 + $0x368] ss:$16 sps:$4 sm:$0xff]   ;;  %v4725_v63 = vld [vmem:[%s6802_s1 + $0x384] ss:$16 sps:$4 sm:$0xff]  }
  0x69   : > { %2780 = vmatpush1.bf16.msra.mxu0 %v4637_v0  ;;  %3067 = vmatpush1.bf16.msra.mxu1 %v4638_v1  ;;  %v4728_v0 = vld [vmem:[%s6802_s1 + $0x38c] ss:$16 sps:$4 sm:$0xff]   ;;  %v4723_v1 = vld [vmem:[%s6802_s1 + $0x380] ss:$16 sps:$4 sm:$0xff]  }
  0x6a   : > { %2781 = vmatprep.subr.bf16.mxu0 %v4639_v2  ;;  %3068 = vmatprep.subr.bf16.mxu1 %v4641_v3  ;;  %v4726_v2 = vld [vmem:[%s6802_s1 + $0x388] ss:$16 sps:$4 sm:$0xff]   ;;  %v4731_v3 = vld [vmem:[%s6802_s1 + $0x3a4] ss:$16 sps:$4 sm:$0xff]  }
  0x6d   : > { %2782 = vmatpush1.bf16.msra.mxu0 %v4643_v4  ;;  %3069 = vmatpush1.bf16.msra.mxu1 %v4644_v5  ;;  %v4734_v4 = vld [vmem:[%s6802_s1 + $0x3ac] ss:$16 sps:$4 sm:$0xff]   ;;  %v4729_v5 = vld [vmem:[%s6802_s1 + $0x3a0] ss:$16 sps:$4 sm:$0xff]  }
  0x6e   : > { %2783 = vmatprep.subr.bf16.mxu0 %v4645_v6  ;;  %3070 = vmatprep.subr.bf16.mxu1 %v4647_v7  ;;  %v4732_v6 = vld [vmem:[%s6802_s1 + $0x3a8] ss:$16 sps:$4 sm:$0xff]   ;;  %v4737_v7 = vld [vmem:[%s6802_s1 + $0x3c4] ss:$16 sps:$4 sm:$0xff]  }
  0x71   : > { %2784 = vmatpush1.bf16.msra.mxu0 %v4649_v8  ;;  %3071 = vmatpush1.bf16.msra.mxu1 %v4650_v9  ;;  %v4740_v8 = vld [vmem:[%s6802_s1 + $0x3cc] ss:$16 sps:$4 sm:$0xff]   ;;  %v689_v9 = vcombine.high %v5602_v52, %v5602_v52 }
  0x72   : > { %2794 = vmatprep.subr.bf16.mxu0 %v4653_v10  ;;  %3081 = vmatprep.subr.bf16.mxu1 %v4656_v11  ;;  %v4735_v10 = vld [vmem:[%s6802_s1 + $0x3c0] ss:$16 sps:$4 sm:$0xff]   ;;  %v4738_v11 = vld [vmem:[%s6802_s1 + $0x3c8] ss:$16 sps:$4 sm:$0xff]   ;;  %v4746_v52 = vld [vmem:[%s6802_s1 + $0x3ec] ss:$16 sps:$4 sm:$0xff]  }
  0x74   : > { %2786 = vmatmul.mubr.bf16.vlgmr.msra.gmra.mrb[0].mxu0 %v5671_v13  ;;  %3073 = vmatmul.mubr.bf16.vlgmr.msra.gmra.mrb[0].mxu1 %v5671_v13 }
  0x75   : > { %2795 = vmatpush1.bf16.msra.mxu0 %v4651_v12  ;;  %3082 = vmatpush1.bf16.msra.mxu1 %v4654_v14  ;;  %v4743_v12 = vld [vmem:[%s6802_s1 + $0x3e4] ss:$16 sps:$4 sm:$0xff]   ;;  %v5855_v14 = vrot.slane %v689_v9, %v5591_v49  ;;  %v4822_v9 = vld [vmem:[%s6802_s1 + $0x588] ss:$16 sps:$4 sm:$0xff]  }
  0x76   : > { %2796 = vmatprep.subr.bf16.mxu0 %v4659_v15  ;;  %3083 = vmatprep.subr.bf16.mxu1 %v4662_v16  ;;  %v4741_v15 = vld [vmem:[%s6802_s1 + $0x3e0] ss:$16 sps:$4 sm:$0xff]   ;;  %v4744_v16 = vld [vmem:[%s6802_s1 + $0x3e8] ss:$16 sps:$4 sm:$0xff]  }
  0x77   : > { %2826 = vmatprep.mubr.bf16.mxu0 %v736_v17  ;;  %3113 = vmatprep.mubr.bf16.mxu1 %v736_v17  ;;  %v4749_v17 = vld [vmem:[%s6802_s1 + $0x404] ss:$16 sps:$4 sm:$0xff]  }
  0x79   : > { %2797 = vmatpush1.bf16.msra.mxu0 %v4657_v18  ;;  %3084 = vmatpush1.bf16.msra.mxu1 %v4660_v19  ;;  %v4752_v18 = vld [vmem:[%s6802_s1 + $0x40c] ss:$16 sps:$4 sm:$0xff]   ;;  %v705_v19 = vcombine.high %v5855_v14, %v5855_v14 }
  0x7a   : > { %2798 = vmatprep.subr.bf16.mxu0 %v4665_v20  ;;  %3085 = vmatprep.subr.bf16.mxu1 %v4668_v21  ;;  %v4747_v20 = vld [vmem:[%s6802_s1 + $0x400] ss:$16 sps:$4 sm:$0xff]   ;;  %v734_v21 = vcombine.high %v5671_v13, %v5671_v13 }
  0x7b   : > { %v4753_v13 = vld [vmem:[%s6802_s1 + $0x420] ss:$16 sps:$4 sm:$0xff]  }
  0x7d   : > { %2799 = vmatpush1.bf16.msra.mxu0 %v4663_v22  ;;  %3086 = vmatpush1.bf16.msra.mxu1 %v4666_v23  ;;  %v4750_v22 = vld [vmem:[%s6802_s1 + $0x408] ss:$16 sps:$4 sm:$0xff]   ;;  %v4755_v23 = vld [vmem:[%s6802_s1 + $0x424] ss:$16 sps:$4 sm:$0xff]  }
  0x7e   : > { %2800 = vmatprep.subr.bf16.mxu0 %v4671_v24  ;;  %3087 = vmatprep.subr.bf16.mxu1 %v4674_v25  ;;  %v4758_v24 = vld [vmem:[%s6802_s1 + $0x42c] ss:$16 sps:$4 sm:$0xff]   ;;  %v5886_v25 = vrot.slane %v705_v19, %v5591_v49  ;;  %v4839_v19 = vld [vmem:[%s6802_s1 + $0x5e4] ss:$16 sps:$4 sm:$0xff]  }
  0x81   : > { %2801 = vmatpush1.bf16.msra.mxu0 %v4669_v26  ;;  %3088 = vmatpush1.bf16.msra.mxu1 %v4672_v27  ;;  %v4756_v26 = vld [vmem:[%s6802_s1 + $0x428] ss:$16 sps:$4 sm:$0xff]   ;;  %v4761_v27 = vld [vmem:[%s6802_s1 + $0x444] ss:$16 sps:$4 sm:$0xff]  }
  0x82   : > { %2802 = vmatprep.subr.bf16.mxu0 %v4677_v28  ;;  %3089 = vmatprep.subr.bf16.mxu1 %v4680_v29  ;;  %v4764_v28 = vld [vmem:[%s6802_s1 + $0x44c] ss:$16 sps:$4 sm:$0xff]   ;;  %v4759_v29 = vld [vmem:[%s6802_s1 + $0x440] ss:$16 sps:$4 sm:$0xff]  }
  0x85   : > { %2803 = vmatpush1.bf16.msra.mxu0 %v4675_v30  ;;  %3090 = vmatpush1.bf16.msra.mxu1 %v4678_v31  ;;  %v4762_v30 = vld [vmem:[%s6802_s1 + $0x448] ss:$16 sps:$4 sm:$0xff]   ;;  %v4767_v31 = vld [vmem:[%s6802_s1 + $0x464] ss:$16 sps:$4 sm:$0xff]  }
  0x86   : > { %2804 = vmatprep.subr.bf16.mxu0 %v4683_v32  ;;  %3091 = vmatprep.subr.bf16.mxu1 %v4686_v33  ;;  %v4770_v32 = vld [vmem:[%s6802_s1 + $0x46c] ss:$16 sps:$4 sm:$0xff]   ;;  %v4765_v33 = vld [vmem:[%s6802_s1 + $0x460] ss:$16 sps:$4 sm:$0xff]  }
  0x89   : > { %2805 = vmatpush1.bf16.msra.mxu0 %v4681_v34  ;;  %3092 = vmatpush1.bf16.msra.mxu1 %v4684_v35  ;;  %v4768_v34 = vld [vmem:[%s6802_s1 + $0x468] ss:$16 sps:$4 sm:$0xff]   ;;  %v4773_v35 = vld [vmem:[%s6802_s1 + $0x484] ss:$16 sps:$4 sm:$0xff]  }
  0x8a   : > { %2806 = vmatprep.subr.bf16.mxu0 %v4689_v36  ;;  %3093 = vmatprep.subr.bf16.mxu1 %v4692_v37  ;;  %v4776_v36 = vld [vmem:[%s6802_s1 + $0x48c] ss:$16 sps:$4 sm:$0xff]   ;;  %v4771_v37 = vld [vmem:[%s6802_s1 + $0x480] ss:$16 sps:$4 sm:$0xff]  }
  0x8d   : > { %2807 = vmatpush1.bf16.msra.mxu0 %v4687_v38  ;;  %3094 = vmatpush1.bf16.msra.mxu1 %v4690_v39  ;;  %v4774_v38 = vld [vmem:[%s6802_s1 + $0x488] ss:$16 sps:$4 sm:$0xff]   ;;  %v4779_v39 = vld [vmem:[%s6802_s1 + $0x4a4] ss:$16 sps:$4 sm:$0xff]  }
  0x8e   : > { %2808 = vmatprep.subr.bf16.mxu0 %v4695_v40  ;;  %3095 = vmatprep.subr.bf16.mxu1 %v4698_v41  ;;  %v4782_v40 = vld [vmem:[%s6802_s1 + $0x4ac] ss:$16 sps:$4 sm:$0xff]   ;;  %v4777_v41 = vld [vmem:[%s6802_s1 + $0x4a0] ss:$16 sps:$4 sm:$0xff]  }
  0x91   : > { %2809 = vmatpush1.bf16.msra.mxu0 %v4693_v43  ;;  %3096 = vmatpush1.bf16.msra.mxu1 %v4696_v44  ;;  %v4780_v43 = vld [vmem:[%s6802_s1 + $0x4a8] ss:$16 sps:$4 sm:$0xff]   ;;  %v4785_v44 = vld [vmem:[%s6802_s1 + $0x4c4] ss:$16 sps:$4 sm:$0xff]  }
  0x92   : > { %2810 = vmatprep.subr.bf16.mxu0 %v4701_v45  ;;  %3097 = vmatprep.subr.bf16.mxu1 %v4704_v46  ;;  %v4788_v45 = vld [vmem:[%s6802_s1 + $0x4cc] ss:$16 sps:$4 sm:$0xff]   ;;  %v4783_v46 = vld [vmem:[%s6802_s1 + $0x4c0] ss:$16 sps:$4 sm:$0xff]  }
  0x95   : > { %2811 = vmatpush1.bf16.msra.mxu0 %v4699_v47  ;;  %3098 = vmatpush1.bf16.msra.mxu1 %v4702_v48  ;;  %v4786_v47 = vld [vmem:[%s6802_s1 + $0x4c8] ss:$16 sps:$4 sm:$0xff]   ;;  %v4791_v48 = vld [vmem:[%s6802_s1 + $0x4e4] ss:$16 sps:$4 sm:$0xff]  }
  0x96   : > { %2812 = vmatprep.subr.bf16.mxu0 %v4707_v50  ;;  %3099 = vmatprep.subr.bf16.mxu1 %v4710_v51  ;;  %v4794_v50 = vld [vmem:[%s6802_s1 + $0x4ec] ss:$16 sps:$4 sm:$0xff]   ;;  %v4789_v51 = vld [vmem:[%s6802_s1 + $0x4e0] ss:$16 sps:$4 sm:$0xff]  }
  0x99   : > { %2813 = vmatpush1.bf16.msra.mxu0 %v4705_v53  ;;  %3100 = vmatpush1.bf16.msra.mxu1 %v4708_v54  ;;  %v4792_v53 = vld [vmem:[%s6802_s1 + $0x4e8] ss:$16 sps:$4 sm:$0xff]   ;;  %v4797_v54 = vld [vmem:[%s6802_s1 + $0x504] ss:$16 sps:$4 sm:$0xff]  }
  0x9a   : > { %2814 = vmatprep.subr.bf16.mxu0 %v4713_v55  ;;  %3101 = vmatprep.subr.bf16.mxu1 %v4716_v56  ;;  %v4800_v55 = vld [vmem:[%s6802_s1 + $0x50c] ss:$16 sps:$4 sm:$0xff]   ;;  %v4795_v56 = vld [vmem:[%s6802_s1 + $0x500] ss:$16 sps:$4 sm:$0xff]  }
  0x9d   : > { %2815 = vmatpush1.bf16.msra.mxu0 %v4711_v57  ;;  %3102 = vmatpush1.bf16.msra.mxu1 %v4714_v58  ;;  %v4798_v57 = vld [vmem:[%s6802_s1 + $0x508] ss:$16 sps:$4 sm:$0xff]   ;;  %v4803_v58 = vld [vmem:[%s6802_s1 + $0x524] ss:$16 sps:$4 sm:$0xff]  }
  0x9e   : > { %2816 = vmatprep.subr.bf16.mxu0 %v4719_v59  ;;  %3103 = vmatprep.subr.bf16.mxu1 %v4722_v60  ;;  %v4806_v59 = vld [vmem:[%s6802_s1 + $0x52c] ss:$16 sps:$4 sm:$0xff]   ;;  %v4801_v60 = vld [vmem:[%s6802_s1 + $0x520] ss:$16 sps:$4 sm:$0xff]  }
  0xa1   : > { %2817 = vmatpush1.bf16.msra.mxu0 %v4717_v61  ;;  %3104 = vmatpush1.bf16.msra.mxu1 %v4720_v62  ;;  %v4804_v61 = vld [vmem:[%s6802_s1 + $0x528] ss:$16 sps:$4 sm:$0xff]   ;;  %v4809_v62 = vld [vmem:[%s6802_s1 + $0x544] ss:$16 sps:$4 sm:$0xff]  }
  0xa2   : > { %2818 = vmatprep.subr.bf16.mxu0 %v4725_v63  ;;  %3105 = vmatprep.subr.bf16.mxu1 %v4728_v0  ;;  %v4812_v63 = vld [vmem:[%s6802_s1 + $0x54c] ss:$16 sps:$4 sm:$0xff]   ;;  %v4807_v0 = vld [vmem:[%s6802_s1 + $0x540] ss:$16 sps:$4 sm:$0xff]  }
  0xa5   : > { %2819 = vmatpush1.bf16.msra.mxu0 %v4723_v1  ;;  %3106 = vmatpush1.bf16.msra.mxu1 %v4726_v2  ;;  %v4810_v1 = vld [vmem:[%s6802_s1 + $0x548] ss:$16 sps:$4 sm:$0xff]   ;;  %v4815_v2 = vld [vmem:[%s6802_s1 + $0x564] ss:$16 sps:$4 sm:$0xff]  }
  0xa6   : > { %2820 = vmatprep.subr.bf16.mxu0 %v4731_v3  ;;  %3107 = vmatprep.subr.bf16.mxu1 %v4734_v4  ;;  %v4818_v3 = vld [vmem:[%s6802_s1 + $0x56c] ss:$16 sps:$4 sm:$0xff]   ;;  %v4813_v4 = vld [vmem:[%s6802_s1 + $0x560] ss:$16 sps:$4 sm:$0xff]  }
  0xa9   : > { %2821 = vmatpush1.bf16.msra.mxu0 %v4729_v5  ;;  %3108 = vmatpush1.bf16.msra.mxu1 %v4732_v6  ;;  %v4816_v5 = vld [vmem:[%s6802_s1 + $0x568] ss:$16 sps:$4 sm:$0xff]   ;;  %v4821_v6 = vld [vmem:[%s6802_s1 + $0x584] ss:$16 sps:$4 sm:$0xff]  }
  0xaa   : > { %2822 = vmatprep.subr.bf16.mxu0 %v4737_v7  ;;  %3109 = vmatprep.subr.bf16.mxu1 %v4740_v8  ;;  %v4824_v7 = vld [vmem:[%s6802_s1 + $0x58c] ss:$16 sps:$4 sm:$0xff]   ;;  %v4819_v8 = vld [vmem:[%s6802_s1 + $0x580] ss:$16 sps:$4 sm:$0xff]  }
  0xad   : > { %2823 = vmatpush1.bf16.msra.mxu0 %v4735_v10  ;;  %3110 = vmatpush1.bf16.msra.mxu1 %v4738_v11  ;;  %v4827_v10 = vld [vmem:[%s6802_s1 + $0x5a4] ss:$16 sps:$4 sm:$0xff]   ;;  %v4830_v11 = vld [vmem:[%s6802_s1 + $0x5ac] ss:$16 sps:$4 sm:$0xff]  }
  0xae   : > { %2824 = vmatprep.subr.bf16.mxu0 %v4743_v12  ;;  %3111 = vmatprep.subr.bf16.mxu1 %v4746_v52  ;;  %v4825_v12 = vld [vmem:[%s6802_s1 + $0x5a0] ss:$16 sps:$4 sm:$0xff]   ;;  %v4828_v52 = vld [vmem:[%s6802_s1 + $0x5a8] ss:$16 sps:$4 sm:$0xff]  }
  0xb1   : > { %2825 = vmatpush1.bf16.msra.mxu0 %v4741_v15  ;;  %3112 = vmatpush1.bf16.msra.mxu1 %v4744_v16  ;;  %v4833_v15 = vld [vmem:[%s6802_s1 + $0x5c4] ss:$16 sps:$4 sm:$0xff]   ;;  %v4836_v16 = vld [vmem:[%s6802_s1 + $0x5cc] ss:$16 sps:$4 sm:$0xff]  }
  0xb2   : > { %2835 = vmatprep.subr.bf16.mxu0 %v4749_v17  ;;  %3122 = vmatprep.subr.bf16.mxu1 %v4752_v18  ;;  %v4831_v17 = vld [vmem:[%s6802_s1 + $0x5c0] ss:$16 sps:$4 sm:$0xff]   ;;  %v4834_v18 = vld [vmem:[%s6802_s1 + $0x5c8] ss:$16 sps:$4 sm:$0xff]  }
  0xb4   : > { %2827 = vmatmul.mubr.bf16.vlgmr.msra.gmra.mrb[0].mxu0 %v734_v21  ;;  %3114 = vmatmul.mubr.bf16.vlgmr.msra.gmra.mrb[0].mxu1 %v734_v21  ;;  %v4837_v21 = vld [vmem:[%s6802_s1 + $0x5e0] ss:$16 sps:$4 sm:$0xff]  }
  0xb5   : > { %2836 = vmatpush1.bf16.msra.mxu0 %v4747_v20  ;;  %3123 = vmatpush1.bf16.msra.mxu1 %v4750_v22  ;;  %v4842_v20 = vld [vmem:[%s6802_s1 + $0x5ec] ss:$16 sps:$4 sm:$0xff]   ;;  %v4840_v22 = vld [vmem:[%s6802_s1 + $0x5e8] ss:$16 sps:$4 sm:$0xff]  }
  0xb6   : > { %2837 = vmatprep.subr.bf16.mxu0 %v4755_v23  ;;  %3124 = vmatprep.subr.bf16.mxu1 %v4758_v24  ;;  %v4846_v23 = vld [vmem:[%s6802_s1 + $0x604] ss:$16 sps:$4 sm:$0xff]   ;;  %v4849_v24 = vld [vmem:[%s6802_s1 + $0x60c] ss:$16 sps:$4 sm:$0xff]  }
  0xb7   : > { %2867 = vmatprep.mubr.bf16.mxu0 %v5886_v25  ;;  %3154 = vmatprep.mubr.bf16.mxu1 %v5886_v25 }
  0xb9   : > { %2838 = vmatpush1.bf16.msra.mxu0 %v4753_v13  ;;  %3125 = vmatpush1.bf16.msra.mxu1 %v4756_v26  ;;  %v4844_v13 = vld [vmem:[%s6802_s1 + $0x600] ss:$16 sps:$4 sm:$0xff]   ;;  %v6075_v26 = vrot.slane %v5855_v14, %v5591_v49  ;;  %v737_v14 = vcombine.high %v5886_v25, %v5886_v25  ;;  %v4858_v25 = vld [vmem:[%s6802_s1 + $0x644] ss:$16 sps:$4 sm:$0xff]  }
  0xba   : > { %2839 = vmatprep.subr.bf16.mxu0 %v4761_v27  ;;  %3126 = vmatprep.subr.bf16.mxu1 %v4764_v28  ;;  %v4847_v27 = vld [vmem:[%s6802_s1 + $0x608] ss:$16 sps:$4 sm:$0xff]   ;;  %v4852_v28 = vld [vmem:[%s6802_s1 + $0x624] ss:$16 sps:$4 sm:$0xff]  }
  0xbd   : > { %2840 = vmatpush1.bf16.msra.mxu0 %v4759_v29  ;;  %3127 = vmatpush1.bf16.msra.mxu1 %v4762_v30  ;;  %v4855_v29 = vld [vmem:[%s6802_s1 + $0x62c] ss:$16 sps:$4 sm:$0xff]   ;;  %v4850_v30 = vld [vmem:[%s6802_s1 + $0x620] ss:$16 sps:$4 sm:$0xff]  }
  0xbe   : > { %2841 = vmatprep.subr.bf16.mxu0 %v4767_v31  ;;  %3128 = vmatprep.subr.bf16.mxu1 %v4770_v32  ;;  %v4853_v31 = vld [vmem:[%s6802_s1 + $0x628] ss:$16 sps:$4 sm:$0xff]   ;;  %v4861_v32 = vld [vmem:[%s6802_s1 + $0x64c] ss:$16 sps:$4 sm:$0xff]  }
  0xc1   : > { %2842 = vmatpush1.bf16.msra.mxu0 %v4765_v33  ;;  %3129 = vmatpush1.bf16.msra.mxu1 %v4768_v34  ;;  %v4856_v33 = vld [vmem:[%s6802_s1 + $0x640] ss:$16 sps:$4 sm:$0xff]   ;;  %v4859_v34 = vld [vmem:[%s6802_s1 + $0x648] ss:$16 sps:$4 sm:$0xff]  }
  0xc2   : > { %2843 = vmatprep.subr.bf16.mxu0 %v4773_v35  ;;  %3130 = vmatprep.subr.bf16.mxu1 %v4776_v36  ;;  %v4864_v35 = vld [vmem:[%s6802_s1 + $0x664] ss:$16 sps:$4 sm:$0xff]   ;;  %v4867_v36 = vld [vmem:[%s6802_s1 + $0x66c] ss:$16 sps:$4 sm:$0xff]  }
  0xc5   : > { %2844 = vmatpush1.bf16.msra.mxu0 %v4771_v37  ;;  %3131 = vmatpush1.bf16.msra.mxu1 %v4774_v38  ;;  %v4862_v37 = vld [vmem:[%s6802_s1 + $0x660] ss:$16 sps:$4 sm:$0xff]   ;;  %v4865_v38 = vld [vmem:[%s6802_s1 + $0x668] ss:$16 sps:$4 sm:$0xff]  }
  0xc6   : > { %2845 = vmatprep.subr.bf16.mxu0 %v4779_v39  ;;  %3132 = vmatprep.subr.bf16.mxu1 %v4782_v40  ;;  %v4870_v39 = vld [vmem:[%s6802_s1 + $0x684] ss:$16 sps:$4 sm:$0xff]   ;;  %v4873_v40 = vld [vmem:[%s6802_s1 + $0x68c] ss:$16 sps:$4 sm:$0xff]  }
  0xc9   : > { %2846 = vmatpush1.bf16.msra.mxu0 %v4777_v41  ;;  %3133 = vmatpush1.bf16.msra.mxu1 %v4780_v43  ;;  %v4868_v41 = vld [vmem:[%s6802_s1 + $0x680] ss:$16 sps:$4 sm:$0xff]   ;;  %v4871_v43 = vld [vmem:[%s6802_s1 + $0x688] ss:$16 sps:$4 sm:$0xff]  }
  0xca   : > { %2847 = vmatprep.subr.bf16.mxu0 %v4785_v44  ;;  %3134 = vmatprep.subr.bf16.mxu1 %v4788_v45  ;;  %v4876_v44 = vld [vmem:[%s6802_s1 + $0x6a4] ss:$16 sps:$4 sm:$0xff]   ;;  %v4879_v45 = vld [vmem:[%s6802_s1 + $0x6ac] ss:$16 sps:$4 sm:$0xff]  }
  0xcd   : > { %2848 = vmatpush1.bf16.msra.mxu0 %v4783_v46  ;;  %3135 = vmatpush1.bf16.msra.mxu1 %v4786_v47  ;;  %v4874_v46 = vld [vmem:[%s6802_s1 + $0x6a0] ss:$16 sps:$4 sm:$0xff]   ;;  %v4877_v47 = vld [vmem:[%s6802_s1 + $0x6a8] ss:$16 sps:$4 sm:$0xff]  }
  0xce   : > { %2849 = vmatprep.subr.bf16.mxu0 %v4791_v48  ;;  %3136 = vmatprep.subr.bf16.mxu1 %v4794_v50  ;;  %v4882_v48 = vld [vmem:[%s6802_s1 + $0x6c4] ss:$16 sps:$4 sm:$0xff]   ;;  %v4885_v50 = vld [vmem:[%s6802_s1 + $0x6cc] ss:$16 sps:$4 sm:$0xff]  }
  0xd1   : > { %2850 = vmatpush1.bf16.msra.mxu0 %v4789_v51  ;;  %3137 = vmatpush1.bf16.msra.mxu1 %v4792_v53  ;;  %v4880_v51 = vld [vmem:[%s6802_s1 + $0x6c0] ss:$16 sps:$4 sm:$0xff]   ;;  %v4883_v53 = vld [vmem:[%s6802_s1 + $0x6c8] ss:$16 sps:$4 sm:$0xff]  }
  0xd2   : > { %2851 = vmatprep.subr.bf16.mxu0 %v4797_v54  ;;  %3138 = vmatprep.subr.bf16.mxu1 %v4800_v55  ;;  %v4888_v54 = vld [vmem:[%s6802_s1 + $0x6e4] ss:$16 sps:$4 sm:$0xff]   ;;  %v4891_v55 = vld [vmem:[%s6802_s1 + $0x6ec] ss:$16 sps:$4 sm:$0xff]  }
  0xd5   : > { %2852 = vmatpush1.bf16.msra.mxu0 %v4795_v56  ;;  %3139 = vmatpush1.bf16.msra.mxu1 %v4798_v57  ;;  %v4886_v56 = vld [vmem:[%s6802_s1 + $0x6e0] ss:$16 sps:$4 sm:$0xff]   ;;  %v4889_v57 = vld [vmem:[%s6802_s1 + $0x6e8] ss:$16 sps:$4 sm:$0xff]  }
  0xd6   : > { %2853 = vmatprep.subr.bf16.mxu0 %v4803_v58  ;;  %3140 = vmatprep.subr.bf16.mxu1 %v4806_v59  ;;  %v4894_v58 = vld [vmem:[%s6802_s1 + $0x704] ss:$16 sps:$4 sm:$0xff]   ;;  %v4897_v59 = vld [vmem:[%s6802_s1 + $0x70c] ss:$16 sps:$4 sm:$0xff]  }
  0xd9   : > { %2854 = vmatpush1.bf16.msra.mxu0 %v4801_v60  ;;  %3141 = vmatpush1.bf16.msra.mxu1 %v4804_v61  ;;  %v4892_v60 = vld [vmem:[%s6802_s1 + $0x700] ss:$16 sps:$4 sm:$0xff]   ;;  %v4895_v61 = vld [vmem:[%s6802_s1 + $0x708] ss:$16 sps:$4 sm:$0xff]  }
  0xda   : > { %2855 = vmatprep.subr.bf16.mxu0 %v4809_v62  ;;  %3142 = vmatprep.subr.bf16.mxu1 %v4812_v63  ;;  %v4900_v62 = vld [vmem:[%s6802_s1 + $0x724] ss:$16 sps:$4 sm:$0xff]   ;;  %v4903_v63 = vld [vmem:[%s6802_s1 + $0x72c] ss:$16 sps:$4 sm:$0xff]  }
  0xdd   : > { %2856 = vmatpush1.bf16.msra.mxu0 %v4807_v0  ;;  %3143 = vmatpush1.bf16.msra.mxu1 %v4810_v1  ;;  %v4898_v0 = vld [vmem:[%s6802_s1 + $0x720] ss:$16 sps:$4 sm:$0xff]   ;;  %v4901_v1 = vld [vmem:[%s6802_s1 + $0x728] ss:$16 sps:$4 sm:$0xff]  }
  0xde   : > { %2857 = vmatprep.subr.bf16.mxu0 %v4815_v2  ;;  %3144 = vmatprep.subr.bf16.mxu1 %v4818_v3  ;;  %v4906_v2 = vld [vmem:[%s6802_s1 + $0x744] ss:$16 sps:$4 sm:$0xff]   ;;  %v4909_v3 = vld [vmem:[%s6802_s1 + $0x74c] ss:$16 sps:$4 sm:$0xff]  }
  0xe1   : > { %2858 = vmatpush1.bf16.msra.mxu0 %v4813_v4  ;;  %3145 = vmatpush1.bf16.msra.mxu1 %v4816_v5  ;;  %v4904_v4 = vld [vmem:[%s6802_s1 + $0x740] ss:$16 sps:$4 sm:$0xff]   ;;  %v4907_v5 = vld [vmem:[%s6802_s1 + $0x748] ss:$16 sps:$4 sm:$0xff]  }
  0xe2   : > { %2859 = vmatprep.subr.bf16.mxu0 %v4821_v6  ;;  %3146 = vmatprep.subr.bf16.mxu1 %v4824_v7  ;;  %v4912_v6 = vld [vmem:[%s6802_s1 + $0x764] ss:$16 sps:$4 sm:$0xff]   ;;  %v4915_v7 = vld [vmem:[%s6802_s1 + $0x76c] ss:$16 sps:$4 sm:$0xff]  }
  0xe5   : > { %2860 = vmatpush1.bf16.msra.mxu0 %v4819_v8  ;;  %3147 = vmatpush1.bf16.msra.mxu1 %v4822_v9  ;;  %v4910_v8 = vld [vmem:[%s6802_s1 + $0x760] ss:$16 sps:$4 sm:$0xff]   ;;  %v4913_v9 = vld [vmem:[%s6802_s1 + $0x768] ss:$16 sps:$4 sm:$0xff]  }
  0xe6   : > { %2861 = vmatprep.subr.bf16.mxu0 %v4827_v10  ;;  %3148 = vmatprep.subr.bf16.mxu1 %v4830_v11  ;;  %v4918_v10 = vld [vmem:[%s6802_s1 + $0x784] ss:$16 sps:$4 sm:$0xff]   ;;  %v4921_v11 = vld [vmem:[%s6802_s1 + $0x78c] ss:$16 sps:$4 sm:$0xff]  }
  0xe9   : > { %2862 = vmatpush1.bf16.msra.mxu0 %v4825_v12  ;;  %3149 = vmatpush1.bf16.msra.mxu1 %v4828_v52  ;;  %v4916_v12 = vld [vmem:[%s6802_s1 + $0x780] ss:$16 sps:$4 sm:$0xff]   ;;  %v4919_v52 = vld [vmem:[%s6802_s1 + $0x788] ss:$16 sps:$4 sm:$0xff]  }
  0xea   : > { %2863 = vmatprep.subr.bf16.mxu0 %v4833_v15  ;;  %3150 = vmatprep.subr.bf16.mxu1 %v4836_v16  ;;  %v4924_v15 = vld [vmem:[%s6802_s1 + $0x7a4] ss:$16 sps:$4 sm:$0xff]   ;;  %v4927_v16 = vld [vmem:[%s6802_s1 + $0x7ac] ss:$16 sps:$4 sm:$0xff]  }
  0xed   : > { %2864 = vmatpush1.bf16.msra.mxu0 %v4831_v17  ;;  %3151 = vmatpush1.bf16.msra.mxu1 %v4834_v18  ;;  %v4922_v17 = vld [vmem:[%s6802_s1 + $0x7a0] ss:$16 sps:$4 sm:$0xff]   ;;  %v4925_v18 = vld [vmem:[%s6802_s1 + $0x7a8] ss:$16 sps:$4 sm:$0xff]  }
  0xee   : > { %2865 = vmatprep.subr.bf16.mxu0 %v4839_v19  ;;  %3152 = vmatprep.subr.bf16.mxu1 %v4842_v20  ;;  %v4930_v19 = vld [vmem:[%s6802_s1 + $0x7c4] ss:$16 sps:$4 sm:$0xff]   ;;  %v4933_v20 = vld [vmem:[%s6802_s1 + $0x7cc] ss:$16 sps:$4 sm:$0xff]  }
  0xf1   : > { %2866 = vmatpush1.bf16.msra.mxu0 %v4837_v21  ;;  %3153 = vmatpush1.bf16.msra.mxu1 %v4840_v22  ;;  %v6249_v21 = vld [vmem:[%s6801_s0 + $0x8] sm:$0x1f]  ;;  %v4928_v22 = vld [vmem:[%s6802_s1 + $0x7c0] ss:$16 sps:$4 sm:$0xff]  }
  0xf2   : > { %2876 = vmatprep.subr.bf16.mxu0 %v4846_v23  ;;  %3163 = vmatprep.subr.bf16.mxu1 %v4849_v24  ;;  %v4931_v23 = vld [vmem:[%s6802_s1 + $0x7c8] ss:$16 sps:$4 sm:$0xff]   ;;  %v4936_v24 = vld [vmem:[%s6802_s1 + $0x7e4] ss:$16 sps:$4 sm:$0xff]  }
  0xf4   : > { %2868 = vmatmul.mubr.bf16.vlgmr.msra.gmra.mrb[0].mxu0 %v6075_v26  ;;  %3155 = vmatmul.mubr.bf16.vlgmr.msra.gmra.mrb[0].mxu1 %v6075_v26 }
  0xf5   : > { %2877 = vmatpush1.bf16.msra.mxu0 %v4844_v13  ;;  %3164 = vmatpush1.bf16.msra.mxu1 %v4847_v27  ;;  %v4939_v13 = vld [vmem:[%s6802_s1 + $0x7ec] ss:$16 sps:$4 sm:$0xff]   ;;  %v6265_v27 = vrot.slane %v6249_v21, %v5591_v49 }
  0xf6   : > { %2878 = vmatprep.subr.bf16.mxu0 %v4852_v28  ;;  %3165 = vmatprep.subr.bf16.mxu1 %v4855_v29  ;;  %v4934_v28 = vld [vmem:[%s6802_s1 + $0x7e0] ss:$16 sps:$4 sm:$0xff]   ;;  %v4937_v29 = vld [vmem:[%s6802_s1 + $0x7e8] ss:$16 sps:$4 sm:$0xff]  }
  0xf7   : > { %2908 = vmatprep.mubr.bf16.mxu0 %v737_v14  ;;  %3195 = vmatprep.mubr.bf16.mxu1 %v737_v14  ;;  %v4942_v14 = vld [vmem:[%s6802_s1 + $0x804] ss:$16 sps:$4 sm:$0xff]  }
  0xf9   : > { %2879 = vmatpush1.bf16.msra.mxu0 %v4850_v30  ;;  %3166 = vmatpush1.bf16.msra.mxu1 %v4853_v31  ;;  %v4945_v30 = vld [vmem:[%s6802_s1 + $0x80c] ss:$16 sps:$4 sm:$0xff]   ;;  %v4940_v31 = vld [vmem:[%s6802_s1 + $0x800] ss:$16 sps:$4 sm:$0xff]  }
  0xfa   : > { %2880 = vmatprep.subr.bf16.mxu0 %v4858_v25  ;;  %3167 = vmatprep.subr.bf16.mxu1 %v4861_v32  ;;  %v753_v25 = vcombine.high %v6265_v27, %v6265_v27  ;;  %v4943_v32 = vld [vmem:[%s6802_s1 + $0x808] ss:$16 sps:$4 sm:$0xff]  }
  0xfd   : > { %2881 = vmatpush1.bf16.msra.mxu0 %v4856_v33  ;;  %3168 = vmatpush1.bf16.msra.mxu1 %v4859_v34  ;;  %v735_v33 = vcombine.high %v6075_v26, %v6075_v26  ;;  %v4948_v34 = vld [vmem:[%s6802_s1 + $0x824] ss:$16 sps:$4 sm:$0xff]   ;;  %v4946_v26 = vld [vmem:[%s6802_s1 + $0x820] ss:$16 sps:$4 sm:$0xff]  }
  0xfe   : > { %2882 = vmatprep.subr.bf16.mxu0 %v4864_v35  ;;  %3169 = vmatprep.subr.bf16.mxu1 %v4867_v36  ;;  %v4951_v35 = vld [vmem:[%s6802_s1 + $0x82c] ss:$16 sps:$4 sm:$0xff]   ;;  %v6296_v36 = vrot.slane %v753_v25, %v5591_v49  ;;  %v5032_v25 = vld [vmem:[%s6802_s1 + $0x9e4] ss:$16 sps:$4 sm:$0xff]  }
 0x101   : > { %2883 = vmatpush1.bf16.msra.mxu0 %v4862_v37  ;;  %3170 = vmatpush1.bf16.msra.mxu1 %v4865_v38  ;;  %v4949_v37 = vld [vmem:[%s6802_s1 + $0x828] ss:$16 sps:$4 sm:$0xff]   ;;  %v4954_v38 = vld [vmem:[%s6802_s1 + $0x844] ss:$16 sps:$4 sm:$0xff]  }
 0x102   : > { %2884 = vmatprep.subr.bf16.mxu0 %v4870_v39  ;;  %3171 = vmatprep.subr.bf16.mxu1 %v4873_v40  ;;  %v4957_v39 = vld [vmem:[%s6802_s1 + $0x84c] ss:$16 sps:$4 sm:$0xff]   ;;  %v4952_v40 = vld [vmem:[%s6802_s1 + $0x840] ss:$16 sps:$4 sm:$0xff]  }
 0x105   : > { %2885 = vmatpush1.bf16.msra.mxu0 %v4868_v41  ;;  %3172 = vmatpush1.bf16.msra.mxu1 %v4871_v43  ;;  %v4955_v41 = vld [vmem:[%s6802_s1 + $0x848] ss:$16 sps:$4 sm:$0xff]   ;;  %v4960_v43 = vld [vmem:[%s6802_s1 + $0x864] ss:$16 sps:$4 sm:$0xff]  }
 0x106   : > { %2886 = vmatprep.subr.bf16.mxu0 %v4876_v44  ;;  %3173 = vmatprep.subr.bf16.mxu1 %v4879_v45  ;;  %v4963_v44 = vld [vmem:[%s6802_s1 + $0x86c] ss:$16 sps:$4 sm:$0xff]   ;;  %v4958_v45 = vld [vmem:[%s6802_s1 + $0x860] ss:$16 sps:$4 sm:$0xff]  }
 0x109   : > { %2887 = vmatpush1.bf16.msra.mxu0 %v4874_v46  ;;  %3174 = vmatpush1.bf16.msra.mxu1 %v4877_v47  ;;  %v4961_v46 = vld [vmem:[%s6802_s1 + $0x868] ss:$16 sps:$4 sm:$0xff]   ;;  %v4966_v47 = vld [vmem:[%s6802_s1 + $0x884] ss:$16 sps:$4 sm:$0xff]  }
 0x10a   : > { %2888 = vmatprep.subr.bf16.mxu0 %v4882_v48  ;;  %3175 = vmatprep.subr.bf16.mxu1 %v4885_v50  ;;  %v4969_v48 = vld [vmem:[%s6802_s1 + $0x88c] ss:$16 sps:$4 sm:$0xff]   ;;  %v4964_v50 = vld [vmem:[%s6802_s1 + $0x880] ss:$16 sps:$4 sm:$0xff]  }
 0x10d   : > { %2889 = vmatpush1.bf16.msra.mxu0 %v4880_v51  ;;  %3176 = vmatpush1.bf16.msra.mxu1 %v4883_v53  ;;  %v4967_v51 = vld [vmem:[%s6802_s1 + $0x888] ss:$16 sps:$4 sm:$0xff]   ;;  %v4972_v53 = vld [vmem:[%s6802_s1 + $0x8a4] ss:$16 sps:$4 sm:$0xff]  }
 0x10e   : > { %2890 = vmatprep.subr.bf16.mxu0 %v4888_v54  ;;  %3177 = vmatprep.subr.bf16.mxu1 %v4891_v55  ;;  %v4975_v54 = vld [vmem:[%s6802_s1 + $0x8ac] ss:$16 sps:$4 sm:$0xff]   ;;  %v4970_v55 = vld [vmem:[%s6802_s1 + $0x8a0] ss:$16 sps:$4 sm:$0xff]  }
 0x111   : > { %2891 = vmatpush1.bf16.msra.mxu0 %v4886_v56  ;;  %3178 = vmatpush1.bf16.msra.mxu1 %v4889_v57  ;;  %v4973_v56 = vld [vmem:[%s6802_s1 + $0x8a8] ss:$16 sps:$4 sm:$0xff]   ;;  %v4978_v57 = vld [vmem:[%s6802_s1 + $0x8c4] ss:$16 sps:$4 sm:$0xff]  }
 0x112   : > { %2892 = vmatprep.subr.bf16.mxu0 %v4894_v58  ;;  %3179 = vmatprep.subr.bf16.mxu1 %v4897_v59  ;;  %v4981_v58 = vld [vmem:[%s6802_s1 + $0x8cc] ss:$16 sps:$4 sm:$0xff]   ;;  %v4976_v59 = vld [vmem:[%s6802_s1 + $0x8c0] ss:$16 sps:$4 sm:$0xff]  }
 0x115   : > { %2893 = vmatpush1.bf16.msra.mxu0 %v4892_v60  ;;  %3180 = vmatpush1.bf16.msra.mxu1 %v4895_v61  ;;  %v4979_v60 = vld [vmem:[%s6802_s1 + $0x8c8] ss:$16 sps:$4 sm:$0xff]   ;;  %v4984_v61 = vld [vmem:[%s6802_s1 + $0x8e4] ss:$16 sps:$4 sm:$0xff]  }
 0x116   : > { %2894 = vmatprep.subr.bf16.mxu0 %v4900_v62  ;;  %3181 = vmatprep.subr.bf16.mxu1 %v4903_v63  ;;  %v4987_v62 = vld [vmem:[%s6802_s1 + $0x8ec] ss:$16 sps:$4 sm:$0xff]   ;;  %v4982_v63 = vld [vmem:[%s6802_s1 + $0x8e0] ss:$16 sps:$4 sm:$0xff]  }
 0x119   : > { %2895 = vmatpush1.bf16.msra.mxu0 %v4898_v0  ;;  %3182 = vmatpush1.bf16.msra.mxu1 %v4901_v1  ;;  %v4985_v0 = vld [vmem:[%s6802_s1 + $0x8e8] ss:$16 sps:$4 sm:$0xff]   ;;  %v4990_v1 = vld [vmem:[%s6802_s1 + $0x904] ss:$16 sps:$4 sm:$0xff]  }
 0x11a   : > { %2896 = vmatprep.subr.bf16.mxu0 %v4906_v2  ;;  %3183 = vmatprep.subr.bf16.mxu1 %v4909_v3  ;;  %v4993_v2 = vld [vmem:[%s6802_s1 + $0x90c] ss:$16 sps:$4 sm:$0xff]   ;;  %v4988_v3 = vld [vmem:[%s6802_s1 + $0x900] ss:$16 sps:$4 sm:$0xff]  }
 0x11d   : > { %2897 = vmatpush1.bf16.msra.mxu0 %v4904_v4  ;;  %3184 = vmatpush1.bf16.msra.mxu1 %v4907_v5  ;;  %v4991_v4 = vld [vmem:[%s6802_s1 + $0x908] ss:$16 sps:$4 sm:$0xff]   ;;  %v4996_v5 = vld [vmem:[%s6802_s1 + $0x924] ss:$16 sps:$4 sm:$0xff]  }
 0x11e   : > { %2898 = vmatprep.subr.bf16.mxu0 %v4912_v6  ;;  %3185 = vmatprep.subr.bf16.mxu1 %v4915_v7  ;;  %v4999_v6 = vld [vmem:[%s6802_s1 + $0x92c] ss:$16 sps:$4 sm:$0xff]   ;;  %v4994_v7 = vld [vmem:[%s6802_s1 + $0x920] ss:$16 sps:$4 sm:$0xff]  }
 0x121   : > { %2899 = vmatpush1.bf16.msra.mxu0 %v4910_v8  ;;  %3186 = vmatpush1.bf16.msra.mxu1 %v4913_v9  ;;  %v4997_v8 = vld [vmem:[%s6802_s1 + $0x928] ss:$16 sps:$4 sm:$0xff]   ;;  %v5002_v9 = vld [vmem:[%s6802_s1 + $0x944] ss:$16 sps:$4 sm:$0xff]  }
 0x122   : > { %2900 = vmatprep.subr.bf16.mxu0 %v4918_v10  ;;  %3187 = vmatprep.subr.bf16.mxu1 %v4921_v11  ;;  %v5005_v10 = vld [vmem:[%s6802_s1 + $0x94c] ss:$16 sps:$4 sm:$0xff]   ;;  %v5000_v11 = vld [vmem:[%s6802_s1 + $0x940] ss:$16 sps:$4 sm:$0xff]  }
 0x125   : > { %2901 = vmatpush1.bf16.msra.mxu0 %v4916_v12  ;;  %3188 = vmatpush1.bf16.msra.mxu1 %v4919_v52  ;;  %v5003_v12 = vld [vmem:[%s6802_s1 + $0x948] ss:$16 sps:$4 sm:$0xff]   ;;  %v5008_v52 = vld [vmem:[%s6802_s1 + $0x964] ss:$16 sps:$4 sm:$0xff]  }
 0x126   : > { %2902 = vmatprep.subr.bf16.mxu0 %v4924_v15  ;;  %3189 = vmatprep.subr.bf16.mxu1 %v4927_v16  ;;  %v5011_v15 = vld [vmem:[%s6802_s1 + $0x96c] ss:$16 sps:$4 sm:$0xff]   ;;  %v5006_v16 = vld [vmem:[%s6802_s1 + $0x960] ss:$16 sps:$4 sm:$0xff]  }
 0x129   : > { %2903 = vmatpush1.bf16.msra.mxu0 %v4922_v17  ;;  %3190 = vmatpush1.bf16.msra.mxu1 %v4925_v18  ;;  %v5009_v17 = vld [vmem:[%s6802_s1 + $0x968] ss:$16 sps:$4 sm:$0xff]   ;;  %v5014_v18 = vld [vmem:[%s6802_s1 + $0x984] ss:$16 sps:$4 sm:$0xff]  }
 0x12a   : > { %2904 = vmatprep.subr.bf16.mxu0 %v4930_v19  ;;  %3191 = vmatprep.subr.bf16.mxu1 %v4933_v20  ;;  %v5017_v19 = vld [vmem:[%s6802_s1 + $0x98c] ss:$16 sps:$4 sm:$0xff]   ;;  %v5012_v20 = vld [vmem:[%s6802_s1 + $0x980] ss:$16 sps:$4 sm:$0xff]  }
 0x12d   : > { %2905 = vmatpush1.bf16.msra.mxu0 %v4928_v22  ;;  %3192 = vmatpush1.bf16.msra.mxu1 %v4931_v23  ;;  %v5015_v22 = vld [vmem:[%s6802_s1 + $0x988] ss:$16 sps:$4 sm:$0xff]   ;;  %v5020_v23 = vld [vmem:[%s6802_s1 + $0x9a4] ss:$16 sps:$4 sm:$0xff]  }
 0x12e   : > { %2906 = vmatprep.subr.bf16.mxu0 %v4936_v24  ;;  %3193 = vmatprep.subr.bf16.mxu1 %v4939_v13  ;;  %v5023_v24 = vld [vmem:[%s6802_s1 + $0x9ac] ss:$16 sps:$4 sm:$0xff]   ;;  %v5018_v13 = vld [vmem:[%s6802_s1 + $0x9a0] ss:$16 sps:$4 sm:$0xff]  }
 0x131   : > { %2907 = vmatpush1.bf16.msra.mxu0 %v4934_v28  ;;  %3194 = vmatpush1.bf16.msra.mxu1 %v4937_v29  ;;  %v5021_v28 = vld [vmem:[%s6802_s1 + $0x9a8] ss:$16 sps:$4 sm:$0xff]   ;;  %v5026_v29 = vld [vmem:[%s6802_s1 + $0x9c4] ss:$16 sps:$4 sm:$0xff]  }
 0x132   : > { %2917 = vmatprep.subr.bf16.mxu0 %v4942_v14  ;;  %3204 = vmatprep.subr.bf16.mxu1 %v4945_v30  ;;  %v5029_v14 = vld [vmem:[%s6802_s1 + $0x9cc] ss:$16 sps:$4 sm:$0xff]   ;;  %v5024_v30 = vld [vmem:[%s6802_s1 + $0x9c0] ss:$16 sps:$4 sm:$0xff]  }
 0x134   : > { %2909 = vmatmul.mubr.bf16.vlgmr.msra.gmra.mrb[0].mxu0 %v735_v33  ;;  %3196 = vmatmul.mubr.bf16.vlgmr.msra.gmra.mrb[0].mxu1 %v735_v33  ;;  %v5030_v33 = vld [vmem:[%s6802_s1 + $0x9e0] ss:$16 sps:$4 sm:$0xff]  }
 0x135   : > { %2918 = vmatpush1.bf16.msra.mxu0 %v4940_v31  ;;  %3205 = vmatpush1.bf16.msra.mxu1 %v4943_v32  ;;  %v5027_v31 = vld [vmem:[%s6802_s1 + $0x9c8] ss:$16 sps:$4 sm:$0xff]   ;;  %v5035_v32 = vld [vmem:[%s6802_s1 + $0x9ec] ss:$16 sps:$4 sm:$0xff]  }
 0x136   : > { %2919 = vmatprep.subr.bf16.mxu0 %v4948_v34  ;;  %3206 = vmatprep.subr.bf16.mxu1 %v4951_v35  ;;  %v5033_v34 = vld [vmem:[%s6802_s1 + $0x9e8] ss:$16 sps:$4 sm:$0xff]   ;;  %v5039_v35 = vld [vmem:[%s6802_s1 + $0xa04] ss:$16 sps:$4 sm:$0xff]  }
 0x137   : > { %2949 = vmatprep.mubr.bf16.mxu0 %v6296_v36  ;;  %3236 = vmatprep.mubr.bf16.mxu1 %v6296_v36 }
 0x139   : > { %2920 = vmatpush1.bf16.msra.mxu0 %v4946_v26  ;;  %3207 = vmatpush1.bf16.msra.mxu1 %v4949_v37  ;;  %v5042_v26 = vld [vmem:[%s6802_s1 + $0xa0c] ss:$16 sps:$4 sm:$0xff]   ;;  %v6482_v37 = vrot.slane %v6265_v27, %v5591_v49 }
 0x13a   : > { %2921 = vmatprep.subr.bf16.mxu0 %v4954_v38  ;;  %3208 = vmatprep.subr.bf16.mxu1 %v4957_v39  ;;  %v5037_v38 = vld [vmem:[%s6802_s1 + $0xa00] ss:$16 sps:$4 sm:$0xff]   ;;  %v5040_v39 = vld [vmem:[%s6802_s1 + $0xa08] ss:$16 sps:$4 sm:$0xff]   ;;  %v5048_v27 = vld [vmem:[%s6802_s1 + $0xa2c] ss:$16 sps:$4 sm:$0xff]  }
 0x13d   : > { %2922 = vmatpush1.bf16.msra.mxu0 %v4952_v40  ;;  %3209 = vmatpush1.bf16.msra.mxu1 %v4955_v41  ;;  %v5045_v40 = vld [vmem:[%s6802_s1 + $0xa24] ss:$16 sps:$4 sm:$0xff]   ;;  %v776_v41 = vcombine.high %v6296_v36, %v6296_v36 }
 0x13e   : > { %2923 = vmatprep.subr.bf16.mxu0 %v4960_v43  ;;  %3210 = vmatprep.subr.bf16.mxu1 %v4963_v44  ;;  %v5043_v43 = vld [vmem:[%s6802_s1 + $0xa20] ss:$16 sps:$4 sm:$0xff]   ;;  %v5046_v44 = vld [vmem:[%s6802_s1 + $0xa28] ss:$16 sps:$4 sm:$0xff]   ;;  %v5051_v36 = vld [vmem:[%s6802_s1 + $0xa44] ss:$16 sps:$4 sm:$0xff]  }
 0x141   : > { %2924 = vmatpush1.bf16.msra.mxu0 %v4958_v45  ;;  %3211 = vmatpush1.bf16.msra.mxu1 %v4961_v46  ;;  %v5054_v45 = vld [vmem:[%s6802_s1 + $0xa4c] ss:$16 sps:$4 sm:$0xff]   ;;  %v5049_v46 = vld [vmem:[%s6802_s1 + $0xa40] ss:$16 sps:$4 sm:$0xff]  }
 0x142   : > { %2925 = vmatprep.subr.bf16.mxu0 %v4966_v47  ;;  %3212 = vmatprep.subr.bf16.mxu1 %v4969_v48  ;;  %v5052_v47 = vld [vmem:[%s6802_s1 + $0xa48] ss:$16 sps:$4 sm:$0xff]   ;;  %v5057_v48 = vld [vmem:[%s6802_s1 + $0xa64] ss:$16 sps:$4 sm:$0xff]  }
 0x145   : > { %2926 = vmatpush1.bf16.msra.mxu0 %v4964_v50  ;;  %3213 = vmatpush1.bf16.msra.mxu1 %v4967_v51  ;;  %v5060_v50 = vld [vmem:[%s6802_s1 + $0xa6c] ss:$16 sps:$4 sm:$0xff]   ;;  %v5055_v51 = vld [vmem:[%s6802_s1 + $0xa60] ss:$16 sps:$4 sm:$0xff]  }
 0x146   : > { %2927 = vmatprep.subr.bf16.mxu0 %v4972_v53  ;;  %3214 = vmatprep.subr.bf16.mxu1 %v4975_v54  ;;  %v5058_v53 = vld [vmem:[%s6802_s1 + $0xa68] ss:$16 sps:$4 sm:$0xff]   ;;  %v5063_v54 = vld [vmem:[%s6802_s1 + $0xa84] ss:$16 sps:$4 sm:$0xff]  }
 0x149   : > { %2928 = vmatpush1.bf16.msra.mxu0 %v4970_v55  ;;  %3215 = vmatpush1.bf16.msra.mxu1 %v4973_v56  ;;  %v5066_v55 = vld [vmem:[%s6802_s1 + $0xa8c] ss:$16 sps:$4 sm:$0xff]   ;;  %v5061_v56 = vld [vmem:[%s6802_s1 + $0xa80] ss:$16 sps:$4 sm:$0xff]  }
 0x14a   : > { %2929 = vmatprep.subr.bf16.mxu0 %v4978_v57  ;;  %3216 = vmatprep.subr.bf16.mxu1 %v4981_v58  ;;  %v5064_v57 = vld [vmem:[%s6802_s1 + $0xa88] ss:$16 sps:$4 sm:$0xff]   ;;  %v5069_v58 = vld [vmem:[%s6802_s1 + $0xaa4] ss:$16 sps:$4 sm:$0xff]  }
 0x14d   : > { %2930 = vmatpush1.bf16.msra.mxu0 %v4976_v59  ;;  %3217 = vmatpush1.bf16.msra.mxu1 %v4979_v60  ;;  %v5072_v59 = vld [vmem:[%s6802_s1 + $0xaac] ss:$16 sps:$4 sm:$0xff]   ;;  %v5067_v60 = vld [vmem:[%s6802_s1 + $0xaa0] ss:$16 sps:$4 sm:$0xff]  }
 0x14e   : > { %2931 = vmatprep.subr.bf16.mxu0 %v4984_v61  ;;  %3218 = vmatprep.subr.bf16.mxu1 %v4987_v62  ;;  %v5070_v61 = vld [vmem:[%s6802_s1 + $0xaa8] ss:$16 sps:$4 sm:$0xff]   ;;  %v5075_v62 = vld [vmem:[%s6802_s1 + $0xac4] ss:$16 sps:$4 sm:$0xff]  }
 0x151   : > { %2932 = vmatpush1.bf16.msra.mxu0 %v4982_v63  ;;  %3219 = vmatpush1.bf16.msra.mxu1 %v4985_v0  ;;  %v5078_v63 = vld [vmem:[%s6802_s1 + $0xacc] ss:$16 sps:$4 sm:$0xff]   ;;  %v5073_v0 = vld [vmem:[%s6802_s1 + $0xac0] ss:$16 sps:$4 sm:$0xff]  }
 0x152   : > { %2933 = vmatprep.subr.bf16.mxu0 %v4990_v1  ;;  %3220 = vmatprep.subr.bf16.mxu1 %v4993_v2  ;;  %v5076_v1 = vld [vmem:[%s6802_s1 + $0xac8] ss:$16 sps:$4 sm:$0xff]   ;;  %v5081_v2 = vld [vmem:[%s6802_s1 + $0xae4] ss:$16 sps:$4 sm:$0xff]  }
 0x155   : > { %2934 = vmatpush1.bf16.msra.mxu0 %v4988_v3  ;;  %3221 = vmatpush1.bf16.msra.mxu1 %v4991_v4  ;;  %v5084_v3 = vld [vmem:[%s6802_s1 + $0xaec] ss:$16 sps:$4 sm:$0xff]   ;;  %v5079_v4 = vld [vmem:[%s6802_s1 + $0xae0] ss:$16 sps:$4 sm:$0xff]  }
 0x156   : > { %2935 = vmatprep.subr.bf16.mxu0 %v4996_v5  ;;  %3222 = vmatprep.subr.bf16.mxu1 %v4999_v6  ;;  %v5082_v5 = vld [vmem:[%s6802_s1 + $0xae8] ss:$16 sps:$4 sm:$0xff]   ;;  %v5087_v6 = vld [vmem:[%s6802_s1 + $0xb04] ss:$16 sps:$4 sm:$0xff]  }
 0x159   : > { %2936 = vmatpush1.bf16.msra.mxu0 %v4994_v7  ;;  %3223 = vmatpush1.bf16.msra.mxu1 %v4997_v8  ;;  %v5090_v7 = vld [vmem:[%s6802_s1 + $0xb0c] ss:$16 sps:$4 sm:$0xff]   ;;  %v5085_v8 = vld [vmem:[%s6802_s1 + $0xb00] ss:$16 sps:$4 sm:$0xff]  }
 0x15a   : > { %2937 = vmatprep.subr.bf16.mxu0 %v5002_v9  ;;  %3224 = vmatprep.subr.bf16.mxu1 %v5005_v10  ;;  %v5088_v9 = vld [vmem:[%s6802_s1 + $0xb08] ss:$16 sps:$4 sm:$0xff]   ;;  %v5093_v10 = vld [vmem:[%s6802_s1 + $0xb24] ss:$16 sps:$4 sm:$0xff]  }
 0x15d   : > { %2938 = vmatpush1.bf16.msra.mxu0 %v5000_v11  ;;  %3225 = vmatpush1.bf16.msra.mxu1 %v5003_v12  ;;  %v5096_v11 = vld [vmem:[%s6802_s1 + $0xb2c] ss:$16 sps:$4 sm:$0xff]   ;;  %v5091_v12 = vld [vmem:[%s6802_s1 + $0xb20] ss:$16 sps:$4 sm:$0xff]  }
 0x15e   : > { %2939 = vmatprep.subr.bf16.mxu0 %v5008_v52  ;;  %3226 = vmatprep.subr.bf16.mxu1 %v5011_v15  ;;  %v5094_v52 = vld [vmem:[%s6802_s1 + $0xb28] ss:$16 sps:$4 sm:$0xff]   ;;  %v5099_v15 = vld [vmem:[%s6802_s1 + $0xb44] ss:$16 sps:$4 sm:$0xff]  }
 0x161   : > { %2940 = vmatpush1.bf16.msra.mxu0 %v5006_v16  ;;  %3227 = vmatpush1.bf16.msra.mxu1 %v5009_v17  ;;  %v5102_v16 = vld [vmem:[%s6802_s1 + $0xb4c] ss:$16 sps:$4 sm:$0xff]   ;;  %v5097_v17 = vld [vmem:[%s6802_s1 + $0xb40] ss:$16 sps:$4 sm:$0xff]  }
 0x162   : > { %2941 = vmatprep.subr.bf16.mxu0 %v5014_v18  ;;  %3228 = vmatprep.subr.bf16.mxu1 %v5017_v19  ;;  %v5100_v18 = vld [vmem:[%s6802_s1 + $0xb48] ss:$16 sps:$4 sm:$0xff]   ;;  %v5105_v19 = vld [vmem:[%s6802_s1 + $0xb64] ss:$16 sps:$4 sm:$0xff]  }
 0x165   : > { %2942 = vmatpush1.bf16.msra.mxu0 %v5012_v20  ;;  %3229 = vmatpush1.bf16.msra.mxu1 %v5015_v22  ;;  %v5108_v20 = vld [vmem:[%s6802_s1 + $0xb6c] ss:$16 sps:$4 sm:$0xff]   ;;  %v5103_v22 = vld [vmem:[%s6802_s1 + $0xb60] ss:$16 sps:$4 sm:$0xff]  }
 0x166   : > { %2943 = vmatprep.subr.bf16.mxu0 %v5020_v23  ;;  %3230 = vmatprep.subr.bf16.mxu1 %v5023_v24  ;;  %v5106_v23 = vld [vmem:[%s6802_s1 + $0xb68] ss:$16 sps:$4 sm:$0xff]   ;;  %v5111_v24 = vld [vmem:[%s6802_s1 + $0xb84] ss:$16 sps:$4 sm:$0xff]  }
 0x169   : > { %2944 = vmatpush1.bf16.msra.mxu0 %v5018_v13  ;;  %3231 = vmatpush1.bf16.msra.mxu1 %v5021_v28  ;;  %v5114_v13 = vld [vmem:[%s6802_s1 + $0xb8c] ss:$16 sps:$4 sm:$0xff]   ;;  %v5109_v28 = vld [vmem:[%s6802_s1 + $0xb80] ss:$16 sps:$4 sm:$0xff]  }
 0x16a   : > { %2945 = vmatprep.subr.bf16.mxu0 %v5026_v29  ;;  %3232 = vmatprep.subr.bf16.mxu1 %v5029_v14  ;;  %v5112_v29 = vld [vmem:[%s6802_s1 + $0xb88] ss:$16 sps:$4 sm:$0xff]   ;;  %v5117_v14 = vld [vmem:[%s6802_s1 + $0xba4] ss:$16 sps:$4 sm:$0xff]  }
 0x16d   : > { %2946 = vmatpush1.bf16.msra.mxu0 %v5024_v30  ;;  %3233 = vmatpush1.bf16.msra.mxu1 %v5027_v31  ;;  %v5120_v30 = vld [vmem:[%s6802_s1 + $0xbac] ss:$16 sps:$4 sm:$0xff]   ;;  %v5115_v31 = vld [vmem:[%s6802_s1 + $0xba0] ss:$16 sps:$4 sm:$0xff]  }
 0x16e   : > { %2947 = vmatprep.subr.bf16.mxu0 %v5032_v25  ;;  %3234 = vmatprep.subr.bf16.mxu1 %v5035_v32  ;;  %v5118_v25 = vld [vmem:[%s6802_s1 + $0xba8] ss:$16 sps:$4 sm:$0xff]   ;;  %v5123_v32 = vld [vmem:[%s6802_s1 + $0xbc4] ss:$16 sps:$4 sm:$0xff]  }
 0x171   : > { %2948 = vmatpush1.bf16.msra.mxu0 %v5030_v33  ;;  %3235 = vmatpush1.bf16.msra.mxu1 %v5033_v34  ;;  %v5126_v33 = vld [vmem:[%s6802_s1 + $0xbcc] ss:$16 sps:$4 sm:$0xff]   ;;  %v5121_v34 = vld [vmem:[%s6802_s1 + $0xbc0] ss:$16 sps:$4 sm:$0xff]  }
 0x172   : > { %2958 = vmatprep.subr.bf16.mxu0 %v5039_v35  ;;  %3245 = vmatprep.subr.bf16.mxu1 %v5042_v26  ;;  %v5124_v35 = vld [vmem:[%s6802_s1 + $0xbc8] ss:$16 sps:$4 sm:$0xff]   ;;  %v5129_v26 = vld [vmem:[%s6802_s1 + $0xbe4] ss:$16 sps:$4 sm:$0xff]  }
 0x174   : > { %2950 = vmatmul.mubr.bf16.vlgmr.msra.gmra.mrb[0].mxu0 %v6482_v37  ;;  %3237 = vmatmul.mubr.bf16.vlgmr.msra.gmra.mrb[0].mxu1 %v6482_v37 }
 0x175   : > { %2959 = vmatpush1.bf16.msra.mxu0 %v5037_v38  ;;  %3246 = vmatpush1.bf16.msra.mxu1 %v5040_v39  ;;  %v5132_v38 = vld [vmem:[%s6802_s1 + $0xbec] ss:$16 sps:$4 sm:$0xff]   ;;  %v5127_v39 = vld [vmem:[%s6802_s1 + $0xbe0] ss:$16 sps:$4 sm:$0xff]  }
 0x176   : > { %2960 = vmatprep.subr.bf16.mxu0 %v5045_v40  ;;  %3247 = vmatprep.subr.bf16.mxu1 %v5048_v27  ;;  %v5130_v40 = vld [vmem:[%s6802_s1 + $0xbe8] ss:$16 sps:$4 sm:$0xff]   ;;  %v5135_v27 = vld [vmem:[%s6802_s1 + $0xc04] ss:$16 sps:$4 sm:$0xff]  }
 0x177   : > { %2990 = vmatprep.mubr.bf16.mxu0 %v776_v41  ;;  %3277 = vmatprep.mubr.bf16.mxu1 %v776_v41  ;;  %v5138_v41 = vld [vmem:[%s6802_s1 + $0xc0c] ss:$16 sps:$4 sm:$0xff]  }
 0x179   : > { %2961 = vmatpush1.bf16.msra.mxu0 %v5043_v43  ;;  %3248 = vmatpush1.bf16.msra.mxu1 %v5046_v44  ;;  %v775_v43 = vcombine.high %v6482_v37, %v6482_v37  ;;  %v5133_v44 = vld [vmem:[%s6802_s1 + $0xc00] ss:$16 sps:$4 sm:$0xff]   ;;  %v5144_v37 = vld [vmem:[%s6802_s1 + $0xc2c] ss:$16 sps:$4 sm:$0xff]  }
 0x17a   : > { %2962 = vmatprep.subr.bf16.mxu0 %v5051_v36  ;;  %3249 = vmatprep.subr.bf16.mxu1 %v5054_v45  ;;  %v5136_v36 = vld [vmem:[%s6802_s1 + $0xc08] ss:$16 sps:$4 sm:$0xff]   ;;  %v5141_v45 = vld [vmem:[%s6802_s1 + $0xc24] ss:$16 sps:$4 sm:$0xff]  }
 0x17d   : > { %2963 = vmatpush1.bf16.msra.mxu0 %v5049_v46  ;;  %3250 = vmatpush1.bf16.msra.mxu1 %v5052_v47  ;;  %v738_v46 = vcombine.high %v6249_v21, %v6249_v21  ;;  %v5139_v47 = vld [vmem:[%s6802_s1 + $0xc20] ss:$16 sps:$4 sm:$0xff]  }
 0x17e   : > { %2964 = vmatprep.subr.bf16.mxu0 %v5057_v48  ;;  %3251 = vmatprep.subr.bf16.mxu1 %v5060_v50  ;;  %v5142_v48 = vld [vmem:[%s6802_s1 + $0xc28] ss:$16 sps:$4 sm:$0xff]   ;;  %v5320_v50 = vmov 0  }
 0x181   : > { %2965 = vmatpush1.bf16.msra.mxu0 %v5055_v51  ;;  %3252 = vmatpush1.bf16.msra.mxu1 %v5058_v53  ;;  %v752_v51 = vrot.slane %v738_v46, %v5591_v49  ;;  %v669_v53 = vsub.s32 0, %v5573_v42 }
 0x182   : > { %2966 = vmatprep.subr.bf16.mxu0 %v5063_v54  ;;  %3253 = vmatprep.subr.bf16.mxu1 %v5066_v55  ;;  %v677_v54 = vsub.s32 2, %v5573_v42  ;;  %v665_v55 = vld [vmem:[%s6803_s2] sm:$0xf] }
 0x183   : > { %v767_v21 = vrot.slane %v752_v51, %v5591_v49 }
 0x185   : > { %2967 = vmatpush1.bf16.msra.mxu0 %v5061_v56  ;;  %3254 = vmatpush1.bf16.msra.mxu1 %v5064_v57  ;;  %v673_v56 = vsub.s32 1, %v5573_v42  ;;  %v681_v57 = vsub.s32 3, %v5573_v42 }
 0x186   : > { %2968 = vmatprep.subr.bf16.mxu0 %v5069_v58  ;;  %3255 = vmatprep.subr.bf16.mxu1 %v5072_v59  ;;  %v670_v58 = vrot.slane %v665_v55, %v669_v53  ;;  %v678_v59 = vrot.slane %v665_v55, %v677_v54 }
 0x189   : > { %2969 = vmatpush1.bf16.msra.mxu0 %v5067_v60  ;;  %3256 = vmatpush1.bf16.msra.mxu1 %v5070_v61  ;;  %v674_v60 = vrot.slane %v665_v55, %v673_v56  ;;  %v682_v61 = vrot.slane %v665_v55, %v681_v57 }
 0x18a   : > { %2970 = vmatprep.subr.bf16.mxu0 %v5075_v62  ;;  %3257 = vmatprep.subr.bf16.mxu1 %v5078_v63 }
 0x18d   : > { %2971 = vmatpush1.bf16.msra.mxu0 %v5073_v0  ;;  %3258 = vmatpush1.bf16.msra.mxu1 %v5076_v1 }
 0x18e   : > { %2972 = vmatprep.subr.bf16.mxu0 %v5081_v2  ;;  %3259 = vmatprep.subr.bf16.mxu1 %v5084_v3 }
 0x191   : > { %2973 = vmatpush1.bf16.msra.mxu0 %v5079_v4  ;;  %3260 = vmatpush1.bf16.msra.mxu1 %v5082_v5 }
 0x192   : > { %2974 = vmatprep.subr.bf16.mxu0 %v5087_v6  ;;  %3261 = vmatprep.subr.bf16.mxu1 %v5090_v7 }
 0x195   : > { %2975 = vmatpush1.bf16.msra.mxu0 %v5085_v8  ;;  %3262 = vmatpush1.bf16.msra.mxu1 %v5088_v9 }
 0x196   : > { %2976 = vmatprep.subr.bf16.mxu0 %v5093_v10  ;;  %3263 = vmatprep.subr.bf16.mxu1 %v5096_v11 }
 0x199   : > { %2977 = vmatpush1.bf16.msra.mxu0 %v5091_v12  ;;  %3264 = vmatpush1.bf16.msra.mxu1 %v5094_v52 }
 0x19a   : > { %2978 = vmatprep.subr.bf16.mxu0 %v5099_v15  ;;  %3265 = vmatprep.subr.bf16.mxu1 %v5102_v16 }
 0x19d   : > { %2979 = vmatpush1.bf16.msra.mxu0 %v5097_v17  ;;  %3266 = vmatpush1.bf16.msra.mxu1 %v5100_v18 }
 0x19e   : > { %2980 = vmatprep.subr.bf16.mxu0 %v5105_v19  ;;  %3267 = vmatprep.subr.bf16.mxu1 %v5108_v20 }
 0x1a1   : > { %2981 = vmatpush1.bf16.msra.mxu0 %v5103_v22  ;;  %3268 = vmatpush1.bf16.msra.mxu1 %v5106_v23 }
 0x1a2   : > { %2982 = vmatprep.subr.bf16.mxu0 %v5111_v24  ;;  %3269 = vmatprep.subr.bf16.mxu1 %v5114_v13 }
 0x1a5   : > { %2983 = vmatpush1.bf16.msra.mxu0 %v5109_v28  ;;  %3270 = vmatpush1.bf16.msra.mxu1 %v5112_v29 }
 0x1a6   : > { %2984 = vmatprep.subr.bf16.mxu0 %v5117_v14  ;;  %3271 = vmatprep.subr.bf16.mxu1 %v5120_v30 }
 0x1a9   : > { %2985 = vmatpush1.bf16.msra.mxu0 %v5115_v31  ;;  %3272 = vmatpush1.bf16.msra.mxu1 %v5118_v25 }
 0x1aa   : > { %2986 = vmatprep.subr.bf16.mxu0 %v5123_v32  ;;  %3273 = vmatprep.subr.bf16.mxu1 %v5126_v33 }
 0x1ad   : > { %2987 = vmatpush1.bf16.msra.mxu0 %v5121_v34  ;;  %3274 = vmatpush1.bf16.msra.mxu1 %v5124_v35 }
 0x1ae   : > { %2988 = vmatprep.subr.bf16.mxu0 %v5129_v26  ;;  %3275 = vmatprep.subr.bf16.mxu1 %v5132_v38 }
 0x1b1   : > { %2989 = vmatpush1.bf16.msra.mxu0 %v5127_v39  ;;  %3276 = vmatpush1.bf16.msra.mxu1 %v5130_v40 }
 0x1b2   : > { %2999 = vmatprep.subr.bf16.mxu0 %v5135_v27  ;;  %3286 = vmatprep.subr.bf16.mxu1 %v5138_v41 }
 0x1b4   : > { %2991 = vmatmul.mubr.bf16.vlgmr.msra.gmra.mrb[0].mxu0 %v775_v43  ;;  %3278 = vmatmul.mubr.bf16.vlgmr.msra.gmra.mrb[0].mxu1 %v775_v43 }
 0x1b5   : > { %3000 = vmatpush1.bf16.msra.mxu0 %v5133_v44  ;;  %3287 = vmatpush1.bf16.msra.mxu1 %v5136_v36 }
 0x1b6   : > { %3001 = vmatprep.subr.bf16.mxu0 %v5141_v45  ;;  %3288 = vmatprep.subr.bf16.mxu1 %v5144_v37 }
 0x1b7   : > { %3031 = vmatprep.mubr.bf16.mxu0 %v5320_v50  ;;  %3318 = vmatprep.mubr.bf16.mxu1 %v5320_v50 }
 0x1b9   : > { %3002 = vmatpush1.bf16.msra.mxu0 %v5139_v47  ;;  %3289 = vmatpush1.bf16.msra.mxu1 %v5142_v48 }
 0x1c0   : > { %4378 = vmatmul.mubr.msk.bf16.vlgmr.msra.gmra.mrb[0].mxu0 %vm2749_vm0, %v767_v21  ;;  %4379 = vmatmul.mubr.msk.bf16.vlgmr.msra.gmra.mrb[0].mxu1 %vm2749_vm0, %v767_v21 }
 0x293   : > { %v3033_v62 = vpop.f32.mrb[0].mxu0  ;;  %v3320_v63 = vpop.f32.mrb[0].mxu1 }
 0x294   : > { %v4454_v0 = vadd.f32 %v3033_v62, %v670_v58  ;;  %v4456_v1 = vadd.f32 %v3320_v63, %v678_v59  ;;  %v3035_v2 = vpop.f32.mrb[1].mxu0  ;;  %v3322_v3 = vpop.f32.mrb[1].mxu1 }
 0x295   : > { %v4455_v4 = vadd.f32 %v3035_v2, %v674_v60  ;;  %v4457_v5 = vadd.f32 %v3322_v3, %v682_v61  ;;  %v3037_v6 = vpop.f32.mrb[2].mxu0  ;;  %v3324_v7 = vpop.f32.mrb[2].mxu1 }
 0x296   : > { %v3327_v8 = vmax.f32 %v4454_v0, 0.0  ;;  %v3329_v9 = vmax.f32 %v4456_v1, 0.0  ;;  %v3038_v10 = vpop.f32.mrb[3].mxu0  ;;  %v3325_v11 = vpop.f32.mrb[3].mxu1 }
 0x297   : > { %v3328_v12 = vmax.f32 %v4455_v4, 0.0  ;;  %v3330_v42 = vmax.f32 %v4457_v5, 0.0 }
 0x299   : > { %v4380_v52 = vpack.c.bf16 %v3328_v12, %v3327_v8  ;;  %v4381_v15 = vpack.c.bf16 %v3330_v42, %v3329_v9 }
 0x29b   : > { %v3347_v16 = vrot.slane %v4380_v52, %v5591_v49  ;;  %v3354_v17 = vrot.slane %v4381_v15, %v5591_v49 }
 0x29d   : > { %v3355_v18 = vcombine.low %v3347_v16, %v3354_v17 }
 0x29f   : > { %4382 = vst.sshfl [vmem:[#allocation2] sm:$0x55 pattern:$0x73625140] %v3355_v18 }
 0x2a0 PF: > { %v5145_v19 = vld [vmem:[%s5436_s15 + $0x4] ss:$8 sps:$4 sm:$0xff]   ;;  %v5149_v22 = vld [vmem:[%s5436_s15] ss:$8 sps:$4 sm:$0xff]   ;;  %v5151_v23 = vld [vmem:[%s5436_s15 + $0x14] ss:$8 sps:$4 sm:$0xff]   ;;  %v3432_v57 = vlaneseq }
 0x2a1   : > { %v5147_v20 = vld [vmem:[%s5436_s15 + $0x104] ss:$8 sps:$4 sm:$0xff]   ;;  %3791 = vmatprep.subr.bf16.mxu1 %v5145_v19  ;;  %v5150_v49 = vld [vmem:[%s5436_s15 + $0x100] ss:$8 sps:$4 sm:$0xff]   ;;  %v5153_v24 = vld [vmem:[%s5436_s15 + $0x114] ss:$8 sps:$4 sm:$0xff]  }
 0x2a2   : > { %3832 = vmatprep.subr.bf16.mxu0 %v5147_v20  ;;  %3792 = vmatpush1.bf16.msra.mxu1 %v5149_v22  ;;  %v5155_v13 = vld [vmem:[%s5436_s15 + $0x10] ss:$8 sps:$4 sm:$0xff]   ;;  %v5157_v29 = vld [vmem:[%s5436_s15 + $0x24] ss:$8 sps:$4 sm:$0xff]   ;;  %v5161_v30 = vld [vmem:[%s5436_s15 + $0x20] ss:$8 sps:$4 sm:$0xff]  }
 0x2a3   : > { %3833 = vmatpush1.bf16.msra.mxu0 %v5150_v49  ;;  %3793 = vmatprep.subr.bf16.mxu1 %v5151_v23  ;;  %v5156_v28 = vld [vmem:[%s5436_s15 + $0x110] ss:$8 sps:$4 sm:$0xff]   ;;  %v5159_v14 = vld [vmem:[%s5436_s15 + $0x124] ss:$8 sps:$4 sm:$0xff]   ;;  %v5162_v31 = vld [vmem:[%s5436_s15 + $0x120] ss:$8 sps:$4 sm:$0xff]  }
 0x2a4   : > { %3834 = vmatprep.subr.bf16.mxu0 %v5153_v24  ;;  %v5163_v25 = vld [vmem:[%s5436_s15 + $0x34] ss:$8 sps:$4 sm:$0xff]   ;;  %v5167_v33 = vld [vmem:[%s5436_s15 + $0x30] ss:$8 sps:$4 sm:$0xff]   ;;  %v5169_v35 = vld [vmem:[%s5436_s15 + $0x44] ss:$8 sps:$4 sm:$0xff]  }
 0x2a5   : > { %v5165_v32 = vld [vmem:[%s5436_s15 + $0x134] ss:$8 sps:$4 sm:$0xff]   ;;  %v5168_v34 = vld [vmem:[%s5436_s15 + $0x130] ss:$8 sps:$4 sm:$0xff]   ;;  %v5171_v26 = vld [vmem:[%s5436_s15 + $0x144] ss:$8 sps:$4 sm:$0xff]  }
 0x2a6   : > { %3794 = vmatpush1.bf16.msra.mxu1 %v5155_v13  ;;  %v5173_v38 = vld [vmem:[%s5436_s15 + $0x40] ss:$8 sps:$4 sm:$0xff]   ;;  %v5175_v40 = vld [vmem:[%s5436_s15 + $0x54] ss:$8 sps:$4 sm:$0xff]   ;;  %v5179_v41 = vld [vmem:[%s5436_s15 + $0x50] ss:$8 sps:$4 sm:$0xff]  }
 0x2a7   : > { %3835 = vmatpush1.bf16.msra.mxu0 %v5156_v28  ;;  %3795 = vmatprep.subr.bf16.mxu1 %v5157_v29  ;;  %v5174_v39 = vld [vmem:[%s5436_s15 + $0x140] ss:$8 sps:$4 sm:$0xff]   ;;  %v5177_v27 = vld [vmem:[%s5436_s15 + $0x154] ss:$8 sps:$4 sm:$0xff]   ;;  %v5180_v43 = vld [vmem:[%s5436_s15 + $0x150] ss:$8 sps:$4 sm:$0xff]  }
 0x2a8   : > { %3836 = vmatprep.subr.bf16.mxu0 %v5159_v14  ;;  %v5181_v44 = vld [vmem:[%s5436_s15 + $0x64] ss:$8 sps:$4 sm:$0xff]   ;;  %v5185_v45 = vld [vmem:[%s5436_s15 + $0x60] ss:$8 sps:$4 sm:$0xff]   ;;  %v5187_v46 = vld [vmem:[%s5436_s15 + $0x74] ss:$8 sps:$4 sm:$0xff]  }
 0x2a9   : > { %v5183_v36 = vld [vmem:[%s5436_s15 + $0x164] ss:$8 sps:$4 sm:$0xff]   ;;  %v5186_v37 = vld [vmem:[%s5436_s15 + $0x160] ss:$8 sps:$4 sm:$0xff]   ;;  %v5189_v47 = vld [vmem:[%s5436_s15 + $0x174] ss:$8 sps:$4 sm:$0xff]  }
 0x2aa   : > { %3796 = vmatpush1.bf16.msra.mxu1 %v5161_v30  ;;  %v5191_v48 = vld [vmem:[%s5436_s15 + $0x70] ss:$8 sps:$4 sm:$0xff]   ;;  %v5193_v51 = vld [vmem:[%s5436_s15 + $0x84] ss:$8 sps:$4 sm:$0xff]   ;;  %v5197_v53 = vld [vmem:[%s5436_s15 + $0x80] ss:$8 sps:$4 sm:$0xff]  }
 0x2ab   : > { %3837 = vmatpush1.bf16.msra.mxu0 %v5162_v31  ;;  %3797 = vmatprep.subr.bf16.mxu1 %v5163_v25  ;;  %v5192_v50 = vld [vmem:[%s5436_s15 + $0x170] ss:$8 sps:$4 sm:$0xff]   ;;  %v5195_v21 = vld [vmem:[%s5436_s15 + $0x184] ss:$8 sps:$4 sm:$0xff]   ;;  %v5198_v54 = vld [vmem:[%s5436_s15 + $0x180] ss:$8 sps:$4 sm:$0xff]  }
 0x2ac   : > { %3838 = vmatprep.subr.bf16.mxu0 %v5165_v32  ;;  %v5199_v55 = vld [vmem:[%s5436_s15 + $0x94] ss:$8 sps:$4 sm:$0xff]   ;;  %v5321_v58 = vmov 1966171168   ;;  %v5203_v60 = vld [vmem:[%s5436_s15 + $0x90] ss:$8 sps:$4 sm:$0xff]  }
 0x2ad   : > { %v5201_v56 = vld [vmem:[%s5436_s15 + $0x194] ss:$8 sps:$4 sm:$0xff]   ;;  %v3452_v59 = vunpack.c.l.s4 %v5321_v58  ;;  %v5204_v61 = vld [vmem:[%s5436_s15 + $0x190] ss:$8 sps:$4 sm:$0xff]   ;;  %v5205_v62 = vld [vmem:[%s5436_s15 + $0xa4] ss:$8 sps:$4 sm:$0xff]  }
 0x2ae   : > { %3798 = vmatpush1.bf16.msra.mxu1 %v5167_v33  ;;  %v5207_v63 = vld [vmem:[%s5436_s15 + $0x1a4] ss:$8 sps:$4 sm:$0xff]   ;;  %v6755_v0 = vshrl.u32 %v3432_v57, 7  ;;  %v5209_v2 = vld [vmem:[%s5436_s15 + $0xa0] ss:$8 sps:$4 sm:$0xff]  }
 0x2af   : > { %3839 = vmatpush1.bf16.msra.mxu0 %v5168_v34  ;;  %3799 = vmatprep.subr.bf16.mxu1 %v5169_v35  ;;  %v3453_v1 = vunpack.c.0.s8 %v3452_v59  ;;  %v5210_v3 = vld [vmem:[%s5436_s15 + $0x1a0] ss:$8 sps:$4 sm:$0xff]   ;;  %v5211_v4 = vld [vmem:[%s5436_s15 + $0xb4] ss:$8 sps:$4 sm:$0xff]   ;;  %v5215_v8 = vld [vmem:[%s5436_s15 + $0xb0] ss:$8 sps:$4 sm:$0xff]  }
 0x2b0   : > { %3840 = vmatprep.subr.bf16.mxu0 %v5171_v26  ;;  %v5213_v5 = vld [vmem:[%s5436_s15 + $0x1b4] ss:$8 sps:$4 sm:$0xff]   ;;  %v5216_v9 = vld [vmem:[%s5436_s15 + $0x1b0] ss:$8 sps:$4 sm:$0xff]   ;;  %v5217_v11 = vld [vmem:[%s5436_s15 + $0xc4] ss:$8 sps:$4 sm:$0xff]  }
 0x2b1   : > { %v3456_v6 = vsub.s32 %v3453_v1, %v6755_v0  ;;  %v4383_v7 = vld.sshfl [vmem:[#allocation2] sm:$0x33 pattern:$0x75316420]  ;;  %v5219_v12 = vld [vmem:[%s5436_s15 + $0x1c4] ss:$8 sps:$4 sm:$0xff]  }
 0x2b2   : > { %3800 = vmatpush1.bf16.msra.mxu1 %v5173_v38  ;;  %v3450_v10 = vcombine.high %v4383_v7, %v4383_v7  ;;  %v5221_v52 = vld [vmem:[%s5436_s15 + $0xc0] ss:$8 sps:$4 sm:$0xff]   ;;  %v5223_v17 = vld [vmem:[%s5436_s15 + $0xd4] ss:$8 sps:$4 sm:$0xff]   ;;  %v5227_v19 = vld [vmem:[%s5436_s15 + $0xd0] ss:$8 sps:$4 sm:$0xff]  }
 0x2b3   : > { %3841 = vmatpush1.bf16.msra.mxu0 %v5174_v39  ;;  %3801 = vmatprep.subr.bf16.mxu1 %v5175_v40  ;;  %v5222_v15 = vld [vmem:[%s5436_s15 + $0x1c0] ss:$8 sps:$4 sm:$0xff]   ;;  %v5225_v18 = vld [vmem:[%s5436_s15 + $0x1d4] ss:$8 sps:$4 sm:$0xff]   ;;  %v5228_v20 = vld [vmem:[%s5436_s15 + $0x1d0] ss:$8 sps:$4 sm:$0xff]   ;;  %v3457_v29 = vrot.slane %v4383_v7, %v3456_v6 }
 0x2b4   : > { %3842 = vmatprep.subr.bf16.mxu0 %v5177_v27  ;;  %v3464_v42 = vrot.slane %v3450_v10, %v3456_v6  ;;  %v5229_v22 = vld [vmem:[%s5436_s15 + $0xe4] ss:$8 sps:$4 sm:$0xff]   ;;  %v5233_v23 = vld [vmem:[%s5436_s15 + $0xe0] ss:$8 sps:$4 sm:$0xff]   ;;  %v5235_v13 = vld [vmem:[%s5436_s15 + $0xf4] ss:$8 sps:$4 sm:$0xff]  }
 0x2b5   : > { %v5231_v49 = vld [vmem:[%s5436_s15 + $0x1e4] ss:$8 sps:$4 sm:$0xff]   ;;  %v5234_v24 = vld [vmem:[%s5436_s15 + $0x1e0] ss:$8 sps:$4 sm:$0xff]   ;;  %v5237_v28 = vld [vmem:[%s5436_s15 + $0x1f4] ss:$8 sps:$4 sm:$0xff]   ;;  %v3465_v31 = vcombine.high %v3457_v29, %v3457_v29 }
 0x2b6   : > { %3802 = vmatpush1.bf16.msra.mxu1 %v5179_v41  ;;  %v3466_v16 = vcombine.high %v3464_v42, %v3464_v42  ;;  %3823 = vmatprep.mubr.bf16.mxu1 %v3464_v42  ;;  %v5239_v14 = vld [vmem:[%s5436_s15 + $0xf0] ss:$8 sps:$4 sm:$0xff]   ;;  %v3434_v25 = vsub.s32 0, %v6755_v0  ;;  %v3430_v32 = vld [vmem:[%s258_s10] sm:$0x3]  ;;  %v3438_v33 = vsub.s32 1, %v6755_v0 }
 0x2b7   : > { %3843 = vmatpush1.bf16.msra.mxu0 %v5180_v43  ;;  %3803 = vmatprep.subr.bf16.mxu1 %v5181_v44  ;;  %v5240_v30 = vld [vmem:[%s5436_s15 + $0x1f0] ss:$8 sps:$4 sm:$0xff]  }
 0x2b8   : > { %3844 = vmatprep.subr.bf16.mxu0 %v5183_v36  ;;  %3864 = vmatprep.mubr.bf16.mxu0 %v3466_v16  ;;  %v3435_v34 = vrot.slane %v3430_v32, %v3434_v25  ;;  %v3439_v35 = vrot.slane %v3430_v32, %v3438_v33 }
 0x2ba   : > { %3804 = vmatpush1.bf16.msra.mxu1 %v5185_v45 }
 0x2bb   : > { %3845 = vmatpush1.bf16.msra.mxu0 %v5186_v37  ;;  %3805 = vmatprep.subr.bf16.mxu1 %v5187_v46 }
 0x2bc   : > { %3846 = vmatprep.subr.bf16.mxu0 %v5189_v47 }
 0x2be   : > { %3806 = vmatpush1.bf16.msra.mxu1 %v5191_v48 }
 0x2bf   : > { %3847 = vmatpush1.bf16.msra.mxu0 %v5192_v50  ;;  %3807 = vmatprep.subr.bf16.mxu1 %v5193_v51 }
 0x2c0   : > { %3848 = vmatprep.subr.bf16.mxu0 %v5195_v21 }
 0x2c2   : > { %3808 = vmatpush1.bf16.msra.mxu1 %v5197_v53 }
 0x2c3   : > { %3849 = vmatpush1.bf16.msra.mxu0 %v5198_v54  ;;  %3809 = vmatprep.subr.bf16.mxu1 %v5199_v55 }
 0x2c4   : > { %3850 = vmatprep.subr.bf16.mxu0 %v5201_v56 }
 0x2c6   : > { %3810 = vmatpush1.bf16.msra.mxu1 %v5203_v60 }
 0x2c7   : > { %3851 = vmatpush1.bf16.msra.mxu0 %v5204_v61  ;;  %3811 = vmatprep.subr.bf16.mxu1 %v5205_v62 }
 0x2c8   : > { %3852 = vmatprep.subr.bf16.mxu0 %v5207_v63 }
 0x2ca   : > { %3812 = vmatpush1.bf16.msra.mxu1 %v5209_v2 }
 0x2cb   : > { %3853 = vmatpush1.bf16.msra.mxu0 %v5210_v3  ;;  %3813 = vmatprep.subr.bf16.mxu1 %v5211_v4 }
 0x2cc   : > { %3854 = vmatprep.subr.bf16.mxu0 %v5213_v5 }
 0x2ce   : > { %3814 = vmatpush1.bf16.msra.mxu1 %v5215_v8 }
 0x2cf   : > { %3855 = vmatpush1.bf16.msra.mxu0 %v5216_v9  ;;  %3815 = vmatprep.subr.bf16.mxu1 %v5217_v11 }
 0x2d0   : > { %3856 = vmatprep.subr.bf16.mxu0 %v5219_v12 }
 0x2d2   : > { %3816 = vmatpush1.bf16.msra.mxu1 %v5221_v52 }
 0x2d3   : > { %3857 = vmatpush1.bf16.msra.mxu0 %v5222_v15  ;;  %3817 = vmatprep.subr.bf16.mxu1 %v5223_v17 }
 0x2d4   : > { %3858 = vmatprep.subr.bf16.mxu0 %v5225_v18 }
 0x2d6   : > { %3818 = vmatpush1.bf16.msra.mxu1 %v5227_v19 }
 0x2d7   : > { %3859 = vmatpush1.bf16.msra.mxu0 %v5228_v20  ;;  %3819 = vmatprep.subr.bf16.mxu1 %v5229_v22 }
 0x2d8   : > { %3860 = vmatprep.subr.bf16.mxu0 %v5231_v49 }
 0x2da   : > { %3820 = vmatpush1.bf16.msra.mxu1 %v5233_v23 }
 0x2db   : > { %3861 = vmatpush1.bf16.msra.mxu0 %v5234_v24  ;;  %3821 = vmatprep.subr.bf16.mxu1 %v5235_v13 }
 0x2dc   : > { %3862 = vmatprep.subr.bf16.mxu0 %v5237_v28 }
 0x2de   : > { %3822 = vmatpush1.bf16.msra.mxu1 %v5239_v14 }
 0x2df   : > { %3863 = vmatpush1.bf16.msra.mxu0 %v5240_v30 }
 0x2e1   : > { %3824 = vmatmul.mubr.bf16.vlgmr.msra.gmra.mrb[0].mxu1 %v3457_v29 }
 0x2e2   : > { %3865 = vmatmul.mubr.bf16.vlgmr.msra.gmra.mrb[0].mxu0 %v3465_v31 }
 0x3b4   : > { %v3825_v26 = vpop.f32.mrb[0].mxu1 }
 0x3b5   : > { %v3866_v38 = vpop.f32.mrb[0].mxu0  ;;  %v3826_v39 = vadd.f32 %v3825_v26, %v3435_v34  ;;  %v3827_v40 = vpop.f32.mrb[1].mxu1 }
 0x3b6   : > { %v3868_v27 = vpop.f32.mrb[1].mxu0  ;;  %v3828_v41 = vadd.f32 %v3827_v40, %v3439_v35  ;;  %v3829_v43 = vpop.f32.mrb[2].mxu1 }
 0x3b7   : > { %v3870_v44 = vpop.f32.mrb[2].mxu0  ;;  %v3867_v36 = vadd.f32 %v3866_v38, %v3826_v39  ;;  %v3830_v45 = vpop.f32.mrb[3].mxu1 }
 0x3b8   : > { %v3871_v37 = vpop.f32.mrb[3].mxu0  ;;  %v3869_v46 = vadd.f32 %v3868_v27, %v3828_v41 }
 0x3b9   : > { %v4448_v47 = vmul.f32 -1.442695, %v3867_v36 }
 0x3ba   : > { %v4449_v48 = vmul.f32 -1.442695, %v3869_v46 }
 0x3bb   : > { %5241 = vpow2.f32 %v4448_v47 }
 0x3bc   : > { %5243 = vpow2.f32 %v4449_v48 }
 0x3c5   : > { %v5242_v50 = vpop.eup %5241 }
 0x3c6   : > { %v5244_v51 = vpop.eup %5243  ;;  %v3879_v21 = vadd.f32 1.0, %v5242_v50 }
 0x3c7   : > { %v3880_v53 = vadd.f32 1.0, %v5244_v51 }
 0x3c8   : > { %5245 = vrcp.f32 %v3879_v21 }
 0x3c9   : > { %5247 = vrcp.f32 %v3880_v53 }
 0x3d2   : > { %v5246_v54 = vpop.eup %5245 }
 0x3d3   : > { %v5248_v55 = vpop.eup %5247 }
 0x3d4   : > { %v3887_v56 = vcombine.low %v5246_v54, %v5248_v55 }
 0x3d6   : > { %4450 = vst.sshfl [vmem:[%s5453_s18] sm:$0x33 pattern:$0x76325410] %v3887_v56 }
 0x3d7 PF: > { %p15_p7 = scmp.ge.s32.totalorder %s5374_s23, 8   ;;  %s6809_s18 = smov %s5305_s19 }
 0x3d8   : > { %s6810_s19 = smov %s5309_s20  ;;  %s6811_s20 = smov %s5384_s26 }
 0x3d9   : > { %s6812_s21 = smov %s5374_s23  ;;  %17 = sbr.rel (!%p15_p7) target bundleno = 3 (0x3), region = 87 }
 0x3e0   :  { %3919 = vsyncpa [#allocation4], 1 }
 0x3e1   :  { %3921 = vsyncpa [#allocation4 + $0x1], 1 }

// kernel: vgg_forward.2
= control target key start
LH: loop header
LB: loop body
LE: loop exit
PB: predicated region body
PF: predicated region fallthrough
CT: control target
= control target key end

     0   :  { %s5153_s9 = smov 127   ;;  %s5154_s16 = smov 126   ;;  %vm46_vm0 = vcmask 583680   ;;  %vm7660_vm1 = vcmask 1039360   ;;  %vm7657_vm2 = vcmask 1031168   ;;  %vm7661_vm3 = vcmask 801792   ;;  %s7649_s0 = inlined_call_operand.vmem [shape: f32[2,3,902], index: 0, kind: input, shape index: {}]   ;;  %s7650_s1 = inlined_call_operand.vmem [shape: bf16[16,27], index: 1, kind: input, shape index: {}]   ;;  %s7651_s2 = inlined_call_operand.vmem [shape: f32[16,1], index: 2, kind: input, shape index: {}]   ;;  %s7652_s5 = inlined_call_operand.vmem [shape: bf16[809,258], index: 5, kind: input, shape index: {}]   ;;  %s7653_s3 = inlined_call_operand.vmem [shape: bf16[32,144], index: 3, kind: input, shape index: {}]   ;;  %s7654_s4 = inlined_call_operand.vmem [shape: f32[32,1], index: 4, kind: input, shape index: {}]   ;;  %s7655_s6 = inlined_call_operand.vmem [shape: bf16[207,49], index: 6, kind: input, shape index: {}]   ;;  %s7656_s7 = inlined_call_operand.vmem [shape: bf16[2,32,49], index: 7, kind: output, shape index: {}]  }
   0x1   :  { %v5230_v0 = vld [vmem:[%s7649_s0 + $0x10] sm:$0x77]  ;;  %v100_v1 = vld [vmem:[%s7649_s0 + $0x8] sm:$0x77]  ;;  %v5238_v2 = vld [vmem:[%s7649_s0] sm:$0x77] }
   0x2   :  { %v114_v3 = vrot.slane %v5230_v0, 5  ;;  %v112_v4 = vrot.slane %v100_v1, 5  ;;  %v108_v5 = vcombine.high %v100_v1, %v100_v1  ;;  %v5244_v6 = vld [vmem:[%s7649_s0] sm:$0x77]  ;;  %v107_v7 = vcombine.high %v5238_v2, %v5238_v2  ;;  %v211_v11 = vld [vmem:[%s7649_s0 + $0x8] sm:$0x77] }
   0x3   :  { %v218_v9 = vcombine.high %v5244_v6, %v5244_v6  ;;  %v223_v12 = vrot.slane %v211_v11, 2  ;;  %v219_v14 = vcombine.high %v211_v11, %v211_v11  ;;  %v5260_v15 = vld [vmem:[%s7649_s0 + $0x10] sm:$0x77]  ;;  %v5265_v16 = vld [vmem:[%s7649_s0] sm:$0x77]  ;;  %s5155_s21 = smov 98  }
   0x4   :  { %125 = vrot.lane.b32.xlu1 %v114_v3, %s5153_s9  ;;  %121 = vrot.lane.b32.xlu0 %v112_v4, %s5153_s9  ;;  %v113_v8 = vrot.slane %v108_v5, 5  ;;  %v111_v10 = vrot.slane %v107_v7, 5  ;;  %v225_v17 = vrot.slane %v5260_v15, 2  ;;  %v347_v19 = vcombine.high %v5265_v16, %v5265_v16  ;;  %v340_v20 = vld [vmem:[%s7649_s0 + $0x8] sm:$0x77]  ;;  %s5156_s10 = smov 97  }
   0x5   :  { %v222_v13 = vrot.slane %v218_v9, 2  ;;  %v224_v18 = vrot.slane %v219_v14, 2  ;;  %v352_v21 = vrot.slane %v340_v20, 7  ;;  %v348_v23 = vcombine.high %v340_v20, %v340_v20  ;;  %v5280_v24 = vld [vmem:[%s7649_s0 + $0x10] sm:$0x77]  ;;  %s5157_s18 = smov 96  }
   0x6   :  { %v351_v22 = vrot.slane %v347_v19, 7  ;;  %v354_v25 = vrot.slane %v5280_v24, 7  ;;  %v451_v27 = vld [vmem:[%s7649_s0 + $0x8] sm:$0x77]  ;;  %v450_v29 = vld [vmem:[%s7649_s0] sm:$0x77] }
   0x7   :  { %v353_v26 = vrot.slane %v348_v23, 7  ;;  %v459_v28 = vcombine.low %v451_v27, %v451_v27  ;;  %v5296_v30 = vld [vmem:[%s7649_s0 + $0x10] sm:$0x77]  ;;  %v549_v31 = vld [vmem:[%s7649_s0] sm:$0x77]  ;;  %v221_v45 = vrot.slane %v5244_v6, 2  ;;  %v458_v48 = vcombine.low %v450_v29, %v450_v29 }
   0x8   :  { %123 = vrot.lane.b32.xlu1 %v113_v8, %s5153_s9  ;;  %119 = vrot.lane.b32.xlu0 %v111_v10, %s5153_s9  ;;  %v27_v32 = vld [vmem:[%s7649_s0] sm:$0x77]  ;;  %v460_v33 = vcombine.low %v5296_v30, %v5296_v30  ;;  %v557_v34 = vcombine.high %v549_v31, %v549_v31  ;;  %v28_v36 = vld [vmem:[%s7649_s0 + $0x8] sm:$0x77]  ;;  %v110_v46 = vrot.slane %v5238_v2, 5  ;;  %v350_v49 = vrot.slane %v5265_v16, 7 }
   0x9   :  { %v34_v35 = vcombine.high %v27_v32, %v27_v32  ;;  %40 = vst [vmem:[#allocation2] sm:$0x7] %v27_v32  ;;  %v550_v37 = vld [vmem:[%s7649_s0 + $0x8] sm:$0x77]  ;;  %v35_v38 = vcombine.high %v28_v36, %v28_v36  ;;  %42 = vst [vmem:[#allocation2 + $0x10] sm:$0x7] %v28_v36 }
   0xa   :  { %v562_v39 = vrot.slane %v550_v37, 1  ;;  %v561_v40 = vrot.slane %v557_v34, 1  ;;  %v558_v41 = vcombine.high %v550_v37, %v550_v37  ;;  %v5319_v42 = vld [vmem:[%s7649_s0 + $0x10] sm:$0x77]  ;;  %v678_v47 = vld [vmem:[%s7649_s0] sm:$0x77] }
   0xb   :  { %41 = vst [vmem:[#allocation2 + $0x8] sm:$0x7] %v34_v35  ;;  %43 = vst [vmem:[#allocation2 + $0x18] sm:$0x7] %v35_v38  ;;  %v564_v43 = vrot.slane %v5319_v42, 1  ;;  %v686_v50 = vcombine.high %v678_v47, %v678_v47  ;;  %v560_v53 = vrot.slane %v549_v31, 1 }
   0xc   :  { %232 = vrot.lane.b32.xlu1 %v223_v12, %s5154_s16  ;;  %230 = vrot.lane.b32.xlu0 %v222_v13, %s5154_s16  ;;  %v563_v44 = vrot.slane %v558_v41, 1  ;;  %v679_v51 = vld [vmem:[%s7649_s0 + $0x8] sm:$0x77]  ;;  %v799_v55 = vld [vmem:[%s7649_s0] sm:$0x77]  ;;  %s5158_s26 = smov 68   ;;  %v109_v13 = vcombine.high %v5230_v0, %v5230_v0  ;;  %v220_v0 = vcombine.high %v5260_v15, %v5260_v15  ;;  %v349_v15 = vcombine.high %v5280_v24, %v5280_v24 }
   0xd   :  { %v691_v52 = vrot.slane %v686_v50, 6  ;;  %v687_v54 = vcombine.high %v679_v51, %v679_v51  ;;  %v692_v57 = vrot.slane %v679_v51, 6  ;;  %v807_v58 = vcombine.high %v799_v55, %v799_v55  ;;  %v5347_v59 = vld [vmem:[%s7649_s0 + $0x10] sm:$0x77]  ;;  %v800_v60 = vld [vmem:[%s7649_s0 + $0x8] sm:$0x77] }
   0xe   :  { %v694_v62 = vrot.slane %v5347_v59, 6  ;;  %v808_v63 = vcombine.high %v800_v60, %v800_v60  ;;  %s5159_s8 = smov 67   ;;  %v813_v2 = vrot.slane %v800_v60, 3  ;;  %v920_v3 = vld [vmem:[%s7649_s0] sm:$0x77]  ;;  %s5160_s19 = smov 66   ;;  %v559_v24 = vcombine.high %v5319_v42, %v5319_v42 }
   0xf   :  { %v693_v56 = vrot.slane %v687_v54, 6  ;;  %v812_v61 = vrot.slane %v807_v58, 3  ;;  %v5363_v4 = vld [vmem:[%s7649_s0 + $0x10] sm:$0x77]  ;;  %v928_v5 = vcombine.high %v920_v3, %v920_v3  ;;  %v921_v7 = vld [vmem:[%s7649_s0 + $0x8] sm:$0x77]  ;;  %v688_v32 = vcombine.high %v5347_v59, %v5347_v59 }
  0x10   :  { %236 = vrot.lane.b32.xlu1 %v225_v17, %s5154_s16  ;;  %234 = vrot.lane.b32.xlu0 %v224_v18, %s5154_s16  ;;  %v814_v1 = vrot.slane %v808_v63, 3  ;;  %v815_v6 = vrot.slane %v5363_v4, 3  ;;  %v929_v8 = vcombine.high %v921_v7, %v921_v7  ;;  %v690_v9 = vrot.slane %v678_v47, 6  ;;  %v5378_v10 = vld [vmem:[%s7649_s0 + $0x10] sm:$0x77]  ;;  %s5162_s14 = smov 72  }
  0x11   :  { %v29_v11 = vld [vmem:[%s7649_s0 + $0x10] sm:$0x77]  ;;  %v811_v14 = vrot.slane %v799_v55, 3  ;;  %v102_v16 = vld [vmem:[%s7649_s0 + $0x18] sm:$0x7]  ;;  %v115_v18 = vrot.slane %v109_v13, 5 }
  0x12   :  { %v36_v12 = vcombine.high %v29_v11, %v29_v11  ;;  %44 = vst [vmem:[#allocation2 + $0x20] sm:$0x7] %v29_v11  ;;  %v116_v17 = vrot.slane %v102_v16, 5  ;;  %v213_v19 = vld [vmem:[%s7649_s0 + $0x18] sm:$0x7]  ;;  %v7662_v20 = vmov 0  }
  0x13   :  { %1250 = vmatprep.mubr.bf16.mxu1 %v7662_v20  ;;  %1207 = vmatprep.mubr.bf16.mxu0 %v7662_v20  ;;  %v342_v23 = vld [vmem:[%s7649_s0 + $0x18] sm:$0x7]  ;;  %v565_v31 = vrot.slane %v559_v24, 1  ;;  %v695_v35 = vrot.slane %v688_v32, 6  ;;  %v4340_v42 = vld [vmem:[%s7649_s0 + $0x20] sm:$0x77] }
  0x14   :  { %361 = vrot.lane.b32.xlu1 %v352_v21, %s5155_s21  ;;  %359 = vrot.lane.b32.xlu0 %v351_v22, %s5155_s21  ;;  %45 = vst [vmem:[#allocation2 + $0x28] sm:$0x7] %v36_v12  ;;  %v227_v21 = vrot.slane %v213_v19, 2  ;;  %v226_v22 = vrot.slane %v220_v0, 2  ;;  %v5439_v36 = vld [vmem:[%s7649_s0 + $0x18] sm:$0x77] }
  0x15   :  { %4818 = vset.pattern.permute.xlu0 %v7662_v20  ;;  %4817 = vset.pattern.permute.xlu1 %v7662_v20  ;;  %v30_v37 = vld [vmem:[%s7649_s0 + $0x18] sm:$0x7]  ;;  %v817_v38 = vrot.slane %v5439_v36, 3  ;;  %v4352_v50 = vld [vmem:[%s7649_s0 + $0x20] sm:$0x77]  ;;  %s5163_s20 = smov 71  }
  0x16   :  { %47 = vst.msk [vmem:[#allocation2 + $0x30] sm:$0x7] %vm46_vm0, %v30_v37  ;;  %v5455_v41 = vld [vmem:[%s7649_s0 + $0x18] sm:$0x77]  ;;  %v401_v55 = vcombine.high %v4352_v50, %v4352_v50  ;;  %v4356_v63 = vld [vmem:[%s7649_s0 + $0x20] sm:$0x77] }
  0x17   :  { %s5165_s27 = smov 42   ;;  %s5166_s28 = smov 41   ;;  %vm476_vm4 = vcmask 793600   ;;  %vm7658_vm5 = vcmask 785408   ;;  %vm714_vm6 = vcmask 556032   ;;  %vm835_vm7 = vcmask 547840  }
  0x18   :  { %365 = vrot.lane.b32.xlu1 %v354_v25, %s5155_s21  ;;  %363 = vrot.lane.b32.xlu0 %v353_v26, %s5155_s21  ;;  %v356_v25 = vrot.slane %v342_v23, 7  ;;  %v355_v26 = vrot.slane %v349_v15, 7  ;;  %s5167_s11 = smov 40   ;;  %v4368_v15 = vld [vmem:[%s7649_s0 + $0x20] sm:$0x77]  ;;  %s5168_s15 = smov 12  }
  0x19   :  { %s5170_s22 = smov 10   ;;  %vm948_vm8 = vcmask 539648   ;;  %vm7659_vm9 = vcmask 1044480   ;;  %vm1130_vm10 = vcmask 1045504   ;;  %vm151_vm11 = vcmask 586755   ;;  %s5173_s24 = smov 56  }
  0x1a   :  { %vm262_vm12 = vcmask 588806   ;;  %vm270_vm13 = vcmask 581632   ;;  %vm391_vm14 = vcmask 584705   ;;  %vm1125_vm15 = vcmask 220160   ;;  %s5186_s13 = smov 32  }
  0x1c   :  { %466 = vrot.lane.b32.xlu1 %v459_v28, %s5156_s10  ;;  %464 = vrot.lane.b32.xlu0 %v450_v29, %s5156_s10  ;;  %v552_v28 = vld [vmem:[%s7649_s0 + $0x18] sm:$0x7] }
  0x1d   :  { %v566_v29 = vrot.slane %v552_v28, 1 }
  0x20   :  { %470 = vrot.lane.b32.xlu1 %v460_v33, %s5156_s10  ;;  %468 = vrot.lane.b32.xlu0 %v451_v27, %s5156_s10  ;;  %v4840_v27 = vld [vmem:[%s7649_s0 + $0x18] ss:$0 sps:$4 sm:$0x77]  }
  0x21   :  { %v5429_v33 = vld [vmem:[%s7649_s0 + $0x18] sm:$0x77] }
  0x22   :  { %v696_v34 = vrot.slane %v5429_v33, 6  ;;  %v689_v13 = vcombine.high %v5429_v33, %v5429_v33 }
  0x24   :  { %571 = vrot.lane.b32.xlu1 %v562_v39, %s5157_s18  ;;  %569 = vrot.lane.b32.xlu0 %v561_v40, %s5157_s18  ;;  %v930_v40 = vcombine.high %v5378_v10, %v5378_v10  ;;  %v697_v0 = vrot.slane %v689_v13, 6 }
  0x28   :  { %575 = vrot.lane.b32.xlu1 %v564_v43, %s5157_s18  ;;  %573 = vrot.lane.b32.xlu0 %v563_v44, %s5157_s18  ;;  %v4344_v43 = vld [vmem:[%s7649_s0 + $0x20] sm:$0x77]  ;;  %v57_v44 = vcombine.high %v4340_v42, %v4340_v42 }
  0x29   :  { %v164_v47 = vrot.slane %v4344_v43, 5 }
  0x2c   :  { %228 = vrot.lane.b32.xlu1 %v221_v45, %s5154_s16  ;;  %117 = vrot.lane.b32.xlu0 %v110_v46, %s5153_s9  ;;  %v161_v45 = vcombine.high %v4344_v43, %v4344_v43  ;;  %v4348_v46 = vld [vmem:[%s7649_s0 + $0x20] sm:$0x77] }
  0x30   :  { %462 = vrot.lane.b32.xlu1 %v458_v48, %s5156_s10  ;;  %357 = vrot.lane.b32.xlu0 %v350_v49, %s5155_s21  ;;  %v165_v48 = vrot.slane %v161_v45, 5  ;;  %v280_v49 = vcombine.high %v4348_v46, %v4348_v46  ;;  %v4341_v45 = vld [vmem:[%s7649_s0 + $0x28] sm:$0x77] }
  0x32   :  { %v284_v54 = vrot.slane %v280_v49, 2 }
  0x34   :  { %700 = vrot.lane.b32.xlu1 %v691_v52, %s5158_s26  ;;  %567 = vrot.lane.b32.xlu0 %v560_v53, %s5157_s18  ;;  %v283_v53 = vrot.slane %v4348_v46, 2  ;;  %v4345_v46 = vld [vmem:[%s7649_s0 + $0x28] sm:$0x77] }
  0x38   :  { %704 = vrot.lane.b32.xlu1 %v693_v56, %s5158_s26  ;;  %702 = vrot.lane.b32.xlu0 %v692_v57, %s5158_s26 }
  0x3c   :  { %821 = vrot.lane.b32.xlu1 %v812_v61, %s5159_s8  ;;  %706 = vrot.lane.b32.xlu0 %v694_v62, %s5158_s26  ;;  %v404_v61 = vrot.slane %v4352_v50, 7  ;;  %v405_v62 = vrot.slane %v401_v55, 7  ;;  %v4349_v55 = vld [vmem:[%s7649_s0 + $0x28] sm:$0x77] }
  0x40   :  { %825 = vrot.lane.b32.xlu1 %v814_v1, %s5159_s8  ;;  %823 = vrot.lane.b32.xlu0 %v813_v2, %s5159_s8  ;;  %v4360_v1 = vld [vmem:[%s7649_s0 + $0x20] sm:$0x77] }
  0x41   :  { %v622_v11 = vrot.slane %v4360_v1, 1 }
  0x44   :  { %934 = vrot.lane.b32.xlu1 %v928_v5, %s5160_s19  ;;  %827 = vrot.lane.b32.xlu0 %v815_v6, %s5159_s8  ;;  %v506_v5 = vcombine.low %v4356_v63, %v4356_v63  ;;  %v619_v6 = vcombine.high %v4360_v1, %v4360_v1 }
  0x46   :  { %v623_v12 = vrot.slane %v619_v6, 1 }
  0x48   :  { %938 = vrot.lane.b32.xlu1 %v929_v8, %s5160_s19  ;;  %936 = vrot.lane.b32.xlu0 %v921_v7, %s5160_s19 }
  0x4c   :  { %698 = vrot.lane.b32.xlu1 %v690_v9, %s5158_s26  ;;  %940 = vrot.lane.b32.xlu0 %v5378_v10, %s5160_s19 }
  0x50   :  { %932 = vrot.lane.b32.xlu1 %v920_v3, %s5160_s19  ;;  %819 = vrot.lane.b32.xlu0 %v811_v14, %s5159_s8  ;;  %v4364_v14 = vld [vmem:[%s7649_s0 + $0x20] sm:$0x77] }
  0x51   :  { %v749_v19 = vrot.slane %v4364_v14, 6 }
  0x54   :  { %129 = vrot.lane.b32.xlu1 %v116_v17, %s5153_s9  ;;  %127 = vrot.lane.b32.xlu0 %v115_v18, %s5153_s9 }
  0x58   :  { %240 = vrot.lane.b32.xlu1 %v227_v21, %s5154_s16  ;;  %238 = vrot.lane.b32.xlu0 %v226_v22, %s5154_s16  ;;  %v745_v21 = vcombine.high %v4364_v14, %v4364_v14  ;;  %v810_v22 = vcombine.high %v5439_v36, %v5439_v36 }
  0x5a   :  { %v750_v24 = vrot.slane %v745_v21, 6  ;;  %v818_v28 = vrot.slane %v810_v22, 3 }
  0x5c   :  { %369 = vrot.lane.b32.xlu1 %v356_v25, %s5155_s21  ;;  %367 = vrot.lane.b32.xlu0 %v355_v26, %s5155_s21 }
  0x60   :  { %474 = vrot.lane.b32.xlu1 %v4840_v27, %s5156_s10  ;;  %472 = vrot.lane.b32.xlu0 %v5296_v30, %s5156_s10  ;;  %v809_v30 = vcombine.high %v5363_v4, %v5363_v4  ;;  %s5164_s10 = smov 70  }
  0x62   :  { %v816_v39 = vrot.slane %v809_v30, 3 }
  0x64   :  { %579 = vrot.lane.b32.xlu1 %v566_v29, %s5157_s18  ;;  %577 = vrot.lane.b32.xlu0 %v565_v31, %s5157_s18  ;;  %v866_v29 = vcombine.high %v4368_v15, %v4368_v15 }
  0x68   :  { %710 = vrot.lane.b32.xlu1 %v696_v34, %s5158_s26  ;;  %708 = vrot.lane.b32.xlu0 %v695_v35, %s5158_s26  ;;  %v870_v34 = vrot.slane %v4368_v15, 3  ;;  %v871_v35 = vrot.slane %v866_v29, 3 }
  0x6c   :  { %831 = vrot.lane.b32.xlu1 %v817_v38, %s5159_s8  ;;  %829 = vrot.lane.b32.xlu0 %v816_v39, %s5159_s8  ;;  %v931_v39 = vcombine.high %v5455_v41, %v5455_v41 }
  0x70   :  { %944 = vrot.lane.b32.xlu1 %v5455_v41, %s5160_s19  ;;  %942 = vrot.lane.b32.xlu0 %v930_v40, %s5160_s19  ;;  %v4372_v40 = vld [vmem:[%s7649_s0 + $0x20] sm:$0x77] }
  0x71   :  { %v978_v41 = vcombine.high %v4372_v40, %v4372_v40 }
  0x74   :  { %60 = vrot.lane.b32.xlu0 %v4340_v42, %s5162_s14  ;;  %62 = vrot.lane.b32.xlu1 %v57_v44, %s5162_s14 }
  0x76   :  { %v5474_v51 = vpop.permute.xlu1 %125  ;;  %v122_v52 = vpop.permute.xlu0 %121 }
  0x78   :  { %171 = vrot.lane.b32.xlu0 %v164_v47, %s5163_s20  ;;  %173 = vrot.lane.b32.xlu1 %v165_v48, %s5163_s20 }
  0x7a   :  { %v124_v56 = vpop.permute.xlu1 %123  ;;  %v5478_v57 = vpop.permute.xlu0 %119 }
  0x7b   :  { %v134_v58 = vsel %vm7660_vm1, %v122_v52, %v124_v56  ;;  %v135_v59 = vsel %vm7660_vm1, %v124_v56, %v5474_v51  ;;  %v133_v60 = vsel %vm7660_vm1, %v5478_v57, %v122_v52  ;;  %v58_v52 = vcombine.high %v4341_v45, %v4341_v45 }
  0x7c   :  { %147 = vst [vmem:[#allocation2 + $0x10] sm:$0x38] %v134_v58  ;;  %148 = vst [vmem:[#allocation2 + $0x18] sm:$0x38] %v135_v59  ;;  %290 = vrot.lane.b32.xlu0 %v283_v53, %s5164_s10  ;;  %292 = vrot.lane.b32.xlu1 %v284_v54, %s5164_s10  ;;  %v166_v53 = vrot.slane %v4345_v46, 5  ;;  %v162_v54 = vcombine.high %v4345_v46, %v4345_v46 }
  0x7d   :  { %146 = vst [vmem:[#allocation2 + $0x8] sm:$0x38] %v133_v60 }
  0x7e   :  { %v233_v2 = vpop.permute.xlu1 %232  ;;  %v5493_v3 = vpop.permute.xlu0 %230 }
  0x7f   :  { %v244_v4 = vsel %vm7657_vm2, %v5493_v3, %v233_v2 }
  0x80   :  { %257 = vst [vmem:[#allocation2 + $0x78] ss:$-108 sps:$4 sm:$0xc1] %v244_v4   ;;  %411 = vrot.lane.b32.xlu0 %v404_v61, %s5165_s27  ;;  %413 = vrot.lane.b32.xlu1 %v405_v62, %s5165_s27  ;;  %v285_v4 = vrot.slane %v4349_v55, 2 }
  0x82   :  { %v5499_v7 = vpop.permute.xlu1 %236  ;;  %v235_v8 = vpop.permute.xlu0 %234 }
  0x83   :  { %v245_v9 = vsel %vm7657_vm2, %v233_v2, %v235_v8  ;;  %v246_v10 = vsel %vm7657_vm2, %v235_v8, %v5499_v7  ;;  %v167_v2 = vrot.slane %v162_v54, 5 }
  0x84   :  { %258 = vst [vmem:[#allocation2 + $0x80] ss:$-108 sps:$4 sm:$0xc1] %v245_v9   ;;  %259 = vst [vmem:[#allocation2 + $0x88] ss:$-108 sps:$4 sm:$0xc1] %v246_v10   ;;  %510 = vrot.lane.b32.xlu0 %v506_v5, %s5166_s28  ;;  %512 = vrot.lane.b32.xlu1 %v4356_v63, %s5166_s28  ;;  %v281_v63 = vcombine.high %v4349_v55, %v4349_v55 }
  0x85   :  { %v4353_v5 = vld [vmem:[%s7649_s0 + $0x28] sm:$0x77] }
  0x86   :  { %v362_v16 = vpop.permute.xlu1 %361  ;;  %v5511_v17 = vpop.permute.xlu0 %359  ;;  %v286_v13 = vrot.slane %v281_v63, 2 }
  0x87   :  { %v373_v18 = vsel %vm7661_vm3, %v5511_v17, %v362_v16  ;;  %v1025_v61 = vld [vmem:[#allocation2 + $0x8] sm:$0xff] }
  0x88   :  { %386 = vst [vmem:[#allocation2 + $0x78] sm:$0xe] %v373_v18  ;;  %629 = vrot.lane.b32.xlu0 %v622_v11, %s5167_s11  ;;  %631 = vrot.lane.b32.xlu1 %v623_v12, %s5167_s11  ;;  %v406_v18 = vrot.slane %v4353_v5, 7 }
  0x8a   :  { %v5522_v23 = vpop.permute.xlu1 %365  ;;  %v364_v25 = vpop.permute.xlu0 %363 }
  0x8b   :  { %v374_v26 = vsel %vm7661_vm3, %v362_v16, %v364_v25  ;;  %v375_v27 = vsel %vm7661_vm3, %v364_v25, %v5522_v23  ;;  %v1026_v11 = vld [vmem:[#allocation2 + $0x10] sm:$0xff] }
  0x8c   :  { %387 = vst [vmem:[#allocation2 + $0x80] sm:$0xe] %v374_v26  ;;  %388 = vst [vmem:[#allocation2 + $0x88] sm:$0xe] %v375_v27  ;;  %712 = vrot.lane.b32.xlu0 %v697_v0, %s5158_s26  ;;  %757 = vrot.lane.b32.xlu1 %v749_v19, %s5168_s15  ;;  %s5169_s26 = smov 11   ;;  %v402_v0 = vcombine.high %v4353_v5, %v4353_v5 }
  0x8d   :  { %v4357_v19 = vld [vmem:[%s7649_s0 + $0x28] sm:$0x77] }
  0x8e   :  { %v467_v31 = vpop.permute.xlu1 %466  ;;  %v465_v32 = vpop.permute.xlu0 %464  ;;  %v407_v15 = vrot.slane %v402_v0, 7  ;;  %v507_v25 = vcombine.low %v4357_v19, %v4357_v19  ;;  %v4361_v26 = vld [vmem:[%s7649_s0 + $0x28] sm:$0x77] }
  0x8f   :  { %v478_v33 = vsel %vm476_vm4, %v465_v32, %v467_v31 }
  0x90   :  { %491 = vst [vmem:[#allocation2 + $0x78] sm:$0x70] %v478_v33  ;;  %759 = vrot.lane.b32.xlu0 %v750_v24, %s5168_s15  ;;  %833 = vrot.lane.b32.xlu1 %v818_v28, %s5159_s8  ;;  %v4365_v33 = vld [vmem:[%s7649_s0 + $0x28] sm:$0x77]  ;;  %s5178_s8 = smov 95  }
  0x92   :  { %v5532_v30 = vpop.permute.xlu1 %470  ;;  %v469_v36 = vpop.permute.xlu0 %468 }
  0x93   :  { %v479_v37 = vsel %vm476_vm4, %v467_v31, %v469_v36  ;;  %v480_v38 = vsel %vm476_vm4, %v469_v36, %v5532_v30  ;;  %v624_v31 = vrot.slane %v4361_v26, 1 }
  0x94   :  { %492 = vst [vmem:[#allocation2 + $0x80] sm:$0x70] %v479_v37  ;;  %493 = vst [vmem:[#allocation2 + $0x88] sm:$0x70] %v480_v38  ;;  %878 = vrot.lane.b32.xlu0 %v870_v34, %s5169_s26  ;;  %880 = vrot.lane.b32.xlu1 %v871_v35, %s5169_s26 }
  0x96   :  { %v572_v42 = vpop.permute.xlu1 %571  ;;  %v570_v43 = vpop.permute.xlu0 %569 }
  0x97   :  { %v583_v44 = vsel %vm7658_vm5, %v570_v43, %v572_v42 }
  0x98   :  { %596 = vst [vmem:[#allocation2 + $0xe8] ss:$-108 sps:$4 sm:$0x83] %v583_v44   ;;  %946 = vrot.lane.b32.xlu0 %v931_v39, %s5160_s19  ;;  %982 = vrot.lane.b32.xlu1 %v4372_v40, %s5170_s22  ;;  %v4369_v44 = vld [vmem:[%s7649_s0 + $0x28] sm:$0x77] }
  0x9a   :  { %v5553_v47 = vpop.permute.xlu1 %575  ;;  %v574_v48 = vpop.permute.xlu0 %573 }
  0x9b   :  { %v584_v49 = vsel %vm7658_vm5, %v572_v42, %v574_v48  ;;  %v585_v50 = vsel %vm7658_vm5, %v574_v48, %v5553_v47  ;;  %v751_v42 = vrot.slane %v4365_v33, 6 }
  0x9c   :  { %597 = vst [vmem:[#allocation2 + $0xf0] ss:$-108 sps:$4 sm:$0x83] %v584_v49   ;;  %598 = vst [vmem:[#allocation2 + $0xf8] ss:$-108 sps:$4 sm:$0x83] %v585_v50   ;;  %984 = vrot.lane.b32.xlu0 %v978_v41, %s5170_s22  ;;  %64 = vrot.lane.b32.xlu1 %v4341_v45, %s5162_s14 }
  0x9d   :  { %v872_v50 = vrot.slane %v4369_v44, 3 }
  0x9e   :  { %v229_v56 = vpop.permute.xlu1 %228  ;;  %v118_v58 = vpop.permute.xlu0 %117 }
  0x9f   :  { %v243_v59 = vsel %vm7657_vm2, %v229_v56, %v5493_v3  ;;  %v132_v60 = vsel %vm7660_vm1, %v118_v58, %v5478_v57  ;;  %v1039_v62 = vld [vmem:[#allocation2 + $0x78] sm:$0xff]  ;;  %v4373_v58 = vld [vmem:[%s7649_s0 + $0x28] sm:$0x77] }
  0xa0   :  { %256 = vst [vmem:[#allocation2 + $0x70] ss:$-108 sps:$4 sm:$0xc1] %v243_v59   ;;  %145 = vst [vmem:[#allocation2] sm:$0x38] %v132_v60  ;;  %66 = vrot.lane.b32.xlu0 %v58_v52, %s5162_s14  ;;  %175 = vrot.lane.b32.xlu1 %v166_v53, %s5163_s20  ;;  %v1081_v1 = vpack.c.bf16 %v1039_v62, %v1025_v61  ;;  %v1027_v57 = vld [vmem:[#allocation2 + $0x18] sm:$0xff]  ;;  %v867_v52 = vcombine.high %v4369_v44, %v4369_v44 }
  0xa1   :  { %v979_v63 = vcombine.high %v4373_v58, %v4373_v58 }
  0xa2   :  { %v463_v3 = vpop.permute.xlu1 %462  ;;  %v358_v6 = vpop.permute.xlu0 %357  ;;  %1175 = vmatprep.subr.bf16.mxu0 %v1081_v1  ;;  %v873_v56 = vrot.slane %v867_v52, 3  ;;  %v4342_v1 = vld [vmem:[%s7649_s0 + $0x30] sm:$0x77] }
  0xa3   :  { %v477_v8 = vsel %vm476_vm4, %v463_v3, %v465_v32  ;;  %v372_v9 = vsel %vm7661_vm3, %v358_v6, %v5511_v17  ;;  %v1041_v10 = vld [vmem:[#allocation2 + $0x88] sm:$0xff]  ;;  %v1040_v12 = vld [vmem:[#allocation2 + $0x80] sm:$0xff]  ;;  %v620_v32 = vcombine.high %v4361_v26, %v4361_v26  ;;  %v4354_v26 = vld [vmem:[%s7649_s0 + $0x30] sm:$0x77] }
  0xa4   :  { %490 = vst [vmem:[#allocation2 + $0x70] sm:$0x70] %v477_v8  ;;  %385 = vst [vmem:[#allocation2 + $0x70] sm:$0xe] %v372_v9  ;;  %177 = vrot.lane.b32.xlu0 %v167_v2, %s5163_s20  ;;  %294 = vrot.lane.b32.xlu1 %v285_v4, %s5164_s10  ;;  %v1083_v14 = vpack.c.bf16 %v1041_v10, %v1027_v57  ;;  %v1082_v16 = vpack.c.bf16 %v1040_v12, %v1026_v11  ;;  %v4346_v2 = vld [vmem:[%s7649_s0 + $0x30] sm:$0x77] }
  0xa5   :  { %v625_v40 = vrot.slane %v620_v32, 1  ;;  %v59_v57 = vcombine.high %v4342_v1, %v4342_v1  ;;  %v163_v8 = vcombine.high %v4346_v2, %v4346_v2  ;;  %v168_v9 = vrot.slane %v4346_v2, 5  ;;  %v4350_v12 = vld [vmem:[%s7649_s0 + $0x30] sm:$0x77] }
  0xa6   :  { %v5580_v21 = vpop.permute.xlu1 %700  ;;  %v568_v17 = vpop.permute.xlu0 %567  ;;  %1218 = vmatprep.subr.bf16.mxu1 %v1083_v14  ;;  %v7664_v10 = vmov 65535  }
  0xa7   :  { %v582_v22 = vsel %vm7658_vm5, %v568_v17, %v570_v43  ;;  %1219 = vmatpush1.bf16.msra.mxu1 %v1082_v16  ;;  %v1024_v37 = vld [vmem:[#allocation2] sm:$0xff]  ;;  %v746_v43 = vcombine.high %v4365_v33, %v4365_v33  ;;  %v1131_v11 = vsel %vm7659_vm9, 4294967295, %v7664_v10  ;;  %v282_v17 = vcombine.high %v4350_v12, %v4350_v12  ;;  %v6560_v10 = vld [vmem:[%s7652_s5 + $0x270] ss:$12 sps:$4 sm:$0xff]  }
  0xa8   :  { %595 = vst [vmem:[#allocation2 + $0xe0] ss:$-108 sps:$4 sm:$0x83] %v582_v22   ;;  %296 = vrot.lane.b32.xlu0 %v286_v13, %s5164_s10  ;;  %415 = vrot.lane.b32.xlu1 %v406_v18, %s5165_s27  ;;  %v169_v22 = vrot.slane %v163_v8, 5  ;;  %vm668_vm9 = vcmask 1041984   ;;  %7758 = vst [vmem:[#allocation13_spill] sm:$0xff] %v6560_v10 }
  0xa9   :  { %v752_v49 = vrot.slane %v746_v43, 6  ;;  %v288_v33 = vrot.slane %v282_v17, 2 }
  0xaa   :  { %v705_v27 = vpop.permute.xlu1 %704  ;;  %v703_v24 = vpop.permute.xlu0 %702 }
  0xab   :  { %v716_v28 = vsel %vm714_vm6, %v5580_v21, %v703_v24  ;;  %v717_v29 = vsel %vm714_vm6, %v703_v24, %v705_v27 }
  0xac   :  { %730 = vst [vmem:[#allocation2 + $0xe8] sm:$0x1c] %v716_v28  ;;  %731 = vst [vmem:[#allocation2 + $0xf0] sm:$0x1c] %v717_v29  ;;  %417 = vrot.lane.b32.xlu0 %v407_v15, %s5165_s27  ;;  %514 = vrot.lane.b32.xlu1 %v507_v25, %s5166_s28  ;;  %v287_v15 = vrot.slane %v4350_v12, 2 }
  0xad   :  { %v4370_v12 = vld [vmem:[%s7649_s0 + $0x30] sm:$0x77] }
  0xae   :  { %v5596_v34 = vpop.permute.xlu1 %821  ;;  %v5598_v35 = vpop.permute.xlu0 %706 }
  0xaf   :  { %v718_v36 = vsel %vm714_vm6, %v705_v27, %v5598_v35  ;;  %v1038_v38 = vld [vmem:[#allocation2 + $0x70] sm:$0xff] }
  0xb0   :  { %732 = vst [vmem:[#allocation2 + $0xf8] sm:$0x1c] %v718_v36  ;;  %516 = vrot.lane.b32.xlu0 %v4357_v19, %s5166_s28  ;;  %633 = vrot.lane.b32.xlu1 %v624_v31, %s5167_s11  ;;  %v1080_v39 = vpack.c.bf16 %v1038_v38, %v1024_v37  ;;  %v408_v38 = vrot.slane %v4354_v26, 7 }
  0xb2   :  { %v826_v41 = vpop.permute.xlu1 %825  ;;  %v824_v45 = vpop.permute.xlu0 %823  ;;  %1176 = vmatpush1.bf16.msra.mxu0 %v1080_v39 }
  0xb3   :  { %v837_v46 = vsel %vm835_vm7, %v5596_v34, %v824_v45  ;;  %v838_v48 = vsel %vm835_vm7, %v824_v45, %v826_v41 }
  0xb4   :  { %851 = vst [vmem:[#allocation2 + $0xe8] sm:$0xe0] %v837_v46  ;;  %852 = vst [vmem:[#allocation2 + $0xf0] sm:$0xe0] %v838_v48  ;;  %635 = vrot.lane.b32.xlu0 %v625_v40, %s5167_s11  ;;  %761 = vrot.lane.b32.xlu1 %v751_v42, %s5168_s15  ;;  %v403_v42 = vcombine.high %v4354_v26, %v4354_v26 }
  0xb6   :  { %v935_v53 = vpop.permute.xlu1 %934  ;;  %v5612_v54 = vpop.permute.xlu0 %827  ;;  %v409_v52 = vrot.slane %v403_v42, 7 }
  0xb7   :  { %v839_v55 = vsel %vm835_vm7, %v826_v41, %v5612_v54 }
  0xb8   :  { %853 = vst [vmem:[#allocation2 + $0xf8] sm:$0xe0] %v839_v55  ;;  %763 = vrot.lane.b32.xlu0 %v752_v49, %s5168_s15  ;;  %882 = vrot.lane.b32.xlu1 %v872_v50, %s5169_s26 }
  0xba   :  { %v939_v59 = vpop.permute.xlu1 %938  ;;  %v937_v60 = vpop.permute.xlu0 %936 }
  0xbb   :  { %v950_v61 = vsel %vm948_vm8, %v935_v53, %v937_v60  ;;  %v951_v62 = vsel %vm948_vm8, %v937_v60, %v939_v59  ;;  %v1053_v0 = vld [vmem:[#allocation2 + $0xe8] sm:$0xff]  ;;  %v1054_v37 = vld [vmem:[#allocation2 + $0xf0] sm:$0xff] }
  0xbc   :  { %964 = vst [vmem:[#allocation2 + $0x158] sm:$0x7] %v950_v61  ;;  %965 = vst [vmem:[#allocation2 + $0x160] sm:$0x7] %v951_v62  ;;  %884 = vrot.lane.b32.xlu0 %v873_v56, %s5169_s26  ;;  %986 = vrot.lane.b32.xlu1 %v4373_v58, %s5170_s22  ;;  %v4362_v60 = vld [vmem:[%s7649_s0 + $0x30] sm:$0x77] }
  0xbe   :  { %v699_v4 = vpop.permute.xlu1 %698  ;;  %v5631_v5 = vpop.permute.xlu0 %940 }
  0xbf   :  { %v715_v3 = vsel %vm714_vm6, %v699_v4, %v5580_v21  ;;  %v952_v6 = vsel %vm948_vm8, %v939_v59, %v5631_v5  ;;  %v5647_v21 = vsel %vm1130_vm10, %v1131_v11, 0  ;;  %vm496_vm10 = vcmask 587780  }
  0xc0   :  { %729 = vst [vmem:[#allocation2 + $0xe0] sm:$0x1c] %v715_v3  ;;  %966 = vst [vmem:[#allocation2 + $0x168] sm:$0x7] %v952_v6  ;;  %988 = vrot.lane.b32.xlu0 %v979_v63, %s5170_s22  ;;  %68 = vrot.lane.b32.xlu1 %v4342_v1, %s5162_s14  ;;  %v621_v63 = vcombine.high %v4362_v60, %v4362_v60  ;;  %v626_v1 = vrot.slane %v4362_v60, 1 }
  0xc2   :  { %v933_v13 = vpop.permute.xlu1 %932  ;;  %v820_v14 = vpop.permute.xlu0 %819 }
  0xc3   :  { %v949_v16 = vsel %vm948_vm8, %v933_v13, %v935_v53  ;;  %v836_v18 = vsel %vm835_vm7, %v820_v14, %v5596_v34  ;;  %v1067_v19 = vld [vmem:[#allocation2 + $0x158] sm:$0x7]  ;;  %v1068_v27 = vld [vmem:[#allocation2 + $0x160] sm:$0x7] }
  0xc4   :  { %963 = vst [vmem:[#allocation2 + $0x150] sm:$0x7] %v949_v16  ;;  %850 = vst [vmem:[#allocation2 + $0xe0] sm:$0xe0] %v836_v18  ;;  %70 = vrot.lane.b32.xlu0 %v59_v57, %s5162_s14  ;;  %179 = vrot.lane.b32.xlu1 %v168_v9, %s5163_s20  ;;  %v1095_v25 = vpack.c.bf16 %v1067_v19, %v1053_v0  ;;  %v1055_v34 = vld [vmem:[#allocation2 + $0xf8] sm:$0xff]  ;;  %v1096_v40 = vpack.c.bf16 %v1068_v27, %v1054_v37  ;;  %v627_v57 = vrot.slane %v621_v63, 1 }
  0xc5   :  { %v868_v18 = vcombine.high %v4370_v12, %v4370_v12  ;;  %v874_v0 = vrot.slane %v4370_v12, 3  ;;  %v4374_v27 = vld [vmem:[%s7649_s0 + $0x30] sm:$0x77]  ;;  %v4347_v37 = vld [vmem:[%s7649_s0 + $0x38] sm:$0x7] }
  0xc6   :  { %v130_v24 = vpop.permute.xlu1 %129  ;;  %v128_v28 = vpop.permute.xlu0 %127  ;;  %v1137_v29 = vand.u32 %v5647_v21, %v1095_v25  ;;  %v1140_v50 = vand.u32 %v5647_v21, %v1096_v40  ;;  %v4351_v40 = vld [vmem:[%s7649_s0 + $0x38] sm:$0x7] }
  0xc7   :  { %152 = vst.msk [vmem:[#allocation2 + $0x30] sm:$0x38] %vm151_vm11, %v130_v24  ;;  %v136_v31 = vsel %vm7660_vm1, %v5474_v51, %v128_v28  ;;  %v137_v32 = vsel %vm7660_vm1, %v128_v28, %v130_v24  ;;  %v1069_v36 = vld [vmem:[#allocation2 + $0x168] sm:$0x7]  ;;  %v4358_v51 = vld [vmem:[%s7649_s0 + $0x30] sm:$0x77] }
  0xc8   :  { %149 = vst [vmem:[#allocation2 + $0x20] sm:$0x38] %v136_v31  ;;  %150 = vst [vmem:[#allocation2 + $0x28] sm:$0x38] %v137_v32  ;;  %181 = vrot.lane.b32.xlu0 %v169_v22, %s5163_s20  ;;  %298 = vrot.lane.b32.xlu1 %v287_v15, %s5164_s10  ;;  %v1097_v39 = vpack.c.bf16 %v1069_v36, %v1055_v34  ;;  %v508_v53 = vcombine.low %v4358_v51, %v4358_v51  ;;  %vm601_vm11 = vcmask 588807   ;;  %v875_v15 = vrot.slane %v868_v18, 3 }
  0xc9   :  { %1177 = vmatprep.subr.bf16.mxu0 %v1137_v29  ;;  %vm643_vm1 = vcmask 326656  }
  0xca   :  { %v241_v43 = vpop.permute.xlu1 %240  ;;  %v239_v44 = vpop.permute.xlu0 %238  ;;  %v1143_v41 = vand.u32 %v5647_v21, %v1097_v39  ;;  %v4343_v39 = vld [vmem:[%s7649_s0 + $0x38] sm:$0x7] }
  0xcb   :  { %263 = vst.msk [vmem:[#allocation2 + $0x30] sm:$0xc0] %vm262_vm12, %v241_v43  ;;  %v247_v45 = vsel %vm7657_vm2, %v5499_v7, %v239_v44  ;;  %v248_v46 = vsel %vm7657_vm2, %v239_v44, %v241_v43  ;;  %v1052_v48 = vld [vmem:[#allocation2 + $0xe0] sm:$0xff]  ;;  %v1066_v49 = vld [vmem:[#allocation2 + $0x150] sm:$0x7]  ;;  %vm609_vm12 = vcmask 582656  }
  0xcc   :  { %271 = vst.msk [vmem:[#allocation2 + $0xa0] sm:$0x1] %vm270_vm13, %v241_v43  ;;  %260 = vst [vmem:[#allocation2 + $0x90] ss:$-108 sps:$4 sm:$0xc1] %v247_v45   ;;  %300 = vrot.lane.b32.xlu0 %v288_v33, %s5164_s10  ;;  %419 = vrot.lane.b32.xlu1 %v408_v38, %s5165_s27  ;;  %v1094_v55 = vpack.c.bf16 %v1066_v49, %v1052_v48  ;;  %v5675_v7 = vld [vmem:[%s7650_s1] sm:$0xff]   ;;  %v980_v33 = vcombine.high %v4374_v27, %v4374_v27 }
  0xcd   :  { %261 = vst [vmem:[#allocation2 + $0x98] ss:$-108 sps:$4 sm:$0xc1] %v248_v46   ;;  %1220 = vmatprep.subr.bf16.mxu1 %v1143_v41  ;;  %vm74_vm13 = vcmask 588800   ;;  %v170_v43 = vrot.slane %v4347_v37, 5  ;;  %v289_v44 = vrot.slane %v4351_v40, 2 }
  0xce   :  { %1221 = vmatpush1.bf16.msra.mxu1 %v1140_v50  ;;  %v370_v56 = vpop.permute.xlu1 %369  ;;  %v368_v58 = vpop.permute.xlu0 %367  ;;  %v1134_v59 = vand.u32 %v5647_v21, %v1094_v55  ;;  %v4355_v41 = vld [vmem:[%s7649_s0 + $0x38] sm:$0x7]  ;;  %vm304_vm2 = vcmask 572416  }
  0xcf   :  { %392 = vst.msk [vmem:[#allocation2 + $0xa0] sm:$0xe] %vm391_vm14, %v370_v56  ;;  %v376_v61 = vsel %vm7661_vm3, %v5522_v23, %v368_v58  ;;  %v377_v62 = vsel %vm7661_vm3, %v368_v58, %v370_v56  ;;  %v4366_v23 = vld [vmem:[%s7649_s0 + $0x30] sm:$0x77]  ;;  %vm200_vm14 = vcmask 1046083   ;;  %v410_v48 = vrot.slane %v4355_v41, 7 }
  0xd0   :  { %389 = vst [vmem:[#allocation2 + $0x90] sm:$0xe] %v376_v61  ;;  %390 = vst [vmem:[#allocation2 + $0x98] sm:$0xe] %v377_v62  ;;  %421 = vrot.lane.b32.xlu0 %v409_v52, %s5165_s27  ;;  %518 = vrot.lane.b32.xlu1 %v508_v53, %s5166_s28  ;;  %v747_v8 = vcombine.high %v4366_v23, %v4366_v23  ;;  %v753_v9 = vrot.slane %v4366_v23, 6  ;;  %vm789_vm3 = vcmask 1045058  }
  0xd1   :  { %1178 = vmatpush1.bf16.msra.mxu0 %v1134_v59  ;;  %4378 = vmatmul.mubr.msk.bf16.vlgmr.msra.gmra.mrb[0].mxu1 %vm1125_vm15, %v5675_v7  ;;  %v4875_v49 = vld [vmem:[%s7649_s0 + $0x38] ss:$0 sps:$4 sm:$0x77]  }
  0xd2   :  { %v475_v2 = vpop.permute.xlu1 %474  ;;  %v473_v4 = vpop.permute.xlu0 %472  ;;  %1336 = vmatprep.mubr.bf16.mxu1 %v7662_v20  ;;  %v754_v16 = vrot.slane %v747_v8, 6  ;;  %v4363_v50 = vld [vmem:[%s7649_s0 + $0x38] sm:$0x7] }
  0xd3   :  { %497 = vst.msk [vmem:[#allocation2 + $0xa0] sm:$0x70] %vm496_vm10, %v475_v2  ;;  %v481_v3 = vsel %vm476_vm4, %v5532_v30, %v473_v4  ;;  %v482_v6 = vsel %vm476_vm4, %v473_v4, %v475_v2  ;;  %v1028_v31 = vld [vmem:[#allocation2 + $0x20] sm:$0xff]  ;;  %vm89_vm4 = vcmask 1043008   ;;  %vm185_vm10 = vcmask 580608  }
  0xd4   :  { %494 = vst [vmem:[#allocation2 + $0x90] sm:$0x70] %v481_v3  ;;  %495 = vst [vmem:[#allocation2 + $0x98] sm:$0x70] %v482_v6  ;;  %4377 = vmatmul.mubr.msk.bf16.vlgmr.msra.gmra.mrb[0].mxu0 %vm1125_vm15, %v5675_v7  ;;  %520 = vrot.lane.b32.xlu0 %v4358_v51, %s5166_s28  ;;  %v1029_v24 = vld [vmem:[#allocation2 + $0x28] sm:$0xff]  ;;  %v628_v62 = vrot.slane %v4363_v50, 1 }
  0xd5   :  { %637 = vrot.lane.b32.xlu1 %v626_v1, %s5167_s11  ;;  %1293 = vmatprep.mubr.bf16.mxu0 %v7662_v20  ;;  %v4367_v55 = vld [vmem:[%s7649_s0 + $0x38] sm:$0x77] }
  0xd6   :  { %v580_v11 = vpop.permute.xlu1 %579  ;;  %v578_v30 = vpop.permute.xlu0 %577  ;;  %v748_v2 = vcombine.high %v4367_v55, %v4367_v55  ;;  %v755_v4 = vrot.slane %v4367_v55, 6  ;;  %v4371_v8 = vld [vmem:[%s7649_s0 + $0x38] sm:$0x77] }
  0xd7   :  { %602 = vst.msk [vmem:[#allocation2 + $0xa0] sm:$0x80] %vm601_vm11, %v580_v11  ;;  %v586_v13 = vsel %vm7658_vm5, %v5553_v47, %v578_v30  ;;  %v587_v14 = vsel %vm7658_vm5, %v578_v30, %v580_v11  ;;  %vm319_vm11 = vcmask 1048134   ;;  %vm425_vm5 = vcmask 343040  }
  0xd8   :  { %610 = vst.msk [vmem:[#allocation2 + $0x110] sm:$0x3] %vm609_vm12, %v580_v11  ;;  %599 = vst [vmem:[#allocation2 + $0x100] ss:$-108 sps:$4 sm:$0x83] %v586_v13   ;;  %639 = vrot.lane.b32.xlu0 %v627_v57, %s5167_s11  ;;  %vm329_vm12 = vcmask 1040960   ;;  %v869_v30 = vcombine.high %v4371_v8, %v4371_v8 }
  0xd9   :  { %600 = vst [vmem:[#allocation2 + $0x108] ss:$-108 sps:$4 sm:$0x83] %v587_v14   ;;  %765 = vrot.lane.b32.xlu1 %v753_v9, %s5168_s15  ;;  %v756_v11 = vrot.slane %v748_v2, 6  ;;  %v876_v12 = vrot.slane %v4371_v8, 3 }
  0xda   :  { %v5709_v19 = vpop.permute.xlu1 %710  ;;  %v709_v17 = vpop.permute.xlu0 %708  ;;  %v877_v18 = vrot.slane %v869_v30, 3 }
  0xdb   :  { %v719_v22 = vsel %vm714_vm6, %v5598_v35, %v709_v17  ;;  %v720_v47 = vsel %vm714_vm6, %v709_v17, %v5709_v19 }
  0xdc   :  { %733 = vst [vmem:[#allocation2 + $0x100] sm:$0x1c] %v719_v22  ;;  %734 = vst [vmem:[#allocation2 + $0x108] sm:$0x1c] %v720_v47  ;;  %767 = vrot.lane.b32.xlu0 %v754_v16, %s5168_s15  ;;  %v4375_v22 = vld [vmem:[%s7649_s0 + $0x38] sm:$0x77] }
  0xdd   :  { %886 = vrot.lane.b32.xlu1 %v874_v0, %s5169_s26  ;;  %s5184_s0 = smov 64  }
  0xde   :  { %v5717_v25 = vpop.permute.xlu1 %831  ;;  %v830_v26 = vpop.permute.xlu0 %829 }
  0xdf   :  { %v840_v35 = vsel %vm835_vm7, %v5612_v54, %v830_v26  ;;  %v841_v28 = vsel %vm835_vm7, %v830_v26, %v5717_v25  ;;  %v1042_v32 = vld [vmem:[#allocation2 + $0x90] sm:$0xff] }
  0xe0   :  { %v1043_v29 = vld [vmem:[#allocation2 + $0x98] sm:$0xff]  ;;  %854 = vst [vmem:[#allocation2 + $0x100] sm:$0xe0] %v840_v35  ;;  %855 = vst [vmem:[#allocation2 + $0x108] sm:$0xe0] %v841_v28  ;;  %888 = vrot.lane.b32.xlu0 %v875_v15, %s5169_s26  ;;  %v1084_v36 = vpack.c.bf16 %v1042_v32, %v1028_v31  ;;  %v981_v15 = vcombine.high %v4375_v22, %v4375_v22  ;;  %v1109_v28 = vld [vmem:[%s7651_s2 + $0x8] sm:$0xff] }
  0xe1   :  { %v1085_v34 = vpack.c.bf16 %v1043_v29, %v1029_v24  ;;  %990 = vrot.lane.b32.xlu1 %v4374_v27, %s5170_s22  ;;  %v1108_v24 = vld [vmem:[%s7651_s2] sm:$0xff] }
  0xe2   :  { %v5731_v54 = vpop.permute.xlu1 %944  ;;  %v943_v38 = vpop.permute.xlu0 %942 }
  0xe3   :  { %1261 = vmatprep.subr.bf16.mxu0 %v1085_v34  ;;  %v953_v42 = vsel %vm948_vm8, %v5631_v5, %v943_v38  ;;  %v954_v51 = vsel %vm948_vm8, %v943_v38, %v5731_v54 }
  0xe4   :  { %1262 = vmatpush1.bf16.msra.mxu0 %v1084_v36  ;;  %967 = vst [vmem:[#allocation2 + $0x170] sm:$0x7] %v953_v42  ;;  %968 = vst [vmem:[#allocation2 + $0x178] sm:$0x7] %v954_v51  ;;  %992 = vrot.lane.b32.xlu0 %v980_v33, %s5170_s22 }
  0xe5   :  { %72 = vrot.lane.b32.xlu1 %v4343_v39, %s5162_s14 }
  0xe6   :  { %v61_v45 = vpop.permute.xlu0 %60  ;;  %v5748_v5 = vpop.permute.xlu1 %62 }
  0xe7   :  { %90 = vst.msk [vmem:[#allocation2 + $0x30] sm:$0x7] %vm89_vm4, %v61_v45  ;;  %v75_v46 = vsel %vm74_vm13, %v61_v45, %v5748_v5  ;;  %v1057_v56 = vld [vmem:[#allocation2 + $0x108] sm:$0xff]  ;;  %v1056_v60 = vld [vmem:[#allocation2 + $0x100] sm:$0xff] }
  0xe8   :  { %91 = vst [vmem:[#allocation2 + $0x38] sm:$0x7] %v75_v46  ;;  %183 = vrot.lane.b32.xlu0 %v170_v43, %s5163_s20 }
  0xe9   :  { %302 = vrot.lane.b32.xlu1 %v289_v44, %s5164_s10 }
  0xea   :  { %v172_v52 = vpop.permute.xlu0 %171  ;;  %v5761_v53 = vpop.permute.xlu1 %173 }
  0xeb   :  { %201 = vst.msk [vmem:[#allocation2 + $0x30] sm:$0x38] %vm200_vm14, %v172_v52  ;;  %v186_v58 = vsel %vm185_vm10, %v172_v52, %v5761_v53  ;;  %v1071_v59 = vld [vmem:[#allocation2 + $0x178] sm:$0x7]  ;;  %v1070_v61 = vld [vmem:[#allocation2 + $0x170] sm:$0x7] }
  0xec   :  { %202 = vst [vmem:[#allocation2 + $0x38] sm:$0x38] %v186_v58  ;;  %423 = vrot.lane.b32.xlu0 %v410_v48, %s5165_s27  ;;  %v1099_v63 = vpack.c.bf16 %v1071_v59, %v1057_v56  ;;  %v1098_v1 = vpack.c.bf16 %v1070_v61, %v1056_v60  ;;  %vm440_vm14 = vcmask 1044033   ;;  %s5179_s27 = smov 94  }
  0xed   :  { %522 = vrot.lane.b32.xlu1 %v4875_v49, %s5166_s28  ;;  %s5180_s28 = smov 80  }
  0xee   :  { %v291_v23 = vpop.permute.xlu0 %290  ;;  %v5770_v3 = vpop.permute.xlu1 %292  ;;  %v1149_v6 = vand.u32 %v5647_v21, %v1099_v63  ;;  %v1146_v57 = vand.u32 %v5647_v21, %v1098_v1 }
  0xef   :  { %320 = vst.msk [vmem:[#allocation2 + $0x30] sm:$0xc0] %vm319_vm11, %v291_v23  ;;  %v305_v9 = vsel %vm304_vm2, %v291_v23, %v5770_v3  ;;  %vm539_vm11 = vcmask 1047108  }
  0xf0   :  { %330 = vst.msk [vmem:[#allocation2 + $0xa0] sm:$0x1] %vm329_vm12, %v291_v23  ;;  %321 = vst [vmem:[#allocation2 + $0xa8] ss:$-108 sps:$4 sm:$0xc1] %v305_v9   ;;  %641 = vrot.lane.b32.xlu0 %v628_v62, %s5167_s11  ;;  %1263 = vmatprep.subr.bf16.mxu0 %v1149_v6  ;;  %vm524_vm12 = vcmask 334848  }
  0xf1   :  { %769 = vrot.lane.b32.xlu1 %v755_v4, %s5168_s15  ;;  %1264 = vmatpush1.bf16.msra.mxu0 %v1146_v57  ;;  %s5181_s11 = smov 79  }
  0xf2   :  { %v412_v13 = vpop.permute.xlu0 %411  ;;  %v5783_v14 = vpop.permute.xlu1 %413 }
  0xf3   :  { %441 = vst.msk [vmem:[#allocation2 + $0xa0] sm:$0xe] %vm440_vm14, %v412_v13  ;;  %v426_v16 = vsel %vm425_vm5, %v412_v13, %v5783_v14  ;;  %vm658_vm14 = vcmask 1048135  }
  0xf4   :  { %442 = vst [vmem:[#allocation2 + $0xa8] sm:$0xe] %v426_v16  ;;  %771 = vrot.lane.b32.xlu0 %v756_v11, %s5168_s15  ;;  %4379 = vmatmul.mubr.msk.bf16.vlgmr.msra.gmra.mrb[4].mxu0 %vm1125_vm15, %v5675_v7  ;;  %s5183_s15 = smov 78  }
  0xf5   :  { %890 = vrot.lane.b32.xlu1 %v876_v12, %s5169_s26  ;;  %1379 = vmatprep.mubr.bf16.mxu0 %v7662_v20 }
  0xf6   :  { %v511_v0 = vpop.permute.xlu0 %510  ;;  %v5792_v17 = vpop.permute.xlu1 %512  ;;  %v1030_v42 = vld [vmem:[#allocation2 + $0x30] sm:$0xff] }
  0xf7   :  { %540 = vst.msk [vmem:[#allocation2 + $0xa0] sm:$0x70] %vm539_vm11, %v511_v0  ;;  %v525_v47 = vsel %vm524_vm12, %v511_v0, %v5792_v17  ;;  %vm735_vm11 = vcmask 585730   ;;  %v1031_v39 = vld [vmem:[#allocation2 + $0x38] sm:$0xff] }
  0xf8   :  { %541 = vst [vmem:[#allocation2 + $0xa8] sm:$0x70] %v525_v47  ;;  %892 = vrot.lane.b32.xlu0 %v877_v18, %s5169_s26  ;;  %s5185_s26 = smov 62  }
  0xf9   :  { %994 = vrot.lane.b32.xlu1 %v4375_v22, %s5170_s22 }
  0xfa   :  { %v630_v26 = vpop.permute.xlu0 %629  ;;  %v5801_v27 = vpop.permute.xlu1 %631 }
  0xfb   :  { %659 = vst.msk [vmem:[#allocation2 + $0xa0] sm:$0x80] %vm658_vm14, %v630_v26  ;;  %v644_v35 = vsel %vm643_vm1, %v630_v26, %v5801_v27  ;;  %vm856_vm14 = vcmask 588805  }
  0xfc   :  { %669 = vst.msk [vmem:[#allocation2 + $0x110] sm:$0x3] %vm668_vm9, %v630_v26  ;;  %660 = vst [vmem:[#allocation2 + $0x118] ss:$-108 sps:$4 sm:$0x83] %v644_v35   ;;  %996 = vrot.lane.b32.xlu0 %v981_v15, %s5170_s22  ;;  %vm773_vm9 = vcmask 97280  }
  0xfd   :  { %1112 = vperm.xlu1 %4817, %v1108_v24  }
  0xfe   :  { %v713_v29 = vpop.permute.xlu0 %712  ;;  %v758_v31 = vpop.permute.xlu1 %757 }
  0xff   :  { %v721_v32 = vsel %vm714_vm6, %v5709_v19, %v713_v29  ;;  %vm910_vm6 = vcmask 1048133  }
 0x100   :  { %736 = vst.msk [vmem:[#allocation2 + $0x110] sm:$0x1c] %vm735_vm11, %v721_v32  ;;  %1117 = vperm.xlu0 %4818, %v1109_v28   ;;  %vm894_vm11 = vcmask 89088  }
 0x101   :  { %790 = vst.msk [vmem:[#allocation2 + $0x110] sm:$0x1c] %vm789_vm3, %v758_v31  ;;  %vm998_vm3 = vcmask 80896  }
 0x102   :  { %v5814_v33 = vpop.permute.xlu0 %759  ;;  %v834_v34 = vpop.permute.xlu1 %833  ;;  %v1044_v36 = vld [vmem:[#allocation2 + $0xa0] sm:$0xff] }
 0x103   :  { %v774_v37 = vsel %vm773_vm9, %v758_v31, %v5814_v33  ;;  %v842_v38 = vsel %vm835_vm7, %v5717_v25, %v834_v34  ;;  %v1045_v40 = vld [vmem:[#allocation2 + $0xa8] sm:$0xff]  ;;  %v1086_v51 = vpack.c.bf16 %v1044_v36, %v1030_v42  ;;  %vm208_vm7 = vcmask 128003  }
 0x104   :  { %791 = vst [vmem:[#allocation2 + $0x118] sm:$0x1c] %v774_v37  ;;  %857 = vst.msk [vmem:[#allocation2 + $0x110] sm:$0xe0] %vm856_vm14, %v842_v38  ;;  %v1087_v19 = vpack.c.bf16 %v1045_v40, %v1031_v39  ;;  %vm448_vm14 = vcmask 125953  }
 0x106   :  { %v879_v43 = vpop.permute.xlu0 %878  ;;  %v5820_v44 = vpop.permute.xlu1 %880  ;;  %1304 = vmatprep.subr.bf16.mxu1 %v1087_v19 }
 0x107   :  { %911 = vst.msk [vmem:[#allocation2 + $0x110] sm:$0xe0] %vm910_vm6, %v879_v43  ;;  %v895_v41 = vsel %vm894_vm11, %v879_v43, %v5820_v44  ;;  %1305 = vmatpush1.bf16.msra.mxu1 %v1086_v51 }
 0x108   :  { %912 = vst [vmem:[#allocation2 + $0x118] sm:$0xe0] %v895_v41 }
 0x10a   :  { %v947_v25 = vpop.permute.xlu0 %946  ;;  %v983_v45 = vpop.permute.xlu1 %982 }
 0x10b   :  { %v955_v46 = vsel %vm948_vm8, %v5731_v54, %v947_v25  ;;  %vm327_vm8 = vcmask 130054  }
 0x10c   :  { %969 = vst.msk [vmem:[#allocation2 + $0x180] sm:$0x7] %vm46_vm0, %v955_v46  ;;  %vm97_vm0 = vcmask 124928  }
 0x10d   :  { %1014 = vst.msk [vmem:[#allocation2 + $0x180] sm:$0x7] %vm89_vm4, %v983_v45  ;;  %vm337_vm4 = vcmask 122880  }
 0x10e   :  { %v5828_v48 = vpop.permute.xlu0 %984  ;;  %v65_v49 = vpop.permute.xlu1 %64  ;;  %v1058_v62 = vld [vmem:[#allocation2 + $0x110] sm:$0xff] }
 0x10f   :  { %v999_v50 = vsel %vm998_vm3, %v983_v45, %v5828_v48  ;;  %v76_v52 = vsel %vm74_vm13, %v5748_v5, %v65_v49  ;;  %v1059_v1 = vld [vmem:[#allocation2 + $0x118] sm:$0xff] }
 0x110   :  { %1015 = vst [vmem:[#allocation2 + $0x188] sm:$0x7] %v999_v50  ;;  %92 = vst [vmem:[#allocation2 + $0x40] sm:$0x7] %v76_v52 }
 0x112   :  { %v5834_v55 = vpop.permute.xlu0 %66  ;;  %v176_v56 = vpop.permute.xlu1 %175 }
 0x113   :  { %v77_v54 = vsel %vm74_vm13, %v65_v49, %v5834_v55  ;;  %v187_v58 = vsel %vm185_vm10, %v5761_v53, %v176_v56 }
 0x114   :  { %93 = vst [vmem:[#allocation2 + $0x48] sm:$0x7] %v77_v54  ;;  %203 = vst [vmem:[#allocation2 + $0x40] sm:$0x38] %v187_v58  ;;  %v1072_v59 = vld [vmem:[#allocation2 + $0x180] sm:$0x7] }
 0x115   :  { %v1100_v4 = vpack.c.bf16 %v1072_v59, %v1058_v62 }
 0x116   :  { %v5840_v60 = vpop.permute.xlu0 %177  ;;  %v295_v61 = vpop.permute.xlu1 %294 }
 0x117   :  { %v188_v5 = vsel %vm185_vm10, %v176_v56, %v5840_v60  ;;  %v306_v63 = vsel %vm304_vm2, %v5770_v3, %v295_v61  ;;  %v1073_v2 = vld [vmem:[#allocation2 + $0x188] sm:$0x7]  ;;  %v1152_v11 = vand.u32 %v5647_v21, %v1100_v4 }
 0x118   :  { %204 = vst [vmem:[#allocation2 + $0x48] sm:$0x38] %v188_v5  ;;  %322 = vst [vmem:[#allocation2 + $0xb0] ss:$-108 sps:$4 sm:$0xc1] %v306_v63   ;;  %v1101_v23 = vpack.c.bf16 %v1073_v2, %v1059_v1 }
 0x11a   :  { %v5846_v53 = vpop.permute.xlu0 %296  ;;  %v416_v6 = vpop.permute.xlu1 %415  ;;  %v1155_v57 = vand.u32 %v5647_v21, %v1101_v23 }
 0x11b   :  { %v307_v8 = vsel %vm304_vm2, %v295_v61, %v5846_v53  ;;  %v427_v9 = vsel %vm425_vm5, %v5783_v14, %v416_v6 }
 0x11c   :  { %323 = vst [vmem:[#allocation2 + $0xb8] ss:$-108 sps:$4 sm:$0xc1] %v307_v8   ;;  %443 = vst [vmem:[#allocation2 + $0xb0] sm:$0xe] %v427_v9  ;;  %1306 = vmatprep.subr.bf16.mxu1 %v1155_v57 }
 0x11d   :  { %1307 = vmatpush1.bf16.msra.mxu1 %v1152_v11 }
 0x11e   :  { %v5854_v3 = vpop.permute.xlu0 %417  ;;  %v515_v30 = vpop.permute.xlu1 %514 }
 0x11f   :  { %v428_v12 = vsel %vm425_vm5, %v416_v6, %v5854_v3  ;;  %v526_v13 = vsel %vm524_vm12, %v5792_v17, %v515_v30  ;;  %v1032_v38 = vld [vmem:[#allocation2 + $0x40] sm:$0xff] }
 0x120   :  { %444 = vst [vmem:[#allocation2 + $0xb8] sm:$0xe] %v428_v12  ;;  %542 = vst [vmem:[#allocation2 + $0xb0] sm:$0x70] %v526_v13  ;;  %4380 = vmatmul.mubr.msk.bf16.vlgmr.msra.gmra.mrb[4].mxu1 %vm1125_vm15, %v5675_v7 }
 0x121   :  { %1422 = vmatprep.mubr.bf16.mxu1 %v7662_v20 }
 0x122   :  { %v5863_v14 = vpop.permute.xlu0 %516  ;;  %v634_v16 = vpop.permute.xlu1 %633 }
 0x123   :  { %v527_v18 = vsel %vm524_vm12, %v515_v30, %v5863_v14  ;;  %v645_v0 = vsel %vm643_vm1, %v5801_v27, %v634_v16  ;;  %v1033_v34 = vld [vmem:[#allocation2 + $0x48] sm:$0xff] }
 0x124   :  { %543 = vst [vmem:[#allocation2 + $0xb8] sm:$0x70] %v527_v18  ;;  %661 = vst [vmem:[#allocation2 + $0x120] ss:$-108 sps:$4 sm:$0x83] %v645_v0  }
 0x126   :  { %v5869_v22 = vpop.permute.xlu0 %635  ;;  %v762_v17 = vpop.permute.xlu1 %761 }
 0x127   :  { %v646_v47 = vsel %vm643_vm1, %v634_v16, %v5869_v22  ;;  %v775_v15 = vsel %vm773_vm9, %v5814_v33, %v762_v17 }
 0x128   :  { %662 = vst [vmem:[#allocation2 + $0x128] ss:$-108 sps:$4 sm:$0x83] %v646_v47   ;;  %792 = vst [vmem:[#allocation2 + $0x120] sm:$0x1c] %v775_v15 }
 0x12a   :  { %v5875_v26 = vpop.permute.xlu0 %763  ;;  %v883_v24 = vpop.permute.xlu1 %882 }
 0x12b   :  { %v776_v35 = vsel %vm773_vm9, %v762_v17, %v5875_v26  ;;  %v896_v27 = vsel %vm894_vm11, %v5820_v44, %v883_v24  ;;  %v1046_v31 = vld [vmem:[#allocation2 + $0xb0] sm:$0xff] }
 0x12c   :  { %793 = vst [vmem:[#allocation2 + $0x128] sm:$0x1c] %v776_v35  ;;  %913 = vst [vmem:[#allocation2 + $0x120] sm:$0xe0] %v896_v27  ;;  %v1088_v39 = vpack.c.bf16 %v1046_v31, %v1032_v38 }
 0x12e   :  { %v5881_v28 = vpop.permute.xlu0 %884  ;;  %v987_v29 = vpop.permute.xlu1 %986 }
 0x12f   :  { %v897_v32 = vsel %vm894_vm11, %v883_v24, %v5881_v28  ;;  %v1000_v33 = vsel %vm998_vm3, %v5828_v48, %v987_v29  ;;  %v1047_v36 = vld [vmem:[#allocation2 + $0xb8] sm:$0xff] }
 0x130   :  { %914 = vst [vmem:[#allocation2 + $0x128] sm:$0xe0] %v897_v32  ;;  %1016 = vst [vmem:[#allocation2 + $0x190] sm:$0x7] %v1000_v33  ;;  %v1089_v37 = vpack.c.bf16 %v1047_v36, %v1033_v34 }
 0x132   :  { %v5887_v40 = vpop.permute.xlu0 %988  ;;  %v69_v19 = vpop.permute.xlu1 %68  ;;  %1347 = vmatprep.subr.bf16.mxu0 %v1089_v37 }
 0x133   :  { %v1001_v42 = vsel %vm998_vm3, %v987_v29, %v5887_v40  ;;  %v78_v51 = vsel %vm74_vm13, %v5834_v55, %v69_v19  ;;  %1348 = vmatpush1.bf16.msra.mxu0 %v1088_v39  ;;  %v1060_v49 = vld [vmem:[#allocation2 + $0x120] sm:$0xff] }
 0x134   :  { %1017 = vst [vmem:[#allocation2 + $0x198] sm:$0x7] %v1001_v42  ;;  %94 = vst [vmem:[#allocation2 + $0x50] sm:$0x7] %v78_v51 }
 0x136   :  { %v5893_v43 = vpop.permute.xlu0 %70  ;;  %v180_v44 = vpop.permute.xlu1 %179 }
 0x137   :  { %v79_v41 = vsel %vm74_vm13, %v69_v19, %v5893_v43  ;;  %v189_v25 = vsel %vm185_vm10, %v5840_v60, %v180_v44  ;;  %v1074_v45 = vld [vmem:[#allocation2 + $0x190] sm:$0x7]  ;;  %v1061_v55 = vld [vmem:[#allocation2 + $0x128] sm:$0xff] }
 0x138   :  { %95 = vst [vmem:[#allocation2 + $0x58] sm:$0x7] %v79_v41  ;;  %205 = vst [vmem:[#allocation2 + $0x50] sm:$0x38] %v189_v25  ;;  %v1102_v54 = vpack.c.bf16 %v1074_v45, %v1060_v49 }
 0x13a   :  { %v5899_v46 = vpop.permute.xlu0 %181  ;;  %v299_v48 = vpop.permute.xlu1 %298  ;;  %v1158_v63 = vand.u32 %v5647_v21, %v1102_v54 }
 0x13b   :  { %v190_v50 = vsel %vm185_vm10, %v180_v44, %v5899_v46  ;;  %v308_v52 = vsel %vm304_vm2, %v5846_v53, %v299_v48  ;;  %v1075_v56 = vld [vmem:[#allocation2 + $0x198] sm:$0x7] }
 0x13c   :  { %206 = vst [vmem:[#allocation2 + $0x58] sm:$0x38] %v190_v50  ;;  %324 = vst [vmem:[#allocation2 + $0xc0] ss:$-108 sps:$4 sm:$0xc1] %v308_v52   ;;  %v1103_v58 = vpack.c.bf16 %v1075_v56, %v1061_v55 }
 0x13e   :  { %v5905_v59 = vpop.permute.xlu0 %300  ;;  %v420_v60 = vpop.permute.xlu1 %419  ;;  %v1161_v61 = vand.u32 %v5647_v21, %v1103_v58 }
 0x13f   :  { %v309_v62 = vsel %vm304_vm2, %v299_v48, %v5905_v59  ;;  %v429_v5 = vsel %vm425_vm5, %v5854_v3, %v420_v60 }
 0x140   :  { %325 = vst [vmem:[#allocation2 + $0xc8] ss:$-108 sps:$4 sm:$0xc1] %v309_v62   ;;  %445 = vst [vmem:[#allocation2 + $0xc0] sm:$0xe] %v429_v5  ;;  %1349 = vmatprep.subr.bf16.mxu0 %v1161_v61 }
 0x141   :  { %1350 = vmatpush1.bf16.msra.mxu0 %v1158_v63 }
 0x142   :  { %v5913_v1 = vpop.permute.xlu0 %421  ;;  %v519_v2 = vpop.permute.xlu1 %518 }
 0x143   :  { %v430_v4 = vsel %vm425_vm5, %v420_v60, %v5913_v1  ;;  %v528_v23 = vsel %vm524_vm12, %v5863_v14, %v519_v2  ;;  %v1034_v35 = vld [vmem:[#allocation2 + $0x50] sm:$0xff] }
 0x144   :  { %446 = vst [vmem:[#allocation2 + $0xc8] sm:$0xe] %v430_v4  ;;  %544 = vst [vmem:[#allocation2 + $0xc0] sm:$0x70] %v528_v23  ;;  %4381 = vmatmul.mubr.msk.bf16.vlgmr.msra.gmra.mrb[8].mxu0 %vm1125_vm15, %v5675_v7 }
 0x145   :  { %1465 = vmatprep.mubr.bf16.mxu0 %v7662_v20  ;;  %v6554_v20 = vld [vmem:[%s7652_s5 + $0x3f8] ss:$12 sps:$4 sm:$0xff]  }
 0x146   :  { %v5922_v53 = vpop.permute.xlu0 %520  ;;  %7757 = vst [vmem:[#allocation12_spill] sm:$0xff] %v6554_v20 }
 0x147   :  { %v529_v6 = vsel %vm524_vm12, %v519_v2, %v5922_v53  ;;  %v638_v57 = vpop.permute.xlu1 %637  ;;  %v1035_v47 = vld [vmem:[#allocation2 + $0x58] sm:$0xff] }
 0x148   :  { %545 = vst [vmem:[#allocation2 + $0xc8] sm:$0x70] %v529_v6  ;;  %v647_v8 = vsel %vm643_vm1, %v5869_v22, %v638_v57 }
 0x149   :  { %663 = vst [vmem:[#allocation2 + $0x130] ss:$-108 sps:$4 sm:$0x83] %v647_v8  }
 0x14a   :  { %v5928_v9 = vpop.permute.xlu0 %639 }
 0x14b   :  { %v648_v11 = vsel %vm643_vm1, %v638_v57, %v5928_v9  ;;  %v766_v3 = vpop.permute.xlu1 %765 }
 0x14c   :  { %664 = vst [vmem:[#allocation2 + $0x138] ss:$-108 sps:$4 sm:$0x83] %v648_v11   ;;  %v777_v30 = vsel %vm773_vm9, %v5875_v26, %v766_v3 }
 0x14d   :  { %794 = vst [vmem:[#allocation2 + $0x130] sm:$0x1c] %v777_v30 }
 0x14e   :  { %v5934_v12 = vpop.permute.xlu0 %767 }
 0x14f   :  { %v778_v13 = vsel %vm773_vm9, %v766_v3, %v5934_v12  ;;  %v887_v14 = vpop.permute.xlu1 %886 }
 0x150   :  { %795 = vst [vmem:[#allocation2 + $0x138] sm:$0x1c] %v778_v13  ;;  %v898_v16 = vsel %vm894_vm11, %v5881_v28, %v887_v14  ;;  %v1048_v0 = vld [vmem:[#allocation2 + $0xc0] sm:$0xff] }
 0x151   :  { %915 = vst [vmem:[#allocation2 + $0x130] sm:$0xe0] %v898_v16  ;;  %v1090_v27 = vpack.c.bf16 %v1048_v0, %v1034_v35 }
 0x152   :  { %v5940_v18 = vpop.permute.xlu0 %888 }
 0x153   :  { %v899_v22 = vsel %vm894_vm11, %v887_v14, %v5940_v18  ;;  %v991_v17 = vpop.permute.xlu1 %990  ;;  %v1049_v15 = vld [vmem:[#allocation2 + $0xc8] sm:$0xff] }
 0x154   :  { %916 = vst [vmem:[#allocation2 + $0x138] sm:$0xe0] %v899_v22  ;;  %v1002_v26 = vsel %vm998_vm3, %v5887_v40, %v991_v17  ;;  %v1091_v24 = vpack.c.bf16 %v1049_v15, %v1035_v47 }
 0x155   :  { %1018 = vst [vmem:[#allocation2 + $0x1a0] sm:$0x7] %v1002_v26 }
 0x156   :  { %v5946_v28 = vpop.permute.xlu0 %992  ;;  %1390 = vmatprep.subr.bf16.mxu1 %v1091_v24 }
 0x157   :  { %v1003_v29 = vsel %vm998_vm3, %v991_v17, %v5946_v28  ;;  %v73_v31 = vpop.permute.xlu1 %72  ;;  %1391 = vmatpush1.bf16.msra.mxu1 %v1090_v27 }
 0x158   :  { %1019 = vst [vmem:[#allocation2 + $0x1a8] sm:$0x7] %v1003_v29  ;;  %v80_v32 = vsel %vm74_vm13, %v5893_v43, %v73_v31  ;;  %98 = vst.msk [vmem:[#allocation2 + $0x68] sm:$0x7] %vm97_vm0, %v73_v31  ;;  %vm547_vm13 = vcmask 129028   ;;  %v1062_v40 = vld [vmem:[#allocation2 + $0x130] sm:$0xff] }
 0x159   :  { %96 = vst [vmem:[#allocation2 + $0x60] sm:$0x7] %v80_v32 }
 0x15a   :  { %v184_v33 = vpop.permute.xlu0 %183 }
 0x15b   :  { %v191_v34 = vsel %vm185_vm10, %v5899_v46, %v184_v33  ;;  %209 = vst.msk [vmem:[#allocation2 + $0x68] sm:$0x38] %vm208_vm7, %v184_v33  ;;  %v303_v36 = vpop.permute.xlu1 %302  ;;  %v1063_v51 = vld [vmem:[#allocation2 + $0x138] sm:$0xff]  ;;  %vm676_vm10 = vcmask 123904  }
 0x15c   :  { %207 = vst [vmem:[#allocation2 + $0x60] sm:$0x38] %v191_v34  ;;  %v310_v37 = vsel %vm304_vm2, %v5905_v59, %v303_v36  ;;  %328 = vst.msk [vmem:[#allocation2 + $0x68] sm:$0xc0] %vm327_vm8, %v303_v36  ;;  %v1076_v38 = vld [vmem:[#allocation2 + $0x1a0] sm:$0x7] }
 0x15d   :  { %338 = vst.msk [vmem:[#allocation2 + $0xd8] sm:$0x1] %vm337_vm4, %v303_v36  ;;  %326 = vst [vmem:[#allocation2 + $0xd0] ss:$-108 sps:$4 sm:$0xc1] %v310_v37   ;;  %v1104_v44 = vpack.c.bf16 %v1076_v38, %v1062_v40  ;;  %vm666_vm2 = vcmask 130055  }
 0x15e   :  { %v424_v39 = vpop.permute.xlu0 %423 }
 0x15f   :  { %v431_v19 = vsel %vm425_vm5, %v5913_v1, %v424_v39  ;;  %449 = vst.msk [vmem:[#allocation2 + $0xd8] sm:$0xe] %vm448_vm14, %v424_v39  ;;  %v523_v42 = vpop.permute.xlu1 %522  ;;  %v1077_v43 = vld [vmem:[#allocation2 + $0x1a8] sm:$0x7]  ;;  %v1164_v50 = vand.u32 %v5647_v21, %v1104_v44  ;;  %vm797_vm5 = vcmask 126978  }
 0x160   :  { %447 = vst [vmem:[#allocation2 + $0xd0] sm:$0xe] %v431_v19  ;;  %v530_v41 = vsel %vm524_vm12, %v5922_v53, %v523_v42  ;;  %548 = vst.msk [vmem:[#allocation2 + $0xd8] sm:$0x70] %vm547_vm13, %v523_v42  ;;  %v1105_v25 = vpack.c.bf16 %v1077_v43, %v1063_v51 }
 0x161   :  { %546 = vst [vmem:[#allocation2 + $0xd0] sm:$0x70] %v530_v41 }
 0x162   :  { %v642_v45 = vpop.permute.xlu0 %641  ;;  %v1167_v46 = vand.u32 %v5647_v21, %v1105_v25 }
 0x163   :  { %v649_v48 = vsel %vm643_vm1, %v5928_v9, %v642_v45  ;;  %667 = vst.msk [vmem:[#allocation2 + $0xd8] sm:$0x80] %vm666_vm2, %v642_v45  ;;  %v770_v49 = vpop.permute.xlu1 %769  ;;  %v1037_v59 = vld [vmem:[#allocation2 + $0x68] sm:$0xff]  ;;  %vm918_vm1 = vcmask 130053  }
 0x164   :  { %677 = vst.msk [vmem:[#allocation2 + $0x148] sm:$0x3] %vm676_vm10, %v642_v45  ;;  %665 = vst [vmem:[#allocation2 + $0x140] ss:$-108 sps:$4 sm:$0x83] %v649_v48   ;;  %v779_v52 = vsel %vm773_vm9, %v5934_v12, %v770_v49  ;;  %1392 = vmatprep.subr.bf16.mxu1 %v1167_v46  ;;  %v1036_v1 = vld [vmem:[#allocation2 + $0x60] sm:$0xff] }
 0x165   :  { %796 = vst [vmem:[#allocation2 + $0x140] sm:$0x1c] %v779_v52  ;;  %1393 = vmatpush1.bf16.msra.mxu1 %v1164_v50 }
 0x166   :  { %v772_v55 = vpop.permute.xlu0 %771 }
 0x167   :  { %v780_v56 = vsel %vm773_vm9, %v770_v49, %v772_v55  ;;  %v891_v54 = vpop.permute.xlu1 %890 }
 0x168   :  { %798 = vst.msk [vmem:[#allocation2 + $0x148] sm:$0x1c] %vm797_vm5, %v780_v56  ;;  %v900_v58 = vsel %vm894_vm11, %v5940_v18, %v891_v54  ;;  %4382 = vmatmul.mubr.msk.bf16.vlgmr.msra.gmra.mrb[8].mxu1 %vm1125_vm15, %v5675_v7 }
 0x169   :  { %917 = vst [vmem:[#allocation2 + $0x140] sm:$0xe0] %v900_v58 }
 0x16a   :  { %v893_v60 = vpop.permute.xlu0 %892  ;;  %v1051_v61 = vld [vmem:[#allocation2 + $0xd8] sm:$0xff] }
 0x16b   :  { %v901_v62 = vsel %vm894_vm11, %v891_v54, %v893_v60  ;;  %v995_v5 = vpop.permute.xlu1 %994  ;;  %v1093_v63 = vpack.c.bf16 %v1051_v61, %v1037_v59  ;;  %v1050_v2 = vld [vmem:[#allocation2 + $0xd0] sm:$0xff]  ;;  %v4877_v61 = vld [vmem:[%s7652_s5] ss:$12 sps:$4 sm:$0xff]  }
 0x16c   :  { %919 = vst.msk [vmem:[#allocation2 + $0x148] sm:$0xe0] %vm918_vm1, %v901_v62  ;;  %v1004_v4 = vsel %vm998_vm3, %v5946_v28, %v995_v5  ;;  %v1092_v23 = vpack.c.bf16 %v1050_v2, %v1036_v1  ;;  %v4879_v62 = vld [vmem:[%s7652_s5 + $0x4] ss:$12 sps:$4 sm:$0xff]   ;;  %v4885_v1 = vld [vmem:[%s7652_s5 + $0x34] ss:$12 sps:$4 sm:$0xff]  }
 0x16d   :  { %1020 = vst [vmem:[#allocation2 + $0x1b0] sm:$0x7] %v1004_v4  ;;  %1433 = vmatprep.subr.bf16.mxu0 %v1093_v63  ;;  %2710 = vmatprep.subr.bf16.mxu1 %v4879_v62  ;;  %v4880_v63 = vld [vmem:[%s7652_s5 + $0x18] ss:$12 sps:$4 sm:$0xff]   ;;  %v4883_v2 = vld [vmem:[%s7652_s5 + $0x30] ss:$12 sps:$4 sm:$0xff]  }
 0x16e   :  { %v997_v53 = vpop.permute.xlu0 %996  ;;  %1434 = vmatpush1.bf16.msra.mxu0 %v1092_v23  ;;  %2711 = vmatpush1.bf16.msra.mxu1 %v4877_v61  ;;  %v4888_v4 = vld [vmem:[%s7652_s5 + $0x4c] ss:$12 sps:$4 sm:$0xff]   ;;  %v4886_v23 = vld [vmem:[%s7652_s5 + $0x48] ss:$12 sps:$4 sm:$0xff]   ;;  %v6152_v61 = vld [vmem:[%s7652_s5 + $0x150] ss:$12 sps:$4 sm:$0xff]  }
 0x16f   :  { %v1005_v6 = vsel %vm998_vm3, %v995_v5, %v997_v53  ;;  %v4882_v5 = vld [vmem:[%s7652_s5 + $0x1c] ss:$12 sps:$4 sm:$0xff]   ;;  %v4891_v53 = vld [vmem:[%s7652_s5 + $0x64] ss:$12 sps:$4 sm:$0xff]   ;;  %v6157_v62 = vld [vmem:[%s7652_s5 + $0x154] ss:$12 sps:$4 sm:$0xff]  }
 0x170   :  { %1021 = vst.msk [vmem:[#allocation2 + $0x1b8] sm:$0x7] %vm97_vm0, %v1005_v6  ;;  %v1064_v9 = vld [vmem:[#allocation2 + $0x140] sm:$0xff]  ;;  %2712 = vmatprep.subr.bf16.mxu1 %v4882_v5  ;;  %v4904_v6 = vld [vmem:[%s7652_s5 + $0xc8] ss:$12 sps:$4 sm:$0xff]   ;;  %vm7740_vm0 = vcmask 1039360  }
 0x171   :  { %v6162_v5 = vld [vmem:[%s7652_s5 + $0x158] ss:$12 sps:$4 sm:$0xff]   ;;  %vm7742_vm8 = vmmov %vm7740_vm0 }
 0x172   :  { %2713 = vmatpush1.bf16.msra.mxu1 %v4880_v63  ;;  %vm7747_vm10 = vmmov %vm7740_vm0 }
 0x173   :  { %v1065_v8 = vld [vmem:[#allocation2 + $0x148] sm:$0xff]  ;;  %2714 = vmatprep.subr.bf16.mxu1 %v4885_v1  ;;  %v6167_v1 = vld [vmem:[%s7652_s5 + $0x98] ss:$12 sps:$4 sm:$0xff]   ;;  %vm7748_vm5 = vmmov %vm7740_vm0 }
 0x174   :  { %v1078_v57 = vld [vmem:[#allocation2 + $0x1b0] sm:$0x7]  ;;  %vm7810_vm1 = vmmov %vm7740_vm0 }
 0x175   :  { %v1106_v3 = vpack.c.bf16 %v1078_v57, %v1064_v9  ;;  %v4905_v57 = vld [vmem:[%s7652_s5 + $0x8] ss:$12 sps:$4 sm:$0xff]  }
 0x176   :  { %2715 = vmatpush1.bf16.msra.mxu1 %v4883_v2  ;;  %v4894_v9 = vld [vmem:[%s7652_s5 + $0x7c] ss:$12 sps:$4 sm:$0xff]  }
 0x177   :  { %v1079_v11 = vld [vmem:[#allocation2 + $0x1b8] sm:$0x7]  ;;  %v1170_v13 = vand.u32 %v5647_v21, %v1106_v3  ;;  %2716 = vmatprep.subr.bf16.mxu1 %v4888_v4  ;;  %v4910_v3 = vld [vmem:[%s7652_s5 + $0x20] ss:$12 sps:$4 sm:$0xff]  }
 0x178   :  { %v1107_v30 = vpack.c.bf16 %v1079_v11, %v1065_v8  ;;  %v4889_v8 = vld [vmem:[%s7652_s5 + $0x60] ss:$12 sps:$4 sm:$0xff]  }
 0x179   :  { %v4909_v11 = vld [vmem:[%s7652_s5 + $0xe0] ss:$12 sps:$4 sm:$0xff]  }
 0x17a   :  { %v1173_v12 = vand.u32 %v5647_v21, %v1107_v30  ;;  %2717 = vmatpush1.bf16.msra.mxu1 %v4886_v23  ;;  %v4892_v30 = vld [vmem:[%s7652_s5 + $0x78] ss:$12 sps:$4 sm:$0xff]  }
 0x17b   :  { %2718 = vmatprep.subr.bf16.mxu1 %v4891_v53 }
 0x17c   :  { %1435 = vmatprep.subr.bf16.mxu0 %v1173_v12  ;;  %v5981_v14 = vpop.permute.xlu1 %1112  ;;  %v4914_v12 = vld [vmem:[%s7652_s5 + $0xf8] ss:$12 sps:$4 sm:$0xff]  }
 0x17d   :  { %1436 = vmatpush1.bf16.msra.mxu0 %v1170_v13  ;;  %v4915_v13 = vld [vmem:[%s7652_s5 + $0x38] ss:$12 sps:$4 sm:$0xff]  }
 0x17e   :  { %4599 = vmatprep.subr.bf16.mxu0 %v4904_v6  ;;  %2719 = vmatpush1.bf16.msra.mxu1 %v4889_v8 }
 0x17f   :  { %v5983_v18 = vpop.permute.xlu0 %1117  ;;  %2720 = vmatprep.subr.bf16.mxu1 %v4894_v9  ;;  %v6179_v9 = vld [vmem:[%s7652_s5 + $0x16c] ss:$12 sps:$4 sm:$0xff]  }
 0x180   :  { %4383 = vmatmul.mubr.msk.bf16.vlgmr.msra.gmra.mrb[12].mxu0 %vm1125_vm15, %v5675_v7  ;;  %vm7735_vm15 = vcmask 801792  }
 0x181   :  { %4600 = vmatpush3.bf16.msra.mxu0 %v4905_v57  ;;  %vm7736_vm9 = vmmov %vm7735_vm15 }
 0x182   :  { %4601 = vmatprep.subr.bf16.mxu0 %v4909_v11  ;;  %2721 = vmatpush1.bf16.msra.mxu1 %v4892_v30  ;;  %v6184_v11 = vld [vmem:[%s7652_s5 + $0x170] ss:$12 sps:$4 sm:$0xff]   ;;  %vm7737_vm6 = vmmov %vm7736_vm9 }
 0x183   :  { %vm7738_vm11 = vmmov %vm7737_vm6 }
 0x184   :  { %vm7739_vm3 = vmmov %vm7737_vm6 }
 0x185   :  { %4602 = vmatpush3.bf16.msra.mxu0 %v4910_v3  ;;  %vm7741_vm7 = vmmov %vm7739_vm3 }
 0x186   :  { %4603 = vmatprep.subr.bf16.mxu0 %v4914_v12  ;;  %v6190_v12 = vld [vmem:[%s7652_s5 + $0x168] ss:$12 sps:$4 sm:$0xff]   ;;  %vm7743_vm4 = vmmov %vm7739_vm3 }
 0x187   :  { %vm7744_vm14 = vmmov %vm7739_vm3 }
 0x188   :  { %vm7745_vm13 = vmmov %vm7739_vm3 }
 0x189   :  { %4604 = vmatpush3.bf16.msra.mxu0 %v4915_v13  ;;  %v6195_v13 = vld [vmem:[%s7652_s5 + $0xb0] ss:$12 sps:$4 sm:$0xff]   ;;  %vm7746_vm2 = vmmov %vm7739_vm3 }
 0x1a4   :  { %v1252_v16 = vpop.f32.mrb[0].mxu1 }
 0x1a5   :  { %v1254_v0 = vpop.f32.mrb[1].mxu1  ;;  %v1253_v22 = vadd.f32 %v1252_v16, %v5981_v14  ;;  %v4897_v16 = vld [vmem:[%s7652_s5 + $0x94] ss:$12 sps:$4 sm:$0xff]  }
 0x1a6   :  { %v1256_v17 = vpop.f32.mrb[2].mxu1  ;;  %v1255_v47 = vadd.f32 %v1254_v0, %v5981_v14  ;;  %v4919_v0 = vld [vmem:[%s7652_s5 + $0x110] ss:$12 sps:$4 sm:$0xff]   ;;  %2722 = vmatprep.subr.bf16.mxu1 %v4897_v16 }
 0x1a7   :  { %v1257_v15 = vadd.f32 %v1256_v17, %v5983_v18  ;;  %v1478_v26 = vmax.f32 %v1253_v22, 0.0  ;;  %v1209_v21 = vpop.f32.mrb[0].mxu0  ;;  %v1258_v24 = vpop.f32.mrb[3].mxu1  ;;  %4605 = vmatprep.subr.bf16.mxu0 %v4919_v0 }
 0x1a8   :  { %v1210_v35 = vadd.f32 %v1209_v21, %v5981_v14  ;;  %v1259_v7 = vadd.f32 %v1258_v24, %v5983_v18  ;;  %v1479_v27 = vmax.f32 %v1255_v47, 0.0  ;;  %v1211_v28 = vpop.f32.mrb[1].mxu0 }
 0x1a9   :  { %v1492_v29 = vmax.f32 %v1257_v15, 0.0  ;;  %v1212_v31 = vadd.f32 %v1211_v28, %v5981_v14  ;;  %v1213_v32 = vpop.f32.mrb[2].mxu0  ;;  %v4895_v15 = vld [vmem:[%s7652_s5 + $0x90] ss:$12 sps:$4 sm:$0xff]   ;;  %v4898_v28 = vld [vmem:[%s7652_s5 + $0xa8] ss:$12 sps:$4 sm:$0xff]  }
 0x1aa   :  { %v1476_v33 = vmax.f32 %v1210_v35, 0.0  ;;  %v1493_v34 = vmax.f32 %v1259_v7, 0.0  ;;  %v1214_v36 = vadd.f32 %v1213_v32, %v5983_v18  ;;  %v1215_v37 = vpop.f32.mrb[3].mxu0  ;;  %v4900_v35 = vld [vmem:[%s7652_s5 + $0xac] ss:$12 sps:$4 sm:$0xff]   ;;  %2723 = vmatpush1.bf16.msra.mxu1 %v4895_v15 }
 0x1ab   :  { %v5992_v38 = vpack.c.bf16 %v1492_v29, %v1478_v26  ;;  %v1477_v39 = vmax.f32 %v1212_v31, 0.0  ;;  %v1216_v40 = vadd.f32 %v1215_v37, %v5983_v18  ;;  %v4920_v26 = vld [vmem:[%s7652_s5 + $0x50] ss:$12 sps:$4 sm:$0xff]   ;;  %v4924_v29 = vld [vmem:[%s7652_s5 + $0x128] ss:$12 sps:$4 sm:$0xff]   ;;  %2724 = vmatprep.subr.bf16.mxu1 %v4900_v35 }
 0x1ac   :  { %v5995_v19 = vpack.c.bf16 %v1493_v34, %v1479_v27  ;;  %v1490_v42 = vmax.f32 %v1214_v36, 0.0  ;;  %v4903_v32 = vld [vmem:[%s7652_s5 + $0xc4] ss:$12 sps:$4 sm:$0xff]   ;;  %4606 = vmatpush3.bf16.msra.mxu0 %v4920_v26  ;;  %v4925_v36 = vld [vmem:[%s7652_s5 + $0x68] ss:$12 sps:$4 sm:$0xff]  }
 0x1ad   :  { %v1491_v51 = vmax.f32 %v1216_v40, 0.0  ;;  %1536 = vrot.lane.b32.xlu1 %v5992_v38, %s5155_s21  ;;  %4607 = vmatprep.subr.bf16.mxu0 %v4924_v29 }
 0x1ae   :  { %v5999_v43 = vpack.c.bf16 %v1490_v42, %v1476_v33  ;;  %1538 = vrot.lane.b32.xlu0 %v5995_v19, %s5155_s21  ;;  %v4901_v42 = vld [vmem:[%s7652_s5 + $0xc0] ss:$12 sps:$4 sm:$0xff]   ;;  %2725 = vmatpush1.bf16.msra.mxu1 %v4898_v28 }
 0x1af   :  { %v6003_v44 = vpack.c.bf16 %v1491_v51, %v1477_v39  ;;  %v4929_v51 = vld [vmem:[%s7652_s5 + $0x140] ss:$12 sps:$4 sm:$0xff]   ;;  %2726 = vmatprep.subr.bf16.mxu1 %v4903_v32 }
 0x1b0   :  { %4608 = vmatpush3.bf16.msra.mxu0 %v4925_v36 }
 0x1b1   :  { %1534 = vrot.lane.b32.xlu1 %v6003_v44, %s5155_s21  ;;  %4609 = vmatprep.subr.bf16.mxu0 %v4929_v51 }
 0x1b2   :  { %2727 = vmatpush1.bf16.msra.mxu1 %v4901_v42 }
 0x1b5   :  { %1532 = vrot.lane.b32.xlu1 %v5999_v43, %s5155_s21 }
 0x1c7   :  { %v1295_v41 = vpop.f32.mrb[4].mxu0 }
 0x1c8   :  { %v1296_v25 = vadd.f32 %v1295_v41, %v5981_v14  ;;  %v1297_v45 = vpop.f32.mrb[5].mxu0 }
 0x1c9   :  { %v1298_v46 = vadd.f32 %v1297_v45, %v5981_v14  ;;  %v1299_v48 = vpop.f32.mrb[6].mxu0  ;;  %v4930_v45 = vld [vmem:[%s7652_s5 + $0x80] ss:$12 sps:$4 sm:$0xff]  }
 0x1ca   :  { %v1300_v49 = vadd.f32 %v1299_v48, %v5983_v18  ;;  %v1301_v50 = vpop.f32.mrb[7].mxu0  ;;  %v1480_v55 = vmax.f32 %v1296_v25, 0.0  ;;  %v4908_v25 = vld [vmem:[%s7652_s5 + $0xdc] ss:$12 sps:$4 sm:$0xff]   ;;  %v4913_v48 = vld [vmem:[%s7652_s5 + $0xf4] ss:$12 sps:$4 sm:$0xff]   ;;  %4610 = vmatpush3.bf16.msra.mxu0 %v4930_v45 }
 0x1cb   :  { %v1302_v52 = vadd.f32 %v1301_v50, %v5983_v18  ;;  %v1481_v54 = vmax.f32 %v1298_v46, 0.0  ;;  %v4906_v46 = vld [vmem:[%s7652_s5 + $0xd8] ss:$12 sps:$4 sm:$0xff]   ;;  %2728 = vmatprep.subr.bf16.mxu1 %v4908_v25  ;;  %4611 = vmatprep.subr.bf16.mxu0 %v6162_v5 }
 0x1cc   :  { %v1494_v56 = vmax.f32 %v1300_v49, 0.0  ;;  %v4911_v49 = vld [vmem:[%s7652_s5 + $0xf0] ss:$12 sps:$4 sm:$0xff]   ;;  %v4918_v50 = vld [vmem:[%s7652_s5 + $0x10c] ss:$12 sps:$4 sm:$0xff]   ;;  %2729 = vmatpush1.bf16.msra.mxu1 %v4906_v46 }
 0x1cd   :  { %v1495_v58 = vmax.f32 %v1302_v52, 0.0  ;;  %2730 = vmatprep.subr.bf16.mxu1 %v4913_v48  ;;  %v4916_v52 = vld [vmem:[%s7652_s5 + $0x108] ss:$12 sps:$4 sm:$0xff]  }
 0x1ce   :  { %v6013_v59 = vpack.c.bf16 %v1494_v56, %v1480_v55  ;;  %v4923_v55 = vld [vmem:[%s7652_s5 + $0x124] ss:$12 sps:$4 sm:$0xff]   ;;  %v4921_v56 = vld [vmem:[%s7652_s5 + $0x120] ss:$12 sps:$4 sm:$0xff]   ;;  %4612 = vmatpush3.bf16.msra.mxu0 %v6167_v1 }
 0x1cf   :  { %v6015_v60 = vpack.c.bf16 %v1495_v58, %v1481_v54  ;;  %v4928_v54 = vld [vmem:[%s7652_s5 + $0x13c] ss:$12 sps:$4 sm:$0xff]   ;;  %v4926_v58 = vld [vmem:[%s7652_s5 + $0x138] ss:$12 sps:$4 sm:$0xff]   ;;  %4613 = vmatprep.subr.bf16.mxu0 %v6184_v11 }
 0x1d0   :  { %1540 = vrot.lane.b32.xlu0 %v6013_v59, %s5155_s21  ;;  %2731 = vmatpush1.bf16.msra.mxu1 %v4911_v49 }
 0x1d1   :  { %1542 = vrot.lane.b32.xlu1 %v6015_v60, %s5155_s21  ;;  %2732 = vmatprep.subr.bf16.mxu1 %v4918_v50 }
 0x1d2   :  { %4614 = vmatpush3.bf16.msra.mxu0 %v6195_v13 }
 0x1d4   :  { %2733 = vmatpush1.bf16.msra.mxu1 %v4916_v52 }
 0x1d5   :  { %2734 = vmatprep.subr.bf16.mxu1 %v4923_v55 }
 0x1d8   :  { %2735 = vmatpush1.bf16.msra.mxu1 %v4921_v56 }
 0x1d9   :  { %2736 = vmatprep.subr.bf16.mxu1 %v4928_v54 }
 0x1dc   :  { %2737 = vmatpush1.bf16.msra.mxu1 %v4926_v58 }
 0x1dd   :  { %2738 = vmatprep.subr.bf16.mxu1 %v6157_v62 }
 0x1e0   :  { %2739 = vmatpush1.bf16.msra.mxu1 %v6152_v61 }
 0x1e1   :  { %2740 = vmatprep.subr.bf16.mxu1 %v6179_v9 }
 0x1e4   :  { %2741 = vmatpush1.bf16.msra.mxu1 %v6190_v12 }
 0x1f3   :  { %v1338_v22 = vpop.f32.mrb[4].mxu1 }
 0x1f4   :  { %v1339_v17 = vadd.f32 %v1338_v22, %v5981_v14  ;;  %v1340_v47 = vpop.f32.mrb[5].mxu1 }
 0x1f5   :  { %v1341_v21 = vadd.f32 %v1340_v47, %v5981_v14  ;;  %v1342_v24 = vpop.f32.mrb[6].mxu1  ;;  %v6211_v47 = vld [vmem:[%s7652_s5 + $0x248] ss:$12 sps:$4 sm:$0xff]  }
 0x1f6   :  { %v1343_v7 = vadd.f32 %v1342_v24, %v5983_v18  ;;  %v1344_v27 = vpop.f32.mrb[7].mxu1  ;;  %v1482_v33 = vmax.f32 %v1339_v17, 0.0  ;;  %v6206_v17 = vld [vmem:[%s7652_s5 + $0x184] ss:$12 sps:$4 sm:$0xff]   ;;  %4621 = vmatprep.subr.bf16.mxu0 %v6211_v47 }
 0x1f7   :  { %v1345_v31 = vadd.f32 %v1344_v27, %v5983_v18  ;;  %v1483_v37 = vmax.f32 %v1341_v21, 0.0  ;;  %2753 = vmatprep.subr.bf16.mxu1 %v6206_v17 }
 0x1f8   :  { %v1496_v34 = vmax.f32 %v1343_v7, 0.0 }
 0x1f9   :  { %v1497_v39 = vmax.f32 %v1345_v31, 0.0 }
 0x1fa   :  { %v6106_v40 = vpack.c.bf16 %v1496_v34, %v1482_v33 }
 0x1fb   :  { %v6114_v41 = vpack.c.bf16 %v1497_v39, %v1483_v37 }
 0x217   :  { %v1381_v63 = vpop.f32.mrb[8].mxu0 }
 0x218   :  { %v1382_v2 = vadd.f32 %v1381_v63, %v5981_v14  ;;  %v1383_v4 = vpop.f32.mrb[9].mxu0 }
 0x219   :  { %v1384_v23 = vadd.f32 %v1383_v4, %v5981_v14  ;;  %v1385_v53 = vpop.f32.mrb[10].mxu0 }
 0x21a   :  { %v1484_v6 = vmax.f32 %v1382_v2, 0.0  ;;  %v1386_v57 = vadd.f32 %v1385_v53, %v5983_v18  ;;  %v1387_v8 = vpop.f32.mrb[11].mxu0 }
 0x21b   :  { %v1485_v3 = vmax.f32 %v1384_v23, 0.0  ;;  %v1388_v30 = vadd.f32 %v1387_v8, %v5983_v18 }
 0x21c   :  { %v1498_v16 = vmax.f32 %v1386_v57, 0.0 }
 0x21d   :  { %v1499_v0 = vmax.f32 %v1388_v30, 0.0 }
 0x21e   :  { %v6201_v22 = vpack.c.bf16 %v1498_v16, %v1484_v6 }
 0x21f   :  { %v6213_v15 = vpack.c.bf16 %v1499_v0, %v1485_v3  ;;  %v1537_v26 = vpop.permute.xlu1 %1536 }
 0x220   :  { %v1539_v21 = vpop.permute.xlu0 %1538 }
 0x221   :  { %v1563_v24 = vsel %vm7735_vm15, %v1537_v26, %v1539_v21  ;;  %vm7811_vm15 = vmmov %vm7740_vm0 }
 0x222   :  { %v6219_v35 = vmax.bf16 %v1563_v24, %v5992_v38 }
 0x223   :  { %v1535_v7 = vpop.permute.xlu1 %1534 }
 0x224   :  { %v1562_v27 = vsel %vm7736_vm9, %v1535_v7, %v1537_v26  ;;  %1617 = vrot.lane.b32.xlu1 %v6219_v35, %s5153_s9  ;;  %vm7812_vm9 = vmmov %vm7740_vm0 }
 0x225   :  { %v1588_v28 = vmax.bf16 %v1562_v27, %v6003_v44 }
 0x227   :  { %1615 = vrot.lane.b32.xlu0 %v1588_v28, %s5153_s9  ;;  %v1533_v29 = vpop.permute.xlu1 %1532 }
 0x228   :  { %v1561_v31 = vsel %vm7737_vm6, %v1533_v29, %v1535_v7  ;;  %1544 = vrot.lane.b32.xlu1 %v6106_v40, %s5155_s21  ;;  %vm2698_vm6 = vcmask 1043456  }
 0x229   :  { %v1587_v32 = vmax.bf16 %v1561_v31, %v5999_v43  ;;  %v6281_v31 = vld [vmem:[%s7652_s5 + $0x180] ss:$12 sps:$4 sm:$0xff]  }
 0x22b   :  { %1613 = vrot.lane.b32.xlu0 %v1587_v32, %s5153_s9 }
 0x22c   :  { %1548 = vrot.lane.b32.xlu1 %v6201_v22, %s5155_s21 }
 0x22f   :  { %1546 = vrot.lane.b32.xlu0 %v6114_v41, %s5155_s21 }
 0x233   :  { %1550 = vrot.lane.b32.xlu0 %v6213_v15, %s5155_s21 }
 0x23b   :  { %v1424_v38 = vpop.f32.mrb[8].mxu1 }
 0x23c   :  { %v1425_v44 = vadd.f32 %v1424_v38, %v5981_v14  ;;  %v1426_v33 = vpop.f32.mrb[9].mxu1  ;;  %v6291_v38 = vld [vmem:[%s7652_s5 + $0x19c] ss:$12 sps:$4 sm:$0xff]  }
 0x23d   :  { %v1427_v34 = vadd.f32 %v1426_v33, %v5981_v14  ;;  %v1428_v36 = vpop.f32.mrb[10].mxu1 }
 0x23e   :  { %v1429_v43 = vadd.f32 %v1428_v36, %v5983_v18  ;;  %v1430_v37 = vpop.f32.mrb[11].mxu1  ;;  %v1486_v42 = vmax.f32 %v1425_v44, 0.0  ;;  %v6296_v44 = vld [vmem:[%s7652_s5 + $0x260] ss:$12 sps:$4 sm:$0xff]  }
 0x23f   :  { %v1431_v39 = vadd.f32 %v1430_v37, %v5983_v18  ;;  %v1487_v25 = vmax.f32 %v1427_v34, 0.0  ;;  %v6310_v37 = vld [vmem:[%s7652_s5 + $0x1a0] ss:$12 sps:$4 sm:$0xff]  }
 0x240   :  { %v1500_v51 = vmax.f32 %v1429_v43, 0.0 }
 0x241   :  { %v1501_v45 = vmax.f32 %v1431_v39, 0.0 }
 0x242   :  { %v6241_v46 = vpack.c.bf16 %v1500_v51, %v1486_v42  ;;  %v1541_v48 = vpop.permute.xlu0 %1540  ;;  %v6323_v51 = vld [vmem:[%s7652_s5 + $0x1b4] ss:$12 sps:$4 sm:$0xff]  }
 0x243   :  { %v6243_v49 = vpack.c.bf16 %v1501_v45, %v1487_v25  ;;  %v1564_v50 = vsel %vm7738_vm11, %v1539_v21, %v1541_v48  ;;  %v1543_v52 = vpop.permute.xlu1 %1542  ;;  %v6328_v25 = vld [vmem:[%s7652_s5 + $0x278] ss:$12 sps:$4 sm:$0xff]   ;;  %vm7814_vm11 = vmmov %vm7740_vm0 }
 0x244   :  { %v6247_v55 = vmax.bf16 %v1564_v50, %v5995_v19  ;;  %v1565_v56 = vsel %vm7739_vm3, %v1541_v48, %v1543_v52  ;;  %1552 = vrot.lane.b32.xlu1 %v6241_v46, %s5155_s21  ;;  %v6345_v48 = vld [vmem:[%s7652_s5 + $0x1b8] ss:$12 sps:$4 sm:$0xff]   ;;  %vm7819_vm3 = vcmask 1044480  }
 0x245   :  { %v6253_v54 = vmax.bf16 %v1565_v56, %v6013_v59  ;;  %v6360_v56 = vld [vmem:[%s7652_s5 + $0x290] ss:$12 sps:$4 sm:$0xff]  }
 0x246   :  { %1619 = vrot.lane.b32.xlu0 %v6247_v55, %s5153_s9 }
 0x248   :  { %1621 = vrot.lane.b32.xlu1 %v6253_v54, %s5153_s9 }
 0x253   :  { %v1467_v58 = vpop.f32.mrb[12].mxu0 }
 0x254   :  { %v1468_v63 = vadd.f32 %v1467_v58, %v5981_v14  ;;  %v1469_v2 = vpop.f32.mrb[13].mxu0  ;;  %v6374_v58 = vld [vmem:[%s7652_s5 + $0x1d0] ss:$12 sps:$4 sm:$0xff]  }
 0x255   :  { %v1470_v19 = vadd.f32 %v1469_v2, %v5981_v14  ;;  %v1471_v4 = vpop.f32.mrb[14].mxu0  ;;  %v6386_v2 = vld [vmem:[%s7652_s5 + $0x2a8] ss:$12 sps:$4 sm:$0xff]  }
 0x256   :  { %v1472_v23 = vadd.f32 %v1471_v4, %v5983_v18  ;;  %v1473_v53 = vpop.f32.mrb[15].mxu0  ;;  %v1488_v59 = vmax.f32 %v1468_v63, 0.0  ;;  %v6381_v63 = vld [vmem:[%s7652_s5 + $0x1e4] ss:$12 sps:$4 sm:$0xff]   ;;  %v6400_v4 = vld [vmem:[%s7652_s5 + $0x1e8] ss:$12 sps:$4 sm:$0xff]  }
 0x257   :  { %v1474_v6 = vadd.f32 %v1473_v53, %v5983_v18  ;;  %v1489_v8 = vmax.f32 %v1470_v19, 0.0  ;;  %v6395_v19 = vld [vmem:[%s7652_s5 + $0x1e0] ss:$12 sps:$4 sm:$0xff]  }
 0x258   :  { %v1502_v57 = vmax.f32 %v1472_v23, 0.0  ;;  %v6407_v23 = vld [vmem:[%s7652_s5 + $0x1fc] ss:$12 sps:$4 sm:$0xff]   ;;  %v6412_v53 = vld [vmem:[%s7652_s5 + $0x2c0] ss:$12 sps:$4 sm:$0xff]  }
 0x259   :  { %v1503_v3 = vmax.f32 %v1474_v6, 0.0  ;;  %v6419_v6 = vld [vmem:[%s7652_s5 + $0x1f8] ss:$12 sps:$4 sm:$0xff]  }
 0x25a   :  { %v6263_v30 = vpack.c.bf16 %v1502_v57, %v1488_v59  ;;  %v6424_v59 = vld [vmem:[%s7652_s5 + $0x200] ss:$12 sps:$4 sm:$0xff]  }
 0x25b   :  { %v6265_v16 = vpack.c.bf16 %v1503_v3, %v1489_v8  ;;  %v6431_v57 = vld [vmem:[%s7652_s5 + $0x214] ss:$12 sps:$4 sm:$0xff]   ;;  %v6436_v8 = vld [vmem:[%s7652_s5 + $0x2d8] ss:$12 sps:$4 sm:$0xff]  }
 0x296   :  { %v6267_v0 = vpop.permute.xlu1 %1617 }
 0x299   :  { %v1616_v26 = vpop.permute.xlu0 %1615 }
 0x29a   :  { %v1641_v14 = vsel %vm7740_vm0, %v1616_v26, %v6267_v0  ;;  %v1545_v21 = vpop.permute.xlu1 %1544  ;;  %vm5174_vm0 = vmmov 0  }
 0x29b   :  { %v1666_v24 = vmax.bf16 %v1641_v14, %v1588_v28  ;;  %v1566_v7 = vsel %vm7741_vm7, %v1543_v52, %v1545_v21  ;;  %v6286_v28 = vld [vmem:[%s7652_s5 + $0x188] ss:$12 sps:$4 sm:$0xff]   ;;  %v6355_v52 = vld [vmem:[%s7652_s5 + $0x1cc] ss:$12 sps:$4 sm:$0xff]   ;;  %vm7824_vm7 = vmmov %vm7810_vm1 }
 0x29c   :  { %v6273_v18 = vmax.bf16 %v1566_v7, %v6015_v60  ;;  %v6450_v14 = vld [vmem:[%s7652_s5 + $0x218] ss:$12 sps:$4 sm:$0xff]  }
 0x29d   :  { %v1614_v27 = vpop.permute.xlu0 %1613  ;;  %2742 = vmatprep.mubr.bf16.mxu1 %v1666_v24  ;;  %2914 = vmatprep.mubr.bf16.mxu0 %v1666_v24  ;;  %v6459_v24 = vld [vmem:[%s7652_s5 + $0x22c] ss:$12 sps:$4 sm:$0xff]  }
 0x29e   :  { %v1640_v29 = vsel %vm7742_vm8, %v1614_v27, %v1616_v26  ;;  %1623 = vrot.lane.b32.xlu0 %v6273_v18, %s5153_s9  ;;  %v1549_v33 = vpop.permute.xlu1 %1548  ;;  %v6445_v26 = vld [vmem:[%s7652_s5 + $0x210] ss:$12 sps:$4 sm:$0xff]   ;;  %vm7825_vm8 = vmmov %vm7746_vm2 }
 0x29f   :  { %v1665_v60 = vmax.bf16 %v1640_v29, %v1587_v32  ;;  %v6305_v32 = vld [vmem:[%s7652_s5 + $0x198] ss:$12 sps:$4 sm:$0xff]   ;;  %v6467_v27 = vld [vmem:[%s7652_s5 + $0x2f0] ss:$12 sps:$4 sm:$0xff]  }
 0x2a1   :  { %v1547_v34 = vpop.permute.xlu0 %1546  ;;  %2743 = vmatmul.mubr.bf16.vlgmr.msra.gmra.mrb[12].mxu1 %v1665_v60  ;;  %2915 = vmatmul.mubr.bf16.vlgmr.msra.gmra.mrb[16].mxu0 %v1665_v60 }
 0x2a2   :  { %v1567_v36 = vsel %vm7743_vm4, %v1545_v21, %v1547_v34  ;;  %v1568_v43 = vsel %vm7744_vm14, %v1547_v34, %v1549_v33  ;;  %2754 = vmatpush1.bf16.msra.mxu1 %v6281_v31  ;;  %4622 = vmatpush3.bf16.msra.mxu0 %v6286_v28  ;;  %vm7826_vm4 = vmmov %vm7746_vm2  ;;  %vm3070_vm14 = vcmask 457728  }
 0x2a3   :  { %v6313_v39 = vmax.bf16 %v1567_v36, %v6106_v40  ;;  %v6316_v42 = vmax.bf16 %v1568_v43, %v6114_v41  ;;  %2755 = vmatprep.subr.bf16.mxu1 %v6291_v38  ;;  %4623 = vmatprep.subr.bf16.mxu0 %v6296_v44  ;;  %v6340_v41 = vld [vmem:[%s7652_s5 + $0x1b0] ss:$12 sps:$4 sm:$0xff]  }
 0x2a5   :  { %v1551_v45 = vpop.permute.xlu0 %1550  ;;  %1625 = vrot.lane.b32.xlu1 %v6313_v39, %s5153_s9  ;;  %1627 = vrot.lane.b32.xlu0 %v6316_v42, %s5153_s9 }
 0x2a6   :  { %v1569_v40 = vsel %vm7745_vm13, %v1549_v33, %v1551_v45  ;;  %2756 = vmatpush1.bf16.msra.mxu1 %v6305_v32  ;;  %4624 = vmatpush3.bf16.msra.mxu0 %v6310_v37  ;;  %v6476_v33 = vld [vmem:[%s7652_s5 + $0x228] ss:$12 sps:$4 sm:$0xff]   ;;  %vm7827_vm13 = vmmov %vm7810_vm1 }
 0x2a7   :  { %v6348_v50 = vmax.bf16 %v1569_v40, %v6201_v22  ;;  %2757 = vmatprep.subr.bf16.mxu1 %v6323_v51  ;;  %4625 = vmatprep.subr.bf16.mxu0 %v6328_v25  ;;  %v6369_v22 = vld [vmem:[%s7652_s5 + $0x1c8] ss:$12 sps:$4 sm:$0xff]  }
 0x2a8   :  { %v6500_v40 = vld [vmem:[%s7652_s5 + $0x3c8] ss:$12 sps:$4 sm:$0xff]  }
 0x2a9   :  { %1629 = vrot.lane.b32.xlu1 %v6348_v50, %s5153_s9  ;;  %7749 = vst [vmem:[#allocation4_spill] sm:$0xff] %v6500_v40 }
 0x2aa   :  { %2758 = vmatpush1.bf16.msra.mxu1 %v6340_v41  ;;  %4626 = vmatpush3.bf16.msra.mxu0 %v6345_v48 }
 0x2ab   :  { %2759 = vmatprep.subr.bf16.mxu1 %v6355_v52  ;;  %4627 = vmatprep.subr.bf16.mxu0 %v6360_v56 }
 0x2ad   :  { %1554 = vrot.lane.b32.xlu1 %v6243_v49, %s5155_s21 }
 0x2ae   :  { %2760 = vmatpush1.bf16.msra.mxu1 %v6369_v22  ;;  %4628 = vmatpush3.bf16.msra.mxu0 %v6374_v58 }
 0x2af   :  { %2761 = vmatprep.subr.bf16.mxu1 %v6381_v63  ;;  %4629 = vmatprep.subr.bf16.mxu0 %v6386_v2 }
 0x2b2   :  { %2762 = vmatpush1.bf16.msra.mxu1 %v6395_v19  ;;  %4630 = vmatpush3.bf16.msra.mxu0 %v6400_v4 }
 0x2b3   :  { %2763 = vmatprep.subr.bf16.mxu1 %v6407_v23  ;;  %4631 = vmatprep.subr.bf16.mxu0 %v6412_v53 }
 0x2b6   :  { %2764 = vmatpush1.bf16.msra.mxu1 %v6419_v6  ;;  %4632 = vmatpush3.bf16.msra.mxu0 %v6424_v59  ;;  %v6440_v3 = vpop.permute.xlu1 %1552 }
 0x2b7   :  { %v1570_v21 = vsel %vm7746_vm2, %v1551_v45, %v6440_v3  ;;  %2765 = vmatprep.subr.bf16.mxu1 %v6431_v57  ;;  %4633 = vmatprep.subr.bf16.mxu0 %v6436_v8  ;;  %v6495_v45 = vld [vmem:[%s7652_s5 + $0x244] ss:$12 sps:$4 sm:$0xff]   ;;  %vm7828_vm2 = vmmov %vm7810_vm1 }
 0x2b8   :  { %v6462_v7 = vmax.bf16 %v1570_v21, %v6213_v15  ;;  %v1620_v29 = vpop.permute.xlu0 %1619  ;;  %v6481_v15 = vld [vmem:[%s7652_s5 + $0x230] ss:$12 sps:$4 sm:$0xff]  }
 0x2b9   :  { %v1642_v36 = vsel %vm7748_vm5, %v6267_v0, %v1620_v29  ;;  %v6512_v0 = vld [vmem:[%s7652_s5 + $0x308] ss:$12 sps:$4 sm:$0xff]   ;;  %vm7847_vm5 = vcmask 785408  }
 0x2ba   :  { %2766 = vmatpush1.bf16.msra.mxu1 %v6445_v26  ;;  %4634 = vmatpush3.bf16.msra.mxu0 %v6450_v14  ;;  %v6471_v60 = vpop.permute.xlu1 %1621  ;;  %7751 = vst [vmem:[#allocation6_spill] sm:$0xff] %v6512_v0  ;;  %v6515_v21 = vmax.bf16 %v1642_v36, %v6219_v35  ;;  %v6536_v35 = vld [vmem:[%s7652_s5 + $0x258] ss:$12 sps:$4 sm:$0xff]   ;;  %v6542_v36 = vld [vmem:[%s7652_s5 + $0x320] ss:$12 sps:$4 sm:$0xff]  }
 0x2bb   :  { %1631 = vrot.lane.b32.xlu0 %v6462_v7, %s5153_s9  ;;  %v1643_v34 = vsel %vm7747_vm10, %v1620_v29, %v6471_v60  ;;  %2767 = vmatprep.subr.bf16.mxu1 %v6459_v24  ;;  %v6522_v29 = vld [vmem:[%s7652_s5 + $0x25c] ss:$12 sps:$4 sm:$0xff]   ;;  %7754 = vst [vmem:[#allocation9_spill] sm:$0xff] %v6536_v35  ;;  %7755 = vst [vmem:[#allocation10_spill] sm:$0xff] %v6542_v36 }
 0x2bc   :  { %v1668_v43 = vmax.bf16 %v1643_v34, %v6247_v55  ;;  %4635 = vmatprep.subr.bf16.mxu0 %v6467_v27  ;;  %v6507_v55 = vld [vmem:[%s7652_s5 + $0x240] ss:$12 sps:$4 sm:$0xff]   ;;  %7752 = vst [vmem:[#allocation7_spill] sm:$0xff] %v6522_v29  ;;  %vm7829_vm10 = vmmov %vm7826_vm4 }
 0x2bd   :  { %7750 = vst [vmem:[#allocation5_spill] sm:$0xff] %v6507_v55  ;;  %v6527_v34 = vld [vmem:[%s7652_s5 + $0x3e0] ss:$12 sps:$4 sm:$0xff]  }
 0x2be   :  { %2768 = vmatpush1.bf16.msra.mxu1 %v6476_v33  ;;  %4636 = vmatpush3.bf16.msra.mxu0 %v6481_v15  ;;  %7753 = vst [vmem:[#allocation8_spill] sm:$0xff] %v6527_v34 }
 0x2bf   :  { %1556 = vrot.lane.b32.xlu0 %v6263_v30, %s5155_s21  ;;  %2785 = vmatprep.mubr.bf16.mxu1 %v1668_v43 }
 0x2c0   :  { %2955 = vmatprep.mubr.bf16.mxu0 %v1668_v43  ;;  %2769 = vmatprep.subr.bf16.mxu1 %v6495_v45  ;;  %v6548_v43 = vld [vmem:[%s7652_s5 + $0x274] ss:$12 sps:$4 sm:$0xff]  }
 0x2c1   :  { %2956 = vmatmul.mubr.bf16.vlgmr.msra.gmra.mrb[20].mxu0 %v6515_v21  ;;  %4643 = vmatprep.subr.bf16.mxu0 %v6500_v40  ;;  %7756 = vst [vmem:[#allocation11_spill] sm:$0xff] %v6548_v43 }
 0x2c2   :  { %2770 = vmatpush1.bf16.msra.mxu1 %v6507_v55  ;;  %4644 = vmatpush3.bf16.msra.mxu0 %v6512_v0  ;;  %v6566_v0 = vld [vmem:[%s7652_s5 + $0x338] ss:$12 sps:$4 sm:$0xff]  }
 0x2c3   :  { %2771 = vmatprep.subr.bf16.mxu1 %v6522_v29  ;;  %4645 = vmatprep.subr.bf16.mxu0 %v6527_v34  ;;  %7759 = vst [vmem:[#allocation14_spill] sm:$0xff] %v6566_v0  ;;  %v6572_v34 = vld [vmem:[%s7652_s5 + $0x28c] ss:$12 sps:$4 sm:$0xff]  }
 0x2c4   :  { %7760 = vst [vmem:[#allocation15_spill] sm:$0xff] %v6572_v34 }
 0x2c6   :  { %2772 = vmatpush1.bf16.msra.mxu1 %v6536_v35  ;;  %4646 = vmatpush3.bf16.msra.mxu0 %v6542_v36  ;;  %v6578_v35 = vld [vmem:[%s7652_s5 + $0x410] ss:$12 sps:$4 sm:$0xff]   ;;  %v6584_v36 = vld [vmem:[%s7652_s5 + $0x288] ss:$12 sps:$4 sm:$0xff]  }
 0x2c7   :  { %2773 = vmatprep.subr.bf16.mxu1 %v6548_v43  ;;  %4647 = vmatprep.subr.bf16.mxu0 %v6554_v20  ;;  %7761 = vst [vmem:[#allocation16_spill] sm:$0xff] %v6578_v35  ;;  %7762 = vst [vmem:[#allocation17_spill] sm:$0xff] %v6584_v36  ;;  %v6590_v43 = vld [vmem:[%s7652_s5 + $0x350] ss:$12 sps:$4 sm:$0xff]  }
 0x2c8   :  { %7763 = vst [vmem:[#allocation18_spill] sm:$0xff] %v6590_v43  ;;  %v6596_v20 = vld [vmem:[%s7652_s5 + $0x2a4] ss:$12 sps:$4 sm:$0xff]  }
 0x2c9   :  { %7764 = vst [vmem:[#allocation19_spill] sm:$0xff] %v6596_v20 }
 0x2ca   :  { %2774 = vmatpush1.bf16.msra.mxu1 %v6560_v10  ;;  %4648 = vmatpush3.bf16.msra.mxu0 %v6566_v0  ;;  %v6602_v10 = vld [vmem:[%s7652_s5 + $0x428] ss:$12 sps:$4 sm:$0xff]   ;;  %v6608_v0 = vld [vmem:[%s7652_s5 + $0x2a0] ss:$12 sps:$4 sm:$0xff]  }
 0x2cb   :  { %2775 = vmatprep.subr.bf16.mxu1 %v6572_v34  ;;  %4649 = vmatprep.subr.bf16.mxu0 %v6578_v35  ;;  %7765 = vst [vmem:[#allocation20_spill] sm:$0xff] %v6602_v10  ;;  %7766 = vst [vmem:[#allocation21_spill] sm:$0xff] %v6608_v0  ;;  %v6614_v34 = vld [vmem:[%s7652_s5 + $0x368] ss:$12 sps:$4 sm:$0xff]  }
 0x2cc   :  { %7767 = vst [vmem:[#allocation22_spill] sm:$0xff] %v6614_v34  ;;  %v6620_v35 = vld [vmem:[%s7652_s5 + $0x2bc] ss:$12 sps:$4 sm:$0xff]  }
 0x2cd   :  { %7768 = vst [vmem:[#allocation23_spill] sm:$0xff] %v6620_v35 }
 0x2ce   :  { %2776 = vmatpush1.bf16.msra.mxu1 %v6584_v36  ;;  %4650 = vmatpush3.bf16.msra.mxu0 %v6590_v43  ;;  %v6626_v36 = vld [vmem:[%s7652_s5 + $0x440] ss:$12 sps:$4 sm:$0xff]   ;;  %v6632_v43 = vld [vmem:[%s7652_s5 + $0x2b8] ss:$12 sps:$4 sm:$0xff]  }
 0x2cf   :  { %2777 = vmatprep.subr.bf16.mxu1 %v6596_v20  ;;  %4651 = vmatprep.subr.bf16.mxu0 %v6602_v10  ;;  %7769 = vst [vmem:[#allocation24_spill] sm:$0xff] %v6626_v36  ;;  %7770 = vst [vmem:[#allocation25_spill] sm:$0xff] %v6632_v43  ;;  %v6638_v20 = vld [vmem:[%s7652_s5 + $0x380] ss:$12 sps:$4 sm:$0xff]  }
 0x2d0   :  { %7771 = vst [vmem:[#allocation26_spill] sm:$0xff] %v6638_v20  ;;  %v6644_v10 = vld [vmem:[%s7652_s5 + $0x2d4] ss:$12 sps:$4 sm:$0xff]  }
 0x2d1   :  { %7772 = vst [vmem:[#allocation27_spill] sm:$0xff] %v6644_v10 }
 0x2d2   :  { %2778 = vmatpush1.bf16.msra.mxu1 %v6608_v0  ;;  %4652 = vmatpush3.bf16.msra.mxu0 %v6614_v34  ;;  %v6650_v0 = vld [vmem:[%s7652_s5 + $0x458] ss:$12 sps:$4 sm:$0xff]   ;;  %v6656_v34 = vld [vmem:[%s7652_s5 + $0x2d0] ss:$12 sps:$4 sm:$0xff]  }
 0x2d3   :  { %2779 = vmatprep.subr.bf16.mxu1 %v6620_v35  ;;  %4653 = vmatprep.subr.bf16.mxu0 %v6626_v36  ;;  %7773 = vst [vmem:[#allocation28_spill] sm:$0xff] %v6650_v0  ;;  %7774 = vst [vmem:[#allocation29_spill] sm:$0xff] %v6656_v34  ;;  %v6662_v35 = vld [vmem:[%s7652_s5 + $0x398] ss:$12 sps:$4 sm:$0xff]  }
 0x2d4   :  { %7775 = vst [vmem:[#allocation30_spill] sm:$0xff] %v6662_v35  ;;  %v6668_v36 = vld [vmem:[%s7652_s5 + $0x2ec] ss:$12 sps:$4 sm:$0xff]  }
 0x2d5   :  { %7776 = vst [vmem:[#allocation31_spill] sm:$0xff] %v6668_v36 }
 0x2d6   :  { %2780 = vmatpush1.bf16.msra.mxu1 %v6632_v43  ;;  %4654 = vmatpush3.bf16.msra.mxu0 %v6638_v20  ;;  %v6674_v43 = vld [vmem:[%s7652_s5 + $0x470] ss:$12 sps:$4 sm:$0xff]   ;;  %v6680_v20 = vld [vmem:[%s7652_s5 + $0x2e8] ss:$12 sps:$4 sm:$0xff]  }
 0x2d7   :  { %2781 = vmatprep.subr.bf16.mxu1 %v6644_v10  ;;  %4655 = vmatprep.subr.bf16.mxu0 %v6650_v0  ;;  %7777 = vst [vmem:[#allocation32_spill] sm:$0xff] %v6674_v43  ;;  %7778 = vst [vmem:[#allocation33_spill] sm:$0xff] %v6680_v20  ;;  %v6686_v10 = vld [vmem:[%s7652_s5 + $0x3b0] ss:$12 sps:$4 sm:$0xff]  }
 0x2d8   :  { %7779 = vst [vmem:[#allocation34_spill] sm:$0xff] %v6686_v10  ;;  %v6692_v0 = vld [vmem:[%s7652_s5 + $0x304] ss:$12 sps:$4 sm:$0xff]  }
 0x2d9   :  { %7780 = vst [vmem:[#allocation35_spill] sm:$0xff] %v6692_v0 }
 0x2da   :  { %2782 = vmatpush1.bf16.msra.mxu1 %v6656_v34  ;;  %4656 = vmatpush3.bf16.msra.mxu0 %v6662_v35  ;;  %v6699_v35 = vld [vmem:[%s7652_s5 + $0x300] ss:$12 sps:$4 sm:$0xff]   ;;  %v7693_v34 = vmov 0.0  }
 0x2db   :  { %2783 = vmatprep.subr.bf16.mxu1 %v6668_v36  ;;  %4657 = vmatprep.subr.bf16.mxu0 %v6674_v43  ;;  %7781 = vst [vmem:[#allocation36_spill] sm:$0xff] %v6699_v35  ;;  %v6706_v36 = vld [vmem:[%s7652_s5 + $0x31c] ss:$12 sps:$4 sm:$0xff]   ;;  %v6714_v43 = vld [vmem:[%s7652_s5 + $0x318] ss:$12 sps:$4 sm:$0xff]  }
 0x2dc   :  { %7782 = vst [vmem:[#allocation37_spill] sm:$0xff] %v6706_v36  ;;  %7783 = vst [vmem:[#allocation38_spill] sm:$0xff] %v6714_v43 }
 0x2de   :  { %2784 = vmatpush1.bf16.msra.mxu1 %v6680_v20  ;;  %4658 = vmatpush3.bf16.msra.mxu0 %v6686_v10  ;;  %v6720_v10 = vld [vmem:[%s7652_s5 + $0x334] ss:$12 sps:$4 sm:$0xff]  }
 0x2df   :  { %2796 = vmatprep.subr.bf16.mxu1 %v6692_v0  ;;  %4739 = vmatprep.subr.bf16.mxu0 %v7693_v34  ;;  %7784 = vst [vmem:[#allocation39_spill] sm:$0xff] %v6720_v10  ;;  %v6732_v34 = vld [vmem:[%s7652_s5 + $0x34c] ss:$12 sps:$4 sm:$0xff]  }
 0x2e0   :  { %7786 = vst [vmem:[#allocation41_spill] sm:$0xff] %v6732_v34 }
 0x2e1   :  { %2786 = vmatmul.mubr.bf16.vlgmr.msra.gmra.mrb[12].mxu1 %v6515_v21  ;;  %v6726_v21 = vld [vmem:[%s7652_s5 + $0x330] ss:$12 sps:$4 sm:$0xff]  }
 0x2e2   :  { %2797 = vmatpush1.bf16.msra.mxu1 %v6699_v35  ;;  %7785 = vst [vmem:[#allocation40_spill] sm:$0xff] %v6726_v21  ;;  %v6864_v35 = vld [vmem:[%s7652_s5 + $0x454] ss:$12 sps:$4 sm:$0xff]  }
 0x2e3   :  { %2798 = vmatprep.subr.bf16.mxu1 %v6706_v36  ;;  %v6738_v36 = vld [vmem:[%s7652_s5 + $0x348] ss:$12 sps:$4 sm:$0xff]   ;;  %7808 = vst [vmem:[#allocation63_spill] sm:$0xff] %v6864_v35 }
 0x2e4   :  { %7787 = vst [vmem:[#allocation42_spill] sm:$0xff] %v6738_v36 }
 0x2e6   :  { %2799 = vmatpush1.bf16.msra.mxu1 %v6714_v43  ;;  %v6744_v43 = vld [vmem:[%s7652_s5 + $0x364] ss:$12 sps:$4 sm:$0xff]  }
 0x2e7   :  { %2800 = vmatprep.subr.bf16.mxu1 %v6720_v10  ;;  %7788 = vst [vmem:[#allocation43_spill] sm:$0xff] %v6744_v43  ;;  %v6750_v10 = vld [vmem:[%s7652_s5 + $0x360] ss:$12 sps:$4 sm:$0xff]  }
 0x2e8   :  { %7789 = vst [vmem:[#allocation44_spill] sm:$0xff] %v6750_v10 }
 0x2ea   :  { %2801 = vmatpush1.bf16.msra.mxu1 %v6726_v21  ;;  %v6756_v21 = vld [vmem:[%s7652_s5 + $0x37c] ss:$12 sps:$4 sm:$0xff]  }
 0x2eb   :  { %2802 = vmatprep.subr.bf16.mxu1 %v6732_v34  ;;  %7790 = vst [vmem:[#allocation45_spill] sm:$0xff] %v6756_v21  ;;  %v6762_v34 = vld [vmem:[%s7652_s5 + $0x378] ss:$12 sps:$4 sm:$0xff]  }
 0x2ec   :  { %7791 = vst [vmem:[#allocation46_spill] sm:$0xff] %v6762_v34 }
 0x2ee   :  { %2803 = vmatpush1.bf16.msra.mxu1 %v6738_v36  ;;  %v6768_v36 = vld [vmem:[%s7652_s5 + $0x394] ss:$12 sps:$4 sm:$0xff]  }
 0x2ef   :  { %2804 = vmatprep.subr.bf16.mxu1 %v6744_v43  ;;  %7792 = vst [vmem:[#allocation47_spill] sm:$0xff] %v6768_v36  ;;  %v6774_v43 = vld [vmem:[%s7652_s5 + $0x390] ss:$12 sps:$4 sm:$0xff]  }
 0x2f0   :  { %7793 = vst [vmem:[#allocation48_spill] sm:$0xff] %v6774_v43 }
 0x2f2   :  { %2805 = vmatpush1.bf16.msra.mxu1 %v6750_v10  ;;  %v6780_v10 = vld [vmem:[%s7652_s5 + $0x3ac] ss:$12 sps:$4 sm:$0xff]  }
 0x2f3   :  { %2806 = vmatprep.subr.bf16.mxu1 %v6756_v21  ;;  %7794 = vst [vmem:[#allocation49_spill] sm:$0xff] %v6780_v10  ;;  %v6786_v21 = vld [vmem:[%s7652_s5 + $0x3a8] ss:$12 sps:$4 sm:$0xff]  }
 0x2f4   :  { %7795 = vst [vmem:[#allocation50_spill] sm:$0xff] %v6786_v21 }
 0x2f6   :  { %2807 = vmatpush1.bf16.msra.mxu1 %v6762_v34  ;;  %v6792_v34 = vld [vmem:[%s7652_s5 + $0x3c4] ss:$12 sps:$4 sm:$0xff]  }
 0x2f7   :  { %2808 = vmatprep.subr.bf16.mxu1 %v6768_v36  ;;  %7796 = vst [vmem:[#allocation51_spill] sm:$0xff] %v6792_v34  ;;  %v6798_v36 = vld [vmem:[%s7652_s5 + $0x3c0] ss:$12 sps:$4 sm:$0xff]  }
 0x2f8   :  { %7797 = vst [vmem:[#allocation52_spill] sm:$0xff] %v6798_v36 }
 0x2fa   :  { %2809 = vmatpush1.bf16.msra.mxu1 %v6774_v43  ;;  %v6804_v43 = vld [vmem:[%s7652_s5 + $0x3dc] ss:$12 sps:$4 sm:$0xff]  }
 0x2fb   :  { %2810 = vmatprep.subr.bf16.mxu1 %v6780_v10  ;;  %7798 = vst [vmem:[#allocation53_spill] sm:$0xff] %v6804_v43  ;;  %v6810_v10 = vld [vmem:[%s7652_s5 + $0x3d8] ss:$12 sps:$4 sm:$0xff]  }
 0x2fc   :  { %7799 = vst [vmem:[#allocation54_spill] sm:$0xff] %v6810_v10 }
 0x2fe   :  { %2811 = vmatpush1.bf16.msra.mxu1 %v6786_v21  ;;  %v6816_v21 = vld [vmem:[%s7652_s5 + $0x3f4] ss:$12 sps:$4 sm:$0xff]  }
 0x2ff   :  { %2812 = vmatprep.subr.bf16.mxu1 %v6792_v34  ;;  %7800 = vst [vmem:[#allocation55_spill] sm:$0xff] %v6816_v21  ;;  %v6822_v34 = vld [vmem:[%s7652_s5 + $0x3f0] ss:$12 sps:$4 sm:$0xff]  }
 0x300   :  { %7801 = vst [vmem:[#allocation56_spill] sm:$0xff] %v6822_v34 }
 0x302   :  { %2813 = vmatpush1.bf16.msra.mxu1 %v6798_v36  ;;  %v6828_v36 = vld [vmem:[%s7652_s5 + $0x40c] ss:$12 sps:$4 sm:$0xff]  }
 0x303   :  { %2814 = vmatprep.subr.bf16.mxu1 %v6804_v43  ;;  %7802 = vst [vmem:[#allocation57_spill] sm:$0xff] %v6828_v36  ;;  %v6834_v43 = vld [vmem:[%s7652_s5 + $0x408] ss:$12 sps:$4 sm:$0xff]  }
 0x304   :  { %7803 = vst [vmem:[#allocation58_spill] sm:$0xff] %v6834_v43 }
 0x306   :  { %2815 = vmatpush1.bf16.msra.mxu1 %v6810_v10  ;;  %v6840_v10 = vld [vmem:[%s7652_s5 + $0x424] ss:$12 sps:$4 sm:$0xff]  }
 0x307   :  { %2816 = vmatprep.subr.bf16.mxu1 %v6816_v21  ;;  %7804 = vst [vmem:[#allocation59_spill] sm:$0xff] %v6840_v10  ;;  %v6846_v21 = vld [vmem:[%s7652_s5 + $0x420] ss:$12 sps:$4 sm:$0xff]  }
 0x308   :  { %7805 = vst [vmem:[#allocation60_spill] sm:$0xff] %v6846_v21 }
 0x30a   :  { %2817 = vmatpush1.bf16.msra.mxu1 %v6822_v34  ;;  %v6852_v34 = vld [vmem:[%s7652_s5 + $0x43c] ss:$12 sps:$4 sm:$0xff]  }
 0x30b   :  { %2818 = vmatprep.subr.bf16.mxu1 %v6828_v36  ;;  %7806 = vst [vmem:[#allocation61_spill] sm:$0xff] %v6852_v34  ;;  %v6858_v36 = vld [vmem:[%s7652_s5 + $0x438] ss:$12 sps:$4 sm:$0xff]  }
 0x30c   :  { %7807 = vst [vmem:[#allocation62_spill] sm:$0xff] %v6858_v36 }
 0x30e   :  { %2819 = vmatpush1.bf16.msra.mxu1 %v6834_v43 }
 0x30f   :  { %2820 = vmatprep.subr.bf16.mxu1 %v6840_v10  ;;  %v6870_v10 = vld [vmem:[%s7652_s5 + $0x450] ss:$12 sps:$4 sm:$0xff]  }
 0x310   :  { %v1624_v43 = vpop.permute.xlu0 %1623  ;;  %7809 = vst [vmem:[#allocation64_spill] sm:$0xff] %v6870_v10 }
 0x311   :  { %v1644_v20 = vsel %vm7810_vm1, %v6471_v60, %v1624_v43  ;;  %v6888_v60 = vld [vmem:[%s7652_s5 + $0x468] ss:$12 sps:$4 sm:$0xff]  }
 0x312   :  { %2821 = vmatpush1.bf16.msra.mxu1 %v6846_v21 }
 0x313   :  { %2822 = vmatprep.subr.bf16.mxu1 %v6852_v34 }
 0x316   :  { %2823 = vmatpush1.bf16.msra.mxu1 %v6858_v36  ;;  %v6880_v36 = vld [vmem:[%s7652_s5 + $0x46c] ss:$12 sps:$4 sm:$0xff]  }
 0x317   :  { %v1628_v21 = vpop.permute.xlu0 %1627  ;;  %v1626_v0 = vpop.permute.xlu1 %1625  ;;  %2824 = vmatprep.subr.bf16.mxu1 %v6864_v35 }
 0x318   :  { %v1645_v34 = vsel %vm7811_vm15, %v1624_v43, %v1626_v0  ;;  %v1646_v29 = vsel %vm7812_vm9, %v1626_v0, %v1628_v21  ;;  %v6893_v0 = vld [vmem:[%s7652_s5 + $0x488] ss:$12 sps:$4 sm:$0xff]   ;;  %v1669_v43 = vmax.bf16 %v1644_v20, %v6253_v54  ;;  %v6909_v20 = vld [vmem:[%s7652_s5 + $0x4a0] ss:$12 sps:$4 sm:$0xff]   ;;  %vm7894_vm15 = vmmov %vm7810_vm1 }
 0x319   :  { %v1670_v55 = vmax.bf16 %v1645_v34, %v6273_v18  ;;  %v1671_v40 = vmax.bf16 %v1646_v29, %v6313_v39  ;;  %7813 = vst [vmem:[#allocation65_spill] sm:$0xff] %v6893_v0  ;;  %v6902_v29 = vld [vmem:[%s7652_s5 + $0x484] ss:$12 sps:$4 sm:$0xff]   ;;  %v7815_v34 = vmov 65535   ;;  %7816 = vst [vmem:[#allocation66_spill] sm:$0xff] %v6909_v20 }
 0x31a   :  { %2825 = vmatpush1.bf16.msra.mxu1 %v6870_v10  ;;  %v2699_v10 = vsel %vm2698_vm6, 4294967295, %v7815_v34  ;;  %v6916_v54 = vld [vmem:[%s7652_s5 + $0x480] ss:$12 sps:$4 sm:$0xff]   ;;  %vm7895_vm9 = vmmov %vm7847_vm5  ;;  %vm7897_vm6 = vcmask 1031168  }
 0x31b   :  { %3056 = vrot.lane.b32.xlu1 %v1671_v40, %s5173_s24  ;;  %2828 = vmatprep.mubr.bf16.mxu1 %v1670_v55  ;;  %v1630_v18 = vpop.permute.xlu1 %1629  ;;  %7817 = vst [vmem:[#allocation67_spill] sm:$0xff] %v6916_v54  ;;  %v5080_v34 = vld [vmem:[%s7652_s5 + $0x4b4] ss:$12 sps:$4 sm:$0x1f]  }
 0x31c   :  { %2996 = vmatprep.mubr.bf16.mxu0 %v1670_v55  ;;  %v1647_v39 = vsel %vm7814_vm11, %v1628_v21, %v1630_v18  ;;  %2826 = vmatprep.subr.bf16.mxu1 %v6880_v36  ;;  %v5077_v55 = vld [vmem:[%s7652_s5 + $0x4b8] ss:$12 sps:$4 sm:$0x1f]   ;;  %v6926_v21 = vld [vmem:[%s7652_s5 + $0x49c] ss:$12 sps:$4 sm:$0xff]   ;;  %vm7898_vm11 = vmmov %vm7847_vm5 }
 0x31d   :  { %v1672_v35 = vmax.bf16 %v1647_v39, %v6316_v42  ;;  %2997 = vmatmul.mubr.bf16.vlgmr.msra.gmra.mrb[24].mxu0 %v1669_v43  ;;  %v7818_v42 = vmov 0.0   ;;  %v2700_v39 = vsel %vm7819_vm3, %v2699_v10, 0  ;;  %vm3492_vm3 = vcmask 916480  }
 0x31e   :  { %4740 = vmatpush3.bf16.msra.mxu0 %v6893_v0  ;;  %2827 = vmatpush1.bf16.msra.mxu1 %v6888_v60  ;;  %v6942_v10 = vand.u32 %v5077_v55, %v2700_v39  ;;  %v5078_v0 = vld [vmem:[%s7652_s5 + $0x4b0] ss:$12 sps:$4 sm:$0x1f]  }
 0x31f   :  { %4741 = vmatprep.subr.bf16.mxu0 %v7818_v42  ;;  %3058 = vrot.lane.b32.xlu1 %v1672_v35, %s5173_s24  ;;  %v6940_v35 = vld [vmem:[%s7652_s5 + $0x498] ss:$12 sps:$4 sm:$0xff]  }
 0x320   :  { %2839 = vmatprep.subr.bf16.mxu1 %v6902_v29  ;;  %4745 = vmatprep.mubr.msk.bf16.mxu0 %vm5174_vm0, %v7818_v42  ;;  %7820 = vst [vmem:[#allocation68_spill] sm:$0xff] %v6942_v10  ;;  %v5113_v55 = vld [vmem:[%s7652_s5 + $0x4] ss:$12 sps:$4 sm:$0xff]  }
 0x321   :  { %2829 = vmatmul.mubr.bf16.vlgmr.msra.gmra.mrb[12].mxu1 %v1669_v43  ;;  %v6949_v43 = vand.u32 %v5080_v34, %v2700_v39  ;;  %v5114_v34 = vld [vmem:[%s7652_s5] ss:$12 sps:$4 sm:$0xff]  }
 0x322   :  { %4742 = vmatpush3.bf16.msra.mxu0 %v6909_v20  ;;  %2840 = vmatpush1.bf16.msra.mxu1 %v6916_v54  ;;  %v7822_v20 = vmov 0   ;;  %v6954_v54 = vand.u32 %v5078_v0, %v2700_v39  ;;  %v5115_v0 = vld [vmem:[%s7652_s5 + $0x1c] ss:$12 sps:$4 sm:$0xff]  }
 0x323   :  { %4743 = vmatprep.subr.bf16.mxu0 %v7818_v42  ;;  %2841 = vmatprep.subr.bf16.mxu1 %v6926_v21  ;;  %7821 = vst [vmem:[#allocation69_spill] sm:$0xff] %v6949_v43  ;;  %v5116_v39 = vld [vmem:[%s7652_s5 + $0xc8] ss:$12 sps:$4 sm:$0xff]  }
 0x324   :  { %2871 = vmatprep.mubr.bf16.mxu1 %v7822_v20  ;;  %7823 = vst [vmem:[#allocation70_spill] sm:$0xff] %v6954_v54 }
 0x326   :  { %4744 = vmatpush3.bf16.msra.mxu0 %v6942_v10  ;;  %2842 = vmatpush1.bf16.msra.mxu1 %v6940_v35 }
 0x327   :  { %2843 = vmatprep.subr.bf16.mxu1 %v6949_v43  ;;  %3086 = vmatprep.subr.bf16.mxu0 %v5113_v55  ;;  %v1555_v55 = vpop.permute.xlu1 %1554 }
 0x329   :  { %4746 = vmatmul.mubr.msk.bf16.vlgmr.msra.gmra.mrb[28].mxu0 %vm524_vm12, %v1671_v40 }
 0x32a   :  { %2844 = vmatpush1.bf16.msra.mxu1 %v6954_v54  ;;  %3087 = vmatpush1.bf16.msra.mxu0 %v5114_v34  ;;  %v5117_v34 = vld [vmem:[%s7652_s5 + $0x18] ss:$12 sps:$4 sm:$0xff]  }
 0x32b   :  { %3088 = vmatprep.subr.bf16.mxu0 %v5115_v0  ;;  %4669 = vmatprep.subr.bf16.mxu1 %v5116_v39  ;;  %v5118_v0 = vld [vmem:[%s7652_s5 + $0x8] ss:$12 sps:$4 sm:$0xff]  }
 0x32d   :  { %4537 = vmatmul.mubr.msk.bf16.vlgmr.msra.gmra.mrb[12].mxu1 %vm524_vm12, %v1671_v40  ;;  %v6972_v10 = vpop.permute.xlu0 %1631  ;;  %v5119_v40 = vld [vmem:[%s7652_s5 + $0x34] ss:$12 sps:$4 sm:$0xff]  }
 0x32e   :  { %v1648_v54 = vsel %vm7824_vm7, %v1630_v18, %v6972_v10  ;;  %3089 = vmatpush1.bf16.msra.mxu0 %v5117_v34  ;;  %4670 = vmatpush3.bf16.msra.mxu1 %v5118_v0  ;;  %v5120_v18 = vld [vmem:[%s7652_s5 + $0xe0] ss:$12 sps:$4 sm:$0xff]   ;;  %v1571_v34 = vsel %vm7825_vm8, %v6440_v3, %v1555_v55  ;;  %vm3514_vm7 = vcmask 908288  }
 0x32f   :  { %v1673_v39 = vmax.bf16 %v1648_v54, %v6348_v50  ;;  %3090 = vmatprep.subr.bf16.mxu0 %v5119_v40  ;;  %4671 = vmatprep.subr.bf16.mxu1 %v5120_v18  ;;  %v5121_v54 = vld [vmem:[%s7652_s5 + $0x30] ss:$12 sps:$4 sm:$0xff]   ;;  %v5122_v0 = vld [vmem:[%s7652_s5 + $0x20] ss:$12 sps:$4 sm:$0xff]   ;;  %v7003_v40 = vmax.bf16 %v1571_v34, %v6241_v46  ;;  %v5125_v46 = vld [vmem:[%s7652_s5 + $0x48] ss:$12 sps:$4 sm:$0xff]  }
 0x330   :  { %v5127_v18 = vld [vmem:[%s7652_s5 + $0x64] ss:$12 sps:$4 sm:$0xff]  }
 0x331   :  { %v6991_v43 = vpop.permute.xlu0 %1556  ;;  %3060 = vrot.lane.b32.xlu0 %v1673_v39, %s5173_s24  ;;  %v5124_v39 = vld [vmem:[%s7652_s5 + $0xf8] ss:$12 sps:$4 sm:$0xff]   ;;  %v5128_v34 = vld [vmem:[%s7652_s5 + $0x110] ss:$12 sps:$4 sm:$0xff]  }
 0x332   :  { %v1572_v50 = vsel %vm7826_vm4, %v1555_v55, %v6991_v43  ;;  %3091 = vmatpush1.bf16.msra.mxu0 %v5121_v54  ;;  %4672 = vmatpush3.bf16.msra.mxu1 %v5122_v0  ;;  %v5123_v55 = vld [vmem:[%s7652_s5 + $0x4c] ss:$12 sps:$4 sm:$0xff]   ;;  %v5130_v54 = vld [vmem:[%s7652_s5 + $0x50] ss:$12 sps:$4 sm:$0xff]  }
 0x333   :  { %v7006_v3 = vmax.bf16 %v1572_v50, %v6243_v49  ;;  %3092 = vmatprep.subr.bf16.mxu0 %v5123_v55  ;;  %4673 = vmatprep.subr.bf16.mxu1 %v5124_v39  ;;  %v5126_v49 = vld [vmem:[%s7652_s5 + $0x38] ss:$12 sps:$4 sm:$0xff]   ;;  %v5129_v50 = vld [vmem:[%s7652_s5 + $0x60] ss:$12 sps:$4 sm:$0xff]   ;;  %v5131_v0 = vld [vmem:[%s7652_s5 + $0x7c] ss:$12 sps:$4 sm:$0xff]  }
 0x334   :  { %v5132_v55 = vld [vmem:[%s7652_s5 + $0x128] ss:$12 sps:$4 sm:$0xff]  }
 0x335   :  { %1635 = vrot.lane.b32.xlu1 %v7006_v3, %s5153_s9  ;;  %1633 = vrot.lane.b32.xlu0 %v7003_v40, %s5153_s9  ;;  %v5134_v39 = vld [vmem:[%s7652_s5 + $0x68] ss:$12 sps:$4 sm:$0xff]  }
 0x336   :  { %3093 = vmatpush1.bf16.msra.mxu0 %v5125_v46  ;;  %4674 = vmatpush3.bf16.msra.mxu1 %v5126_v49  ;;  %v5135_v46 = vld [vmem:[%s7652_s5 + $0x94] ss:$12 sps:$4 sm:$0xff]  }
 0x337   :  { %3094 = vmatprep.subr.bf16.mxu0 %v5127_v18  ;;  %4675 = vmatprep.subr.bf16.mxu1 %v5128_v34  ;;  %v5136_v49 = vld [vmem:[%s7652_s5 + $0x140] ss:$12 sps:$4 sm:$0xff]   ;;  %v5137_v18 = vld [vmem:[%s7652_s5 + $0x90] ss:$12 sps:$4 sm:$0xff]  }
 0x338   :  { %v5138_v34 = vld [vmem:[%s7652_s5 + $0x80] ss:$12 sps:$4 sm:$0xff]  }
 0x339   :  { %1558 = vrot.lane.b32.xlu0 %v6265_v16, %s5155_s21  ;;  %v5133_v16 = vld [vmem:[%s7652_s5 + $0x78] ss:$12 sps:$4 sm:$0xff]   ;;  %s5182_s21 = smov 63  }
 0x33a   :  { %3095 = vmatpush1.bf16.msra.mxu0 %v5129_v50  ;;  %4676 = vmatpush3.bf16.msra.mxu1 %v5130_v54  ;;  %v5139_v50 = vld [vmem:[%s7652_s5 + $0xac] ss:$12 sps:$4 sm:$0xff]   ;;  %v5140_v54 = vld [vmem:[%s7652_s5 + $0xa8] ss:$12 sps:$4 sm:$0xff]  }
 0x33b   :  { %3096 = vmatprep.subr.bf16.mxu0 %v5131_v0  ;;  %4677 = vmatprep.subr.bf16.mxu1 %v5132_v55  ;;  %v5141_v0 = vld [vmem:[%s7652_s5 + $0xc4] ss:$12 sps:$4 sm:$0xff]   ;;  %v5142_v55 = vld [vmem:[%s7652_s5 + $0xc0] ss:$12 sps:$4 sm:$0xff]  }
 0x33e   :  { %3097 = vmatpush1.bf16.msra.mxu0 %v5133_v16  ;;  %4678 = vmatpush3.bf16.msra.mxu1 %v5134_v39  ;;  %v5147_v16 = vld [vmem:[%s7652_s5 + $0x10c] ss:$12 sps:$4 sm:$0xff]   ;;  %v5149_v39 = vld [vmem:[%s7652_s5 + $0x124] ss:$12 sps:$4 sm:$0xff]  }
 0x33f   :  { %3098 = vmatprep.subr.bf16.mxu0 %v5135_v46  ;;  %4679 = vmatprep.subr.bf16.mxu1 %v5136_v49  ;;  %v5150_v46 = vld [vmem:[%s7652_s5 + $0x120] ss:$12 sps:$4 sm:$0xff]   ;;  %v5151_v49 = vld [vmem:[%s7652_s5 + $0x13c] ss:$12 sps:$4 sm:$0xff]  }
 0x342   :  { %3099 = vmatpush1.bf16.msra.mxu0 %v5137_v18  ;;  %4680 = vmatpush3.bf16.msra.mxu1 %v5138_v34  ;;  %v5152_v18 = vld [vmem:[%s7652_s5 + $0x138] ss:$12 sps:$4 sm:$0xff]  }
 0x343   :  { %3100 = vmatprep.subr.bf16.mxu0 %v5139_v50  ;;  %4681 = vmatprep.subr.bf16.mxu1 %v6162_v5  ;;  %v5143_v5 = vld [vmem:[%s7652_s5 + $0xdc] ss:$12 sps:$4 sm:$0xff]  }
 0x346   :  { %3101 = vmatpush1.bf16.msra.mxu0 %v5140_v54  ;;  %4682 = vmatpush3.bf16.msra.mxu1 %v6167_v1  ;;  %v5144_v1 = vld [vmem:[%s7652_s5 + $0xd8] ss:$12 sps:$4 sm:$0xff]  }
 0x347   :  { %3102 = vmatprep.subr.bf16.mxu0 %v5141_v0  ;;  %4683 = vmatprep.subr.bf16.mxu1 %v6184_v11  ;;  %v5145_v11 = vld [vmem:[%s7652_s5 + $0xf4] ss:$12 sps:$4 sm:$0xff]  }
 0x34a   :  { %3103 = vmatpush1.bf16.msra.mxu0 %v5142_v55  ;;  %4684 = vmatpush3.bf16.msra.mxu1 %v6195_v13  ;;  %v5146_v13 = vld [vmem:[%s7652_s5 + $0xf0] ss:$12 sps:$4 sm:$0xff]  }
 0x34b   :  { %3104 = vmatprep.subr.bf16.mxu0 %v5143_v5  ;;  %4691 = vmatprep.subr.bf16.mxu1 %v6211_v47  ;;  %v5148_v47 = vld [vmem:[%s7652_s5 + $0x108] ss:$12 sps:$4 sm:$0xff]   ;;  %s5175_s5 = smov 112  }
 0x34e   :  { %3105 = vmatpush1.bf16.msra.mxu0 %v5144_v1 }
 0x34f   :  { %3106 = vmatprep.subr.bf16.mxu0 %v5145_v11 }
 0x352   :  { %3107 = vmatpush1.bf16.msra.mxu0 %v5146_v13 }
 0x353   :  { %3108 = vmatprep.subr.bf16.mxu0 %v5147_v16 }
 0x356   :  { %3109 = vmatpush1.bf16.msra.mxu0 %v5148_v47 }
 0x357   :  { %3110 = vmatprep.subr.bf16.mxu0 %v5149_v39 }
 0x35a   :  { %3111 = vmatpush1.bf16.msra.mxu0 %v5150_v46 }
 0x35b   :  { %3112 = vmatprep.subr.bf16.mxu0 %v5151_v49 }
 0x35e   :  { %3113 = vmatpush1.bf16.msra.mxu0 %v5152_v18 }
 0x35f   :  { %3114 = vmatprep.subr.bf16.mxu0 %v6157_v62 }
 0x362   :  { %3115 = vmatpush1.bf16.msra.mxu0 %v6152_v61 }
 0x363   :  { %3116 = vmatprep.subr.bf16.mxu0 %v6179_v9 }
 0x366   :  { %3117 = vmatpush1.bf16.msra.mxu0 %v6190_v12 }
 0x367   :  { %3129 = vmatprep.subr.bf16.mxu0 %v6206_v17 }
 0x374   :  { %v4615_v34 = vpop.f32.mrb[16].mxu0 }
 0x375   :  { %v4616_v50 = vpop.f32.mrb[17].mxu0 }
 0x376   :  { %v4617_v54 = vadd.f32 %v4616_v50, %v4615_v34  ;;  %v4618_v0 = vpop.f32.mrb[18].mxu0 }
 0x377   :  { %v4619_v55 = vpop.f32.mrb[19].mxu0 }
 0x378   :  { %v4620_v5 = vadd.f32 %v4619_v55, %v4618_v0 }
 0x38d   :  { %v3057_v9 = vpop.permute.xlu1 %3056 }
 0x391   :  { %v3059_v12 = vpop.permute.xlu1 %3058 }
 0x392   :  { %v3071_v49 = vsel %vm3070_vm14, %v3057_v9, %v3059_v12 }
 0x394   :  { %v4637_v1 = vpop.f32.mrb[20].mxu0 }
 0x395   :  { %v4638_v11 = vpop.f32.mrb[21].mxu0 }
 0x396   :  { %v4639_v13 = vadd.f32 %v4638_v11, %v4637_v1  ;;  %v4640_v16 = vpop.f32.mrb[22].mxu0 }
 0x397   :  { %v4641_v47 = vpop.f32.mrb[23].mxu0 }
 0x398   :  { %v7114_v62 = vadd.f32 %v4639_v13, %v4617_v54  ;;  %v4642_v61 = vadd.f32 %v4641_v47, %v4640_v16 }
 0x39a   :  { %v7116_v39 = vadd.f32 %v4642_v61, %v4620_v5 }
 0x3a3   :  { %v7118_v17 = vpop.permute.xlu0 %3060 }
 0x3a4   :  { %v3072_v46 = vsel %vm3070_vm14, %v3059_v12, %v7118_v17  ;;  %v7848_v12 = vld [vmem:[#allocation36_spill] sm:$0xff] }
 0x3a5   :  { %3118 = vmatprep.mubr.bf16.mxu0 %v3072_v46  ;;  %3290 = vmatprep.mubr.bf16.mxu1 %v3072_v46  ;;  %v7849_v46 = vld [vmem:[#allocation6_spill] sm:$0xff] }
 0x3a6   :  { %3119 = vmatmul.mubr.bf16.vlgmr.msra.gmra.mrb[32].mxu0 %v3071_v49  ;;  %3291 = vmatmul.mubr.bf16.vlgmr.msra.gmra.mrb[16].mxu1 %v3071_v49 }
 0x3a7   :  { %v1634_v18 = vpop.permute.xlu0 %1633  ;;  %v7123_v34 = vpop.permute.xlu1 %1635  ;;  %3130 = vmatpush1.bf16.msra.mxu0 %v6281_v31  ;;  %4692 = vmatpush3.bf16.msra.mxu1 %v6286_v28 }
 0x3a8   :  { %v1649_v50 = vsel %vm7827_vm13, %v6972_v10, %v1634_v18  ;;  %v1650_v54 = vsel %vm7828_vm2, %v1634_v18, %v7123_v34  ;;  %3131 = vmatprep.subr.bf16.mxu0 %v6291_v38  ;;  %4693 = vmatprep.subr.bf16.mxu1 %v6296_v44  ;;  %v7831_v38 = vld [vmem:[#allocation5_spill] sm:$0xff]  ;;  %v7832_v44 = vld [vmem:[#allocation7_spill] sm:$0xff]  ;;  %vm3441_vm2 = vcmask 523264  }
 0x3a9   :  { %v1674_v0 = vmax.bf16 %v1649_v50, %v6462_v7  ;;  %v1675_v55 = vmax.bf16 %v1650_v54, %v7003_v40  ;;  %v7850_v50 = vld [vmem:[#allocation37_spill] sm:$0xff] }
 0x3ab   :  { %3062 = vrot.lane.b32.xlu1 %v1674_v0, %s5173_s24  ;;  %v1559_v5 = vpop.permute.xlu0 %1558  ;;  %3064 = vrot.lane.b32.xlu0 %v1675_v55, %s5173_s24  ;;  %v7852_v0 = vld [vmem:[#allocation38_spill] sm:$0xff]  ;;  %v7853_v55 = vld [vmem:[#allocation39_spill] sm:$0xff] }
 0x3ac   :  { %v1573_v31 = vsel %vm7829_vm10, %v6991_v43, %v1559_v5  ;;  %3132 = vmatpush1.bf16.msra.mxu0 %v6305_v32  ;;  %4694 = vmatpush3.bf16.msra.mxu1 %v6310_v37  ;;  %v7833_v32 = vld [vmem:[#allocation9_spill] sm:$0xff]  ;;  %v7834_v37 = vld [vmem:[#allocation11_spill] sm:$0xff]  ;;  %v7854_v5 = vld [vmem:[#allocation10_spill] sm:$0xff]  ;;  %vm3458_vm10 = vcmask 777216  }
 0x3ad   :  { %v7142_v28 = vmax.bf16 %v1573_v31, %v6263_v30  ;;  %3133 = vmatprep.subr.bf16.mxu0 %v6323_v51  ;;  %4695 = vmatprep.subr.bf16.mxu1 %v6328_v25  ;;  %v7830_v30 = vld [vmem:[#allocation4_spill] sm:$0xff]  ;;  %v7835_v51 = vld [vmem:[#allocation13_spill] sm:$0xff]  ;;  %v7836_v25 = vld [vmem:[#allocation15_spill] sm:$0xff] }
 0x3ae   :  { %v7855_v31 = vld [vmem:[#allocation12_spill] sm:$0xff] }
 0x3af   :  { %1637 = vrot.lane.b32.xlu1 %v7142_v28, %s5153_s9 }
 0x3b0   :  { %3134 = vmatpush1.bf16.msra.mxu0 %v6340_v41  ;;  %4696 = vmatpush3.bf16.msra.mxu1 %v6345_v48  ;;  %v7837_v41 = vld [vmem:[#allocation17_spill] sm:$0xff]  ;;  %v7838_v48 = vld [vmem:[#allocation19_spill] sm:$0xff] }
 0x3b1   :  { %3135 = vmatprep.subr.bf16.mxu0 %v6355_v52  ;;  %4697 = vmatprep.subr.bf16.mxu1 %v6360_v56  ;;  %v7839_v52 = vld [vmem:[#allocation21_spill] sm:$0xff]  ;;  %v7840_v56 = vld [vmem:[#allocation23_spill] sm:$0xff] }
 0x3b4   :  { %3136 = vmatpush1.bf16.msra.mxu0 %v6369_v22  ;;  %4698 = vmatpush3.bf16.msra.mxu1 %v6374_v58  ;;  %v7841_v22 = vld [vmem:[#allocation25_spill] sm:$0xff]  ;;  %v7842_v58 = vld [vmem:[#allocation27_spill] sm:$0xff] }
 0x3b5   :  { %3137 = vmatprep.subr.bf16.mxu0 %v6381_v63  ;;  %4699 = vmatprep.subr.bf16.mxu1 %v6386_v2  ;;  %v7843_v63 = vld [vmem:[#allocation29_spill] sm:$0xff]  ;;  %v7844_v2 = vld [vmem:[#allocation31_spill] sm:$0xff] }
 0x3b8   :  { %3138 = vmatpush1.bf16.msra.mxu0 %v6395_v19  ;;  %4700 = vmatpush3.bf16.msra.mxu1 %v6400_v4  ;;  %v7845_v19 = vld [vmem:[#allocation33_spill] sm:$0xff]  ;;  %v7846_v4 = vld [vmem:[#allocation35_spill] sm:$0xff] }
 0x3b9   :  { %3139 = vmatprep.subr.bf16.mxu0 %v6407_v23  ;;  %4701 = vmatprep.subr.bf16.mxu1 %v6412_v53 }
 0x3bc   :  { %3140 = vmatpush1.bf16.msra.mxu0 %v6419_v6  ;;  %4702 = vmatpush3.bf16.msra.mxu1 %v6424_v59 }
 0x3bd   :  { %3141 = vmatprep.subr.bf16.mxu0 %v6431_v57  ;;  %4703 = vmatprep.subr.bf16.mxu1 %v6436_v8 }
 0x3c0   :  { %3142 = vmatpush1.bf16.msra.mxu0 %v6445_v26  ;;  %4704 = vmatpush3.bf16.msra.mxu1 %v6450_v14 }
 0x3c1   :  { %3143 = vmatprep.subr.bf16.mxu0 %v6459_v24  ;;  %4705 = vmatprep.subr.bf16.mxu1 %v6467_v27 }
 0x3c4   :  { %3144 = vmatpush1.bf16.msra.mxu0 %v6476_v33  ;;  %4706 = vmatpush3.bf16.msra.mxu1 %v6481_v15 }
 0x3c5   :  { %3145 = vmatprep.subr.bf16.mxu0 %v6495_v45  ;;  %4713 = vmatprep.subr.bf16.mxu1 %v7830_v30  ;;  %v7859_v30 = vld [vmem:[#allocation16_spill] sm:$0xff] }
 0x3c8   :  { %3146 = vmatpush1.bf16.msra.mxu0 %v7831_v38  ;;  %v7860_v38 = vld [vmem:[#allocation42_spill] sm:$0xff] }
 0x3c9   :  { %3147 = vmatprep.subr.bf16.mxu0 %v7832_v44  ;;  %v7861_v44 = vld [vmem:[#allocation43_spill] sm:$0xff] }
 0x3cc   :  { %3148 = vmatpush1.bf16.msra.mxu0 %v7833_v32  ;;  %v7862_v32 = vld [vmem:[#allocation18_spill] sm:$0xff] }
 0x3cd   :  { %3149 = vmatprep.subr.bf16.mxu0 %v7834_v37  ;;  %v7863_v37 = vld [vmem:[#allocation20_spill] sm:$0xff] }
 0x3d0   :  { %3150 = vmatpush1.bf16.msra.mxu0 %v7835_v51  ;;  %v7864_v51 = vld [vmem:[#allocation44_spill] sm:$0xff] }
 0x3d1   :  { %3151 = vmatprep.subr.bf16.mxu0 %v7836_v25  ;;  %v7865_v25 = vld [vmem:[#allocation45_spill] sm:$0xff] }
 0x3d4   :  { %3152 = vmatpush1.bf16.msra.mxu0 %v7837_v41  ;;  %v7866_v41 = vld [vmem:[#allocation22_spill] sm:$0xff] }
 0x3d5   :  { %3153 = vmatprep.subr.bf16.mxu0 %v7838_v48  ;;  %v7867_v48 = vld [vmem:[#allocation24_spill] sm:$0xff] }
 0x3d8   :  { %3154 = vmatpush1.bf16.msra.mxu0 %v7839_v52  ;;  %v7868_v52 = vld [vmem:[#allocation46_spill] sm:$0xff] }
 0x3d9   :  { %3155 = vmatprep.subr.bf16.mxu0 %v7840_v56  ;;  %v7869_v56 = vld [vmem:[#allocation47_spill] sm:$0xff] }
 0x3dc   :  { %3156 = vmatpush1.bf16.msra.mxu0 %v7841_v22  ;;  %v7870_v22 = vld [vmem:[#allocation26_spill] sm:$0xff] }
 0x3dd   :  { %3157 = vmatprep.subr.bf16.mxu0 %v7842_v58  ;;  %v7871_v58 = vld [vmem:[#allocation28_spill] sm:$0xff] }
 0x3e0   :  { %3158 = vmatpush1.bf16.msra.mxu0 %v7843_v63  ;;  %v7872_v63 = vld [vmem:[#allocation48_spill] sm:$0xff] }
 0x3e1   :  { %3159 = vmatprep.subr.bf16.mxu0 %v7844_v2  ;;  %v7873_v2 = vld [vmem:[#allocation49_spill] sm:$0xff] }
 0x3e4   :  { %3160 = vmatpush1.bf16.msra.mxu0 %v7845_v19  ;;  %v7874_v19 = vld [vmem:[#allocation30_spill] sm:$0xff] }
 0x3e5   :  { %3172 = vmatprep.subr.bf16.mxu0 %v7846_v4  ;;  %v7875_v4 = vld [vmem:[#allocation32_spill] sm:$0xff] }
 0x3f0   :  { %v4659_v23 = vpop.f32.mrb[24].mxu0 }
 0x3f1   :  { %v4660_v53 = vpop.f32.mrb[25].mxu0 }
 0x3f2   :  { %v4661_v6 = vadd.f32 %v4660_v53, %v4659_v23  ;;  %v4662_v59 = vpop.f32.mrb[26].mxu0  ;;  %v7876_v23 = vld [vmem:[#allocation50_spill] sm:$0xff]  ;;  %v7877_v53 = vld [vmem:[#allocation51_spill] sm:$0xff] }
 0x3f3   :  { %v4663_v57 = vpop.f32.mrb[27].mxu0 }
 0x3f4   :  { %v4664_v8 = vadd.f32 %v4663_v57, %v4662_v59  ;;  %v2999_v26 = vadd.f32 %v4661_v6, %v7114_v62  ;;  %v7878_v6 = vld [vmem:[#allocation34_spill] sm:$0xff]  ;;  %v7879_v59 = vld [vmem:[#allocation52_spill] sm:$0xff]  ;;  %v7880_v57 = vld [vmem:[#allocation53_spill] sm:$0xff] }
 0x3f6   :  { %v3002_v14 = vadd.f32 %v4664_v8, %v7116_v39  ;;  %v7881_v8 = vld [vmem:[#allocation54_spill] sm:$0xff] }
 0x3fc   :  { %v3039_v24 = vpop.f32.mrb[28].mxu0 }
 0x3fd   :  { %v3040_v7 = vadd.f32 %v3039_v24, %v2999_v26  ;;  %v4747_v27 = vpop.f32.mrb[29].mxu0  ;;  %v7882_v26 = vld [vmem:[#allocation55_spill] sm:$0xff]  ;;  %v7884_v24 = vld [vmem:[#allocation57_spill] sm:$0xff] }
 0x3fe   :  { %v3042_v33 = vpop.f32.mrb[30].mxu0  ;;  %v7886_v27 = vld [vmem:[#allocation59_spill] sm:$0xff] }
 0x3ff   :  { %v3043_v15 = vadd.f32 %v3042_v33, %v3002_v14  ;;  %v4748_v45 = vpop.f32.mrb[31].mxu0  ;;  %v7883_v14 = vld [vmem:[#allocation56_spill] sm:$0xff] }
 0x400   :  { %v2873_v10 = vpop.f32.mrb[12].mxu1  ;;  %v7887_v33 = vld [vmem:[#allocation60_spill] sm:$0xff]  ;;  %v7889_v45 = vld [vmem:[#allocation62_spill] sm:$0xff] }
 0x401   :  { %v7190_v43 = vpack.c.bf16 %v3043_v15, %v3040_v7  ;;  %v2875_v40 = vpop.f32.mrb[13].mxu1  ;;  %v7885_v7 = vld [vmem:[#allocation58_spill] sm:$0xff]  ;;  %v7888_v15 = vld [vmem:[#allocation61_spill] sm:$0xff] }
 0x402   :  { %v2877_v1 = vpop.f32.mrb[14].mxu1 }
 0x403   :  { %v7192_v11 = vpack.c.bf16 %v2877_v1, %v2873_v10  ;;  %v2879_v13 = vpop.f32.mrb[15].mxu1  ;;  %v7890_v10 = vld [vmem:[#allocation63_spill] sm:$0xff] }
 0x404   :  { %v7194_v16 = vpack.c.bf16 %v2879_v13, %v2875_v40  ;;  %v7891_v40 = vld [vmem:[#allocation64_spill] sm:$0xff] }
 0x406   :  { %3426 = vst.msk [vmem:[#allocation3 + $0x8] sm:$0xff] %vm7847_vm5, %v7194_v16 }
 0x41d   :  { %v7198_v47 = vpop.permute.xlu0 %3064  ;;  %v3063_v62 = vpop.permute.xlu1 %3062 }
 0x41e   :  { %v3073_v61 = vsel %vm3070_vm14, %v7118_v17, %v3063_v62  ;;  %v3074_v39 = vsel %vm3070_vm14, %v3063_v62, %v7198_v47  ;;  %v7851_v17 = vld [vmem:[#allocation8_spill] sm:$0xff] }
 0x41f   :  { %3161 = vmatprep.mubr.bf16.mxu0 %v3074_v39  ;;  %3331 = vmatprep.mubr.bf16.mxu1 %v3074_v39 }
 0x420   :  { %3162 = vmatmul.mubr.bf16.vlgmr.msra.gmra.mrb[32].mxu0 %v3073_v61  ;;  %3332 = vmatmul.mubr.bf16.vlgmr.msra.gmra.mrb[20].mxu1 %v3073_v61 }
 0x421   :  { %v1638_v9 = vpop.permute.xlu1 %1637  ;;  %3173 = vmatpush1.bf16.msra.mxu0 %v7848_v12  ;;  %4714 = vmatpush3.bf16.msra.mxu1 %v7849_v46 }
 0x422   :  { %v1651_v49 = vsel %vm7810_vm1, %v7123_v34, %v1638_v9  ;;  %v1677_v18 = vmax.bf16 %v1638_v9, %v7142_v28  ;;  %3174 = vmatprep.subr.bf16.mxu0 %v7850_v50  ;;  %4715 = vmatprep.subr.bf16.mxu1 %v7851_v17  ;;  %v7856_v34 = vld [vmem:[#allocation40_spill] sm:$0xff]  ;;  %v7858_v28 = vld [vmem:[#allocation14_spill] sm:$0xff]  ;;  %vm3536_vm1 = vcmask 900096  }
 0x423   :  { %v1676_v54 = vmax.bf16 %v1651_v49, %v7006_v3  ;;  %v7857_v3 = vld [vmem:[#allocation41_spill] sm:$0xff] }
 0x424   :  { %3068 = vrot.lane.b32.xlu1 %v1677_v18, %s5173_s24 }
 0x425   :  { %3066 = vrot.lane.b32.xlu0 %v1676_v54, %s5173_s24  ;;  %3175 = vmatpush1.bf16.msra.mxu0 %v7852_v0  ;;  %s5177_s24 = smov 110   ;;  %v7896_v54 = vld [vmem:[#allocation66_spill] sm:$0xff] }
 0x426   :  { %3176 = vmatprep.subr.bf16.mxu0 %v7853_v55  ;;  %4716 = vmatpush3.bf16.msra.mxu1 %v7854_v5  ;;  %v7899_v5 = vld [vmem:[#allocation69_spill] sm:$0xff] }
 0x427   :  { %4717 = vmatprep.subr.bf16.mxu1 %v7855_v31  ;;  %v7900_v31 = vld [vmem:[#allocation68_spill] sm:$0xff] }
 0x428   :  { %3445 = vrot.lane.b32.xlu1 %v7192_v11, %s5153_s9 }
 0x429   :  { %3447 = vrot.lane.b32.xlu0 %v7194_v16, %s5153_s9  ;;  %3177 = vmatpush1.bf16.msra.mxu0 %v7856_v34  ;;  %v7901_v34 = vld [vmem:[#allocation70_spill] sm:$0xff] }
 0x42a   :  { %3178 = vmatprep.subr.bf16.mxu0 %v7857_v3  ;;  %4718 = vmatpush3.bf16.msra.mxu1 %v7858_v28 }
 0x42b   :  { %4719 = vmatprep.subr.bf16.mxu1 %v7859_v30 }
 0x42c   :  { %3466 = vrot.lane.b32.xlu1 %v7192_v11, %s5154_s16 }
 0x42d   :  { %3468 = vrot.lane.b32.xlu0 %v7194_v16, %s5154_s16  ;;  %3179 = vmatpush1.bf16.msra.mxu0 %v7860_v38  ;;  %s5176_s16 = smov 111  }
 0x42e   :  { %3180 = vmatprep.subr.bf16.mxu0 %v7861_v44  ;;  %4720 = vmatpush3.bf16.msra.mxu1 %v7862_v32 }
 0x42f   :  { %4721 = vmatprep.subr.bf16.mxu1 %v7863_v37 }
 0x430   :  { %3488 = vrot.lane.b32.xlu1 %v7192_v11, %s5175_s5 }
 0x431   :  { %3490 = vrot.lane.b32.xlu0 %v7194_v16, %s5175_s5  ;;  %3181 = vmatpush1.bf16.msra.mxu0 %v7864_v51 }
 0x432   :  { %3182 = vmatprep.subr.bf16.mxu0 %v7865_v25  ;;  %4722 = vmatpush3.bf16.msra.mxu1 %v7866_v41 }
 0x433   :  { %4723 = vmatprep.subr.bf16.mxu1 %v7867_v48 }
 0x434   :  { %3510 = vrot.lane.b32.xlu1 %v7192_v11, %s5176_s16 }
 0x435   :  { %3512 = vrot.lane.b32.xlu0 %v7194_v16, %s5176_s16  ;;  %3183 = vmatpush1.bf16.msra.mxu0 %v7868_v52 }
 0x436   :  { %3184 = vmatprep.subr.bf16.mxu0 %v7869_v56  ;;  %4724 = vmatpush3.bf16.msra.mxu1 %v7870_v22 }
 0x437   :  { %4725 = vmatprep.subr.bf16.mxu1 %v7871_v58 }
 0x439   :  { %3534 = vrot.lane.b32.xlu0 %v7194_v16, %s5177_s24  ;;  %3185 = vmatpush1.bf16.msra.mxu0 %v7872_v63 }
 0x43a   :  { %3186 = vmatprep.subr.bf16.mxu0 %v7873_v2  ;;  %4726 = vmatpush3.bf16.msra.mxu1 %v7874_v19 }
 0x43b   :  { %4727 = vmatprep.subr.bf16.mxu1 %v7875_v4 }
 0x43d   :  { %3187 = vmatpush1.bf16.msra.mxu0 %v7876_v23 }
 0x43e   :  { %3188 = vmatprep.subr.bf16.mxu0 %v7877_v53  ;;  %4728 = vmatpush3.bf16.msra.mxu1 %v7878_v6 }
 0x43f   :  { %4749 = vmatprep.subr.bf16.mxu1 %v7818_v42 }
 0x441   :  { %3189 = vmatpush1.bf16.msra.mxu0 %v7879_v59 }
 0x442   :  { %3190 = vmatprep.subr.bf16.mxu0 %v7880_v57 }
 0x445   :  { %3191 = vmatpush1.bf16.msra.mxu0 %v7881_v8 }
 0x446   :  { %3192 = vmatprep.subr.bf16.mxu0 %v7882_v26 }
 0x449   :  { %3193 = vmatpush1.bf16.msra.mxu0 %v7883_v14 }
 0x44a   :  { %3194 = vmatprep.subr.bf16.mxu0 %v7884_v24 }
 0x44d   :  { %3195 = vmatpush1.bf16.msra.mxu0 %v7885_v7 }
 0x44e   :  { %3196 = vmatprep.subr.bf16.mxu0 %v7886_v27 }
 0x451   :  { %3197 = vmatpush1.bf16.msra.mxu0 %v7887_v33 }
 0x452   :  { %3198 = vmatprep.subr.bf16.mxu0 %v7888_v15 }
 0x455   :  { %3199 = vmatpush1.bf16.msra.mxu0 %v7889_v45 }
 0x456   :  { %3200 = vmatprep.subr.bf16.mxu0 %v7890_v10  ;;  %v3671_v10 = vld [vmem:[%s7654_s4] sm:$0xff] }
 0x459   :  { %3201 = vmatpush1.bf16.msra.mxu0 %v7891_v40  ;;  %v3672_v40 = vld [vmem:[%s7654_s4 + $0x8] sm:$0xff] }
 0x45a   :  { %3202 = vmatprep.subr.bf16.mxu0 %v6880_v36 }
 0x45d   :  { %3203 = vmatpush1.bf16.msra.mxu0 %v6888_v60  ;;  %v7892_v60 = vld [vmem:[#allocation65_spill] sm:$0xff] }
 0x45e   :  { %3215 = vmatprep.subr.bf16.mxu0 %v6902_v29  ;;  %v7893_v29 = vld [vmem:[#allocation67_spill] sm:$0xff] }
 0x479   :  { %v4685_v1 = vpop.f32.mrb[16].mxu1 }
 0x47a   :  { %v4686_v13 = vpop.f32.mrb[17].mxu1 }
 0x47b   :  { %v4687_v62 = vadd.f32 %v4686_v13, %v4685_v1  ;;  %v4688_v61 = vpop.f32.mrb[18].mxu1  ;;  %v3674_v1 = vld [vmem:[%s7654_s4 + $0x18] sm:$0xff] }
 0x47c   :  { %v4689_v39 = vpop.f32.mrb[19].mxu1 }
 0x47d   :  { %v4690_v9 = vadd.f32 %v4689_v39, %v4688_v61 }
 0x496   :  { %v3069_v12 = vpop.permute.xlu1 %3068 }
 0x497   :  { %v3067_v46 = vpop.permute.xlu0 %3066 }
 0x498   :  { %v3075_v49 = vsel %vm3070_vm14, %v7198_v47, %v3067_v46  ;;  %v3076_v18 = vsel %vm3070_vm14, %v3067_v46, %v3069_v12  ;;  %vm3438_vm14 = vcmask 1048320  }
 0x499   :  { %3204 = vmatprep.mubr.bf16.mxu0 %v3076_v18  ;;  %3372 = vmatprep.mubr.bf16.mxu1 %v3076_v18 }
 0x49a   :  { %v3446_v36 = vpop.permute.xlu1 %3445  ;;  %3205 = vmatmul.mubr.bf16.vlgmr.msra.gmra.mrb[32].mxu0 %v3075_v49  ;;  %3373 = vmatmul.mubr.bf16.vlgmr.msra.gmra.mrb[24].mxu1 %v3075_v49 }
 0x49b   :  { %4750 = vmatpush3.bf16.msra.mxu1 %v7892_v60  ;;  %3216 = vmatpush1.bf16.msra.mxu0 %v7893_v29  ;;  %v3448_v50 = vpop.permute.xlu0 %3447 }
 0x49c   :  { %v7280_v17 = vsel %vm7894_vm15, %v3446_v36, %v3448_v50  ;;  %3453 = vst.msk [vmem:[#allocation3 + $0x28] sm:$0xff] %vm7895_vm9, %v3448_v50  ;;  %4751 = vmatprep.subr.bf16.mxu1 %v7818_v42  ;;  %3217 = vmatprep.subr.bf16.mxu0 %v6926_v21  ;;  %vm3480_vm15 = vcmask 769024   ;;  %vm3502_vm9 = vcmask 654336  }
 0x49d   :  { %4755 = vmatprep.mubr.msk.bf16.mxu1 %vm5174_vm0, %v7818_v42  ;;  %3247 = vmatprep.mubr.bf16.mxu0 %v7822_v20  ;;  %vm7902_vm0 = vmmov %vm7847_vm5 }
 0x49e   :  { %v3467_v47 = vpop.permute.xlu1 %3466  ;;  %vm7903_vm8 = vmmov %vm7902_vm0 }
 0x49f   :  { %4752 = vmatpush3.bf16.msra.mxu1 %v7896_v54  ;;  %3218 = vmatpush1.bf16.msra.mxu0 %v6940_v35  ;;  %v3469_v0 = vpop.permute.xlu0 %3468  ;;  %vm7904_vm4 = vmmov %vm7902_vm0 }
 0x4a0   :  { %v7291_v55 = vsel %vm7897_vm6, %v3467_v47, %v3469_v0  ;;  %3475 = vst.msk [vmem:[#allocation3 + $0x48] sm:$0xff] %vm7898_vm11, %v3469_v0  ;;  %4753 = vmatprep.subr.bf16.mxu1 %v7818_v42  ;;  %3219 = vmatprep.subr.bf16.mxu0 %v7899_v5  ;;  %vm7905_vm13 = vmmov %vm7902_vm0  ;;  %vm3524_vm6 = vcmask 646144  }
 0x4a1   :  { %vm7906_vm5 = vmmov %vm7902_vm0 }
 0x4a2   :  { %v3489_v21 = vpop.permute.xlu1 %3488  ;;  %vm7907_vm11 = vmmov %vm7902_vm0 }
 0x4a3   :  { %4754 = vmatpush3.bf16.msra.mxu1 %v7900_v31  ;;  %3220 = vmatpush1.bf16.msra.mxu0 %v7901_v34  ;;  %v3491_v3 = vpop.permute.xlu0 %3490 }
 0x4a4   :  { %v7299_v28 = vsel %vm3492_vm3, %v3489_v21, %v3491_v3  ;;  %3497 = vst.msk [vmem:[#allocation3 + $0x68] sm:$0xff] %vm7902_vm0, %v3491_v3  ;;  %vm3546_vm0 = vcmask 637952  }
 0x4a6   :  { %4756 = vmatmul.mubr.msk.bf16.vlgmr.msra.gmra.mrb[28].mxu1 %vm524_vm12, %v3069_v12  ;;  %v3511_v35 = vpop.permute.xlu1 %3510  ;;  %4539 = vmatmul.mubr.msk.bf16.vlgmr.msra.gmra.mrb[32].mxu0 %vm524_vm12, %v3069_v12  ;;  %vm3713_vm12 = vcmask 130048  }
 0x4a7   :  { %v3513_v42 = vpop.permute.xlu0 %3512 }
 0x4a8   :  { %v7304_v30 = vsel %vm3514_vm7, %v3511_v35, %v3513_v42  ;;  %3519 = vst.msk [vmem:[#allocation3 + $0x88] sm:$0xff] %vm7903_vm8, %v3513_v42  ;;  %vm7908_vm7 = vmmov %vm7904_vm4  ;;  %vm3595_vm8 = vcmask 515072  }
 0x4ab   :  { %v7307_v38 = vpop.permute.xlu0 %3534 }
 0x4ac   :  { %3541 = vst.msk [vmem:[#allocation3 + $0xa8] sm:$0xff] %vm7904_vm4, %v7307_v38 }
 0x4f3   :  { %v4707_v44 = vpop.f32.mrb[20].mxu1 }
 0x4f4   :  { %v4708_v32 = vpop.f32.mrb[21].mxu1 }
 0x4f5   :  { %v4709_v37 = vadd.f32 %v4708_v32, %v4707_v44  ;;  %v4710_v51 = vpop.f32.mrb[22].mxu1 }
 0x4f6   :  { %v4711_v25 = vpop.f32.mrb[23].mxu1 }
 0x4f7   :  { %v3334_v41 = vadd.f32 %v4709_v37, %v4687_v62  ;;  %v4712_v48 = vadd.f32 %v4711_v25, %v4710_v51 }
 0x4f9   :  { %v3337_v52 = vadd.f32 %v4712_v48, %v4690_v9 }
 0x56d   :  { %v4729_v56 = vpop.f32.mrb[24].mxu1 }
 0x56e   :  { %v4730_v22 = vpop.f32.mrb[25].mxu1 }
 0x56f   :  { %v4731_v58 = vadd.f32 %v4730_v22, %v4729_v56  ;;  %v4732_v63 = vpop.f32.mrb[26].mxu1 }
 0x570   :  { %v4733_v2 = vpop.f32.mrb[27].mxu1 }
 0x571   :  { %v4734_v19 = vadd.f32 %v4733_v2, %v4732_v63  ;;  %v3375_v4 = vadd.f32 %v4731_v58, %v3334_v41 }
 0x573   :  { %v3378_v23 = vadd.f32 %v4734_v19, %v3337_v52 }
 0x579   :  { %v3415_v53 = vpop.f32.mrb[28].mxu1  ;;  %v3249_v6 = vpop.f32.mrb[32].mxu0 }
 0x57a   :  { %v3416_v59 = vadd.f32 %v3415_v53, %v3375_v4  ;;  %v4757_v57 = vpop.f32.mrb[29].mxu1  ;;  %v3251_v8 = vpop.f32.mrb[33].mxu0 }
 0x57b   :  { %v3418_v26 = vpop.f32.mrb[30].mxu1  ;;  %v3253_v14 = vpop.f32.mrb[34].mxu0 }
 0x57c   :  { %v3419_v24 = vadd.f32 %v3418_v26, %v3378_v23  ;;  %v3422_v7 = vpack.c.bf16 %v3253_v14, %v3249_v6  ;;  %v4758_v27 = vpop.f32.mrb[31].mxu1  ;;  %v3255_v33 = vpop.f32.mrb[35].mxu0 }
 0x57d   :  { %v3423_v15 = vpack.c.bf16 %v3255_v33, %v3251_v8 }
 0x57e   :  { %v3424_v45 = vpack.c.bf16 %v3419_v24, %v3416_v59  ;;  %3454 = vrot.lane.b32.xlu1 %v3422_v7, %s5178_s8  ;;  %3429 = vrot.lane.b32.xlu0 %v3422_v7, %s5157_s18 }
 0x582   :  { %3476 = vrot.lane.b32.xlu1 %v3422_v7, %s5179_s27  ;;  %3556 = vrot.lane.b32.xlu0 %v7194_v16, %s5157_s18 }
 0x586   :  { %3498 = vrot.lane.b32.xlu1 %v3422_v7, %s5180_s28  ;;  %3578 = vrot.lane.b32.xlu0 %v7194_v16, %s5178_s8 }
 0x58a   :  { %3520 = vrot.lane.b32.xlu1 %v3422_v7, %s5181_s11  ;;  %3589 = vrot.lane.b32.xlu0 %v3422_v7, %s5182_s21 }
 0x58e   :  { %3542 = vrot.lane.b32.xlu1 %v3422_v7, %s5183_s15  ;;  %3606 = vrot.lane.b32.xlu0 %v7194_v16, %s5179_s27  ;;  %v5081_v16 = vld [vmem:[%s7653_s3 + $0x4] ss:$8 sps:$4 sm:$0xff]  }
 0x58f   :  { %4547 = vmatprep.mubr.msk.bf16.mxu0 %vm3713_vm12, %v5081_v16  ;;  %4545 = vmatprep.mubr.msk.bf16.mxu1 %vm3713_vm12, %v5081_v16 }
 0x592   :  { %3456 = vrot.lane.b32.xlu0 %v3423_v15, %s5178_s8  ;;  %3431 = vrot.lane.b32.xlu1 %v3423_v15, %s5157_s18 }
 0x596   :  { %3478 = vrot.lane.b32.xlu0 %v3423_v15, %s5179_s27  ;;  %3532 = vrot.lane.b32.xlu1 %v7192_v11, %s5177_s24 }
 0x59a   :  { %3500 = vrot.lane.b32.xlu0 %v3423_v15, %s5180_s28  ;;  %3563 = vrot.lane.b32.xlu1 %v3422_v7, %s5184_s0 }
 0x59e   :  { %3522 = vrot.lane.b32.xlu0 %v3423_v15, %s5181_s11  ;;  %3554 = vrot.lane.b32.xlu1 %v7192_v11, %s5157_s18 }
 0x5a2   :  { %3544 = vrot.lane.b32.xlu0 %v3423_v15, %s5183_s15  ;;  %3580 = vrot.lane.b32.xlu1 %v7190_v43, %s5178_s8 }
 0x5a6   :  { %3565 = vrot.lane.b32.xlu0 %v3423_v15, %s5184_s0  ;;  %3593 = vrot.lane.b32.xlu1 %v3424_v45, %s5182_s21 }
 0x5aa   :  { %3591 = vrot.lane.b32.xlu0 %v3423_v15, %s5182_s21  ;;  %3576 = vrot.lane.b32.xlu1 %v7192_v11, %s5178_s8 }
 0x5ae   :  { %3618 = vrot.lane.b32.xlu0 %v3423_v15, %s5185_s26  ;;  %3608 = vrot.lane.b32.xlu1 %v7190_v43, %s5179_s27  ;;  %v3673_v43 = vld [vmem:[%s7654_s4 + $0x10] sm:$0xff] }
 0x5b2   :  { %3616 = vrot.lane.b32.xlu0 %v3422_v7, %s5185_s26  ;;  %3620 = vrot.lane.b32.xlu1 %v3424_v45, %s5185_s26 }
 0x5b6   :  { %3677 = vperm.xlu0 %4818, %v3671_v10   ;;  %3604 = vrot.lane.b32.xlu1 %v7192_v11, %s5179_s27 }
 0x5ba   :  { %3687 = vperm.xlu0 %4818, %v3673_v43   ;;  %3682 = vperm.xlu1 %4817, %v3672_v40  }
 0x5be   :  { %3692 = vperm.xlu1 %4817, %v3674_v1  }
 0x5f0   :  { %v3455_v13 = vpop.permute.xlu1 %3454  ;;  %v3430_v62 = vpop.permute.xlu0 %3429 }
 0x5f1   :  { %3463 = vst.msk [vmem:[#allocation3 + $0x28] sm:$0xff] %vm3438_vm14, %v3455_v13  ;;  %3439 = vst.msk [vmem:[#allocation3 + $0x8] sm:$0xff] %vm3438_vm14, %v3430_v62 }
 0x5f4   :  { %v3477_v61 = vpop.permute.xlu1 %3476  ;;  %v3557_v39 = vpop.permute.xlu0 %3556 }
 0x5f5   :  { %3485 = vst.msk [vmem:[#allocation3 + $0x48] sm:$0xff] %vm3438_vm14, %v3477_v61 }
 0x5f6   :  { %3562 = vst.msk [vmem:[#allocation3 + $0xc8] sm:$0xff] %vm7905_vm13, %v3557_v39  ;;  %vm3622_vm13 = vcmask 506880  }
 0x5f8   :  { %v3499_v9 = vpop.permute.xlu1 %3498  ;;  %v7356_v12 = vpop.permute.xlu0 %3578  ;;  %v3636_v46 = vld [vmem:[#allocation3 + $0x8] sm:$0xff] }
 0x5f9   :  { %3507 = vst.msk [vmem:[#allocation3 + $0x68] sm:$0xff] %vm3438_vm14, %v3499_v9  ;;  %3720 = vmatprep.subr.bf16.mxu1 %v3636_v46  ;;  %v3640_v49 = vld [vmem:[#allocation3 + $0x28] sm:$0xff] }
 0x5fa   :  { %3721 = vmatpush1.bf16.msra.mxu1 %v7192_v11 }
 0x5fb   :  { %3722 = vmatprep.subr.bf16.mxu1 %v3640_v49 }
 0x5fc   :  { %v3521_v18 = vpop.permute.xlu1 %3520  ;;  %v7360_v36 = vpop.permute.xlu0 %3589  ;;  %v3644_v60 = vld [vmem:[#allocation3 + $0x48] sm:$0xff] }
 0x5fd   :  { %3529 = vst.msk [vmem:[#allocation3 + $0x88] sm:$0xff] %vm3438_vm14, %v3521_v18 }
 0x5fe   :  { %3723 = vmatpush1.bf16.msra.mxu1 %v7280_v17 }
 0x5ff   :  { %3724 = vmatprep.subr.bf16.mxu1 %v3644_v60 }
 0x600   :  { %v3543_v29 = vpop.permute.xlu1 %3542  ;;  %v7364_v50 = vpop.permute.xlu0 %3606  ;;  %v3648_v47 = vld [vmem:[#allocation3 + $0x68] sm:$0xff] }
 0x601   :  { %3551 = vst.msk [vmem:[#allocation3 + $0xa8] sm:$0xff] %vm3438_vm14, %v3543_v29 }
 0x602   :  { %3725 = vmatpush1.bf16.msra.mxu1 %v7291_v55 }
 0x603   :  { %3726 = vmatprep.subr.bf16.mxu1 %v3648_v47 }
 0x604   :  { %v3432_v11 = vpop.permute.xlu1 %3431  ;;  %v3457_v54 = vpop.permute.xlu0 %3456  ;;  %v3652_v5 = vld [vmem:[#allocation3 + $0x88] sm:$0xff] }
 0x605   :  { %v3434_v0 = vsel %vm7906_vm5, %v3430_v62, %v3432_v11  ;;  %3442 = vst.msk [vmem:[#allocation3 + $0x18] sm:$0xff] %vm3441_vm2, %v3432_v11  ;;  %v3459_v17 = vsel %vm3458_vm10, %v3455_v13, %v3457_v54  ;;  %3465 = vst.msk [vmem:[#allocation3 + $0x38] sm:$0xff] %vm3441_vm2, %v3457_v54  ;;  %v5083_v62 = vld [vmem:[%s7653_s3] ss:$8 sps:$4 sm:$0xff]  }
 0x606   :  { %3727 = vmatpush1.bf16.msra.mxu1 %v7299_v28 }
 0x607   :  { %3728 = vmatprep.subr.bf16.mxu1 %v3652_v5 }
 0x608   :  { %v3533_v55 = vpop.permute.xlu1 %3532  ;;  %v3479_v21 = vpop.permute.xlu0 %3478  ;;  %v3656_v3 = vld [vmem:[#allocation3 + $0xa8] sm:$0xff] }
 0x609   :  { %v3537_v31 = vsel %vm3536_vm1, %v3533_v55, %v7307_v38  ;;  %v3481_v34 = vsel %vm3480_vm15, %v3477_v61, %v3479_v21  ;;  %3487 = vst.msk [vmem:[#allocation3 + $0x58] sm:$0xff] %vm3441_vm2, %v3479_v21  ;;  %v5084_v61 = vld [vmem:[%s7653_s3 + $0x14] ss:$8 sps:$4 sm:$0xff]  }
 0x60a   :  { %3729 = vmatpush1.bf16.msra.mxu1 %v7304_v30 }
 0x60b   :  { %3730 = vmatprep.subr.bf16.mxu1 %v3656_v3 }
 0x60c   :  { %v3564_v35 = vpop.permute.xlu1 %3563  ;;  %v3501_v42 = vpop.permute.xlu0 %3500  ;;  %v3638_v28 = vld [vmem:[#allocation3 + $0x18] sm:$0xff] }
 0x60d   :  { %3572 = vst.msk [vmem:[#allocation3 + $0xc8] sm:$0xff] %vm3438_vm14, %v3564_v35  ;;  %v3503_v44 = vsel %vm3502_vm9, %v3499_v9, %v3501_v42  ;;  %3773 = vmatprep.subr.bf16.mxu0 %v3638_v28  ;;  %v3642_v38 = vld [vmem:[#allocation3 + $0x38] sm:$0xff] }
 0x60e   :  { %3509 = vst.msk [vmem:[#allocation3 + $0x78] sm:$0xff] %vm3441_vm2, %v3501_v42  ;;  %3774 = vmatpush1.bf16.msra.mxu0 %v3434_v0  ;;  %3731 = vmatpush1.bf16.msra.mxu1 %v3537_v31 }
 0x60f   :  { %3775 = vmatprep.subr.bf16.mxu0 %v3642_v38 }
 0x610   :  { %v3555_v32 = vpop.permute.xlu1 %3554  ;;  %v3523_v37 = vpop.permute.xlu0 %3522  ;;  %v3646_v25 = vld [vmem:[#allocation3 + $0x58] sm:$0xff] }
 0x611   :  { %v3558_v30 = vsel %vm7907_vm11, %v3555_v32, %v3557_v39  ;;  %v3525_v51 = vsel %vm3524_vm6, %v3521_v18, %v3523_v37  ;;  %3531 = vst.msk [vmem:[#allocation3 + $0x98] sm:$0xff] %vm3441_vm2, %v3523_v37  ;;  %v5086_v39 = vld [vmem:[%s7653_s3 + $0x10] ss:$8 sps:$4 sm:$0xff]   ;;  %vm4124_vm11 = vcmask 396288  }
 0x612   :  { %3776 = vmatpush1.bf16.msra.mxu0 %v3459_v17 }
 0x613   :  { %3777 = vmatprep.subr.bf16.mxu0 %v3646_v25 }
 0x614   :  { %v3581_v41 = vpop.permute.xlu1 %3580  ;;  %v3545_v48 = vpop.permute.xlu0 %3544  ;;  %v3660_v52 = vld [vmem:[#allocation3 + $0xc8] sm:$0xff] }
 0x615   :  { %v3583_v56 = vsel %vm3458_vm10, %v7356_v12, %v3581_v41  ;;  %v3547_v22 = vsel %vm3546_vm0, %v3543_v29, %v3545_v48  ;;  %3553 = vst.msk [vmem:[#allocation3 + $0xb8] sm:$0xff] %vm3441_vm2, %v3545_v48  ;;  %3732 = vmatprep.subr.bf16.mxu1 %v3660_v52  ;;  %v3650_v58 = vld [vmem:[#allocation3 + $0x78] sm:$0xff] }
 0x616   :  { %3587 = vst.msk [vmem:[#allocation3 + $0xe8] sm:$0xff] %vm7908_vm7, %v3583_v56  ;;  %3778 = vmatpush1.bf16.msra.mxu0 %v3481_v34  ;;  %3733 = vmatpush1.bf16.msra.mxu1 %v3558_v30 }
 0x617   :  { %3601 = vst.msk [vmem:[#allocation3 + $0xe8] sm:$0xff] %vm3438_vm14, %v7360_v36  ;;  %3779 = vmatprep.subr.bf16.mxu0 %v3650_v58 }
 0x618   :  { %v3594_v63 = vpop.permute.xlu1 %3593  ;;  %v3566_v2 = vpop.permute.xlu0 %3565  ;;  %v3654_v4 = vld [vmem:[#allocation3 + $0x98] sm:$0xff] }
 0x619   :  { %v3568_v19 = vsel %vm3441_vm2, %v3564_v35, %v3566_v2  ;;  %3574 = vst.msk [vmem:[#allocation3 + $0xd8] sm:$0xff] %vm3441_vm2, %v3566_v2 }
 0x61a   :  { %3780 = vmatpush1.bf16.msra.mxu0 %v3503_v44 }
 0x61b   :  { %3781 = vmatprep.subr.bf16.mxu0 %v3654_v4 }
 0x61c   :  { %v3577_v23 = vpop.permute.xlu1 %3576  ;;  %v3592_v53 = vpop.permute.xlu0 %3591  ;;  %v3658_v26 = vld [vmem:[#allocation3 + $0xb8] sm:$0xff] }
 0x61d   :  { %v3582_v6 = vsel %vm3458_vm10, %v3577_v23, %v7356_v12  ;;  %v3596_v59 = vsel %vm3595_vm8, %v7360_v36, %v3592_v53  ;;  %v3597_v57 = vsel %vm3595_vm8, %v3592_v53, %v3594_v63 }
 0x61e   :  { %3603 = vst.msk [vmem:[#allocation3 + $0xf8] sm:$0xff] %vm3441_vm2, %v3597_v57  ;;  %3782 = vmatpush1.bf16.msra.mxu0 %v3525_v51  ;;  %v3664_v8 = vld [vmem:[#allocation3 + $0xe8] sm:$0xff] }
 0x61f   :  { %3734 = vmatprep.subr.bf16.mxu1 %v3664_v8  ;;  %3783 = vmatprep.subr.bf16.mxu0 %v3658_v26 }
 0x620   :  { %v3609_v14 = vpop.permute.xlu1 %3608  ;;  %v3619_v24 = vpop.permute.xlu0 %3618  ;;  %3735 = vmatpush1.bf16.msra.mxu1 %v3582_v6  ;;  %v3662_v27 = vld [vmem:[#allocation3 + $0xd8] sm:$0xff] }
 0x621   :  { %v3611_v7 = vsel %vm3480_vm15, %v7364_v50, %v3609_v14 }
 0x622   :  { %3615 = vst.msk [vmem:[#allocation3 + $0x108] sm:$0xff] %vm7904_vm4, %v3611_v7  ;;  %3784 = vmatpush1.bf16.msra.mxu0 %v3547_v22 }
 0x623   :  { %3785 = vmatprep.subr.bf16.mxu0 %v3662_v27 }
 0x624   :  { %v3621_v33 = vpop.permute.xlu1 %3620  ;;  %v3617_v15 = vpop.permute.xlu0 %3616 }
 0x625   :  { %v3624_v45 = vsel %vm3622_vm13, %v3619_v24, %v3621_v33  ;;  %v3623_v16 = vsel %vm3622_vm13, %v3617_v15, %v3619_v24  ;;  %3628 = vst.msk [vmem:[#allocation3 + $0x108] sm:$0xff] %vm3438_vm14, %v3617_v15  ;;  %v3666_v10 = vld [vmem:[#allocation3 + $0xf8] sm:$0xff]  ;;  %vm4053_vm14 = vcmask 1047552  }
 0x626   :  { %3630 = vst.msk [vmem:[#allocation3 + $0x118] sm:$0xff] %vm3441_vm2, %v3624_v45  ;;  %3786 = vmatpush1.bf16.msra.mxu0 %v3568_v19  ;;  %vm7910_vm2 = vcmask 1039360  }
 0x627   :  { %3787 = vmatprep.subr.bf16.mxu0 %v3666_v10  ;;  %vm7911_vm10 = vmmov %vm7910_vm2 }
 0x628   :  { %v3605_v43 = vpop.permute.xlu1 %3604  ;;  %vm7912_vm5 = vmmov %vm7910_vm2 }
 0x629   :  { %v3610_v40 = vsel %vm3480_vm15, %v3605_v43, %v7364_v50  ;;  %vm7914_vm1 = vmmov %vm7910_vm2  ;;  %vm4173_vm15 = vcmask 261120  }
 0x62a   :  { %3788 = vmatpush1.bf16.msra.mxu0 %v3596_v59  ;;  %vm7915_vm9 = vmmov %vm7914_vm1 }
 0x62c   :  { %v3668_v1 = vld [vmem:[#allocation3 + $0x108] sm:$0xff] }
 0x62d   :  { %3736 = vmatprep.subr.bf16.mxu1 %v3668_v1  ;;  %v3670_v13 = vld [vmem:[#allocation3 + $0x118] sm:$0xff] }
 0x62e   :  { %3789 = vmatprep.subr.bf16.mxu0 %v3670_v13  ;;  %3737 = vmatpush1.bf16.msra.mxu1 %v3610_v40  ;;  %v5087_v40 = vld [vmem:[%s7655_s6] sm:$0xff]  }
 0x62f   :  { %3790 = vmatpush1.bf16.msra.mxu0 %v3623_v16  ;;  %4059 = vmatprep.subr.bf16.mxu1 %v7822_v20 }
 0x630   :  { %4266 = vmatprep.subr.bf16.mxu0 %v7822_v20 }
 0x631   :  { %3753 = vmatmul.mubr.bf16.vlgmr.msra.gmra.mrb[32].mxu1 %v5083_v62 }
 0x632   :  { %3806 = vmatmul.mubr.bf16.vlgmr.msra.gmra.mrb[36].mxu0 %v5083_v62  ;;  %4546 = vmatprep.mubr.msk.bf16.mxu1 %vm3713_vm12, %v5084_v61 }
 0x633   :  { %4548 = vmatprep.mubr.msk.bf16.mxu0 %vm3713_vm12, %v5084_v61  ;;  %4060 = vmatpush1.bf16.msra.mxu1 %v5087_v40  ;;  %v5088_v61 = vld [vmem:[%s7655_s6 + $0x8] sm:$0xff]   ;;  %vm4052_vm12 = vcmask 1046528  }
 0x634   :  { %4061 = vmatprep.subr.bf16.mxu1 %v7822_v20 }
 0x635   :  { %v3678_v9 = vpop.permute.xlu0 %3677 }
 0x637   :  { %4062 = vmatpush1.bf16.msra.mxu1 %v5088_v61 }
 0x638   :  { %4063 = vmatprep.subr.bf16.mxu1 %v7822_v20 }
 0x639   :  { %3763 = vmatmul.mubr.bf16.gmra.mrb[36].mxu1 %v5086_v39  ;;  %v3683_v12 = vpop.permute.xlu1 %3682  ;;  %v3688_v38 = vpop.permute.xlu0 %3687 }
 0x63a   :  { %3816 = vmatmul.mubr.bf16.gmra.mrb[40].mxu0 %v5086_v39  ;;  %v5089_v39 = vld [vmem:[%s7655_s6 + $0x10] sm:$0xff]  }
 0x63b   :  { %4064 = vmatpush1.bf16.msra.mxu1 %v5089_v39 }
 0x63c   :  { %4065 = vmatprep.subr.bf16.mxu1 %v7822_v20 }
 0x63d   :  { %v3693_v51 = vpop.permute.xlu1 %3692 }
 0x704   :  { %v3754_v46 = vpop.f32.mrb[32].mxu1 }
 0x705   :  { %v3807_v49 = vpop.f32.mrb[36].mxu0  ;;  %v3755_v18 = vadd.f32 %v3754_v46, %v3678_v9  ;;  %v3756_v36 = vpop.f32.mrb[33].mxu1  ;;  %v5092_v46 = vld [vmem:[%s7655_s6 + $0x28] sm:$0xff]  }
 0x706   :  { %v3808_v60 = vadd.f32 %v3807_v49, %v3678_v9  ;;  %v3809_v29 = vpop.f32.mrb[37].mxu0  ;;  %v3757_v50 = vadd.f32 %v3756_v36, %v3678_v9  ;;  %v3758_v47 = vpop.f32.mrb[34].mxu1  ;;  %v5093_v49 = vld [vmem:[%s7655_s6 + $0x30] sm:$0xff]   ;;  %v5095_v36 = vld [vmem:[%s7655_s6 + $0x40] sm:$0xff]  }
 0x707   :  { %v3810_v11 = vadd.f32 %v3809_v29, %v3678_v9  ;;  %v3811_v54 = vpop.f32.mrb[38].mxu0  ;;  %v3759_v0 = vadd.f32 %v3758_v47, %v3683_v12  ;;  %v3760_v17 = vpop.f32.mrb[35].mxu1  ;;  %v3826_v31 = vmax.f32 %v3755_v18, 0.0  ;;  %v5090_v9 = vld [vmem:[%s7655_s6 + $0x18] sm:$0xff]   ;;  %v5097_v29 = vld [vmem:[%s7655_s6 + $0x50] sm:$0xff]  }
 0x708   :  { %v3812_v5 = vadd.f32 %v3811_v54, %v3683_v12  ;;  %v3813_v55 = vpop.f32.mrb[39].mxu0  ;;  %v3761_v21 = vadd.f32 %v3760_v17, %v3683_v12  ;;  %v3828_v35 = vmax.f32 %v3808_v60, 0.0  ;;  %v3827_v28 = vmax.f32 %v3757_v50, 0.0  ;;  %4066 = vmatpush1.bf16.msra.mxu1 %v5090_v9  ;;  %v5094_v18 = vld [vmem:[%s7655_s6 + $0x38] sm:$0xff]   ;;  %v5096_v60 = vld [vmem:[%s7655_s6 + $0x48] sm:$0xff]   ;;  %v5099_v17 = vld [vmem:[%s7655_s6 + $0x60] sm:$0xff]  }
 0x709   :  { %v3814_v34 = vadd.f32 %v3813_v55, %v3683_v12  ;;  %v3830_v3 = vmax.f32 %v3759_v0, 0.0  ;;  %v3829_v32 = vmax.f32 %v3810_v11, 0.0  ;;  %v5091_v12 = vld [vmem:[%s7655_s6 + $0x20] sm:$0xff]   ;;  %4067 = vmatprep.subr.bf16.mxu1 %v7822_v20  ;;  %v5098_v47 = vld [vmem:[%s7655_s6 + $0x58] sm:$0xff]  }
 0x70a   :  { %v3832_v42 = vmax.f32 %v3812_v5, 0.0  ;;  %v3831_v44 = vmax.f32 %v3761_v21, 0.0  ;;  %v7909_v5 = vmov 65535  }
 0x70b   :  { %v3833_v37 = vmax.f32 %v3814_v34, 0.0  ;;  %v7414_v30 = vpack.c.bf16 %v3830_v3, %v3826_v31  ;;  %v4054_v55 = vsel %vm4052_vm12, 4294967295, %v7909_v5 }
 0x70c   :  { %v7416_v25 = vpack.c.bf16 %v3832_v42, %v3828_v35  ;;  %v7418_v41 = vpack.c.bf16 %v3831_v44, %v3827_v28  ;;  %v3764_v48 = vpop.f32.mrb[36].mxu1  ;;  %4068 = vmatpush1.bf16.msra.mxu1 %v5091_v12  ;;  %v7503_v31 = vsel %vm4053_vm14, %v4054_v55, 0  ;;  %v5100_v44 = vld [vmem:[%s7655_s6] sm:$0xff]  }
 0x70d   :  { %v7420_v52 = vpack.c.bf16 %v3833_v37, %v3829_v32  ;;  %v3817_v56 = vpop.f32.mrb[40].mxu0  ;;  %v3765_v22 = vadd.f32 %v3764_v48, %v3688_v38  ;;  %v3766_v58 = vpop.f32.mrb[37].mxu1  ;;  %4069 = vmatprep.subr.bf16.mxu1 %v7822_v20  ;;  %v4057_v3 = vand.u32 %v5099_v17, %v7503_v31  ;;  %4267 = vmatpush1.bf16.msra.mxu0 %v5100_v44 }
 0x70e   :  { %v3818_v63 = vadd.f32 %v3817_v56, %v3688_v38  ;;  %v3819_v2 = vpop.f32.mrb[41].mxu0  ;;  %3862 = vrot.lane.b32.xlu0 %v7416_v25, %s5175_s5  ;;  %v3767_v19 = vadd.f32 %v3766_v58, %v3688_v38  ;;  %v3768_v4 = vpop.f32.mrb[38].mxu1  ;;  %4268 = vmatprep.subr.bf16.mxu0 %v7822_v20  ;;  %v5102_v58 = vld [vmem:[%s7655_s6 + $0x10] sm:$0xff]  }
 0x70f   :  { %v3820_v23 = vadd.f32 %v3819_v2, %v3688_v38  ;;  %v3821_v53 = vpop.f32.mrb[42].mxu0  ;;  %3864 = vrot.lane.b32.xlu1 %v7420_v52, %s5175_s5  ;;  %v3769_v6 = vadd.f32 %v3768_v4, %v3693_v51  ;;  %v3770_v59 = vpop.f32.mrb[39].mxu1  ;;  %v3834_v26 = vmax.f32 %v3765_v22, 0.0  ;;  %v5103_v2 = vld [vmem:[%s7655_s6 + $0x18] sm:$0xff]   ;;  %v5106_v4 = vld [vmem:[%s7655_s6 + $0x30] sm:$0xff]  }
 0x710   :  { %v3836_v57 = vmax.f32 %v3818_v63, 0.0  ;;  %v3822_v8 = vadd.f32 %v3821_v53, %v3693_v51  ;;  %v3823_v14 = vpop.f32.mrb[43].mxu0  ;;  %v3771_v24 = vadd.f32 %v3770_v59, %v3693_v51  ;;  %v3835_v33 = vmax.f32 %v3767_v19, 0.0  ;;  %4070 = vmatpush1.bf16.msra.mxu1 %v5092_v46  ;;  %v5105_v19 = vld [vmem:[%s7655_s6 + $0x28] sm:$0xff]   ;;  %v5108_v53 = vld [vmem:[%s7655_s6 + $0x40] sm:$0xff]   ;;  %v5110_v59 = vld [vmem:[%s7655_s6 + $0x50] sm:$0xff]  }
 0x711   :  { %v3837_v7 = vmax.f32 %v3820_v23, 0.0  ;;  %v3824_v27 = vadd.f32 %v3823_v14, %v3693_v51  ;;  %v3838_v15 = vmax.f32 %v3769_v6, 0.0  ;;  %4071 = vmatprep.subr.bf16.mxu1 %v7822_v20  ;;  %v5101_v51 = vld [vmem:[%s7655_s6 + $0x8] sm:$0xff]   ;;  %v5107_v23 = vld [vmem:[%s7655_s6 + $0x38] sm:$0xff]  }
 0x712   :  { %v3840_v45 = vmax.f32 %v3822_v8, 0.0  ;;  %3860 = vrot.lane.b32.xlu0 %v7418_v41, %s5175_s5  ;;  %v3839_v16 = vmax.f32 %v3771_v24, 0.0  ;;  %4269 = vmatpush1.bf16.msra.mxu0 %v5101_v51  ;;  %v5109_v6 = vld [vmem:[%s7655_s6 + $0x48] sm:$0xff]   ;;  %v5112_v8 = vld [vmem:[%s7655_s6 + $0x60] sm:$0xff]  }
 0x713   :  { %v3841_v10 = vmax.f32 %v3824_v27, 0.0  ;;  %v7428_v43 = vpack.c.bf16 %v3838_v15, %v3834_v26  ;;  %4270 = vmatprep.subr.bf16.mxu0 %v7822_v20  ;;  %v4264_v26 = vand.u32 %v5112_v8, %v7503_v31 }
 0x714   :  { %v7433_v1 = vpack.c.bf16 %v3840_v45, %v3836_v57  ;;  %v7435_v13 = vpack.c.bf16 %v3839_v16, %v3835_v33  ;;  %4072 = vmatpush1.bf16.msra.mxu1 %v5093_v49  ;;  %v5111_v57 = vld [vmem:[%s7655_s6 + $0x58] sm:$0xff]  }
 0x715   :  { %v7437_v62 = vpack.c.bf16 %v3841_v10, %v3837_v7  ;;  %4073 = vmatprep.subr.bf16.mxu1 %v7822_v20 }
 0x716   :  { %3870 = vrot.lane.b32.xlu1 %v7433_v1, %s5175_s5  ;;  %4271 = vmatpush1.bf16.msra.mxu0 %v5102_v58 }
 0x717   :  { %3872 = vrot.lane.b32.xlu0 %v7437_v62, %s5175_s5  ;;  %4272 = vmatprep.subr.bf16.mxu0 %v7822_v20 }
 0x718   :  { %4074 = vmatpush1.bf16.msra.mxu1 %v5094_v18 }
 0x719   :  { %4075 = vmatprep.subr.bf16.mxu1 %v7822_v20 }
 0x71a   :  { %3868 = vrot.lane.b32.xlu1 %v7435_v13, %s5175_s5  ;;  %4273 = vmatpush1.bf16.msra.mxu0 %v5103_v2 }
 0x71b   :  { %3858 = vrot.lane.b32.xlu0 %v7414_v30, %s5175_s5  ;;  %4274 = vmatprep.subr.bf16.mxu0 %v7822_v20 }
 0x71c   :  { %4076 = vmatpush1.bf16.msra.mxu1 %v5095_v36 }
 0x71d   :  { %4077 = vmatprep.subr.bf16.mxu1 %v7822_v20 }
 0x720   :  { %4078 = vmatpush1.bf16.msra.mxu1 %v5096_v60 }
 0x721   :  { %4079 = vmatprep.subr.bf16.mxu1 %v7822_v20 }
 0x724   :  { %4080 = vmatpush1.bf16.msra.mxu1 %v5097_v29 }
 0x725   :  { %4081 = vmatprep.subr.bf16.mxu1 %v7822_v20 }
 0x728   :  { %4082 = vmatpush1.bf16.msra.mxu1 %v5098_v47 }
 0x729   :  { %4083 = vmatprep.subr.bf16.mxu1 %v7822_v20 }
 0x72c   :  { %4084 = vmatpush1.bf16.msra.mxu1 %v4057_v3 }
 0x780   :  { %v3863_v50 = vpop.permute.xlu0 %3862 }
 0x781   :  { %v3865_v11 = vpop.permute.xlu1 %3864 }
 0x782   :  { %v3876_v54 = vsel %vm3492_vm3, %v3863_v50, %v3865_v11  ;;  %v7493_v0 = vmax.bf16 %v3865_v11, %v7420_v52 }
 0x783   :  { %v7500_v21 = vmax.bf16 %v3876_v54, %v7416_v25 }
 0x784   :  { %3910 = vrot.lane.b32.xlu0 %v7493_v0, %s5153_s9  ;;  %v3861_v34 = vpop.permute.xlu0 %3860 }
 0x785   :  { %v3875_v35 = vsel %vm3492_vm3, %v3861_v34, %v3863_v50  ;;  %3908 = vrot.lane.b32.xlu1 %v7500_v21, %s5153_s9 }
 0x786   :  { %v7512_v42 = vmax.bf16 %v3875_v35, %v7418_v41 }
 0x788   :  { %v3871_v28 = vpop.permute.xlu1 %3870  ;;  %3866 = vrot.lane.b32.xlu0 %v7428_v43, %s5175_s5 }
 0x789   :  { %3906 = vrot.lane.b32.xlu1 %v7512_v42, %s5153_s9  ;;  %v3873_v38 = vpop.permute.xlu0 %3872 }
 0x78a   :  { %v3879_v32 = vsel %vm3492_vm3, %v3871_v28, %v3873_v38  ;;  %v7523_v37 = vmax.bf16 %v3873_v38, %v7437_v62 }
 0x78b   :  { %v7529_v25 = vmax.bf16 %v3879_v32, %v7433_v1 }
 0x78c   :  { %v3869_v41 = vpop.permute.xlu1 %3868  ;;  %3918 = vrot.lane.b32.xlu0 %v7523_v37, %s5153_s9 }
 0x78d   :  { %v3878_v48 = vsel %vm3492_vm3, %v3869_v41, %v3871_v28  ;;  %3916 = vrot.lane.b32.xlu1 %v7529_v25, %s5153_s9  ;;  %v3859_v52 = vpop.permute.xlu0 %3858 }
 0x78e   :  { %v7538_v56 = vmax.bf16 %v3878_v48, %v7435_v13  ;;  %v3874_v22 = vsel %vm3492_vm3, %v3859_v52, %v3861_v34 }
 0x78f   :  { %v7545_v63 = vmax.bf16 %v3874_v22, %v7414_v30  ;;  %v5104_v30 = vld [vmem:[%s7655_s6 + $0x20] sm:$0xff]  }
 0x790   :  { %4275 = vmatpush1.bf16.msra.mxu0 %v5104_v30 }
 0x791   :  { %3914 = vrot.lane.b32.xlu1 %v7538_v56, %s5153_s9  ;;  %3904 = vrot.lane.b32.xlu0 %v7545_v63, %s5153_s9 }
 0x792   :  { %4276 = vmatprep.subr.bf16.mxu0 %v7822_v20 }
 0x794   :  { %4277 = vmatpush1.bf16.msra.mxu0 %v5105_v19 }
 0x795   :  { %4278 = vmatprep.subr.bf16.mxu0 %v7822_v20 }
 0x798   :  { %4279 = vmatpush1.bf16.msra.mxu0 %v5106_v4 }
 0x799   :  { %4280 = vmatprep.subr.bf16.mxu0 %v7822_v20 }
 0x79c   :  { %4281 = vmatpush1.bf16.msra.mxu0 %v5107_v23 }
 0x79d   :  { %4282 = vmatprep.subr.bf16.mxu0 %v7822_v20 }
 0x7a0   :  { %4283 = vmatpush1.bf16.msra.mxu0 %v5108_v53 }
 0x7a1   :  { %4284 = vmatprep.subr.bf16.mxu0 %v7822_v20 }
 0x7a4   :  { %4285 = vmatpush1.bf16.msra.mxu0 %v5109_v6 }
 0x7a5   :  { %4286 = vmatprep.subr.bf16.mxu0 %v7822_v20 }
 0x7a8   :  { %4287 = vmatpush1.bf16.msra.mxu0 %v5110_v59 }
 0x7a9   :  { %4288 = vmatprep.subr.bf16.mxu0 %v7822_v20 }
 0x7ac   :  { %4289 = vmatpush1.bf16.msra.mxu0 %v5111_v57 }
 0x7ad   :  { %4290 = vmatprep.subr.bf16.mxu0 %v7822_v20 }
 0x7b0   :  { %4291 = vmatpush1.bf16.msra.mxu0 %v4264_v26 }
 0x7f6   :  { %v3911_v14 = vpop.permute.xlu0 %3910 }
 0x7f7   :  { %v3937_v24 = vmax.bf16 %v3911_v14, %v7493_v0  ;;  %v3909_v7 = vpop.permute.xlu1 %3908 }
 0x7f8   :  { %v3922_v27 = vsel %vm7910_vm2, %v3909_v7, %v3911_v14 }
 0x7f9   :  { %v3936_v33 = vmax.bf16 %v3922_v27, %v7500_v21  ;;  %4165 = vrot.lane.b32.xlu0 %v3937_v24, %s5186_s13 }
 0x7fa   :  { %v3867_v15 = vpop.permute.xlu0 %3866 }
 0x7fb   :  { %v3877_v20 = vsel %vm3492_vm3, %v3867_v15, %v3869_v41  ;;  %v3907_v45 = vpop.permute.xlu1 %3906  ;;  %4163 = vrot.lane.b32.xlu1 %v3936_v33, %s5186_s13  ;;  %vm7913_vm3 = vmmov %vm7910_vm2 }
 0x7fc   :  { %v3892_v16 = vmax.bf16 %v3877_v20, %v7428_v43  ;;  %v3921_v10 = vsel %vm7911_vm10, %v3907_v45, %v3909_v7 }
 0x7fd   :  { %v3935_v40 = vmax.bf16 %v3921_v10, %v7512_v42 }
 0x7fe   :  { %3912 = vrot.lane.b32.xlu0 %v3892_v16, %s5153_s9  ;;  %v3919_v1 = vpop.permute.xlu0 %3918 }
 0x7ff   :  { %v3941_v13 = vmax.bf16 %v3919_v1, %v7523_v37  ;;  %4562 = vmatprep.mubr.msk.bf16.mxu1 %vm3524_vm6, %v3935_v40  ;;  %v3917_v62 = vpop.permute.xlu1 %3916  ;;  %4161 = vrot.lane.b32.xlu1 %v3935_v40, %s5186_s13 }
 0x800   :  { %v3925_v61 = vsel %vm7912_vm5, %v3917_v62, %v3919_v1 }
 0x801   :  { %v3940_v39 = vmax.bf16 %v3925_v61, %v7529_v25 }
 0x802   :  { %4171 = vrot.lane.b32.xlu0 %v3941_v13, %s5186_s13 }
 0x803   :  { %v3915_v9 = vpop.permute.xlu1 %3914  ;;  %4169 = vrot.lane.b32.xlu1 %v3940_v39, %s5186_s13  ;;  %v3905_v43 = vpop.permute.xlu0 %3904 }
 0x804   :  { %v3924_v12 = vsel %vm7913_vm3, %v3915_v9, %v3917_v62  ;;  %v3920_v46 = vsel %vm7914_vm1, %v3905_v43, %v3907_v45 }
 0x805   :  { %v3939_v49 = vmax.bf16 %v3924_v12, %v7538_v56  ;;  %v3934_v18 = vmax.bf16 %v3920_v46, %v7545_v63 }
 0x807   :  { %4167 = vrot.lane.b32.xlu1 %v3939_v49, %s5186_s13  ;;  %4092 = vmatmul.mubr.bf16.vlgmr.msra.gmra.mrb[40].mxu1 %v3934_v18 }
 0x808   :  { %4563 = vmatprep.mubr.msk.bf16.mxu1 %vm3524_vm6, %v3939_v49 }
 0x86b   :  { %v4166_v36 = vpop.permute.xlu0 %4165 }
 0x86d   :  { %v4164_v60 = vpop.permute.xlu1 %4163 }
 0x86e   :  { %v4175_v29 = vsel %vm4173_vm15, %v4164_v60, %v4166_v36 }
 0x86f   :  { %4581 = vmatprep.mubr.msk.bf16.mxu0 %vm3524_vm6, %v4175_v29 }
 0x870   :  { %v3913_v50 = vpop.permute.xlu0 %3912 }
 0x871   :  { %v3923_v47 = vsel %vm7915_vm9, %v3913_v50, %v3915_v9  ;;  %v4162_v11 = vpop.permute.xlu1 %4161 }
 0x872   :  { %v3938_v54 = vmax.bf16 %v3923_v47, %v3892_v16  ;;  %v4174_v0 = vsel %vm4173_vm15, %v4162_v11, %v4164_v60 }
 0x873   :  { %4299 = vmatmul.mubr.bf16.vlgmr.msra.gmra.mrb[44].mxu0 %v4174_v0 }
 0x874   :  { %4100 = vmatmul.mubr.bf16.gmra.mrb[44].mxu1 %v3938_v54  ;;  %v4172_v17 = vpop.permute.xlu0 %4171 }
 0x875   :  { %v4170_v5 = vpop.permute.xlu1 %4169 }
 0x876   :  { %v4177_v55 = vsel %vm4173_vm15, %v4170_v5, %v4172_v17 }
 0x877   :  { %4582 = vmatprep.mubr.msk.bf16.mxu0 %vm3524_vm6, %v4177_v55 }
 0x879   :  { %v4168_v21 = vpop.permute.xlu1 %4167 }
 0x87a   :  { %v4176_v31 = vsel %vm4173_vm15, %v4168_v21, %v4170_v5 }
 0x87b   :  { %4307 = vmatmul.mubr.bf16.gmra.mrb[48].mxu0 %v4176_v31 }
 0x8da   :  { %v4093_v34 = vpop.f32.mrb[40].mxu1 }
 0x8db   :  { %v4591_v3 = vpack.c.bf16 %v4093_v34, %v4093_v34  ;;  %v4095_v35 = vpop.f32.mrb[41].mxu1 }
 0x8dc   :  { %v4096_v42 = vpop.f32.mrb[42].mxu1 }
 0x8dd   :  { %4125 = vst.msk [vmem:[%s7656_s7] sm:$0xf] %vm4124_vm11, %v4591_v3  ;;  %v4592_v28 = vpack.c.bf16 %v4096_v42, %v4096_v42  ;;  %v4098_v44 = vpop.f32.mrb[43].mxu1 }
 0x8df   :  { %4126 = vst.msk [vmem:[%s7656_s7 + $0x4] sm:$0xf] %vm4124_vm11, %v4592_v28 }
 0x946   :  { %v4300_v38 = vpop.f32.mrb[44].mxu0 }
 0x947   :  { %v4595_v32 = vpack.c.bf16 %v4300_v38, %v4300_v38  ;;  %v4101_v37 = vpop.f32.mrb[44].mxu1  ;;  %v4302_v51 = vpop.f32.mrb[45].mxu0 }
 0x948   :  { %v4593_v25 = vpack.c.bf16 %v4101_v37, %v4101_v37  ;;  %v4103_v41 = vpop.f32.mrb[45].mxu1  ;;  %v4303_v48 = vpop.f32.mrb[46].mxu0 }
 0x949   :  { %4587 = vst.msk [vmem:[%s7656_s7 + $0x10] sm:$0xf] %vm4124_vm11, %v4595_v32  ;;  %v4596_v52 = vpack.c.bf16 %v4303_v48, %v4303_v48  ;;  %v4104_v56 = vpop.f32.mrb[46].mxu1  ;;  %v4305_v22 = vpop.f32.mrb[47].mxu0 }
 0x94a   :  { %4127 = vst.msk [vmem:[%s7656_s7 + $0x8] sm:$0xf] %vm4124_vm11, %v4593_v25  ;;  %v4594_v58 = vpack.c.bf16 %v4104_v56, %v4104_v56  ;;  %v4106_v63 = vpop.f32.mrb[47].mxu1 }
 0x94b   :  { %4588 = vst.msk [vmem:[%s7656_s7 + $0x14] sm:$0xf] %vm4124_vm11, %v4596_v52 }
 0x94c   :  { %4128 = vst.msk [vmem:[%s7656_s7 + $0xc] sm:$0xf] %vm4124_vm11, %v4594_v58 }
 0x94e   :  { %v4308_v2 = vpop.f32.mrb[48].mxu0 }
 0x94f   :  { %v4597_v30 = vpack.c.bf16 %v4308_v2, %v4308_v2  ;;  %v4310_v19 = vpop.f32.mrb[49].mxu0 }
 0x950   :  { %v4311_v4 = vpop.f32.mrb[50].mxu0 }
 0x951   :  { %4589 = vst.msk [vmem:[%s7656_s7 + $0x18] sm:$0xf] %vm4124_vm11, %v4597_v30  ;;  %v4598_v23 = vpack.c.bf16 %v4311_v4, %v4311_v4  ;;  %v4313_v53 = vpop.f32.mrb[51].mxu0 }
 0x953   :  { %4590 = vst.msk [vmem:[%s7656_s7 + $0x1c] sm:$0xf] %vm4124_vm11, %v4598_v23 }

</bundles_post_ra>
